<compile_context>
chip_gen: v7x
topology: tpu7x:2x2x1
jax: 0.10.0
libtpu: 0.0.40
codegen_flags: <defaults>
</compile_context>

<pallas_src>
import numpy as np
import jax
import jax.numpy as jnp
from jax.experimental import pallas as pl
from jax.experimental.pallas import tpu as pltpu


# --------------------------------------------------------------------------
# Constant lane masks (conv boundary masks, upsample parity)
# --------------------------------------------------------------------------

def _build_constants(H, W):
    HW = H * W
    p = np.arange(HW)
    py, px = p // W, p % W

    def tap_masks(dil):
        rows = []
        for dy in (-1, 0, 1):
            for dx in (-1, 0, 1):
                sy = py + dy * dil
                sx = px + dx * dil
                rows.append((sy >= 0) & (sy < H) & (sx >= 0) & (sx < W))
        return np.stack(rows, 0).astype(np.float32)           # (9, HW)

    m1 = tap_masks(1)        # level-1 boundary masks
    m2 = tap_masks(2)        # level-2 dilated-tap masks (exact at anchor lanes)
    parity = np.stack([(px % 2).astype(np.float32),
                       (py % 2).astype(np.float32)], 0)       # (2, HW)
    return jnp.asarray(m1), jnp.asarray(m2), jnp.asarray(parity)


# --------------------------------------------------------------------------
# Fused kernel
# --------------------------------------------------------------------------

def _make_fused_kernel(H, W, NPIX, div_flow, use_mask):
    deltas1 = tuple(dy * W + dx for dy in (-1, 0, 1) for dx in (-1, 0, 1))
    deltas2 = tuple(2 * (dy * W + dx) for dy in (-1, 0, 1) for dx in (-1, 0, 1))

    def conv3x3(srcs, wrefs, b_ref, mask_ref, deltas, relu=True):
        """3x3 'same' conv: 9 per-tap matmuls accumulated in registers.

        srcs:  list of (Ci, NPIX) f32 channel groups (pixels on the lane axis)
        wrefs: matching list of (9, Cout, Ci) bf16 weight refs (tap-major)
        Taps are XLU lane rolls + f32 boundary masks (centre tap needs neither);
        MXU inputs are bf16, accumulation is f32.  No im2col patch in VMEM."""
        acc = None
        for t, delta in enumerate(deltas):
            centre = (delta == 0)
            m = None if centre else mask_ref[t:t + 1, :]              # (1, NPIX)
            for s, w_ref in zip(srcs, wrefs):
                sh = s if centre else pltpu.roll(s, shift=(-delta) % NPIX, axis=1)
                tap = sh if centre else sh * m
                wt = w_ref[t]                                          # (Cout, Ci)
                if s.shape[0] == 1:
                    # 1-channel group (moving mask): outer product on the VPU.
                    contrib = wt.astype(jnp.float32) * tap
                else:
                    contrib = jnp.dot(wt, tap.astype(jnp.bfloat16),
                                      preferred_element_type=jnp.float32)
                acc = contrib if acc is None else acc + contrib
        acc = acc + b_ref[...]
        return jnp.maximum(acc, 0.0) if relu else acc

    def kernel(img_ref, mot_ref, m1_ref, m2_ref, par_ref, *rest):
        if use_mask:
            (w1a_img, w1a_msk, b1a, w1b, b1b, w2a, b2a, w2b, b2b,
             wda_up, wda_skip, bda, wdb, bdb, wo, bo,
             pred_ref, maskout_ref, stats_ref, e1_ref) = rest
        else:
            (w1a_img, b1a, w1b, b1b, w2a, b2a, w2b, b2b,
             wda_up, wda_skip, bda, wdb, bdb, wo, bo,
             pred_ref, maskout_ref, stats_ref, e1_ref) = rest
            w1a_msk = None

        img = img_ref[0]                                    # (3, NPIX)
        mot = mot_ref[0]                                    # (2, NPIX)

        # moving-region mask from GT motion speed (per-item mean * 0.1 threshold)
        u = mot[0:1, :]
        v = mot[1:2, :]
        speed = jnp.sqrt(u * u + v * v)                     # (1, NPIX) f32
        if use_mask:
            thr = jnp.sum(speed) * (0.1 / float(NPIX))
            mask = 1.0 - (speed < thr).astype(jnp.float32)
        else:
            mask = jnp.ones_like(speed)
        maskout_ref[0] = mask

        # ---- encoder level 1 (full resolution, pixels on the lane axis) ----
        if use_mask:
            e1 = conv3x3([img, mask], [w1a_img, w1a_msk], b1a, m1_ref, deltas1)
        else:
            e1 = conv3x3([img], [w1a_img], b1a, m1_ref, deltas1)
        e1 = conv3x3([e1], [w1b], b1b, m1_ref, deltas1)
        e1_ref[...] = e1          # stage the skip connection in VMEM scratch

        # ---- 2x2 max-pool: two lane rolls; the pooled value lives at the
        #      top-left (even-row/even-col) anchor lane of each 2x2 block ----
        hm = jnp.maximum(e1, pltpu.roll(e1, shift=NPIX - 1, axis=1))
        vm = jnp.maximum(hm, pltpu.roll(hm, shift=NPIX - W, axis=1))

        # ---- encoder level 2: dilation-2 convs on the full-res lane layout.
        #      Only anchor lanes are meaningful and only anchor lanes are ever
        #      read (dilated taps step by 2 / 2W), so non-anchor garbage never
        #      leaks into valid outputs. ----
        e2 = conv3x3([vm], [w2a], b2a, m2_ref, deltas2)
        e2 = conv3x3([e2], [w2b], b2b, m2_ref, deltas2)

        # ---- nearest-neighbour 2x upsample: two rolls + parity lerps ----
        xodd = par_ref[0:1, :]
        yodd = par_ref[1:2, :]
        tmp = e2 + xodd * (pltpu.roll(e2, shift=1, axis=1) - e2)
        up = tmp + yodd * (pltpu.roll(tmp, shift=W, axis=1) - tmp)

        # ---- decoder: skip concat folded into a two-source conv ----
        skip = e1_ref[...]
        d = conv3x3([up, skip], [wda_up, wda_skip], bda, m1_ref, deltas1)
        d = conv3x3([d], [wdb], bdb, m1_ref, deltas1)

        # ---- 1x1 output conv ----
        out = jnp.dot(wo[...], d.astype(jnp.bfloat16),
                      preferred_element_type=jnp.float32) + bo[...]
        pred_ref[0] = out                                    # (2, NPIX)

        # ---- per-item loss partials (sum-of-squares + EPE) vs GT motion ----
        diff = out * div_flow - mot
        sq = diff * diff
        sse = jnp.sum(sq)
        epe = jnp.sum(jnp.sqrt(sq[0:1, :] + sq[1:2, :]))
        ones_row = jnp.ones((1, 128), jnp.float32)
        stats_ref[0, 0:1, :] = sse * ones_row
        stats_ref[0, 1:2, :] = epe * ones_row

    return kernel


# --------------------------------------------------------------------------
# Parameters (PyTorch-like HWIO layout) and kernel-format conversion
# --------------------------------------------------------------------------

def init_unet_params(key, channels_in=4, channels_out=2, c1=8, c2=16):
    # TODO(synk): Unet4Motion architecture not provided; representative
    #             2-level U-Net with skip connection + NN upsampling.
    def conv_init(k, kh, kw, cin, cout):
        scale = 1.0 / jnp.sqrt(float(kh * kw * cin))
        w = jax.random.normal(k, (kh, kw, cin, cout), jnp.float32) * scale
        b = jnp.zeros((cout,), jnp.float32)
        return w, b

    keys = jax.random.split(key, 7)
    return {
        'enc1a': conv_init(keys[0], 3, 3, channels_in, c1),
        'enc1b': conv_init(keys[1], 3, 3, c1, c1),
        'enc2a': conv_init(keys[2], 3, 3, c1, c2),
        'enc2b': conv_init(keys[3], 3, 3, c2, c2),
        'dec1a': conv_init(keys[4], 3, 3, c2 + c1, c1),   # Cin order: [up(c2), skip(c1)]
        'dec1b': conv_init(keys[5], 3, 3, c1, c1),
        'out':   conv_init(keys[6], 1, 1, c1, channels_out),
    }


def _kernel_params(params, use_mask):
    """(kh,kw,Cin,Cout) -> tap-major (9, Cout, Cin) bf16 weights + (Cout,1) f32 bias."""
    def conv_w(name):
        w, b = params[name]
        kh, kw, cin, cout = w.shape
        wt = jnp.transpose(w.reshape(kh * kw, cin, cout), (0, 2, 1)).astype(jnp.bfloat16)
        return wt, b.reshape(cout, 1).astype(jnp.float32)

    w1a, b1a = conv_w('enc1a')
    w1b, b1b = conv_w('enc1b')
    w2a, b2a = conv_w('enc2a')
    w2b, b2b = conv_w('enc2b')
    wda, bda = conv_w('dec1a')
    wdb, bdb = conv_w('dec1b')
    wo_raw, bo_raw = params['out']
    cin_o, cout_o = wo_raw.shape[2], wo_raw.shape[3]
    wo = jnp.transpose(wo_raw.reshape(cin_o, cout_o)).astype(jnp.bfloat16)
    bo = bo_raw.reshape(cout_o, 1).astype(jnp.float32)

    c2 = params['enc2b'][0].shape[3]
    out = []
    if use_mask:
        out += [w1a[:, :, :-1], w1a[:, :, -1:], b1a]       # image channels / mask channel
    else:
        out += [w1a, b1a]
    out += [w1b, b1b, w2a, b2a, w2b, b2b,
            wda[:, :, :c2], wda[:, :, c2:], bda,           # up channels / skip channels
            wdb, bdb, wo, bo]
    return out


def _physical_vmem_bytes():
    try:
        return int(pltpu.get_tpu_info().vmem_capacity_bytes)
    except Exception:
        return 64 << 20          # conservative (v7x per-core)


# --------------------------------------------------------------------------
# Forward (UnetMotion.forward)
# --------------------------------------------------------------------------

def make_unet_motion_forward(opt):
    H = int(opt['motionH'])
    W = int(opt['motionW'])
    use_mask = bool(opt.get('use_mask_as_motion_input', False))
    use_hint = bool(opt.get('use_hint_as_motion_input', False))
    div_flow = float(opt.get('div_flow', 20.0))
    assert not use_hint, "TODO(synk): hint-as-motion-input branch not implemented"
    if use_mask:
        assert int(opt['W']) == W == H, "mask spatial size must match motionH/W"
    assert H % 2 == 0 and W % 2 == 0, "2x2 max-pool needs even H, W"
    assert (H * W) % 128 == 0, "pixels live on the lane axis; needs H*W % 128 == 0"
    NPIX = H * W                                   # no padding lanes anywhere

    m1, m2, parity = _build_constants(H, W)
    kernel = _make_fused_kernel(H, W, NPIX, div_flow, use_mask)
    vmem_cap = max(32 << 20, int(0.9 * _physical_vmem_bytes()))

    def _const_spec(arr, buffered):
        index_map = (lambda i, _n=arr.ndim: (0,) * _n)
        if buffered:
            # constant index map -> single buffer is enough (no double buffering)
            return pl.BlockSpec(arr.shape, index_map, pipeline_mode=pl.Buffered(1))
        return pl.BlockSpec(arr.shape, index_map)

    def _build_forward(buffered_residents):

        @jax.jit
        def forward(params, image, motions):
            B, img_c = image.shape[0], image.shape[1]
            c1 = params['enc1b'][0].shape[3]
            c2 = params['enc2b'][0].shape[3]
            expected_cin = img_c + (1 if use_mask else 0)
            assert params['enc1a'][0].shape[2] == expected_cin, "enc1a Cin mismatch"

            img_flat = image.reshape(B, img_c, NPIX).astype(jnp.float32)
            mot_flat = motions.reshape(B, 2, NPIX).astype(jnp.float32)

            wparams = _kernel_params(params, use_mask)
            const_args = [m1, m2, parity]
            args = [img_flat, mot_flat] + const_args + wparams

            data_specs = [
                pl.BlockSpec((1, img_c, NPIX), lambda i: (i, 0, 0)),
                pl.BlockSpec((1, 2, NPIX), lambda i: (i, 0, 0)),
            ]
            resident_specs = [_const_spec(a, buffered_residents)
                              for a in const_args + wparams]

            out_shape = (
                jax.ShapeDtypeStruct((B, 2, NPIX), jnp.float32),   # pred motion (flat)
                jax.ShapeDtypeStruct((B, 1, NPIX), jnp.float32),   # moving mask (flat)
                jax.ShapeDtypeStruct((B, 2, 128), jnp.float32),    # [sse, epe] per item
            )
            out_specs = (
                pl.BlockSpec((1, 2, NPIX), lambda i: (i, 0, 0)),
                pl.BlockSpec((1, 1, NPIX), lambda i: (i, 0, 0)),
                pl.BlockSpec((1, 2, 128), lambda i: (i, 0, 0)),
            )

            # VMEM budget: 2x per-step blocks + residents + scratch + live
            # activations, with headroom; floored at 32 MiB, capped near phys.
            step_bytes = (img_c + 2 + 2 + 1) * NPIX * 4 + 2 * 128 * 4
            resident_bytes = sum(int(np.prod(a.shape)) * a.dtype.itemsize
                                 for a in const_args + wparams)
            scratch_bytes = c1 * NPIX * 4
            act_bytes = (img_c + 1 + 3 * c1 + 2 * c2 + 2) * NPIX * 4
            need = (2 * step_bytes + 2 * resident_bytes + scratch_bytes
                    + 2 * act_bytes + (2 << 20))
            vmem_limit = int(min(vmem_cap, max(32 << 20, need)))

            pred_flat, mask_flat, stats = pl.pallas_call(
                kernel,
                out_shape=out_shape,
                grid=(B,),
                in_specs=data_specs + resident_specs,
                out_specs=out_specs,
                scratch_shapes=[pltpu.VMEM((c1, NPIX), jnp.float32)],  # e1 skip staging
                compiler_params=pltpu.CompilerParams(
                    dimension_semantics=("parallel",),
                    vmem_limit_bytes=vmem_limit),
            )(*args)

            pred_motion = pred_flat.reshape(B, 2, H, W)
            moving_mask = mask_flat.reshape(B, 1, H, W)
            gt_motion = motions.reshape(B, 2, H, W)

            n = float(NPIX)
            sse = jnp.sum(stats[:, 0, 0])
            epe_sum = jnp.sum(stats[:, 1, 0])
            mse = sse / (B * 2 * n)
            epe = epe_sum / (B * n)
            # TODO(synk): exact MotionLoss / PSNR formulas unavailable; EPE + MSE
            #             and a peak-1.0 PSNR are used as representative reductions.
            psnr = 10.0 * jnp.log10(1.0 / (mse + 1e-12))
            loss = {'Total Loss': epe, 'motion_mse': mse, 'PSNR_motion': psnr}

            pred_dict = {'PredMotion': pred_motion,
                         'GTMotion': gt_motion,
                         'InputImg': image}
            if use_mask:
                pred_dict['MovingMask'] = moving_mask
            return loss, pred_dict

        return forward

    fwd_fast = _build_forward(True)    # Buffered(1) residents
    fwd_safe = _build_forward(False)   # default double-buffered residents
    state = {'impl': None}

    def forward(params, image, motions):
        if state['impl'] is None:
            try:
                out = fwd_fast(params, image, motions)
                jax.block_until_ready(out)
                state['impl'] = fwd_fast
                return out
            except Exception:
                # pipeline_mode=pl.Buffered(1) not supported here -> fall back.
                state['impl'] = fwd_safe
        return state['impl'](params, image, motions)

    return forward


def unet_motion_forward(params, opt, batch):
    """Interface-parity wrapper mirroring UnetMotion.forward(batch)."""
    forward = make_unet_motion_forward(opt)
    return forward(params, batch['images'][0], batch['motions'])


# --------------------------------------------------------------------------

if __name__ == "__main__":
    key = jax.random.PRNGKey(0)
    k_img, k_mot, k_par = jax.random.split(key, 3)

    B, Wd = 2, 16
    opt = {'W': Wd, 'motionH': Wd, 'motionW': Wd, 'div_flow': 20.0,
           'use_mask_as_motion_input': True, 'use_hint_as_motion_input': False}

    channels_in = 3 + 1                                   # RGB + moving mask
    params = init_unet_params(k_par, channels_in=channels_in, channels_out=2)

    image = jax.random.normal(k_img, (B, 3, Wd, Wd), jnp.float32)
    motions = jax.random.normal(k_mot, (B, 2, Wd * Wd), jnp.float32)
    batch = {'images': [image], 'motions': motions}

    forward = make_unet_motion_forward(opt)
    loss, pred = forward(params, batch['images'][0], batch['motions'])
    jax.block_until_ready(loss['Total Loss'])
    jax.block_until_ready(loss['PSNR_motion'])
    jax.block_until_ready(pred['PredMotion'])
    print("KERNEL_OK")
</pallas_src>

<mosaic_0001>
module attributes {stable_mosaic.version = 11 : i64} {
  func.func @kernel(%arg0: i32, %arg1: memref<1x3x256xf32, #tpu.memory_space<vmem>>, %arg2: memref<1x2x256xf32, #tpu.memory_space<vmem>>, %arg3: memref<9x256xf32, #tpu.memory_space<vmem>>, %arg4: memref<9x256xf32, #tpu.memory_space<vmem>>, %arg5: memref<2x256xf32, #tpu.memory_space<vmem>>, %arg6: memref<9x8x3xbf16, #tpu.memory_space<vmem>>, %arg7: memref<9x8x1xbf16, #tpu.memory_space<vmem>>, %arg8: memref<8x1xf32, #tpu.memory_space<vmem>>, %arg9: memref<9x8x8xbf16, #tpu.memory_space<vmem>>, %arg10: memref<8x1xf32, #tpu.memory_space<vmem>>, %arg11: memref<9x16x8xbf16, #tpu.memory_space<vmem>>, %arg12: memref<16x1xf32, #tpu.memory_space<vmem>>, %arg13: memref<9x16x16xbf16, #tpu.memory_space<vmem>>, %arg14: memref<16x1xf32, #tpu.memory_space<vmem>>, %arg15: memref<9x8x16xbf16, #tpu.memory_space<vmem>>, %arg16: memref<9x8x8xbf16, #tpu.memory_space<vmem>>, %arg17: memref<8x1xf32, #tpu.memory_space<vmem>>, %arg18: memref<9x8x8xbf16, #tpu.memory_space<vmem>>, %arg19: memref<8x1xf32, #tpu.memory_space<vmem>>, %arg20: memref<2x8xbf16, #tpu.memory_space<vmem>>, %arg21: memref<2x1xf32, #tpu.memory_space<vmem>>, %arg22: memref<1x2x256xf32, #tpu.memory_space<vmem>>, %arg23: memref<1x1x256xf32, #tpu.memory_space<vmem>>, %arg24: memref<1x2x128xf32, #tpu.memory_space<vmem>>, %arg25: memref<8x256xf32, #tpu.memory_space<vmem>>) attributes {dimension_semantics = [#tpu.dimension_semantics<parallel>], iteration_bounds = array<i64: 2>, scalar_prefetch = 0 : i64, scratch_operands = 1 : i64, tpu.core_type = #tpu.core_type<tc>, window_params = [{transform_indices = @transform_0, window_bounds = array<i64: 1, 3, 256>}, {transform_indices = @transform_1, window_bounds = array<i64: 1, 2, 256>}, {pipeline_mode = #tpu.pipeline_mode<synchronous>, transform_indices = @transform_2, window_bounds = array<i64: 9, 256>}, {pipeline_mode = #tpu.pipeline_mode<synchronous>, transform_indices = @transform_3, window_bounds = array<i64: 9, 256>}, {pipeline_mode = #tpu.pipeline_mode<synchronous>, transform_indices = @transform_4, window_bounds = array<i64: 2, 256>}, {pipeline_mode = #tpu.pipeline_mode<synchronous>, transform_indices = @transform_5, window_bounds = array<i64: 9, 8, 3>}, {pipeline_mode = #tpu.pipeline_mode<synchronous>, transform_indices = @transform_6, window_bounds = array<i64: 9, 8, 1>}, {pipeline_mode = #tpu.pipeline_mode<synchronous>, transform_indices = @transform_7, window_bounds = array<i64: 8, 1>}, {pipeline_mode = #tpu.pipeline_mode<synchronous>, transform_indices = @transform_8, window_bounds = array<i64: 9, 8, 8>}, {pipeline_mode = #tpu.pipeline_mode<synchronous>, transform_indices = @transform_9, window_bounds = array<i64: 8, 1>}, {pipeline_mode = #tpu.pipeline_mode<synchronous>, transform_indices = @transform_10, window_bounds = array<i64: 9, 16, 8>}, {pipeline_mode = #tpu.pipeline_mode<synchronous>, transform_indices = @transform_11, window_bounds = array<i64: 16, 1>}, {pipeline_mode = #tpu.pipeline_mode<synchronous>, transform_indices = @transform_12, window_bounds = array<i64: 9, 16, 16>}, {pipeline_mode = #tpu.pipeline_mode<synchronous>, transform_indices = @transform_13, window_bounds = array<i64: 16, 1>}, {pipeline_mode = #tpu.pipeline_mode<synchronous>, transform_indices = @transform_14, window_bounds = array<i64: 9, 8, 16>}, {pipeline_mode = #tpu.pipeline_mode<synchronous>, transform_indices = @transform_15, window_bounds = array<i64: 9, 8, 8>}, {pipeline_mode = #tpu.pipeline_mode<synchronous>, transform_indices = @transform_16, window_bounds = array<i64: 8, 1>}, {pipeline_mode = #tpu.pipeline_mode<synchronous>, transform_indices = @transform_17, window_bounds = array<i64: 9, 8, 8>}, {pipeline_mode = #tpu.pipeline_mode<synchronous>, transform_indices = @transform_18, window_bounds = array<i64: 8, 1>}, {pipeline_mode = #tpu.pipeline_mode<synchronous>, transform_indices = @transform_19, window_bounds = array<i64: 2, 8>}, {pipeline_mode = #tpu.pipeline_mode<synchronous>, transform_indices = @transform_20, window_bounds = array<i64: 2, 1>}, {transform_indices = @transform_21, window_bounds = array<i64: 1, 2, 256>}, {transform_indices = @transform_22, window_bounds = array<i64: 1, 1, 256>}, {transform_indices = @transform_23, window_bounds = array<i64: 1, 2, 128>}]} {
    %c0 = arith.constant 0 : index
    %c0_0 = arith.constant 0 : index
    %c0_1 = arith.constant 0 : index
    %0 = vector.load %arg1[%c0, %c0_0, %c0_1] : memref<1x3x256xf32, #tpu.memory_space<vmem>>, vector<1x3x256xf32>
    %1 = vector.shape_cast %0 : vector<1x3x256xf32> to vector<3x256xf32>
    %c0_2 = arith.constant 0 : index
    %c0_3 = arith.constant 0 : index
    %c0_4 = arith.constant 0 : index
    %2 = vector.load %arg2[%c0_2, %c0_3, %c0_4] : memref<1x2x256xf32, #tpu.memory_space<vmem>>, vector<1x2x256xf32>
    %3 = vector.shape_cast %2 : vector<1x2x256xf32> to vector<2x256xf32>
    %4 = vector.extract_strided_slice %3 {offsets = [0, 0], sizes = [1, 256], strides = [1, 1]} : vector<2x256xf32> to vector<1x256xf32>
    %5 = vector.extract_strided_slice %3 {offsets = [1, 0], sizes = [1, 256], strides = [1, 1]} : vector<2x256xf32> to vector<1x256xf32>
    %6 = arith.mulf %4, %4 : vector<1x256xf32>
    %7 = arith.mulf %5, %5 : vector<1x256xf32>
    %8 = arith.addf %6, %7 : vector<1x256xf32>
    %9 = math.sqrt %8 : vector<1x256xf32>
    %10 = vector.shape_cast %9 : vector<1x256xf32> to vector<1x1x256xf32>
    %cst = arith.constant dense<0.000000e+00> : vector<1xf32>
    %11 = vector.multi_reduction <add>, %10, %cst [1, 2] : vector<1x1x256xf32> to vector<1xf32>
    %12 = vector.shape_cast %11 : vector<1xf32> to vector<1x1x1xf32>
    %13 = vector.extract %12[0, 0, 0] : f32 from vector<1x1x1xf32>
    %cst_5 = arith.constant 3.906250e-04 : f32
    %14 = arith.mulf %13, %cst_5 : f32
    %15 = vector.broadcast %14 : f32 to vector<1x256xf32>
    %16 = arith.cmpf olt, %9, %15 : vector<1x256xf32>
    %17 = arith.extui %16 : vector<1x256xi1> to vector<1x256xi32>
    %18 = arith.sitofp %17 : vector<1x256xi32> to vector<1x256xf32>
    %cst_6 = arith.constant 1.000000e+00 : f32
    %19 = vector.broadcast %cst_6 : f32 to vector<1x256xf32>
    %20 = arith.subf %19, %18 : vector<1x256xf32>
    %c0_7 = arith.constant 0 : index
    %c0_8 = arith.constant 0 : index
    %c0_9 = arith.constant 0 : index
    %21 = vector.load %arg23[%c0_7, %c0_8, %c0_9] : memref<1x1x256xf32, #tpu.memory_space<vmem>>, vector<1x1x256xf32>
    %22 = vector.shape_cast %21 : vector<1x1x256xf32> to vector<1x256xf32>
    %23 = vector.shape_cast %20 : vector<1x256xf32> to vector<1x1x256xf32>
    tpu.vector_store %arg23[%c0_7, %c0_8, %c0_9], %23 {strides = array<i32>} : memref<1x1x256xf32, #tpu.memory_space<vmem>>, vector<1x1x256xf32>,
    %c0_10 = arith.constant 0 : index
    %c0_11 = arith.constant 0 : index
    %24 = vector.load %arg3[%c0_10, %c0_11] : memref<9x256xf32, #tpu.memory_space<vmem>>, vector<1x256xf32>
    %c17_i32 = arith.constant 17 : i32
    %25 = tpu.dynamic_rotate %1 by %c17_i32 dim 1 : vector<3x256xf32>, i32 -> vector<3x256xf32>
    %26 = vector.broadcast %24 : vector<1x256xf32> to vector<3x256xf32>
    %27 = arith.mulf %25, %26 : vector<3x256xf32>
    %c0_12 = arith.constant 0 : index
    %c0_13 = arith.constant 0 : index
    %c0_14 = arith.constant 0 : index
    %28 = vector.load %arg6[%c0_12, %c0_13, %c0_14] : memref<9x8x3xbf16, #tpu.memory_space<vmem>>, vector<1x8x3xbf16>
    %29 = vector.shape_cast %28 : vector<1x8x3xbf16> to vector<8x3xbf16>
    %30 = arith.truncf %27 : vector<3x256xf32> to vector<3x256xbf16>
    %cst_15 = arith.constant dense<0.000000e+00> : vector<8x256xf32>
    %31 = tpu.matmul %29, %30, %cst_15 {dimension_numbers = #tpu.dot_dimension_numbers<[1], [0], [0], [1], [0, 0, 1, 1], [], []>} : vector<8x3xbf16>, vector<3x256xbf16>, vector<8x256xf32> -> vector<8x256xf32>
    %c17_i32_16 = arith.constant 17 : i32
    %32 = tpu.dynamic_rotate %20 by %c17_i32_16 dim 1 : vector<1x256xf32>, i32 -> vector<1x256xf32>
    %33 = arith.mulf %32, %24 : vector<1x256xf32>
    %c0_17 = arith.constant 0 : index
    %c0_18 = arith.constant 0 : index
    %c0_19 = arith.constant 0 : index
    %34 = vector.load %arg7[%c0_17, %c0_18, %c0_19] : memref<9x8x1xbf16, #tpu.memory_space<vmem>>, vector<1x8x1xbf16>
    %35 = vector.shape_cast %34 : vector<1x8x1xbf16> to vector<8x1xbf16>
    %36 = arith.extf %35 : vector<8x1xbf16> to vector<8x1xf32>
    %37 = vector.broadcast %36 : vector<8x1xf32> to vector<8x256xf32>
    %38 = vector.broadcast %33 : vector<1x256xf32> to vector<8x256xf32>
    %39 = arith.mulf %37, %38 : vector<8x256xf32>
    %40 = arith.addf %31, %39 : vector<8x256xf32>
    %c1 = arith.constant 1 : index
    %c0_20 = arith.constant 0 : index
    %41 = vector.load %arg3[%c1, %c0_20] : memref<9x256xf32, #tpu.memory_space<vmem>>, vector<1x256xf32>
    %c16_i32 = arith.constant 16 : i32
    %42 = tpu.dynamic_rotate %1 by %c16_i32 dim 1 : vector<3x256xf32>, i32 -> vector<3x256xf32>
    %43 = vector.broadcast %41 : vector<1x256xf32> to vector<3x256xf32>
    %44 = arith.mulf %42, %43 : vector<3x256xf32>
    %c1_21 = arith.constant 1 : index
    %c0_22 = arith.constant 0 : index
    %c0_23 = arith.constant 0 : index
    %45 = vector.load %arg6[%c1_21, %c0_22, %c0_23] : memref<9x8x3xbf16, #tpu.memory_space<vmem>>, vector<1x8x3xbf16>
    %46 = vector.shape_cast %45 : vector<1x8x3xbf16> to vector<8x3xbf16>
    %47 = arith.truncf %44 : vector<3x256xf32> to vector<3x256xbf16>
    %cst_24 = arith.constant dense<0.000000e+00> : vector<8x256xf32>
    %48 = tpu.matmul %46, %47, %cst_24 {dimension_numbers = #tpu.dot_dimension_numbers<[1], [0], [0], [1], [0, 0, 1, 1], [], []>} : vector<8x3xbf16>, vector<3x256xbf16>, vector<8x256xf32> -> vector<8x256xf32>
    %49 = arith.addf %40, %48 : vector<8x256xf32>
    %c16_i32_25 = arith.constant 16 : i32
    %50 = tpu.dynamic_rotate %20 by %c16_i32_25 dim 1 : vector<1x256xf32>, i32 -> vector<1x256xf32>
    %51 = arith.mulf %50, %41 : vector<1x256xf32>
    %c1_26 = arith.constant 1 : index
    %c0_27 = arith.constant 0 : index
    %c0_28 = arith.constant 0 : index
    %52 = vector.load %arg7[%c1_26, %c0_27, %c0_28] : memref<9x8x1xbf16, #tpu.memory_space<vmem>>, vector<1x8x1xbf16>
    %53 = vector.shape_cast %52 : vector<1x8x1xbf16> to vector<8x1xbf16>
    %54 = arith.extf %53 : vector<8x1xbf16> to vector<8x1xf32>
    %55 = vector.broadcast %54 : vector<8x1xf32> to vector<8x256xf32>
    %56 = vector.broadcast %51 : vector<1x256xf32> to vector<8x256xf32>
    %57 = arith.mulf %55, %56 : vector<8x256xf32>
    %58 = arith.addf %49, %57 : vector<8x256xf32>
    %c2 = arith.constant 2 : index
    %c0_29 = arith.constant 0 : index
    %59 = vector.load %arg3[%c2, %c0_29] : memref<9x256xf32, #tpu.memory_space<vmem>>, vector<1x256xf32>
    %c15_i32 = arith.constant 15 : i32
    %60 = tpu.dynamic_rotate %1 by %c15_i32 dim 1 : vector<3x256xf32>, i32 -> vector<3x256xf32>
    %61 = vector.broadcast %59 : vector<1x256xf32> to vector<3x256xf32>
    %62 = arith.mulf %60, %61 : vector<3x256xf32>
    %c2_30 = arith.constant 2 : index
    %c0_31 = arith.constant 0 : index
    %c0_32 = arith.constant 0 : index
    %63 = vector.load %arg6[%c2_30, %c0_31, %c0_32] : memref<9x8x3xbf16, #tpu.memory_space<vmem>>, vector<1x8x3xbf16>
    %64 = vector.shape_cast %63 : vector<1x8x3xbf16> to vector<8x3xbf16>
    %65 = arith.truncf %62 : vector<3x256xf32> to vector<3x256xbf16>
    %cst_33 = arith.constant dense<0.000000e+00> : vector<8x256xf32>
    %66 = tpu.matmul %64, %65, %cst_33 {dimension_numbers = #tpu.dot_dimension_numbers<[1], [0], [0], [1], [0, 0, 1, 1], [], []>} : vector<8x3xbf16>, vector<3x256xbf16>, vector<8x256xf32> -> vector<8x256xf32>
    %67 = arith.addf %58, %66 : vector<8x256xf32>
    %c15_i32_34 = arith.constant 15 : i32
    %68 = tpu.dynamic_rotate %20 by %c15_i32_34 dim 1 : vector<1x256xf32>, i32 -> vector<1x256xf32>
    %69 = arith.mulf %68, %59 : vector<1x256xf32>
    %c2_35 = arith.constant 2 : index
    %c0_36 = arith.constant 0 : index
    %c0_37 = arith.constant 0 : index
    %70 = vector.load %arg7[%c2_35, %c0_36, %c0_37] : memref<9x8x1xbf16, #tpu.memory_space<vmem>>, vector<1x8x1xbf16>
    %71 = vector.shape_cast %70 : vector<1x8x1xbf16> to vector<8x1xbf16>
    %72 = arith.extf %71 : vector<8x1xbf16> to vector<8x1xf32>
    %73 = vector.broadcast %72 : vector<8x1xf32> to vector<8x256xf32>
    %74 = vector.broadcast %69 : vector<1x256xf32> to vector<8x256xf32>
    %75 = arith.mulf %73, %74 : vector<8x256xf32>
    %76 = arith.addf %67, %75 : vector<8x256xf32>
    %c3 = arith.constant 3 : index
    %c0_38 = arith.constant 0 : index
    %77 = vector.load %arg3[%c3, %c0_38] : memref<9x256xf32, #tpu.memory_space<vmem>>, vector<1x256xf32>
    %c1_i32 = arith.constant 1 : i32
    %78 = tpu.dynamic_rotate %1 by %c1_i32 dim 1 : vector<3x256xf32>, i32 -> vector<3x256xf32>
    %79 = vector.broadcast %77 : vector<1x256xf32> to vector<3x256xf32>
    %80 = arith.mulf %78, %79 : vector<3x256xf32>
    %c3_39 = arith.constant 3 : index
    %c0_40 = arith.constant 0 : index
    %c0_41 = arith.constant 0 : index
    %81 = vector.load %arg6[%c3_39, %c0_40, %c0_41] : memref<9x8x3xbf16, #tpu.memory_space<vmem>>, vector<1x8x3xbf16>
    %82 = vector.shape_cast %81 : vector<1x8x3xbf16> to vector<8x3xbf16>
    %83 = arith.truncf %80 : vector<3x256xf32> to vector<3x256xbf16>
    %cst_42 = arith.constant dense<0.000000e+00> : vector<8x256xf32>
    %84 = tpu.matmul %82, %83, %cst_42 {dimension_numbers = #tpu.dot_dimension_numbers<[1], [0], [0], [1], [0, 0, 1, 1], [], []>} : vector<8x3xbf16>, vector<3x256xbf16>, vector<8x256xf32> -> vector<8x256xf32>
    %85 = arith.addf %76, %84 : vector<8x256xf32>
    %c1_i32_43 = arith.constant 1 : i32
    %86 = tpu.dynamic_rotate %20 by %c1_i32_43 dim 1 : vector<1x256xf32>, i32 -> vector<1x256xf32>
    %87 = arith.mulf %86, %77 : vector<1x256xf32>
    %c3_44 = arith.constant 3 : index
    %c0_45 = arith.constant 0 : index
    %c0_46 = arith.constant 0 : index
    %88 = vector.load %arg7[%c3_44, %c0_45, %c0_46] : memref<9x8x1xbf16, #tpu.memory_space<vmem>>, vector<1x8x1xbf16>
    %89 = vector.shape_cast %88 : vector<1x8x1xbf16> to vector<8x1xbf16>
    %90 = arith.extf %89 : vector<8x1xbf16> to vector<8x1xf32>
    %91 = vector.broadcast %90 : vector<8x1xf32> to vector<8x256xf32>
    %92 = vector.broadcast %87 : vector<1x256xf32> to vector<8x256xf32>
    %93 = arith.mulf %91, %92 : vector<8x256xf32>
    %94 = arith.addf %85, %93 : vector<8x256xf32>
    %c4 = arith.constant 4 : index
    %c0_47 = arith.constant 0 : index
    %c0_48 = arith.constant 0 : index
    %95 = vector.load %arg6[%c4, %c0_47, %c0_48] : memref<9x8x3xbf16, #tpu.memory_space<vmem>>, vector<1x8x3xbf16>
    %96 = vector.shape_cast %95 : vector<1x8x3xbf16> to vector<8x3xbf16>
    %97 = arith.truncf %1 : vector<3x256xf32> to vector<3x256xbf16>
    %cst_49 = arith.constant dense<0.000000e+00> : vector<8x256xf32>
    %98 = tpu.matmul %96, %97, %cst_49 {dimension_numbers = #tpu.dot_dimension_numbers<[1], [0], [0], [1], [0, 0, 1, 1], [], []>} : vector<8x3xbf16>, vector<3x256xbf16>, vector<8x256xf32> -> vector<8x256xf32>
    %99 = arith.addf %94, %98 : vector<8x256xf32>
    %c4_50 = arith.constant 4 : index
    %c0_51 = arith.constant 0 : index
    %c0_52 = arith.constant 0 : index
    %100 = vector.load %arg7[%c4_50, %c0_51, %c0_52] : memref<9x8x1xbf16, #tpu.memory_space<vmem>>, vector<1x8x1xbf16>
    %101 = vector.shape_cast %100 : vector<1x8x1xbf16> to vector<8x1xbf16>
    %102 = arith.extf %101 : vector<8x1xbf16> to vector<8x1xf32>
    %103 = vector.broadcast %102 : vector<8x1xf32> to vector<8x256xf32>
    %104 = vector.broadcast %20 : vector<1x256xf32> to vector<8x256xf32>
    %105 = arith.mulf %103, %104 : vector<8x256xf32>
    %106 = arith.addf %99, %105 : vector<8x256xf32>
    %c5 = arith.constant 5 : index
    %c0_53 = arith.constant 0 : index
    %107 = vector.load %arg3[%c5, %c0_53] : memref<9x256xf32, #tpu.memory_space<vmem>>, vector<1x256xf32>
    %c255_i32 = arith.constant 255 : i32
    %108 = tpu.dynamic_rotate %1 by %c255_i32 dim 1 : vector<3x256xf32>, i32 -> vector<3x256xf32>
    %109 = vector.broadcast %107 : vector<1x256xf32> to vector<3x256xf32>
    %110 = arith.mulf %108, %109 : vector<3x256xf32>
    %c5_54 = arith.constant 5 : index
    %c0_55 = arith.constant 0 : index
    %c0_56 = arith.constant 0 : index
    %111 = vector.load %arg6[%c5_54, %c0_55, %c0_56] : memref<9x8x3xbf16, #tpu.memory_space<vmem>>, vector<1x8x3xbf16>
    %112 = vector.shape_cast %111 : vector<1x8x3xbf16> to vector<8x3xbf16>
    %113 = arith.truncf %110 : vector<3x256xf32> to vector<3x256xbf16>
    %cst_57 = arith.constant dense<0.000000e+00> : vector<8x256xf32>
    %114 = tpu.matmul %112, %113, %cst_57 {dimension_numbers = #tpu.dot_dimension_numbers<[1], [0], [0], [1], [0, 0, 1, 1], [], []>} : vector<8x3xbf16>, vector<3x256xbf16>, vector<8x256xf32> -> vector<8x256xf32>
    %115 = arith.addf %106, %114 : vector<8x256xf32>
    %c255_i32_58 = arith.constant 255 : i32
    %116 = tpu.dynamic_rotate %20 by %c255_i32_58 dim 1 : vector<1x256xf32>, i32 -> vector<1x256xf32>
    %117 = arith.mulf %116, %107 : vector<1x256xf32>
    %c5_59 = arith.constant 5 : index
    %c0_60 = arith.constant 0 : index
    %c0_61 = arith.constant 0 : index
    %118 = vector.load %arg7[%c5_59, %c0_60, %c0_61] : memref<9x8x1xbf16, #tpu.memory_space<vmem>>, vector<1x8x1xbf16>
    %119 = vector.shape_cast %118 : vector<1x8x1xbf16> to vector<8x1xbf16>
    %120 = arith.extf %119 : vector<8x1xbf16> to vector<8x1xf32>
    %121 = vector.broadcast %120 : vector<8x1xf32> to vector<8x256xf32>
    %122 = vector.broadcast %117 : vector<1x256xf32> to vector<8x256xf32>
    %123 = arith.mulf %121, %122 : vector<8x256xf32>
    %124 = arith.addf %115, %123 : vector<8x256xf32>
    %c6 = arith.constant 6 : index
    %c0_62 = arith.constant 0 : index
    %125 = vector.load %arg3[%c6, %c0_62] : memref<9x256xf32, #tpu.memory_space<vmem>>, vector<1x256xf32>
    %c241_i32 = arith.constant 241 : i32
    %126 = tpu.dynamic_rotate %1 by %c241_i32 dim 1 : vector<3x256xf32>, i32 -> vector<3x256xf32>
    %127 = vector.broadcast %125 : vector<1x256xf32> to vector<3x256xf32>
    %128 = arith.mulf %126, %127 : vector<3x256xf32>
    %c6_63 = arith.constant 6 : index
    %c0_64 = arith.constant 0 : index
    %c0_65 = arith.constant 0 : index
    %129 = vector.load %arg6[%c6_63, %c0_64, %c0_65] : memref<9x8x3xbf16, #tpu.memory_space<vmem>>, vector<1x8x3xbf16>
    %130 = vector.shape_cast %129 : vector<1x8x3xbf16> to vector<8x3xbf16>
    %131 = arith.truncf %128 : vector<3x256xf32> to vector<3x256xbf16>
    %cst_66 = arith.constant dense<0.000000e+00> : vector<8x256xf32>
    %132 = tpu.matmul %130, %131, %cst_66 {dimension_numbers = #tpu.dot_dimension_numbers<[1], [0], [0], [1], [0, 0, 1, 1], [], []>} : vector<8x3xbf16>, vector<3x256xbf16>, vector<8x256xf32> -> vector<8x256xf32>
    %133 = arith.addf %124, %132 : vector<8x256xf32>
    %c241_i32_67 = arith.constant 241 : i32
    %134 = tpu.dynamic_rotate %20 by %c241_i32_67 dim 1 : vector<1x256xf32>, i32 -> vector<1x256xf32>
    %135 = arith.mulf %134, %125 : vector<1x256xf32>
    %c6_68 = arith.constant 6 : index
    %c0_69 = arith.constant 0 : index
    %c0_70 = arith.constant 0 : index
    %136 = vector.load %arg7[%c6_68, %c0_69, %c0_70] : memref<9x8x1xbf16, #tpu.memory_space<vmem>>, vector<1x8x1xbf16>
    %137 = vector.shape_cast %136 : vector<1x8x1xbf16> to vector<8x1xbf16>
    %138 = arith.extf %137 : vector<8x1xbf16> to vector<8x1xf32>
    %139 = vector.broadcast %138 : vector<8x1xf32> to vector<8x256xf32>
    %140 = vector.broadcast %135 : vector<1x256xf32> to vector<8x256xf32>
    %141 = arith.mulf %139, %140 : vector<8x256xf32>
    %142 = arith.addf %133, %141 : vector<8x256xf32>
    %c7 = arith.constant 7 : index
    %c0_71 = arith.constant 0 : index
    %143 = vector.load %arg3[%c7, %c0_71] : memref<9x256xf32, #tpu.memory_space<vmem>>, vector<1x256xf32>
    %c240_i32 = arith.constant 240 : i32
    %144 = tpu.dynamic_rotate %1 by %c240_i32 dim 1 : vector<3x256xf32>, i32 -> vector<3x256xf32>
    %145 = vector.broadcast %143 : vector<1x256xf32> to vector<3x256xf32>
    %146 = arith.mulf %144, %145 : vector<3x256xf32>
    %c7_72 = arith.constant 7 : index
    %c0_73 = arith.constant 0 : index
    %c0_74 = arith.constant 0 : index
    %147 = vector.load %arg6[%c7_72, %c0_73, %c0_74] : memref<9x8x3xbf16, #tpu.memory_space<vmem>>, vector<1x8x3xbf16>
    %148 = vector.shape_cast %147 : vector<1x8x3xbf16> to vector<8x3xbf16>
    %149 = arith.truncf %146 : vector<3x256xf32> to vector<3x256xbf16>
    %cst_75 = arith.constant dense<0.000000e+00> : vector<8x256xf32>
    %150 = tpu.matmul %148, %149, %cst_75 {dimension_numbers = #tpu.dot_dimension_numbers<[1], [0], [0], [1], [0, 0, 1, 1], [], []>} : vector<8x3xbf16>, vector<3x256xbf16>, vector<8x256xf32> -> vector<8x256xf32>
    %151 = arith.addf %142, %150 : vector<8x256xf32>
    %c240_i32_76 = arith.constant 240 : i32
    %152 = tpu.dynamic_rotate %20 by %c240_i32_76 dim 1 : vector<1x256xf32>, i32 -> vector<1x256xf32>
    %153 = arith.mulf %152, %143 : vector<1x256xf32>
    %c7_77 = arith.constant 7 : index
    %c0_78 = arith.constant 0 : index
    %c0_79 = arith.constant 0 : index
    %154 = vector.load %arg7[%c7_77, %c0_78, %c0_79] : memref<9x8x1xbf16, #tpu.memory_space<vmem>>, vector<1x8x1xbf16>
    %155 = vector.shape_cast %154 : vector<1x8x1xbf16> to vector<8x1xbf16>
    %156 = arith.extf %155 : vector<8x1xbf16> to vector<8x1xf32>
    %157 = vector.broadcast %156 : vector<8x1xf32> to vector<8x256xf32>
    %158 = vector.broadcast %153 : vector<1x256xf32> to vector<8x256xf32>
    %159 = arith.mulf %157, %158 : vector<8x256xf32>
    %160 = arith.addf %151, %159 : vector<8x256xf32>
    %c8 = arith.constant 8 : index
    %c0_80 = arith.constant 0 : index
    %161 = vector.load %arg3[%c8, %c0_80] : memref<9x256xf32, #tpu.memory_space<vmem>>, vector<1x256xf32>
    %c239_i32 = arith.constant 239 : i32
    %162 = tpu.dynamic_rotate %1 by %c239_i32 dim 1 : vector<3x256xf32>, i32 -> vector<3x256xf32>
    %163 = vector.broadcast %161 : vector<1x256xf32> to vector<3x256xf32>
    %164 = arith.mulf %162, %163 : vector<3x256xf32>
    %c8_81 = arith.constant 8 : index
    %c0_82 = arith.constant 0 : index
    %c0_83 = arith.constant 0 : index
    %165 = vector.load %arg6[%c8_81, %c0_82, %c0_83] : memref<9x8x3xbf16, #tpu.memory_space<vmem>>, vector<1x8x3xbf16>
    %166 = vector.shape_cast %165 : vector<1x8x3xbf16> to vector<8x3xbf16>
    %167 = arith.truncf %164 : vector<3x256xf32> to vector<3x256xbf16>
    %cst_84 = arith.constant dense<0.000000e+00> : vector<8x256xf32>
    %168 = tpu.matmul %166, %167, %cst_84 {dimension_numbers = #tpu.dot_dimension_numbers<[1], [0], [0], [1], [0, 0, 1, 1], [], []>} : vector<8x3xbf16>, vector<3x256xbf16>, vector<8x256xf32> -> vector<8x256xf32>
    %169 = arith.addf %160, %168 : vector<8x256xf32>
    %c239_i32_85 = arith.constant 239 : i32
    %170 = tpu.dynamic_rotate %20 by %c239_i32_85 dim 1 : vector<1x256xf32>, i32 -> vector<1x256xf32>
    %171 = arith.mulf %170, %161 : vector<1x256xf32>
    %c8_86 = arith.constant 8 : index
    %c0_87 = arith.constant 0 : index
    %c0_88 = arith.constant 0 : index
    %172 = vector.load %arg7[%c8_86, %c0_87, %c0_88] : memref<9x8x1xbf16, #tpu.memory_space<vmem>>, vector<1x8x1xbf16>
    %173 = vector.shape_cast %172 : vector<1x8x1xbf16> to vector<8x1xbf16>
    %174 = arith.extf %173 : vector<8x1xbf16> to vector<8x1xf32>
    %175 = vector.broadcast %174 : vector<8x1xf32> to vector<8x256xf32>
    %176 = vector.broadcast %171 : vector<1x256xf32> to vector<8x256xf32>
    %177 = arith.mulf %175, %176 : vector<8x256xf32>
    %178 = arith.addf %169, %177 : vector<8x256xf32>
    %c0_89 = arith.constant 0 : index
    %c0_90 = arith.constant 0 : index
    %179 = vector.load %arg8[%c0_89, %c0_90] : memref<8x1xf32, #tpu.memory_space<vmem>>, vector<8x1xf32>
    %180 = vector.broadcast %179 : vector<8x1xf32> to vector<8x256xf32>
    %181 = arith.addf %178, %180 : vector<8x256xf32>
    %cst_91 = arith.constant 0.000000e+00 : f32
    %182 = vector.broadcast %cst_91 : f32 to vector<8x256xf32>
    %183 = arith.maximumf %181, %182 : vector<8x256xf32>
    %c0_92 = arith.constant 0 : index
    %c0_93 = arith.constant 0 : index
    %184 = vector.load %arg3[%c0_92, %c0_93] : memref<9x256xf32, #tpu.memory_space<vmem>>, vector<1x256xf32>
    %c17_i32_94 = arith.constant 17 : i32
    %185 = tpu.dynamic_rotate %183 by %c17_i32_94 dim 1 : vector<8x256xf32>, i32 -> vector<8x256xf32>
    %186 = vector.broadcast %184 : vector<1x256xf32> to vector<8x256xf32>
    %187 = arith.mulf %185, %186 : vector<8x256xf32>
    %c0_95 = arith.constant 0 : index
    %c0_96 = arith.constant 0 : index
    %c0_97 = arith.constant 0 : index
    %188 = vector.load %arg9[%c0_95, %c0_96, %c0_97] : memref<9x8x8xbf16, #tpu.memory_space<vmem>>, vector<1x8x8xbf16>
    %189 = vector.shape_cast %188 : vector<1x8x8xbf16> to vector<8x8xbf16>
    %190 = arith.truncf %187 : vector<8x256xf32> to vector<8x256xbf16>
    %cst_98 = arith.constant dense<0.000000e+00> : vector<8x256xf32>
    %191 = tpu.matmul %189, %190, %cst_98 {dimension_numbers = #tpu.dot_dimension_numbers<[1], [0], [0], [1], [0, 0, 1, 1], [], []>} : vector<8x8xbf16>, vector<8x256xbf16>, vector<8x256xf32> -> vector<8x256xf32>
    %c1_99 = arith.constant 1 : index
    %c0_100 = arith.constant 0 : index
    %192 = vector.load %arg3[%c1_99, %c0_100] : memref<9x256xf32, #tpu.memory_space<vmem>>, vector<1x256xf32>
    %c16_i32_101 = arith.constant 16 : i32
    %193 = tpu.dynamic_rotate %183 by %c16_i32_101 dim 1 : vector<8x256xf32>, i32 -> vector<8x256xf32>
    %194 = vector.broadcast %192 : vector<1x256xf32> to vector<8x256xf32>
    %195 = arith.mulf %193, %194 : vector<8x256xf32>
    %c1_102 = arith.constant 1 : index
    %c0_103 = arith.constant 0 : index
    %c0_104 = arith.constant 0 : index
    %196 = vector.load %arg9[%c1_102, %c0_103, %c0_104] : memref<9x8x8xbf16, #tpu.memory_space<vmem>>, vector<1x8x8xbf16>
    %197 = vector.shape_cast %196 : vector<1x8x8xbf16> to vector<8x8xbf16>
    %198 = arith.truncf %195 : vector<8x256xf32> to vector<8x256xbf16>
    %cst_105 = arith.constant dense<0.000000e+00> : vector<8x256xf32>
    %199 = tpu.matmul %197, %198, %cst_105 {dimension_numbers = #tpu.dot_dimension_numbers<[1], [0], [0], [1], [0, 0, 1, 1], [], []>} : vector<8x8xbf16>, vector<8x256xbf16>, vector<8x256xf32> -> vector<8x256xf32>
    %200 = arith.addf %191, %199 : vector<8x256xf32>
    %c2_106 = arith.constant 2 : index
    %c0_107 = arith.constant 0 : index
    %201 = vector.load %arg3[%c2_106, %c0_107] : memref<9x256xf32, #tpu.memory_space<vmem>>, vector<1x256xf32>
    %c15_i32_108 = arith.constant 15 : i32
    %202 = tpu.dynamic_rotate %183 by %c15_i32_108 dim 1 : vector<8x256xf32>, i32 -> vector<8x256xf32>
    %203 = vector.broadcast %201 : vector<1x256xf32> to vector<8x256xf32>
    %204 = arith.mulf %202, %203 : vector<8x256xf32>
    %c2_109 = arith.constant 2 : index
    %c0_110 = arith.constant 0 : index
    %c0_111 = arith.constant 0 : index
    %205 = vector.load %arg9[%c2_109, %c0_110, %c0_111] : memref<9x8x8xbf16, #tpu.memory_space<vmem>>, vector<1x8x8xbf16>
    %206 = vector.shape_cast %205 : vector<1x8x8xbf16> to vector<8x8xbf16>
    %207 = arith.truncf %204 : vector<8x256xf32> to vector<8x256xbf16>
    %cst_112 = arith.constant dense<0.000000e+00> : vector<8x256xf32>
    %208 = tpu.matmul %206, %207, %cst_112 {dimension_numbers = #tpu.dot_dimension_numbers<[1], [0], [0], [1], [0, 0, 1, 1], [], []>} : vector<8x8xbf16>, vector<8x256xbf16>, vector<8x256xf32> -> vector<8x256xf32>
    %209 = arith.addf %200, %208 : vector<8x256xf32>
    %c3_113 = arith.constant 3 : index
    %c0_114 = arith.constant 0 : index
    %210 = vector.load %arg3[%c3_113, %c0_114] : memref<9x256xf32, #tpu.memory_space<vmem>>, vector<1x256xf32>
    %c1_i32_115 = arith.constant 1 : i32
    %211 = tpu.dynamic_rotate %183 by %c1_i32_115 dim 1 : vector<8x256xf32>, i32 -> vector<8x256xf32>
    %212 = vector.broadcast %210 : vector<1x256xf32> to vector<8x256xf32>
    %213 = arith.mulf %211, %212 : vector<8x256xf32>
    %c3_116 = arith.constant 3 : index
    %c0_117 = arith.constant 0 : index
    %c0_118 = arith.constant 0 : index
    %214 = vector.load %arg9[%c3_116, %c0_117, %c0_118] : memref<9x8x8xbf16, #tpu.memory_space<vmem>>, vector<1x8x8xbf16>
    %215 = vector.shape_cast %214 : vector<1x8x8xbf16> to vector<8x8xbf16>
    %216 = arith.truncf %213 : vector<8x256xf32> to vector<8x256xbf16>
    %cst_119 = arith.constant dense<0.000000e+00> : vector<8x256xf32>
    %217 = tpu.matmul %215, %216, %cst_119 {dimension_numbers = #tpu.dot_dimension_numbers<[1], [0], [0], [1], [0, 0, 1, 1], [], []>} : vector<8x8xbf16>, vector<8x256xbf16>, vector<8x256xf32> -> vector<8x256xf32>
    %218 = arith.addf %209, %217 : vector<8x256xf32>
    %c4_120 = arith.constant 4 : index
    %c0_121 = arith.constant 0 : index
    %c0_122 = arith.constant 0 : index
    %219 = vector.load %arg9[%c4_120, %c0_121, %c0_122] : memref<9x8x8xbf16, #tpu.memory_space<vmem>>, vector<1x8x8xbf16>
    %220 = vector.shape_cast %219 : vector<1x8x8xbf16> to vector<8x8xbf16>
    %221 = arith.truncf %183 : vector<8x256xf32> to vector<8x256xbf16>
    %cst_123 = arith.constant dense<0.000000e+00> : vector<8x256xf32>
    %222 = tpu.matmul %220, %221, %cst_123 {dimension_numbers = #tpu.dot_dimension_numbers<[1], [0], [0], [1], [0, 0, 1, 1], [], []>} : vector<8x8xbf16>, vector<8x256xbf16>, vector<8x256xf32> -> vector<8x256xf32>
    %223 = arith.addf %218, %222 : vector<8x256xf32>
    %c5_124 = arith.constant 5 : index
    %c0_125 = arith.constant 0 : index
    %224 = vector.load %arg3[%c5_124, %c0_125] : memref<9x256xf32, #tpu.memory_space<vmem>>, vector<1x256xf32>
    %c255_i32_126 = arith.constant 255 : i32
    %225 = tpu.dynamic_rotate %183 by %c255_i32_126 dim 1 : vector<8x256xf32>, i32 -> vector<8x256xf32>
    %226 = vector.broadcast %224 : vector<1x256xf32> to vector<8x256xf32>
    %227 = arith.mulf %225, %226 : vector<8x256xf32>
    %c5_127 = arith.constant 5 : index
    %c0_128 = arith.constant 0 : index
    %c0_129 = arith.constant 0 : index
    %228 = vector.load %arg9[%c5_127, %c0_128, %c0_129] : memref<9x8x8xbf16, #tpu.memory_space<vmem>>, vector<1x8x8xbf16>
    %229 = vector.shape_cast %228 : vector<1x8x8xbf16> to vector<8x8xbf16>
    %230 = arith.truncf %227 : vector<8x256xf32> to vector<8x256xbf16>
    %cst_130 = arith.constant dense<0.000000e+00> : vector<8x256xf32>
    %231 = tpu.matmul %229, %230, %cst_130 {dimension_numbers = #tpu.dot_dimension_numbers<[1], [0], [0], [1], [0, 0, 1, 1], [], []>} : vector<8x8xbf16>, vector<8x256xbf16>, vector<8x256xf32> -> vector<8x256xf32>
    %232 = arith.addf %223, %231 : vector<8x256xf32>
    %c6_131 = arith.constant 6 : index
    %c0_132 = arith.constant 0 : index
    %233 = vector.load %arg3[%c6_131, %c0_132] : memref<9x256xf32, #tpu.memory_space<vmem>>, vector<1x256xf32>
    %c241_i32_133 = arith.constant 241 : i32
    %234 = tpu.dynamic_rotate %183 by %c241_i32_133 dim 1 : vector<8x256xf32>, i32 -> vector<8x256xf32>
    %235 = vector.broadcast %233 : vector<1x256xf32> to vector<8x256xf32>
    %236 = arith.mulf %234, %235 : vector<8x256xf32>
    %c6_134 = arith.constant 6 : index
    %c0_135 = arith.constant 0 : index
    %c0_136 = arith.constant 0 : index
    %237 = vector.load %arg9[%c6_134, %c0_135, %c0_136] : memref<9x8x8xbf16, #tpu.memory_space<vmem>>, vector<1x8x8xbf16>
    %238 = vector.shape_cast %237 : vector<1x8x8xbf16> to vector<8x8xbf16>
    %239 = arith.truncf %236 : vector<8x256xf32> to vector<8x256xbf16>
    %cst_137 = arith.constant dense<0.000000e+00> : vector<8x256xf32>
    %240 = tpu.matmul %238, %239, %cst_137 {dimension_numbers = #tpu.dot_dimension_numbers<[1], [0], [0], [1], [0, 0, 1, 1], [], []>} : vector<8x8xbf16>, vector<8x256xbf16>, vector<8x256xf32> -> vector<8x256xf32>
    %241 = arith.addf %232, %240 : vector<8x256xf32>
    %c7_138 = arith.constant 7 : index
    %c0_139 = arith.constant 0 : index
    %242 = vector.load %arg3[%c7_138, %c0_139] : memref<9x256xf32, #tpu.memory_space<vmem>>, vector<1x256xf32>
    %c240_i32_140 = arith.constant 240 : i32
    %243 = tpu.dynamic_rotate %183 by %c240_i32_140 dim 1 : vector<8x256xf32>, i32 -> vector<8x256xf32>
    %244 = vector.broadcast %242 : vector<1x256xf32> to vector<8x256xf32>
    %245 = arith.mulf %243, %244 : vector<8x256xf32>
    %c7_141 = arith.constant 7 : index
    %c0_142 = arith.constant 0 : index
    %c0_143 = arith.constant 0 : index
    %246 = vector.load %arg9[%c7_141, %c0_142, %c0_143] : memref<9x8x8xbf16, #tpu.memory_space<vmem>>, vector<1x8x8xbf16>
    %247 = vector.shape_cast %246 : vector<1x8x8xbf16> to vector<8x8xbf16>
    %248 = arith.truncf %245 : vector<8x256xf32> to vector<8x256xbf16>
    %cst_144 = arith.constant dense<0.000000e+00> : vector<8x256xf32>
    %249 = tpu.matmul %247, %248, %cst_144 {dimension_numbers = #tpu.dot_dimension_numbers<[1], [0], [0], [1], [0, 0, 1, 1], [], []>} : vector<8x8xbf16>, vector<8x256xbf16>, vector<8x256xf32> -> vector<8x256xf32>
    %250 = arith.addf %241, %249 : vector<8x256xf32>
    %c8_145 = arith.constant 8 : index
    %c0_146 = arith.constant 0 : index
    %251 = vector.load %arg3[%c8_145, %c0_146] : memref<9x256xf32, #tpu.memory_space<vmem>>, vector<1x256xf32>
    %c239_i32_147 = arith.constant 239 : i32
    %252 = tpu.dynamic_rotate %183 by %c239_i32_147 dim 1 : vector<8x256xf32>, i32 -> vector<8x256xf32>
    %253 = vector.broadcast %251 : vector<1x256xf32> to vector<8x256xf32>
    %254 = arith.mulf %252, %253 : vector<8x256xf32>
    %c8_148 = arith.constant 8 : index
    %c0_149 = arith.constant 0 : index
    %c0_150 = arith.constant 0 : index
    %255 = vector.load %arg9[%c8_148, %c0_149, %c0_150] : memref<9x8x8xbf16, #tpu.memory_space<vmem>>, vector<1x8x8xbf16>
    %256 = vector.shape_cast %255 : vector<1x8x8xbf16> to vector<8x8xbf16>
    %257 = arith.truncf %254 : vector<8x256xf32> to vector<8x256xbf16>
    %cst_151 = arith.constant dense<0.000000e+00> : vector<8x256xf32>
    %258 = tpu.matmul %256, %257, %cst_151 {dimension_numbers = #tpu.dot_dimension_numbers<[1], [0], [0], [1], [0, 0, 1, 1], [], []>} : vector<8x8xbf16>, vector<8x256xbf16>, vector<8x256xf32> -> vector<8x256xf32>
    %259 = arith.addf %250, %258 : vector<8x256xf32>
    %c0_152 = arith.constant 0 : index
    %c0_153 = arith.constant 0 : index
    %260 = vector.load %arg10[%c0_152, %c0_153] : memref<8x1xf32, #tpu.memory_space<vmem>>, vector<8x1xf32>
    %261 = vector.broadcast %260 : vector<8x1xf32> to vector<8x256xf32>
    %262 = arith.addf %259, %261 : vector<8x256xf32>
    %cst_154 = arith.constant 0.000000e+00 : f32
    %263 = vector.broadcast %cst_154 : f32 to vector<8x256xf32>
    %264 = arith.maximumf %262, %263 : vector<8x256xf32>
    %c0_155 = arith.constant 0 : index
    %c0_156 = arith.constant 0 : index
    %265 = vector.load %arg25[%c0_155, %c0_156] : memref<8x256xf32, #tpu.memory_space<vmem>>, vector<8x256xf32>
    tpu.vector_store %arg25[%c0_155, %c0_156], %264 {strides = array<i32>} : memref<8x256xf32, #tpu.memory_space<vmem>>, vector<8x256xf32>,
    %c255_i32_157 = arith.constant 255 : i32
    %266 = tpu.dynamic_rotate %264 by %c255_i32_157 dim 1 : vector<8x256xf32>, i32 -> vector<8x256xf32>
    %267 = arith.maximumf %264, %266 : vector<8x256xf32>
    %c240_i32_158 = arith.constant 240 : i32
    %268 = tpu.dynamic_rotate %267 by %c240_i32_158 dim 1 : vector<8x256xf32>, i32 -> vector<8x256xf32>
    %269 = arith.maximumf %267, %268 : vector<8x256xf32>
    %c0_159 = arith.constant 0 : index
    %c0_160 = arith.constant 0 : index
    %270 = vector.load %arg4[%c0_159, %c0_160] : memref<9x256xf32, #tpu.memory_space<vmem>>, vector<1x256xf32>
    %c34_i32 = arith.constant 34 : i32
    %271 = tpu.dynamic_rotate %269 by %c34_i32 dim 1 : vector<8x256xf32>, i32 -> vector<8x256xf32>
    %272 = vector.broadcast %270 : vector<1x256xf32> to vector<8x256xf32>
    %273 = arith.mulf %271, %272 : vector<8x256xf32>
    %c0_161 = arith.constant 0 : index
    %c0_162 = arith.constant 0 : index
    %c0_163 = arith.constant 0 : index
    %274 = vector.load %arg11[%c0_161, %c0_162, %c0_163] : memref<9x16x8xbf16, #tpu.memory_space<vmem>>, vector<1x16x8xbf16>
    %275 = vector.shape_cast %274 : vector<1x16x8xbf16> to vector<16x8xbf16>
    %276 = arith.truncf %273 : vector<8x256xf32> to vector<8x256xbf16>
    %cst_164 = arith.constant dense<0.000000e+00> : vector<16x256xf32>
    %277 = tpu.matmul %275, %276, %cst_164 {dimension_numbers = #tpu.dot_dimension_numbers<[1], [0], [0], [1], [0, 0, 1, 1], [], []>} : vector<16x8xbf16>, vector<8x256xbf16>, vector<16x256xf32> -> vector<16x256xf32>
    %c1_165 = arith.constant 1 : index
    %c0_166 = arith.constant 0 : index
    %278 = vector.load %arg4[%c1_165, %c0_166] : memref<9x256xf32, #tpu.memory_space<vmem>>, vector<1x256xf32>
    %c32_i32 = arith.constant 32 : i32
    %279 = tpu.dynamic_rotate %269 by %c32_i32 dim 1 : vector<8x256xf32>, i32 -> vector<8x256xf32>
    %280 = vector.broadcast %278 : vector<1x256xf32> to vector<8x256xf32>
    %281 = arith.mulf %279, %280 : vector<8x256xf32>
    %c1_167 = arith.constant 1 : index
    %c0_168 = arith.constant 0 : index
    %c0_169 = arith.constant 0 : index
    %282 = vector.load %arg11[%c1_167, %c0_168, %c0_169] : memref<9x16x8xbf16, #tpu.memory_space<vmem>>, vector<1x16x8xbf16>
    %283 = vector.shape_cast %282 : vector<1x16x8xbf16> to vector<16x8xbf16>
    %284 = arith.truncf %281 : vector<8x256xf32> to vector<8x256xbf16>
    %cst_170 = arith.constant dense<0.000000e+00> : vector<16x256xf32>
    %285 = tpu.matmul %283, %284, %cst_170 {dimension_numbers = #tpu.dot_dimension_numbers<[1], [0], [0], [1], [0, 0, 1, 1], [], []>} : vector<16x8xbf16>, vector<8x256xbf16>, vector<16x256xf32> -> vector<16x256xf32>
    %286 = arith.addf %277, %285 : vector<16x256xf32>
    %c2_171 = arith.constant 2 : index
    %c0_172 = arith.constant 0 : index
    %287 = vector.load %arg4[%c2_171, %c0_172] : memref<9x256xf32, #tpu.memory_space<vmem>>, vector<1x256xf32>
    %c30_i32 = arith.constant 30 : i32
    %288 = tpu.dynamic_rotate %269 by %c30_i32 dim 1 : vector<8x256xf32>, i32 -> vector<8x256xf32>
    %289 = vector.broadcast %287 : vector<1x256xf32> to vector<8x256xf32>
    %290 = arith.mulf %288, %289 : vector<8x256xf32>
    %c2_173 = arith.constant 2 : index
    %c0_174 = arith.constant 0 : index
    %c0_175 = arith.constant 0 : index
    %291 = vector.load %arg11[%c2_173, %c0_174, %c0_175] : memref<9x16x8xbf16, #tpu.memory_space<vmem>>, vector<1x16x8xbf16>
    %292 = vector.shape_cast %291 : vector<1x16x8xbf16> to vector<16x8xbf16>
    %293 = arith.truncf %290 : vector<8x256xf32> to vector<8x256xbf16>
    %cst_176 = arith.constant dense<0.000000e+00> : vector<16x256xf32>
    %294 = tpu.matmul %292, %293, %cst_176 {dimension_numbers = #tpu.dot_dimension_numbers<[1], [0], [0], [1], [0, 0, 1, 1], [], []>} : vector<16x8xbf16>, vector<8x256xbf16>, vector<16x256xf32> -> vector<16x256xf32>
    %295 = arith.addf %286, %294 : vector<16x256xf32>
    %c3_177 = arith.constant 3 : index
    %c0_178 = arith.constant 0 : index
    %296 = vector.load %arg4[%c3_177, %c0_178] : memref<9x256xf32, #tpu.memory_space<vmem>>, vector<1x256xf32>
    %c2_i32 = arith.constant 2 : i32
    %297 = tpu.dynamic_rotate %269 by %c2_i32 dim 1 : vector<8x256xf32>, i32 -> vector<8x256xf32>
    %298 = vector.broadcast %296 : vector<1x256xf32> to vector<8x256xf32>
    %299 = arith.mulf %297, %298 : vector<8x256xf32>
    %c3_179 = arith.constant 3 : index
    %c0_180 = arith.constant 0 : index
    %c0_181 = arith.constant 0 : index
    %300 = vector.load %arg11[%c3_179, %c0_180, %c0_181] : memref<9x16x8xbf16, #tpu.memory_space<vmem>>, vector<1x16x8xbf16>
    %301 = vector.shape_cast %300 : vector<1x16x8xbf16> to vector<16x8xbf16>
    %302 = arith.truncf %299 : vector<8x256xf32> to vector<8x256xbf16>
    %cst_182 = arith.constant dense<0.000000e+00> : vector<16x256xf32>
    %303 = tpu.matmul %301, %302, %cst_182 {dimension_numbers = #tpu.dot_dimension_numbers<[1], [0], [0], [1], [0, 0, 1, 1], [], []>} : vector<16x8xbf16>, vector<8x256xbf16>, vector<16x256xf32> -> vector<16x256xf32>
    %304 = arith.addf %295, %303 : vector<16x256xf32>
    %c4_183 = arith.constant 4 : index
    %c0_184 = arith.constant 0 : index
    %c0_185 = arith.constant 0 : index
    %305 = vector.load %arg11[%c4_183, %c0_184, %c0_185] : memref<9x16x8xbf16, #tpu.memory_space<vmem>>, vector<1x16x8xbf16>
    %306 = vector.shape_cast %305 : vector<1x16x8xbf16> to vector<16x8xbf16>
    %307 = arith.truncf %269 : vector<8x256xf32> to vector<8x256xbf16>
    %cst_186 = arith.constant dense<0.000000e+00> : vector<16x256xf32>
    %308 = tpu.matmul %306, %307, %cst_186 {dimension_numbers = #tpu.dot_dimension_numbers<[1], [0], [0], [1], [0, 0, 1, 1], [], []>} : vector<16x8xbf16>, vector<8x256xbf16>, vector<16x256xf32> -> vector<16x256xf32>
    %309 = arith.addf %304, %308 : vector<16x256xf32>
    %c5_187 = arith.constant 5 : index
    %c0_188 = arith.constant 0 : index
    %310 = vector.load %arg4[%c5_187, %c0_188] : memref<9x256xf32, #tpu.memory_space<vmem>>, vector<1x256xf32>
    %c254_i32 = arith.constant 254 : i32
    %311 = tpu.dynamic_rotate %269 by %c254_i32 dim 1 : vector<8x256xf32>, i32 -> vector<8x256xf32>
    %312 = vector.broadcast %310 : vector<1x256xf32> to vector<8x256xf32>
    %313 = arith.mulf %311, %312 : vector<8x256xf32>
    %c5_189 = arith.constant 5 : index
    %c0_190 = arith.constant 0 : index
    %c0_191 = arith.constant 0 : index
    %314 = vector.load %arg11[%c5_189, %c0_190, %c0_191] : memref<9x16x8xbf16, #tpu.memory_space<vmem>>, vector<1x16x8xbf16>
    %315 = vector.shape_cast %314 : vector<1x16x8xbf16> to vector<16x8xbf16>
    %316 = arith.truncf %313 : vector<8x256xf32> to vector<8x256xbf16>
    %cst_192 = arith.constant dense<0.000000e+00> : vector<16x256xf32>
    %317 = tpu.matmul %315, %316, %cst_192 {dimension_numbers = #tpu.dot_dimension_numbers<[1], [0], [0], [1], [0, 0, 1, 1], [], []>} : vector<16x8xbf16>, vector<8x256xbf16>, vector<16x256xf32> -> vector<16x256xf32>
    %318 = arith.addf %309, %317 : vector<16x256xf32>
    %c6_193 = arith.constant 6 : index
    %c0_194 = arith.constant 0 : index
    %319 = vector.load %arg4[%c6_193, %c0_194] : memref<9x256xf32, #tpu.memory_space<vmem>>, vector<1x256xf32>
    %c226_i32 = arith.constant 226 : i32
    %320 = tpu.dynamic_rotate %269 by %c226_i32 dim 1 : vector<8x256xf32>, i32 -> vector<8x256xf32>
    %321 = vector.broadcast %319 : vector<1x256xf32> to vector<8x256xf32>
    %322 = arith.mulf %320, %321 : vector<8x256xf32>
    %c6_195 = arith.constant 6 : index
    %c0_196 = arith.constant 0 : index
    %c0_197 = arith.constant 0 : index
    %323 = vector.load %arg11[%c6_195, %c0_196, %c0_197] : memref<9x16x8xbf16, #tpu.memory_space<vmem>>, vector<1x16x8xbf16>
    %324 = vector.shape_cast %323 : vector<1x16x8xbf16> to vector<16x8xbf16>
    %325 = arith.truncf %322 : vector<8x256xf32> to vector<8x256xbf16>
    %cst_198 = arith.constant dense<0.000000e+00> : vector<16x256xf32>
    %326 = tpu.matmul %324, %325, %cst_198 {dimension_numbers = #tpu.dot_dimension_numbers<[1], [0], [0], [1], [0, 0, 1, 1], [], []>} : vector<16x8xbf16>, vector<8x256xbf16>, vector<16x256xf32> -> vector<16x256xf32>
    %327 = arith.addf %318, %326 : vector<16x256xf32>
    %c7_199 = arith.constant 7 : index
    %c0_200 = arith.constant 0 : index
    %328 = vector.load %arg4[%c7_199, %c0_200] : memref<9x256xf32, #tpu.memory_space<vmem>>, vector<1x256xf32>
    %c224_i32 = arith.constant 224 : i32
    %329 = tpu.dynamic_rotate %269 by %c224_i32 dim 1 : vector<8x256xf32>, i32 -> vector<8x256xf32>
    %330 = vector.broadcast %328 : vector<1x256xf32> to vector<8x256xf32>
    %331 = arith.mulf %329, %330 : vector<8x256xf32>
    %c7_201 = arith.constant 7 : index
    %c0_202 = arith.constant 0 : index
    %c0_203 = arith.constant 0 : index
    %332 = vector.load %arg11[%c7_201, %c0_202, %c0_203] : memref<9x16x8xbf16, #tpu.memory_space<vmem>>, vector<1x16x8xbf16>
    %333 = vector.shape_cast %332 : vector<1x16x8xbf16> to vector<16x8xbf16>
    %334 = arith.truncf %331 : vector<8x256xf32> to vector<8x256xbf16>
    %cst_204 = arith.constant dense<0.000000e+00> : vector<16x256xf32>
    %335 = tpu.matmul %333, %334, %cst_204 {dimension_numbers = #tpu.dot_dimension_numbers<[1], [0], [0], [1], [0, 0, 1, 1], [], []>} : vector<16x8xbf16>, vector<8x256xbf16>, vector<16x256xf32> -> vector<16x256xf32>
    %336 = arith.addf %327, %335 : vector<16x256xf32>
    %c8_205 = arith.constant 8 : index
    %c0_206 = arith.constant 0 : index
    %337 = vector.load %arg4[%c8_205, %c0_206] : memref<9x256xf32, #tpu.memory_space<vmem>>, vector<1x256xf32>
    %c222_i32 = arith.constant 222 : i32
    %338 = tpu.dynamic_rotate %269 by %c222_i32 dim 1 : vector<8x256xf32>, i32 -> vector<8x256xf32>
    %339 = vector.broadcast %337 : vector<1x256xf32> to vector<8x256xf32>
    %340 = arith.mulf %338, %339 : vector<8x256xf32>
    %c8_207 = arith.constant 8 : index
    %c0_208 = arith.constant 0 : index
    %c0_209 = arith.constant 0 : index
    %341 = vector.load %arg11[%c8_207, %c0_208, %c0_209] : memref<9x16x8xbf16, #tpu.memory_space<vmem>>, vector<1x16x8xbf16>
    %342 = vector.shape_cast %341 : vector<1x16x8xbf16> to vector<16x8xbf16>
    %343 = arith.truncf %340 : vector<8x256xf32> to vector<8x256xbf16>
    %cst_210 = arith.constant dense<0.000000e+00> : vector<16x256xf32>
    %344 = tpu.matmul %342, %343, %cst_210 {dimension_numbers = #tpu.dot_dimension_numbers<[1], [0], [0], [1], [0, 0, 1, 1], [], []>} : vector<16x8xbf16>, vector<8x256xbf16>, vector<16x256xf32> -> vector<16x256xf32>
    %345 = arith.addf %336, %344 : vector<16x256xf32>
    %c0_211 = arith.constant 0 : index
    %c0_212 = arith.constant 0 : index
    %346 = vector.load %arg12[%c0_211, %c0_212] : memref<16x1xf32, #tpu.memory_space<vmem>>, vector<16x1xf32>
    %347 = vector.broadcast %346 : vector<16x1xf32> to vector<16x256xf32>
    %348 = arith.addf %345, %347 : vector<16x256xf32>
    %cst_213 = arith.constant 0.000000e+00 : f32
    %349 = vector.broadcast %cst_213 : f32 to vector<16x256xf32>
    %350 = arith.maximumf %348, %349 : vector<16x256xf32>
    %c0_214 = arith.constant 0 : index
    %c0_215 = arith.constant 0 : index
    %351 = vector.load %arg4[%c0_214, %c0_215] : memref<9x256xf32, #tpu.memory_space<vmem>>, vector<1x256xf32>
    %c34_i32_216 = arith.constant 34 : i32
    %352 = tpu.dynamic_rotate %350 by %c34_i32_216 dim 1 : vector<16x256xf32>, i32 -> vector<16x256xf32>
    %353 = vector.broadcast %351 : vector<1x256xf32> to vector<16x256xf32>
    %354 = arith.mulf %352, %353 : vector<16x256xf32>
    %c0_217 = arith.constant 0 : index
    %c0_218 = arith.constant 0 : index
    %c0_219 = arith.constant 0 : index
    %355 = vector.load %arg13[%c0_217, %c0_218, %c0_219] : memref<9x16x16xbf16, #tpu.memory_space<vmem>>, vector<1x16x16xbf16>
    %356 = vector.shape_cast %355 : vector<1x16x16xbf16> to vector<16x16xbf16>
    %357 = arith.truncf %354 : vector<16x256xf32> to vector<16x256xbf16>
    %cst_220 = arith.constant dense<0.000000e+00> : vector<16x256xf32>
    %358 = tpu.matmul %356, %357, %cst_220 {dimension_numbers = #tpu.dot_dimension_numbers<[1], [0], [0], [1], [0, 0, 1, 1], [], []>} : vector<16x16xbf16>, vector<16x256xbf16>, vector<16x256xf32> -> vector<16x256xf32>
    %c1_221 = arith.constant 1 : index
    %c0_222 = arith.constant 0 : index
    %359 = vector.load %arg4[%c1_221, %c0_222] : memref<9x256xf32, #tpu.memory_space<vmem>>, vector<1x256xf32>
    %c32_i32_223 = arith.constant 32 : i32
    %360 = tpu.dynamic_rotate %350 by %c32_i32_223 dim 1 : vector<16x256xf32>, i32 -> vector<16x256xf32>
    %361 = vector.broadcast %359 : vector<1x256xf32> to vector<16x256xf32>
    %362 = arith.mulf %360, %361 : vector<16x256xf32>
    %c1_224 = arith.constant 1 : index
    %c0_225 = arith.constant 0 : index
    %c0_226 = arith.constant 0 : index
    %363 = vector.load %arg13[%c1_224, %c0_225, %c0_226] : memref<9x16x16xbf16, #tpu.memory_space<vmem>>, vector<1x16x16xbf16>
    %364 = vector.shape_cast %363 : vector<1x16x16xbf16> to vector<16x16xbf16>
    %365 = arith.truncf %362 : vector<16x256xf32> to vector<16x256xbf16>
    %cst_227 = arith.constant dense<0.000000e+00> : vector<16x256xf32>
    %366 = tpu.matmul %364, %365, %cst_227 {dimension_numbers = #tpu.dot_dimension_numbers<[1], [0], [0], [1], [0, 0, 1, 1], [], []>} : vector<16x16xbf16>, vector<16x256xbf16>, vector<16x256xf32> -> vector<16x256xf32>
    %367 = arith.addf %358, %366 : vector<16x256xf32>
    %c2_228 = arith.constant 2 : index
    %c0_229 = arith.constant 0 : index
    %368 = vector.load %arg4[%c2_228, %c0_229] : memref<9x256xf32, #tpu.memory_space<vmem>>, vector<1x256xf32>
    %c30_i32_230 = arith.constant 30 : i32
    %369 = tpu.dynamic_rotate %350 by %c30_i32_230 dim 1 : vector<16x256xf32>, i32 -> vector<16x256xf32>
    %370 = vector.broadcast %368 : vector<1x256xf32> to vector<16x256xf32>
    %371 = arith.mulf %369, %370 : vector<16x256xf32>
    %c2_231 = arith.constant 2 : index
    %c0_232 = arith.constant 0 : index
    %c0_233 = arith.constant 0 : index
    %372 = vector.load %arg13[%c2_231, %c0_232, %c0_233] : memref<9x16x16xbf16, #tpu.memory_space<vmem>>, vector<1x16x16xbf16>
    %373 = vector.shape_cast %372 : vector<1x16x16xbf16> to vector<16x16xbf16>
    %374 = arith.truncf %371 : vector<16x256xf32> to vector<16x256xbf16>
    %cst_234 = arith.constant dense<0.000000e+00> : vector<16x256xf32>
    %375 = tpu.matmul %373, %374, %cst_234 {dimension_numbers = #tpu.dot_dimension_numbers<[1], [0], [0], [1], [0, 0, 1, 1], [], []>} : vector<16x16xbf16>, vector<16x256xbf16>, vector<16x256xf32> -> vector<16x256xf32>
    %376 = arith.addf %367, %375 : vector<16x256xf32>
    %c3_235 = arith.constant 3 : index
    %c0_236 = arith.constant 0 : index
    %377 = vector.load %arg4[%c3_235, %c0_236] : memref<9x256xf32, #tpu.memory_space<vmem>>, vector<1x256xf32>
    %c2_i32_237 = arith.constant 2 : i32
    %378 = tpu.dynamic_rotate %350 by %c2_i32_237 dim 1 : vector<16x256xf32>, i32 -> vector<16x256xf32>
    %379 = vector.broadcast %377 : vector<1x256xf32> to vector<16x256xf32>
    %380 = arith.mulf %378, %379 : vector<16x256xf32>
    %c3_238 = arith.constant 3 : index
    %c0_239 = arith.constant 0 : index
    %c0_240 = arith.constant 0 : index
    %381 = vector.load %arg13[%c3_238, %c0_239, %c0_240] : memref<9x16x16xbf16, #tpu.memory_space<vmem>>, vector<1x16x16xbf16>
    %382 = vector.shape_cast %381 : vector<1x16x16xbf16> to vector<16x16xbf16>
    %383 = arith.truncf %380 : vector<16x256xf32> to vector<16x256xbf16>
    %cst_241 = arith.constant dense<0.000000e+00> : vector<16x256xf32>
    %384 = tpu.matmul %382, %383, %cst_241 {dimension_numbers = #tpu.dot_dimension_numbers<[1], [0], [0], [1], [0, 0, 1, 1], [], []>} : vector<16x16xbf16>, vector<16x256xbf16>, vector<16x256xf32> -> vector<16x256xf32>
    %385 = arith.addf %376, %384 : vector<16x256xf32>
    %c4_242 = arith.constant 4 : index
    %c0_243 = arith.constant 0 : index
    %c0_244 = arith.constant 0 : index
    %386 = vector.load %arg13[%c4_242, %c0_243, %c0_244] : memref<9x16x16xbf16, #tpu.memory_space<vmem>>, vector<1x16x16xbf16>
    %387 = vector.shape_cast %386 : vector<1x16x16xbf16> to vector<16x16xbf16>
    %388 = arith.truncf %350 : vector<16x256xf32> to vector<16x256xbf16>
    %cst_245 = arith.constant dense<0.000000e+00> : vector<16x256xf32>
    %389 = tpu.matmul %387, %388, %cst_245 {dimension_numbers = #tpu.dot_dimension_numbers<[1], [0], [0], [1], [0, 0, 1, 1], [], []>} : vector<16x16xbf16>, vector<16x256xbf16>, vector<16x256xf32> -> vector<16x256xf32>
    %390 = arith.addf %385, %389 : vector<16x256xf32>
    %c5_246 = arith.constant 5 : index
    %c0_247 = arith.constant 0 : index
    %391 = vector.load %arg4[%c5_246, %c0_247] : memref<9x256xf32, #tpu.memory_space<vmem>>, vector<1x256xf32>
    %c254_i32_248 = arith.constant 254 : i32
    %392 = tpu.dynamic_rotate %350 by %c254_i32_248 dim 1 : vector<16x256xf32>, i32 -> vector<16x256xf32>
    %393 = vector.broadcast %391 : vector<1x256xf32> to vector<16x256xf32>
    %394 = arith.mulf %392, %393 : vector<16x256xf32>
    %c5_249 = arith.constant 5 : index
    %c0_250 = arith.constant 0 : index
    %c0_251 = arith.constant 0 : index
    %395 = vector.load %arg13[%c5_249, %c0_250, %c0_251] : memref<9x16x16xbf16, #tpu.memory_space<vmem>>, vector<1x16x16xbf16>
    %396 = vector.shape_cast %395 : vector<1x16x16xbf16> to vector<16x16xbf16>
    %397 = arith.truncf %394 : vector<16x256xf32> to vector<16x256xbf16>
    %cst_252 = arith.constant dense<0.000000e+00> : vector<16x256xf32>
    %398 = tpu.matmul %396, %397, %cst_252 {dimension_numbers = #tpu.dot_dimension_numbers<[1], [0], [0], [1], [0, 0, 1, 1], [], []>} : vector<16x16xbf16>, vector<16x256xbf16>, vector<16x256xf32> -> vector<16x256xf32>
    %399 = arith.addf %390, %398 : vector<16x256xf32>
    %c6_253 = arith.constant 6 : index
    %c0_254 = arith.constant 0 : index
    %400 = vector.load %arg4[%c6_253, %c0_254] : memref<9x256xf32, #tpu.memory_space<vmem>>, vector<1x256xf32>
    %c226_i32_255 = arith.constant 226 : i32
    %401 = tpu.dynamic_rotate %350 by %c226_i32_255 dim 1 : vector<16x256xf32>, i32 -> vector<16x256xf32>
    %402 = vector.broadcast %400 : vector<1x256xf32> to vector<16x256xf32>
    %403 = arith.mulf %401, %402 : vector<16x256xf32>
    %c6_256 = arith.constant 6 : index
    %c0_257 = arith.constant 0 : index
    %c0_258 = arith.constant 0 : index
    %404 = vector.load %arg13[%c6_256, %c0_257, %c0_258] : memref<9x16x16xbf16, #tpu.memory_space<vmem>>, vector<1x16x16xbf16>
    %405 = vector.shape_cast %404 : vector<1x16x16xbf16> to vector<16x16xbf16>
    %406 = arith.truncf %403 : vector<16x256xf32> to vector<16x256xbf16>
    %cst_259 = arith.constant dense<0.000000e+00> : vector<16x256xf32>
    %407 = tpu.matmul %405, %406, %cst_259 {dimension_numbers = #tpu.dot_dimension_numbers<[1], [0], [0], [1], [0, 0, 1, 1], [], []>} : vector<16x16xbf16>, vector<16x256xbf16>, vector<16x256xf32> -> vector<16x256xf32>
    %408 = arith.addf %399, %407 : vector<16x256xf32>
    %c7_260 = arith.constant 7 : index
    %c0_261 = arith.constant 0 : index
    %409 = vector.load %arg4[%c7_260, %c0_261] : memref<9x256xf32, #tpu.memory_space<vmem>>, vector<1x256xf32>
    %c224_i32_262 = arith.constant 224 : i32
    %410 = tpu.dynamic_rotate %350 by %c224_i32_262 dim 1 : vector<16x256xf32>, i32 -> vector<16x256xf32>
    %411 = vector.broadcast %409 : vector<1x256xf32> to vector<16x256xf32>
    %412 = arith.mulf %410, %411 : vector<16x256xf32>
    %c7_263 = arith.constant 7 : index
    %c0_264 = arith.constant 0 : index
    %c0_265 = arith.constant 0 : index
    %413 = vector.load %arg13[%c7_263, %c0_264, %c0_265] : memref<9x16x16xbf16, #tpu.memory_space<vmem>>, vector<1x16x16xbf16>
    %414 = vector.shape_cast %413 : vector<1x16x16xbf16> to vector<16x16xbf16>
    %415 = arith.truncf %412 : vector<16x256xf32> to vector<16x256xbf16>
    %cst_266 = arith.constant dense<0.000000e+00> : vector<16x256xf32>
    %416 = tpu.matmul %414, %415, %cst_266 {dimension_numbers = #tpu.dot_dimension_numbers<[1], [0], [0], [1], [0, 0, 1, 1], [], []>} : vector<16x16xbf16>, vector<16x256xbf16>, vector<16x256xf32> -> vector<16x256xf32>
    %417 = arith.addf %408, %416 : vector<16x256xf32>
    %c8_267 = arith.constant 8 : index
    %c0_268 = arith.constant 0 : index
    %418 = vector.load %arg4[%c8_267, %c0_268] : memref<9x256xf32, #tpu.memory_space<vmem>>, vector<1x256xf32>
    %c222_i32_269 = arith.constant 222 : i32
    %419 = tpu.dynamic_rotate %350 by %c222_i32_269 dim 1 : vector<16x256xf32>, i32 -> vector<16x256xf32>
    %420 = vector.broadcast %418 : vector<1x256xf32> to vector<16x256xf32>
    %421 = arith.mulf %419, %420 : vector<16x256xf32>
    %c8_270 = arith.constant 8 : index
    %c0_271 = arith.constant 0 : index
    %c0_272 = arith.constant 0 : index
    %422 = vector.load %arg13[%c8_270, %c0_271, %c0_272] : memref<9x16x16xbf16, #tpu.memory_space<vmem>>, vector<1x16x16xbf16>
    %423 = vector.shape_cast %422 : vector<1x16x16xbf16> to vector<16x16xbf16>
    %424 = arith.truncf %421 : vector<16x256xf32> to vector<16x256xbf16>
    %cst_273 = arith.constant dense<0.000000e+00> : vector<16x256xf32>
    %425 = tpu.matmul %423, %424, %cst_273 {dimension_numbers = #tpu.dot_dimension_numbers<[1], [0], [0], [1], [0, 0, 1, 1], [], []>} : vector<16x16xbf16>, vector<16x256xbf16>, vector<16x256xf32> -> vector<16x256xf32>
    %426 = arith.addf %417, %425 : vector<16x256xf32>
    %c0_274 = arith.constant 0 : index
    %c0_275 = arith.constant 0 : index
    %427 = vector.load %arg14[%c0_274, %c0_275] : memref<16x1xf32, #tpu.memory_space<vmem>>, vector<16x1xf32>
    %428 = vector.broadcast %427 : vector<16x1xf32> to vector<16x256xf32>
    %429 = arith.addf %426, %428 : vector<16x256xf32>
    %cst_276 = arith.constant 0.000000e+00 : f32
    %430 = vector.broadcast %cst_276 : f32 to vector<16x256xf32>
    %431 = arith.maximumf %429, %430 : vector<16x256xf32>
    %c0_277 = arith.constant 0 : index
    %c0_278 = arith.constant 0 : index
    %432 = vector.load %arg5[%c0_277, %c0_278] : memref<2x256xf32, #tpu.memory_space<vmem>>, vector<1x256xf32>
    %c1_279 = arith.constant 1 : index
    %c0_280 = arith.constant 0 : index
    %433 = vector.load %arg5[%c1_279, %c0_280] : memref<2x256xf32, #tpu.memory_space<vmem>>, vector<1x256xf32>
    %c1_i32_281 = arith.constant 1 : i32
    %434 = tpu.dynamic_rotate %431 by %c1_i32_281 dim 1 : vector<16x256xf32>, i32 -> vector<16x256xf32>
    %435 = arith.subf %434, %431 : vector<16x256xf32>
    %436 = vector.broadcast %432 : vector<1x256xf32> to vector<16x256xf32>
    %437 = arith.mulf %436, %435 : vector<16x256xf32>
    %438 = arith.addf %431, %437 : vector<16x256xf32>
    %c16_i32_282 = arith.constant 16 : i32
    %439 = tpu.dynamic_rotate %438 by %c16_i32_282 dim 1 : vector<16x256xf32>, i32 -> vector<16x256xf32>
    %440 = arith.subf %439, %438 : vector<16x256xf32>
    %441 = vector.broadcast %433 : vector<1x256xf32> to vector<16x256xf32>
    %442 = arith.mulf %441, %440 : vector<16x256xf32>
    %443 = arith.addf %438, %442 : vector<16x256xf32>
    %c0_283 = arith.constant 0 : index
    %c0_284 = arith.constant 0 : index
    %444 = vector.load %arg25[%c0_283, %c0_284] : memref<8x256xf32, #tpu.memory_space<vmem>>, vector<8x256xf32>
    %c0_285 = arith.constant 0 : index
    %c0_286 = arith.constant 0 : index
    %445 = vector.load %arg3[%c0_285, %c0_286] : memref<9x256xf32, #tpu.memory_space<vmem>>, vector<1x256xf32>
    %c17_i32_287 = arith.constant 17 : i32
    %446 = tpu.dynamic_rotate %443 by %c17_i32_287 dim 1 : vector<16x256xf32>, i32 -> vector<16x256xf32>
    %447 = vector.broadcast %445 : vector<1x256xf32> to vector<16x256xf32>
    %448 = arith.mulf %446, %447 : vector<16x256xf32>
    %c0_288 = arith.constant 0 : index
    %c0_289 = arith.constant 0 : index
    %c0_290 = arith.constant 0 : index
    %449 = vector.load %arg15[%c0_288, %c0_289, %c0_290] : memref<9x8x16xbf16, #tpu.memory_space<vmem>>, vector<1x8x16xbf16>
    %450 = vector.shape_cast %449 : vector<1x8x16xbf16> to vector<8x16xbf16>
    %451 = arith.truncf %448 : vector<16x256xf32> to vector<16x256xbf16>
    %cst_291 = arith.constant dense<0.000000e+00> : vector<8x256xf32>
    %452 = tpu.matmul %450, %451, %cst_291 {dimension_numbers = #tpu.dot_dimension_numbers<[1], [0], [0], [1], [0, 0, 1, 1], [], []>} : vector<8x16xbf16>, vector<16x256xbf16>, vector<8x256xf32> -> vector<8x256xf32>
    %c17_i32_292 = arith.constant 17 : i32
    %453 = tpu.dynamic_rotate %444 by %c17_i32_292 dim 1 : vector<8x256xf32>, i32 -> vector<8x256xf32>
    %454 = vector.broadcast %445 : vector<1x256xf32> to vector<8x256xf32>
    %455 = arith.mulf %453, %454 : vector<8x256xf32>
    %c0_293 = arith.constant 0 : index
    %c0_294 = arith.constant 0 : index
    %c0_295 = arith.constant 0 : index
    %456 = vector.load %arg16[%c0_293, %c0_294, %c0_295] : memref<9x8x8xbf16, #tpu.memory_space<vmem>>, vector<1x8x8xbf16>
    %457 = vector.shape_cast %456 : vector<1x8x8xbf16> to vector<8x8xbf16>
    %458 = arith.truncf %455 : vector<8x256xf32> to vector<8x256xbf16>
    %cst_296 = arith.constant dense<0.000000e+00> : vector<8x256xf32>
    %459 = tpu.matmul %457, %458, %cst_296 {dimension_numbers = #tpu.dot_dimension_numbers<[1], [0], [0], [1], [0, 0, 1, 1], [], []>} : vector<8x8xbf16>, vector<8x256xbf16>, vector<8x256xf32> -> vector<8x256xf32>
    %460 = arith.addf %452, %459 : vector<8x256xf32>
    %c1_297 = arith.constant 1 : index
    %c0_298 = arith.constant 0 : index
    %461 = vector.load %arg3[%c1_297, %c0_298] : memref<9x256xf32, #tpu.memory_space<vmem>>, vector<1x256xf32>
    %c16_i32_299 = arith.constant 16 : i32
    %462 = tpu.dynamic_rotate %443 by %c16_i32_299 dim 1 : vector<16x256xf32>, i32 -> vector<16x256xf32>
    %463 = vector.broadcast %461 : vector<1x256xf32> to vector<16x256xf32>
    %464 = arith.mulf %462, %463 : vector<16x256xf32>
    %c1_300 = arith.constant 1 : index
    %c0_301 = arith.constant 0 : index
    %c0_302 = arith.constant 0 : index
    %465 = vector.load %arg15[%c1_300, %c0_301, %c0_302] : memref<9x8x16xbf16, #tpu.memory_space<vmem>>, vector<1x8x16xbf16>
    %466 = vector.shape_cast %465 : vector<1x8x16xbf16> to vector<8x16xbf16>
    %467 = arith.truncf %464 : vector<16x256xf32> to vector<16x256xbf16>
    %cst_303 = arith.constant dense<0.000000e+00> : vector<8x256xf32>
    %468 = tpu.matmul %466, %467, %cst_303 {dimension_numbers = #tpu.dot_dimension_numbers<[1], [0], [0], [1], [0, 0, 1, 1], [], []>} : vector<8x16xbf16>, vector<16x256xbf16>, vector<8x256xf32> -> vector<8x256xf32>
    %469 = arith.addf %460, %468 : vector<8x256xf32>
    %c16_i32_304 = arith.constant 16 : i32
    %470 = tpu.dynamic_rotate %444 by %c16_i32_304 dim 1 : vector<8x256xf32>, i32 -> vector<8x256xf32>
    %471 = vector.broadcast %461 : vector<1x256xf32> to vector<8x256xf32>
    %472 = arith.mulf %470, %471 : vector<8x256xf32>
    %c1_305 = arith.constant 1 : index
    %c0_306 = arith.constant 0 : index
    %c0_307 = arith.constant 0 : index
    %473 = vector.load %arg16[%c1_305, %c0_306, %c0_307] : memref<9x8x8xbf16, #tpu.memory_space<vmem>>, vector<1x8x8xbf16>
    %474 = vector.shape_cast %473 : vector<1x8x8xbf16> to vector<8x8xbf16>
    %475 = arith.truncf %472 : vector<8x256xf32> to vector<8x256xbf16>
    %cst_308 = arith.constant dense<0.000000e+00> : vector<8x256xf32>
    %476 = tpu.matmul %474, %475, %cst_308 {dimension_numbers = #tpu.dot_dimension_numbers<[1], [0], [0], [1], [0, 0, 1, 1], [], []>} : vector<8x8xbf16>, vector<8x256xbf16>, vector<8x256xf32> -> vector<8x256xf32>
    %477 = arith.addf %469, %476 : vector<8x256xf32>
    %c2_309 = arith.constant 2 : index
    %c0_310 = arith.constant 0 : index
    %478 = vector.load %arg3[%c2_309, %c0_310] : memref<9x256xf32, #tpu.memory_space<vmem>>, vector<1x256xf32>
    %c15_i32_311 = arith.constant 15 : i32
    %479 = tpu.dynamic_rotate %443 by %c15_i32_311 dim 1 : vector<16x256xf32>, i32 -> vector<16x256xf32>
    %480 = vector.broadcast %478 : vector<1x256xf32> to vector<16x256xf32>
    %481 = arith.mulf %479, %480 : vector<16x256xf32>
    %c2_312 = arith.constant 2 : index
    %c0_313 = arith.constant 0 : index
    %c0_314 = arith.constant 0 : index
    %482 = vector.load %arg15[%c2_312, %c0_313, %c0_314] : memref<9x8x16xbf16, #tpu.memory_space<vmem>>, vector<1x8x16xbf16>
    %483 = vector.shape_cast %482 : vector<1x8x16xbf16> to vector<8x16xbf16>
    %484 = arith.truncf %481 : vector<16x256xf32> to vector<16x256xbf16>
    %cst_315 = arith.constant dense<0.000000e+00> : vector<8x256xf32>
    %485 = tpu.matmul %483, %484, %cst_315 {dimension_numbers = #tpu.dot_dimension_numbers<[1], [0], [0], [1], [0, 0, 1, 1], [], []>} : vector<8x16xbf16>, vector<16x256xbf16>, vector<8x256xf32> -> vector<8x256xf32>
    %486 = arith.addf %477, %485 : vector<8x256xf32>
    %c15_i32_316 = arith.constant 15 : i32
    %487 = tpu.dynamic_rotate %444 by %c15_i32_316 dim 1 : vector<8x256xf32>, i32 -> vector<8x256xf32>
    %488 = vector.broadcast %478 : vector<1x256xf32> to vector<8x256xf32>
    %489 = arith.mulf %487, %488 : vector<8x256xf32>
    %c2_317 = arith.constant 2 : index
    %c0_318 = arith.constant 0 : index
    %c0_319 = arith.constant 0 : index
    %490 = vector.load %arg16[%c2_317, %c0_318, %c0_319] : memref<9x8x8xbf16, #tpu.memory_space<vmem>>, vector<1x8x8xbf16>
    %491 = vector.shape_cast %490 : vector<1x8x8xbf16> to vector<8x8xbf16>
    %492 = arith.truncf %489 : vector<8x256xf32> to vector<8x256xbf16>
    %cst_320 = arith.constant dense<0.000000e+00> : vector<8x256xf32>
    %493 = tpu.matmul %491, %492, %cst_320 {dimension_numbers = #tpu.dot_dimension_numbers<[1], [0], [0], [1], [0, 0, 1, 1], [], []>} : vector<8x8xbf16>, vector<8x256xbf16>, vector<8x256xf32> -> vector<8x256xf32>
    %494 = arith.addf %486, %493 : vector<8x256xf32>
    %c3_321 = arith.constant 3 : index
    %c0_322 = arith.constant 0 : index
    %495 = vector.load %arg3[%c3_321, %c0_322] : memref<9x256xf32, #tpu.memory_space<vmem>>, vector<1x256xf32>
    %c1_i32_323 = arith.constant 1 : i32
    %496 = tpu.dynamic_rotate %443 by %c1_i32_323 dim 1 : vector<16x256xf32>, i32 -> vector<16x256xf32>
    %497 = vector.broadcast %495 : vector<1x256xf32> to vector<16x256xf32>
    %498 = arith.mulf %496, %497 : vector<16x256xf32>
    %c3_324 = arith.constant 3 : index
    %c0_325 = arith.constant 0 : index
    %c0_326 = arith.constant 0 : index
    %499 = vector.load %arg15[%c3_324, %c0_325, %c0_326] : memref<9x8x16xbf16, #tpu.memory_space<vmem>>, vector<1x8x16xbf16>
    %500 = vector.shape_cast %499 : vector<1x8x16xbf16> to vector<8x16xbf16>
    %501 = arith.truncf %498 : vector<16x256xf32> to vector<16x256xbf16>
    %cst_327 = arith.constant dense<0.000000e+00> : vector<8x256xf32>
    %502 = tpu.matmul %500, %501, %cst_327 {dimension_numbers = #tpu.dot_dimension_numbers<[1], [0], [0], [1], [0, 0, 1, 1], [], []>} : vector<8x16xbf16>, vector<16x256xbf16>, vector<8x256xf32> -> vector<8x256xf32>
    %503 = arith.addf %494, %502 : vector<8x256xf32>
    %c1_i32_328 = arith.constant 1 : i32
    %504 = tpu.dynamic_rotate %444 by %c1_i32_328 dim 1 : vector<8x256xf32>, i32 -> vector<8x256xf32>
    %505 = vector.broadcast %495 : vector<1x256xf32> to vector<8x256xf32>
    %506 = arith.mulf %504, %505 : vector<8x256xf32>
    %c3_329 = arith.constant 3 : index
    %c0_330 = arith.constant 0 : index
    %c0_331 = arith.constant 0 : index
    %507 = vector.load %arg16[%c3_329, %c0_330, %c0_331] : memref<9x8x8xbf16, #tpu.memory_space<vmem>>, vector<1x8x8xbf16>
    %508 = vector.shape_cast %507 : vector<1x8x8xbf16> to vector<8x8xbf16>
    %509 = arith.truncf %506 : vector<8x256xf32> to vector<8x256xbf16>
    %cst_332 = arith.constant dense<0.000000e+00> : vector<8x256xf32>
    %510 = tpu.matmul %508, %509, %cst_332 {dimension_numbers = #tpu.dot_dimension_numbers<[1], [0], [0], [1], [0, 0, 1, 1], [], []>} : vector<8x8xbf16>, vector<8x256xbf16>, vector<8x256xf32> -> vector<8x256xf32>
    %511 = arith.addf %503, %510 : vector<8x256xf32>
    %c4_333 = arith.constant 4 : index
    %c0_334 = arith.constant 0 : index
    %c0_335 = arith.constant 0 : index
    %512 = vector.load %arg15[%c4_333, %c0_334, %c0_335] : memref<9x8x16xbf16, #tpu.memory_space<vmem>>, vector<1x8x16xbf16>
    %513 = vector.shape_cast %512 : vector<1x8x16xbf16> to vector<8x16xbf16>
    %514 = arith.truncf %443 : vector<16x256xf32> to vector<16x256xbf16>
    %cst_336 = arith.constant dense<0.000000e+00> : vector<8x256xf32>
    %515 = tpu.matmul %513, %514, %cst_336 {dimension_numbers = #tpu.dot_dimension_numbers<[1], [0], [0], [1], [0, 0, 1, 1], [], []>} : vector<8x16xbf16>, vector<16x256xbf16>, vector<8x256xf32> -> vector<8x256xf32>
    %516 = arith.addf %511, %515 : vector<8x256xf32>
    %c4_337 = arith.constant 4 : index
    %c0_338 = arith.constant 0 : index
    %c0_339 = arith.constant 0 : index
    %517 = vector.load %arg16[%c4_337, %c0_338, %c0_339] : memref<9x8x8xbf16, #tpu.memory_space<vmem>>, vector<1x8x8xbf16>
    %518 = vector.shape_cast %517 : vector<1x8x8xbf16> to vector<8x8xbf16>
    %519 = arith.truncf %444 : vector<8x256xf32> to vector<8x256xbf16>
    %cst_340 = arith.constant dense<0.000000e+00> : vector<8x256xf32>
    %520 = tpu.matmul %518, %519, %cst_340 {dimension_numbers = #tpu.dot_dimension_numbers<[1], [0], [0], [1], [0, 0, 1, 1], [], []>} : vector<8x8xbf16>, vector<8x256xbf16>, vector<8x256xf32> -> vector<8x256xf32>
    %521 = arith.addf %516, %520 : vector<8x256xf32>
    %c5_341 = arith.constant 5 : index
    %c0_342 = arith.constant 0 : index
    %522 = vector.load %arg3[%c5_341, %c0_342] : memref<9x256xf32, #tpu.memory_space<vmem>>, vector<1x256xf32>
    %c255_i32_343 = arith.constant 255 : i32
    %523 = tpu.dynamic_rotate %443 by %c255_i32_343 dim 1 : vector<16x256xf32>, i32 -> vector<16x256xf32>
    %524 = vector.broadcast %522 : vector<1x256xf32> to vector<16x256xf32>
    %525 = arith.mulf %523, %524 : vector<16x256xf32>
    %c5_344 = arith.constant 5 : index
    %c0_345 = arith.constant 0 : index
    %c0_346 = arith.constant 0 : index
    %526 = vector.load %arg15[%c5_344, %c0_345, %c0_346] : memref<9x8x16xbf16, #tpu.memory_space<vmem>>, vector<1x8x16xbf16>
    %527 = vector.shape_cast %526 : vector<1x8x16xbf16> to vector<8x16xbf16>
    %528 = arith.truncf %525 : vector<16x256xf32> to vector<16x256xbf16>
    %cst_347 = arith.constant dense<0.000000e+00> : vector<8x256xf32>
    %529 = tpu.matmul %527, %528, %cst_347 {dimension_numbers = #tpu.dot_dimension_numbers<[1], [0], [0], [1], [0, 0, 1, 1], [], []>} : vector<8x16xbf16>, vector<16x256xbf16>, vector<8x256xf32> -> vector<8x256xf32>
    %530 = arith.addf %521, %529 : vector<8x256xf32>
    %c255_i32_348 = arith.constant 255 : i32
    %531 = tpu.dynamic_rotate %444 by %c255_i32_348 dim 1 : vector<8x256xf32>, i32 -> vector<8x256xf32>
    %532 = vector.broadcast %522 : vector<1x256xf32> to vector<8x256xf32>
    %533 = arith.mulf %531, %532 : vector<8x256xf32>
    %c5_349 = arith.constant 5 : index
    %c0_350 = arith.constant 0 : index
    %c0_351 = arith.constant 0 : index
    %534 = vector.load %arg16[%c5_349, %c0_350, %c0_351] : memref<9x8x8xbf16, #tpu.memory_space<vmem>>, vector<1x8x8xbf16>
    %535 = vector.shape_cast %534 : vector<1x8x8xbf16> to vector<8x8xbf16>
    %536 = arith.truncf %533 : vector<8x256xf32> to vector<8x256xbf16>
    %cst_352 = arith.constant dense<0.000000e+00> : vector<8x256xf32>
    %537 = tpu.matmul %535, %536, %cst_352 {dimension_numbers = #tpu.dot_dimension_numbers<[1], [0], [0], [1], [0, 0, 1, 1], [], []>} : vector<8x8xbf16>, vector<8x256xbf16>, vector<8x256xf32> -> vector<8x256xf32>
    %538 = arith.addf %530, %537 : vector<8x256xf32>
    %c6_353 = arith.constant 6 : index
    %c0_354 = arith.constant 0 : index
    %539 = vector.load %arg3[%c6_353, %c0_354] : memref<9x256xf32, #tpu.memory_space<vmem>>, vector<1x256xf32>
    %c241_i32_355 = arith.constant 241 : i32
    %540 = tpu.dynamic_rotate %443 by %c241_i32_355 dim 1 : vector<16x256xf32>, i32 -> vector<16x256xf32>
    %541 = vector.broadcast %539 : vector<1x256xf32> to vector<16x256xf32>
    %542 = arith.mulf %540, %541 : vector<16x256xf32>
    %c6_356 = arith.constant 6 : index
    %c0_357 = arith.constant 0 : index
    %c0_358 = arith.constant 0 : index
    %543 = vector.load %arg15[%c6_356, %c0_357, %c0_358] : memref<9x8x16xbf16, #tpu.memory_space<vmem>>, vector<1x8x16xbf16>
    %544 = vector.shape_cast %543 : vector<1x8x16xbf16> to vector<8x16xbf16>
    %545 = arith.truncf %542 : vector<16x256xf32> to vector<16x256xbf16>
    %cst_359 = arith.constant dense<0.000000e+00> : vector<8x256xf32>
    %546 = tpu.matmul %544, %545, %cst_359 {dimension_numbers = #tpu.dot_dimension_numbers<[1], [0], [0], [1], [0, 0, 1, 1], [], []>} : vector<8x16xbf16>, vector<16x256xbf16>, vector<8x256xf32> -> vector<8x256xf32>
    %547 = arith.addf %538, %546 : vector<8x256xf32>
    %c241_i32_360 = arith.constant 241 : i32
    %548 = tpu.dynamic_rotate %444 by %c241_i32_360 dim 1 : vector<8x256xf32>, i32 -> vector<8x256xf32>
    %549 = vector.broadcast %539 : vector<1x256xf32> to vector<8x256xf32>
    %550 = arith.mulf %548, %549 : vector<8x256xf32>
    %c6_361 = arith.constant 6 : index
    %c0_362 = arith.constant 0 : index
    %c0_363 = arith.constant 0 : index
    %551 = vector.load %arg16[%c6_361, %c0_362, %c0_363] : memref<9x8x8xbf16, #tpu.memory_space<vmem>>, vector<1x8x8xbf16>
    %552 = vector.shape_cast %551 : vector<1x8x8xbf16> to vector<8x8xbf16>
    %553 = arith.truncf %550 : vector<8x256xf32> to vector<8x256xbf16>
    %cst_364 = arith.constant dense<0.000000e+00> : vector<8x256xf32>
    %554 = tpu.matmul %552, %553, %cst_364 {dimension_numbers = #tpu.dot_dimension_numbers<[1], [0], [0], [1], [0, 0, 1, 1], [], []>} : vector<8x8xbf16>, vector<8x256xbf16>, vector<8x256xf32> -> vector<8x256xf32>
    %555 = arith.addf %547, %554 : vector<8x256xf32>
    %c7_365 = arith.constant 7 : index
    %c0_366 = arith.constant 0 : index
    %556 = vector.load %arg3[%c7_365, %c0_366] : memref<9x256xf32, #tpu.memory_space<vmem>>, vector<1x256xf32>
    %c240_i32_367 = arith.constant 240 : i32
    %557 = tpu.dynamic_rotate %443 by %c240_i32_367 dim 1 : vector<16x256xf32>, i32 -> vector<16x256xf32>
    %558 = vector.broadcast %556 : vector<1x256xf32> to vector<16x256xf32>
    %559 = arith.mulf %557, %558 : vector<16x256xf32>
    %c7_368 = arith.constant 7 : index
    %c0_369 = arith.constant 0 : index
    %c0_370 = arith.constant 0 : index
    %560 = vector.load %arg15[%c7_368, %c0_369, %c0_370] : memref<9x8x16xbf16, #tpu.memory_space<vmem>>, vector<1x8x16xbf16>
    %561 = vector.shape_cast %560 : vector<1x8x16xbf16> to vector<8x16xbf16>
    %562 = arith.truncf %559 : vector<16x256xf32> to vector<16x256xbf16>
    %cst_371 = arith.constant dense<0.000000e+00> : vector<8x256xf32>
    %563 = tpu.matmul %561, %562, %cst_371 {dimension_numbers = #tpu.dot_dimension_numbers<[1], [0], [0], [1], [0, 0, 1, 1], [], []>} : vector<8x16xbf16>, vector<16x256xbf16>, vector<8x256xf32> -> vector<8x256xf32>
    %564 = arith.addf %555, %563 : vector<8x256xf32>
    %c240_i32_372 = arith.constant 240 : i32
    %565 = tpu.dynamic_rotate %444 by %c240_i32_372 dim 1 : vector<8x256xf32>, i32 -> vector<8x256xf32>
    %566 = vector.broadcast %556 : vector<1x256xf32> to vector<8x256xf32>
    %567 = arith.mulf %565, %566 : vector<8x256xf32>
    %c7_373 = arith.constant 7 : index
    %c0_374 = arith.constant 0 : index
    %c0_375 = arith.constant 0 : index
    %568 = vector.load %arg16[%c7_373, %c0_374, %c0_375] : memref<9x8x8xbf16, #tpu.memory_space<vmem>>, vector<1x8x8xbf16>
    %569 = vector.shape_cast %568 : vector<1x8x8xbf16> to vector<8x8xbf16>
    %570 = arith.truncf %567 : vector<8x256xf32> to vector<8x256xbf16>
    %cst_376 = arith.constant dense<0.000000e+00> : vector<8x256xf32>
    %571 = tpu.matmul %569, %570, %cst_376 {dimension_numbers = #tpu.dot_dimension_numbers<[1], [0], [0], [1], [0, 0, 1, 1], [], []>} : vector<8x8xbf16>, vector<8x256xbf16>, vector<8x256xf32> -> vector<8x256xf32>
    %572 = arith.addf %564, %571 : vector<8x256xf32>
    %c8_377 = arith.constant 8 : index
    %c0_378 = arith.constant 0 : index
    %573 = vector.load %arg3[%c8_377, %c0_378] : memref<9x256xf32, #tpu.memory_space<vmem>>, vector<1x256xf32>
    %c239_i32_379 = arith.constant 239 : i32
    %574 = tpu.dynamic_rotate %443 by %c239_i32_379 dim 1 : vector<16x256xf32>, i32 -> vector<16x256xf32>
    %575 = vector.broadcast %573 : vector<1x256xf32> to vector<16x256xf32>
    %576 = arith.mulf %574, %575 : vector<16x256xf32>
    %c8_380 = arith.constant 8 : index
    %c0_381 = arith.constant 0 : index
    %c0_382 = arith.constant 0 : index
    %577 = vector.load %arg15[%c8_380, %c0_381, %c0_382] : memref<9x8x16xbf16, #tpu.memory_space<vmem>>, vector<1x8x16xbf16>
    %578 = vector.shape_cast %577 : vector<1x8x16xbf16> to vector<8x16xbf16>
    %579 = arith.truncf %576 : vector<16x256xf32> to vector<16x256xbf16>
    %cst_383 = arith.constant dense<0.000000e+00> : vector<8x256xf32>
    %580 = tpu.matmul %578, %579, %cst_383 {dimension_numbers = #tpu.dot_dimension_numbers<[1], [0], [0], [1], [0, 0, 1, 1], [], []>} : vector<8x16xbf16>, vector<16x256xbf16>, vector<8x256xf32> -> vector<8x256xf32>
    %581 = arith.addf %572, %580 : vector<8x256xf32>
    %c239_i32_384 = arith.constant 239 : i32
    %582 = tpu.dynamic_rotate %444 by %c239_i32_384 dim 1 : vector<8x256xf32>, i32 -> vector<8x256xf32>
    %583 = vector.broadcast %573 : vector<1x256xf32> to vector<8x256xf32>
    %584 = arith.mulf %582, %583 : vector<8x256xf32>
    %c8_385 = arith.constant 8 : index
    %c0_386 = arith.constant 0 : index
    %c0_387 = arith.constant 0 : index
    %585 = vector.load %arg16[%c8_385, %c0_386, %c0_387] : memref<9x8x8xbf16, #tpu.memory_space<vmem>>, vector<1x8x8xbf16>
    %586 = vector.shape_cast %585 : vector<1x8x8xbf16> to vector<8x8xbf16>
    %587 = arith.truncf %584 : vector<8x256xf32> to vector<8x256xbf16>
    %cst_388 = arith.constant dense<0.000000e+00> : vector<8x256xf32>
    %588 = tpu.matmul %586, %587, %cst_388 {dimension_numbers = #tpu.dot_dimension_numbers<[1], [0], [0], [1], [0, 0, 1, 1], [], []>} : vector<8x8xbf16>, vector<8x256xbf16>, vector<8x256xf32> -> vector<8x256xf32>
    %589 = arith.addf %581, %588 : vector<8x256xf32>
    %c0_389 = arith.constant 0 : index
    %c0_390 = arith.constant 0 : index
    %590 = vector.load %arg17[%c0_389, %c0_390] : memref<8x1xf32, #tpu.memory_space<vmem>>, vector<8x1xf32>
    %591 = vector.broadcast %590 : vector<8x1xf32> to vector<8x256xf32>
    %592 = arith.addf %589, %591 : vector<8x256xf32>
    %cst_391 = arith.constant 0.000000e+00 : f32
    %593 = vector.broadcast %cst_391 : f32 to vector<8x256xf32>
    %594 = arith.maximumf %592, %593 : vector<8x256xf32>
    %c0_392 = arith.constant 0 : index
    %c0_393 = arith.constant 0 : index
    %595 = vector.load %arg3[%c0_392, %c0_393] : memref<9x256xf32, #tpu.memory_space<vmem>>, vector<1x256xf32>
    %c17_i32_394 = arith.constant 17 : i32
    %596 = tpu.dynamic_rotate %594 by %c17_i32_394 dim 1 : vector<8x256xf32>, i32 -> vector<8x256xf32>
    %597 = vector.broadcast %595 : vector<1x256xf32> to vector<8x256xf32>
    %598 = arith.mulf %596, %597 : vector<8x256xf32>
    %c0_395 = arith.constant 0 : index
    %c0_396 = arith.constant 0 : index
    %c0_397 = arith.constant 0 : index
    %599 = vector.load %arg18[%c0_395, %c0_396, %c0_397] : memref<9x8x8xbf16, #tpu.memory_space<vmem>>, vector<1x8x8xbf16>
    %600 = vector.shape_cast %599 : vector<1x8x8xbf16> to vector<8x8xbf16>
    %601 = arith.truncf %598 : vector<8x256xf32> to vector<8x256xbf16>
    %cst_398 = arith.constant dense<0.000000e+00> : vector<8x256xf32>
    %602 = tpu.matmul %600, %601, %cst_398 {dimension_numbers = #tpu.dot_dimension_numbers<[1], [0], [0], [1], [0, 0, 1, 1], [], []>} : vector<8x8xbf16>, vector<8x256xbf16>, vector<8x256xf32> -> vector<8x256xf32>
    %c1_399 = arith.constant 1 : index
    %c0_400 = arith.constant 0 : index
    %603 = vector.load %arg3[%c1_399, %c0_400] : memref<9x256xf32, #tpu.memory_space<vmem>>, vector<1x256xf32>
    %c16_i32_401 = arith.constant 16 : i32
    %604 = tpu.dynamic_rotate %594 by %c16_i32_401 dim 1 : vector<8x256xf32>, i32 -> vector<8x256xf32>
    %605 = vector.broadcast %603 : vector<1x256xf32> to vector<8x256xf32>
    %606 = arith.mulf %604, %605 : vector<8x256xf32>
    %c1_402 = arith.constant 1 : index
    %c0_403 = arith.constant 0 : index
    %c0_404 = arith.constant 0 : index
    %607 = vector.load %arg18[%c1_402, %c0_403, %c0_404] : memref<9x8x8xbf16, #tpu.memory_space<vmem>>, vector<1x8x8xbf16>
    %608 = vector.shape_cast %607 : vector<1x8x8xbf16> to vector<8x8xbf16>
    %609 = arith.truncf %606 : vector<8x256xf32> to vector<8x256xbf16>
    %cst_405 = arith.constant dense<0.000000e+00> : vector<8x256xf32>
    %610 = tpu.matmul %608, %609, %cst_405 {dimension_numbers = #tpu.dot_dimension_numbers<[1], [0], [0], [1], [0, 0, 1, 1], [], []>} : vector<8x8xbf16>, vector<8x256xbf16>, vector<8x256xf32> -> vector<8x256xf32>
    %611 = arith.addf %602, %610 : vector<8x256xf32>
    %c2_406 = arith.constant 2 : index
    %c0_407 = arith.constant 0 : index
    %612 = vector.load %arg3[%c2_406, %c0_407] : memref<9x256xf32, #tpu.memory_space<vmem>>, vector<1x256xf32>
    %c15_i32_408 = arith.constant 15 : i32
    %613 = tpu.dynamic_rotate %594 by %c15_i32_408 dim 1 : vector<8x256xf32>, i32 -> vector<8x256xf32>
    %614 = vector.broadcast %612 : vector<1x256xf32> to vector<8x256xf32>
    %615 = arith.mulf %613, %614 : vector<8x256xf32>
    %c2_409 = arith.constant 2 : index
    %c0_410 = arith.constant 0 : index
    %c0_411 = arith.constant 0 : index
    %616 = vector.load %arg18[%c2_409, %c0_410, %c0_411] : memref<9x8x8xbf16, #tpu.memory_space<vmem>>, vector<1x8x8xbf16>
    %617 = vector.shape_cast %616 : vector<1x8x8xbf16> to vector<8x8xbf16>
    %618 = arith.truncf %615 : vector<8x256xf32> to vector<8x256xbf16>
    %cst_412 = arith.constant dense<0.000000e+00> : vector<8x256xf32>
    %619 = tpu.matmul %617, %618, %cst_412 {dimension_numbers = #tpu.dot_dimension_numbers<[1], [0], [0], [1], [0, 0, 1, 1], [], []>} : vector<8x8xbf16>, vector<8x256xbf16>, vector<8x256xf32> -> vector<8x256xf32>
    %620 = arith.addf %611, %619 : vector<8x256xf32>
    %c3_413 = arith.constant 3 : index
    %c0_414 = arith.constant 0 : index
    %621 = vector.load %arg3[%c3_413, %c0_414] : memref<9x256xf32, #tpu.memory_space<vmem>>, vector<1x256xf32>
    %c1_i32_415 = arith.constant 1 : i32
    %622 = tpu.dynamic_rotate %594 by %c1_i32_415 dim 1 : vector<8x256xf32>, i32 -> vector<8x256xf32>
    %623 = vector.broadcast %621 : vector<1x256xf32> to vector<8x256xf32>
    %624 = arith.mulf %622, %623 : vector<8x256xf32>
    %c3_416 = arith.constant 3 : index
    %c0_417 = arith.constant 0 : index
    %c0_418 = arith.constant 0 : index
    %625 = vector.load %arg18[%c3_416, %c0_417, %c0_418] : memref<9x8x8xbf16, #tpu.memory_space<vmem>>, vector<1x8x8xbf16>
    %626 = vector.shape_cast %625 : vector<1x8x8xbf16> to vector<8x8xbf16>
    %627 = arith.truncf %624 : vector<8x256xf32> to vector<8x256xbf16>
    %cst_419 = arith.constant dense<0.000000e+00> : vector<8x256xf32>
    %628 = tpu.matmul %626, %627, %cst_419 {dimension_numbers = #tpu.dot_dimension_numbers<[1], [0], [0], [1], [0, 0, 1, 1], [], []>} : vector<8x8xbf16>, vector<8x256xbf16>, vector<8x256xf32> -> vector<8x256xf32>
    %629 = arith.addf %620, %628 : vector<8x256xf32>
    %c4_420 = arith.constant 4 : index
    %c0_421 = arith.constant 0 : index
    %c0_422 = arith.constant 0 : index
    %630 = vector.load %arg18[%c4_420, %c0_421, %c0_422] : memref<9x8x8xbf16, #tpu.memory_space<vmem>>, vector<1x8x8xbf16>
    %631 = vector.shape_cast %630 : vector<1x8x8xbf16> to vector<8x8xbf16>
    %632 = arith.truncf %594 : vector<8x256xf32> to vector<8x256xbf16>
    %cst_423 = arith.constant dense<0.000000e+00> : vector<8x256xf32>
    %633 = tpu.matmul %631, %632, %cst_423 {dimension_numbers = #tpu.dot_dimension_numbers<[1], [0], [0], [1], [0, 0, 1, 1], [], []>} : vector<8x8xbf16>, vector<8x256xbf16>, vector<8x256xf32> -> vector<8x256xf32>
    %634 = arith.addf %629, %633 : vector<8x256xf32>
    %c5_424 = arith.constant 5 : index
    %c0_425 = arith.constant 0 : index
    %635 = vector.load %arg3[%c5_424, %c0_425] : memref<9x256xf32, #tpu.memory_space<vmem>>, vector<1x256xf32>
    %c255_i32_426 = arith.constant 255 : i32
    %636 = tpu.dynamic_rotate %594 by %c255_i32_426 dim 1 : vector<8x256xf32>, i32 -> vector<8x256xf32>
    %637 = vector.broadcast %635 : vector<1x256xf32> to vector<8x256xf32>
    %638 = arith.mulf %636, %637 : vector<8x256xf32>
    %c5_427 = arith.constant 5 : index
    %c0_428 = arith.constant 0 : index
    %c0_429 = arith.constant 0 : index
    %639 = vector.load %arg18[%c5_427, %c0_428, %c0_429] : memref<9x8x8xbf16, #tpu.memory_space<vmem>>, vector<1x8x8xbf16>
    %640 = vector.shape_cast %639 : vector<1x8x8xbf16> to vector<8x8xbf16>
    %641 = arith.truncf %638 : vector<8x256xf32> to vector<8x256xbf16>
    %cst_430 = arith.constant dense<0.000000e+00> : vector<8x256xf32>
    %642 = tpu.matmul %640, %641, %cst_430 {dimension_numbers = #tpu.dot_dimension_numbers<[1], [0], [0], [1], [0, 0, 1, 1], [], []>} : vector<8x8xbf16>, vector<8x256xbf16>, vector<8x256xf32> -> vector<8x256xf32>
    %643 = arith.addf %634, %642 : vector<8x256xf32>
    %c6_431 = arith.constant 6 : index
    %c0_432 = arith.constant 0 : index
    %644 = vector.load %arg3[%c6_431, %c0_432] : memref<9x256xf32, #tpu.memory_space<vmem>>, vector<1x256xf32>
    %c241_i32_433 = arith.constant 241 : i32
    %645 = tpu.dynamic_rotate %594 by %c241_i32_433 dim 1 : vector<8x256xf32>, i32 -> vector<8x256xf32>
    %646 = vector.broadcast %644 : vector<1x256xf32> to vector<8x256xf32>
    %647 = arith.mulf %645, %646 : vector<8x256xf32>
    %c6_434 = arith.constant 6 : index
    %c0_435 = arith.constant 0 : index
    %c0_436 = arith.constant 0 : index
    %648 = vector.load %arg18[%c6_434, %c0_435, %c0_436] : memref<9x8x8xbf16, #tpu.memory_space<vmem>>, vector<1x8x8xbf16>
    %649 = vector.shape_cast %648 : vector<1x8x8xbf16> to vector<8x8xbf16>
    %650 = arith.truncf %647 : vector<8x256xf32> to vector<8x256xbf16>
    %cst_437 = arith.constant dense<0.000000e+00> : vector<8x256xf32>
    %651 = tpu.matmul %649, %650, %cst_437 {dimension_numbers = #tpu.dot_dimension_numbers<[1], [0], [0], [1], [0, 0, 1, 1], [], []>} : vector<8x8xbf16>, vector<8x256xbf16>, vector<8x256xf32> -> vector<8x256xf32>
    %652 = arith.addf %643, %651 : vector<8x256xf32>
    %c7_438 = arith.constant 7 : index
    %c0_439 = arith.constant 0 : index
    %653 = vector.load %arg3[%c7_438, %c0_439] : memref<9x256xf32, #tpu.memory_space<vmem>>, vector<1x256xf32>
    %c240_i32_440 = arith.constant 240 : i32
    %654 = tpu.dynamic_rotate %594 by %c240_i32_440 dim 1 : vector<8x256xf32>, i32 -> vector<8x256xf32>
    %655 = vector.broadcast %653 : vector<1x256xf32> to vector<8x256xf32>
    %656 = arith.mulf %654, %655 : vector<8x256xf32>
    %c7_441 = arith.constant 7 : index
    %c0_442 = arith.constant 0 : index
    %c0_443 = arith.constant 0 : index
    %657 = vector.load %arg18[%c7_441, %c0_442, %c0_443] : memref<9x8x8xbf16, #tpu.memory_space<vmem>>, vector<1x8x8xbf16>
    %658 = vector.shape_cast %657 : vector<1x8x8xbf16> to vector<8x8xbf16>
    %659 = arith.truncf %656 : vector<8x256xf32> to vector<8x256xbf16>
    %cst_444 = arith.constant dense<0.000000e+00> : vector<8x256xf32>
    %660 = tpu.matmul %658, %659, %cst_444 {dimension_numbers = #tpu.dot_dimension_numbers<[1], [0], [0], [1], [0, 0, 1, 1], [], []>} : vector<8x8xbf16>, vector<8x256xbf16>, vector<8x256xf32> -> vector<8x256xf32>
    %661 = arith.addf %652, %660 : vector<8x256xf32>
    %c8_445 = arith.constant 8 : index
    %c0_446 = arith.constant 0 : index
    %662 = vector.load %arg3[%c8_445, %c0_446] : memref<9x256xf32, #tpu.memory_space<vmem>>, vector<1x256xf32>
    %c239_i32_447 = arith.constant 239 : i32
    %663 = tpu.dynamic_rotate %594 by %c239_i32_447 dim 1 : vector<8x256xf32>, i32 -> vector<8x256xf32>
    %664 = vector.broadcast %662 : vector<1x256xf32> to vector<8x256xf32>
    %665 = arith.mulf %663, %664 : vector<8x256xf32>
    %c8_448 = arith.constant 8 : index
    %c0_449 = arith.constant 0 : index
    %c0_450 = arith.constant 0 : index
    %666 = vector.load %arg18[%c8_448, %c0_449, %c0_450] : memref<9x8x8xbf16, #tpu.memory_space<vmem>>, vector<1x8x8xbf16>
    %667 = vector.shape_cast %666 : vector<1x8x8xbf16> to vector<8x8xbf16>
    %668 = arith.truncf %665 : vector<8x256xf32> to vector<8x256xbf16>
    %cst_451 = arith.constant dense<0.000000e+00> : vector<8x256xf32>
    %669 = tpu.matmul %667, %668, %cst_451 {dimension_numbers = #tpu.dot_dimension_numbers<[1], [0], [0], [1], [0, 0, 1, 1], [], []>} : vector<8x8xbf16>, vector<8x256xbf16>, vector<8x256xf32> -> vector<8x256xf32>
    %670 = arith.addf %661, %669 : vector<8x256xf32>
    %c0_452 = arith.constant 0 : index
    %c0_453 = arith.constant 0 : index
    %671 = vector.load %arg19[%c0_452, %c0_453] : memref<8x1xf32, #tpu.memory_space<vmem>>, vector<8x1xf32>
    %672 = vector.broadcast %671 : vector<8x1xf32> to vector<8x256xf32>
    %673 = arith.addf %670, %672 : vector<8x256xf32>
    %cst_454 = arith.constant 0.000000e+00 : f32
    %674 = vector.broadcast %cst_454 : f32 to vector<8x256xf32>
    %675 = arith.maximumf %673, %674 : vector<8x256xf32>
    %c0_455 = arith.constant 0 : index
    %c0_456 = arith.constant 0 : index
    %676 = vector.load %arg20[%c0_455, %c0_456] : memref<2x8xbf16, #tpu.memory_space<vmem>>, vector<2x8xbf16>
    %677 = arith.truncf %675 : vector<8x256xf32> to vector<8x256xbf16>
    %cst_457 = arith.constant dense<0.000000e+00> : vector<2x256xf32>
    %678 = tpu.matmul %676, %677, %cst_457 {dimension_numbers = #tpu.dot_dimension_numbers<[1], [0], [0], [1], [0, 0, 1, 1], [], []>} : vector<2x8xbf16>, vector<8x256xbf16>, vector<2x256xf32> -> vector<2x256xf32>
    %c0_458 = arith.constant 0 : index
    %c0_459 = arith.constant 0 : index
    %679 = vector.load %arg21[%c0_458, %c0_459] : memref<2x1xf32, #tpu.memory_space<vmem>>, vector<2x1xf32>
    %680 = vector.broadcast %679 : vector<2x1xf32> to vector<2x256xf32>
    %681 = arith.addf %678, %680 : vector<2x256xf32>
    %c0_460 = arith.constant 0 : index
    %c0_461 = arith.constant 0 : index
    %c0_462 = arith.constant 0 : index
    %682 = vector.load %arg22[%c0_460, %c0_461, %c0_462] : memref<1x2x256xf32, #tpu.memory_space<vmem>>, vector<1x2x256xf32>
    %683 = vector.shape_cast %682 : vector<1x2x256xf32> to vector<2x256xf32>
    %684 = vector.shape_cast %681 : vector<2x256xf32> to vector<1x2x256xf32>
    tpu.vector_store %arg22[%c0_460, %c0_461, %c0_462], %684 {strides = array<i32>} : memref<1x2x256xf32, #tpu.memory_space<vmem>>, vector<1x2x256xf32>,
    %cst_463 = arith.constant 2.000000e+01 : f32
    %685 = vector.broadcast %cst_463 : f32 to vector<2x256xf32>
    %686 = arith.mulf %681, %685 : vector<2x256xf32>
    %687 = arith.subf %686, %3 : vector<2x256xf32>
    %688 = arith.mulf %687, %687 : vector<2x256xf32>
    %689 = vector.shape_cast %688 : vector<2x256xf32> to vector<1x2x256xf32>
    %cst_464 = arith.constant dense<0.000000e+00> : vector<1xf32>
    %690 = vector.multi_reduction <add>, %689, %cst_464 [1, 2] : vector<1x2x256xf32> to vector<1xf32>
    %691 = vector.shape_cast %690 : vector<1xf32> to vector<1x1x1xf32>
    %692 = vector.extract %691[0, 0, 0] : f32 from vector<1x1x1xf32>
    %693 = vector.extract_strided_slice %688 {offsets = [0, 0], sizes = [1, 256], strides = [1, 1]} : vector<2x256xf32> to vector<1x256xf32>
    %694 = vector.extract_strided_slice %688 {offsets = [1, 0], sizes = [1, 256], strides = [1, 1]} : vector<2x256xf32> to vector<1x256xf32>
    %695 = arith.addf %693, %694 : vector<1x256xf32>
    %696 = math.sqrt %695 : vector<1x256xf32>
    %697 = vector.shape_cast %696 : vector<1x256xf32> to vector<1x1x256xf32>
    %cst_465 = arith.constant dense<0.000000e+00> : vector<1xf32>
    %698 = vector.multi_reduction <add>, %697, %cst_465 [1, 2] : vector<1x1x256xf32> to vector<1xf32>
    %699 = vector.shape_cast %698 : vector<1xf32> to vector<1x1x1xf32>
    %700 = vector.extract %699[0, 0, 0] : f32 from vector<1x1x1xf32>
    %cst_466 = arith.constant 1.000000e+00 : f32
    %701 = vector.broadcast %cst_466 : f32 to vector<1x128xf32>
    %702 = vector.broadcast %692 : f32 to vector<1x128xf32>
    %703 = arith.mulf %702, %701 : vector<1x128xf32>
    %c0_467 = arith.constant 0 : index
    %c0_468 = arith.constant 0 : index
    %c0_469 = arith.constant 0 : index
    %704 = vector.load %arg24[%c0_467, %c0_468, %c0_469] : memref<1x2x128xf32, #tpu.memory_space<vmem>>, vector<1x1x128xf32>
    %705 = vector.shape_cast %704 : vector<1x1x128xf32> to vector<1x128xf32>
    %706 = vector.shape_cast %703 : vector<1x128xf32> to vector<1x1x128xf32>
    tpu.vector_store %arg24[%c0_467, %c0_468, %c0_469], %706 {strides = array<i32>} : memref<1x2x128xf32, #tpu.memory_space<vmem>>, vector<1x1x128xf32>,
    %707 = vector.broadcast %700 : f32 to vector<1x128xf32>
    %708 = arith.mulf %707, %701 : vector<1x128xf32>
    %c0_470 = arith.constant 0 : index
    %c1_471 = arith.constant 1 : index
    %c0_472 = arith.constant 0 : index
    %709 = vector.load %arg24[%c0_470, %c1_471, %c0_472] : memref<1x2x128xf32, #tpu.memory_space<vmem>>, vector<1x1x128xf32>
    %710 = vector.shape_cast %709 : vector<1x1x128xf32> to vector<1x128xf32>
    %711 = vector.shape_cast %708 : vector<1x128xf32> to vector<1x1x128xf32>
    tpu.vector_store %arg24[%c0_470, %c1_471, %c0_472], %711 {strides = array<i32>} : memref<1x2x128xf32, #tpu.memory_space<vmem>>, vector<1x1x128xf32>,
    return
  }
  func.func @transform_0(%arg0: i32) -> (i32, i32, i32) {
    %c0_i32 = arith.constant 0 : i32
    %c0_i32_0 = arith.constant 0 : i32
    %c0_i32_1 = arith.constant 0 : i32
    return %arg0, %c0_i32, %c0_i32_0 : i32, i32, i32
  }
  func.func @transform_1(%arg0: i32) -> (i32, i32, i32) {
    %c0_i32 = arith.constant 0 : i32
    %c0_i32_0 = arith.constant 0 : i32
    %c0_i32_1 = arith.constant 0 : i32
    return %arg0, %c0_i32, %c0_i32_0 : i32, i32, i32
  }
  func.func @transform_2(%arg0: i32) -> (i32, i32) {
    %c0_i32 = arith.constant 0 : i32
    %c0_i32_0 = arith.constant 0 : i32
    %c0_i32_1 = arith.constant 0 : i32
    return %c0_i32, %c0_i32_0 : i32, i32
  }
  func.func @transform_3(%arg0: i32) -> (i32, i32) {
    %c0_i32 = arith.constant 0 : i32
    %c0_i32_0 = arith.constant 0 : i32
    %c0_i32_1 = arith.constant 0 : i32
    return %c0_i32, %c0_i32_0 : i32, i32
  }
  func.func @transform_4(%arg0: i32) -> (i32, i32) {
    %c0_i32 = arith.constant 0 : i32
    %c0_i32_0 = arith.constant 0 : i32
    %c0_i32_1 = arith.constant 0 : i32
    return %c0_i32, %c0_i32_0 : i32, i32
  }
  func.func @transform_5(%arg0: i32) -> (i32, i32, i32) {
    %c0_i32 = arith.constant 0 : i32
    %c0_i32_0 = arith.constant 0 : i32
    %c0_i32_1 = arith.constant 0 : i32
    %c0_i32_2 = arith.constant 0 : i32
    return %c0_i32, %c0_i32_0, %c0_i32_1 : i32, i32, i32
  }
  func.func @transform_6(%arg0: i32) -> (i32, i32, i32) {
    %c0_i32 = arith.constant 0 : i32
    %c0_i32_0 = arith.constant 0 : i32
    %c0_i32_1 = arith.constant 0 : i32
    %c0_i32_2 = arith.constant 0 : i32
    return %c0_i32, %c0_i32_0, %c0_i32_1 : i32, i32, i32
  }
  func.func @transform_7(%arg0: i32) -> (i32, i32) {
    %c0_i32 = arith.constant 0 : i32
    %c0_i32_0 = arith.constant 0 : i32
    %c0_i32_1 = arith.constant 0 : i32
    return %c0_i32, %c0_i32_0 : i32, i32
  }
  func.func @transform_8(%arg0: i32) -> (i32, i32, i32) {
    %c0_i32 = arith.constant 0 : i32
    %c0_i32_0 = arith.constant 0 : i32
    %c0_i32_1 = arith.constant 0 : i32
    %c0_i32_2 = arith.constant 0 : i32
    return %c0_i32, %c0_i32_0, %c0_i32_1 : i32, i32, i32
  }
  func.func @transform_9(%arg0: i32) -> (i32, i32) {
    %c0_i32 = arith.constant 0 : i32
    %c0_i32_0 = arith.constant 0 : i32
    %c0_i32_1 = arith.constant 0 : i32
    return %c0_i32, %c0_i32_0 : i32, i32
  }
  func.func @transform_10(%arg0: i32) -> (i32, i32, i32) {
    %c0_i32 = arith.constant 0 : i32
    %c0_i32_0 = arith.constant 0 : i32
    %c0_i32_1 = arith.constant 0 : i32
    %c0_i32_2 = arith.constant 0 : i32
    return %c0_i32, %c0_i32_0, %c0_i32_1 : i32, i32, i32
  }
  func.func @transform_11(%arg0: i32) -> (i32, i32) {
    %c0_i32 = arith.constant 0 : i32
    %c0_i32_0 = arith.constant 0 : i32
    %c0_i32_1 = arith.constant 0 : i32
    return %c0_i32, %c0_i32_0 : i32, i32
  }
  func.func @transform_12(%arg0: i32) -> (i32, i32, i32) {
    %c0_i32 = arith.constant 0 : i32
    %c0_i32_0 = arith.constant 0 : i32
    %c0_i32_1 = arith.constant 0 : i32
    %c0_i32_2 = arith.constant 0 : i32
    return %c0_i32, %c0_i32_0, %c0_i32_1 : i32, i32, i32
  }
  func.func @transform_13(%arg0: i32) -> (i32, i32) {
    %c0_i32 = arith.constant 0 : i32
    %c0_i32_0 = arith.constant 0 : i32
    %c0_i32_1 = arith.constant 0 : i32
    return %c0_i32, %c0_i32_0 : i32, i32
  }
  func.func @transform_14(%arg0: i32) -> (i32, i32, i32) {
    %c0_i32 = arith.constant 0 : i32
    %c0_i32_0 = arith.constant 0 : i32
    %c0_i32_1 = arith.constant 0 : i32
    %c0_i32_2 = arith.constant 0 : i32
    return %c0_i32, %c0_i32_0, %c0_i32_1 : i32, i32, i32
  }
  func.func @transform_15(%arg0: i32) -> (i32, i32, i32) {
    %c0_i32 = arith.constant 0 : i32
    %c0_i32_0 = arith.constant 0 : i32
    %c0_i32_1 = arith.constant 0 : i32
    %c0_i32_2 = arith.constant 0 : i32
    return %c0_i32, %c0_i32_0, %c0_i32_1 : i32, i32, i32
  }
  func.func @transform_16(%arg0: i32) -> (i32, i32) {
    %c0_i32 = arith.constant 0 : i32
    %c0_i32_0 = arith.constant 0 : i32
    %c0_i32_1 = arith.constant 0 : i32
    return %c0_i32, %c0_i32_0 : i32, i32
  }
  func.func @transform_17(%arg0: i32) -> (i32, i32, i32) {
    %c0_i32 = arith.constant 0 : i32
    %c0_i32_0 = arith.constant 0 : i32
    %c0_i32_1 = arith.constant 0 : i32
    %c0_i32_2 = arith.constant 0 : i32
    return %c0_i32, %c0_i32_0, %c0_i32_1 : i32, i32, i32
  }
  func.func @transform_18(%arg0: i32) -> (i32, i32) {
    %c0_i32 = arith.constant 0 : i32
    %c0_i32_0 = arith.constant 0 : i32
    %c0_i32_1 = arith.constant 0 : i32
    return %c0_i32, %c0_i32_0 : i32, i32
  }
  func.func @transform_19(%arg0: i32) -> (i32, i32) {
    %c0_i32 = arith.constant 0 : i32
    %c0_i32_0 = arith.constant 0 : i32
    %c0_i32_1 = arith.constant 0 : i32
    return %c0_i32, %c0_i32_0 : i32, i32
  }
  func.func @transform_20(%arg0: i32) -> (i32, i32) {
    %c0_i32 = arith.constant 0 : i32
    %c0_i32_0 = arith.constant 0 : i32
    %c0_i32_1 = arith.constant 0 : i32
    return %c0_i32, %c0_i32_0 : i32, i32
  }
  func.func @transform_21(%arg0: i32) -> (i32, i32, i32) {
    %c0_i32 = arith.constant 0 : i32
    %c0_i32_0 = arith.constant 0 : i32
    %c0_i32_1 = arith.constant 0 : i32
    return %arg0, %c0_i32, %c0_i32_0 : i32, i32, i32
  }
  func.func @transform_22(%arg0: i32) -> (i32, i32, i32) {
    %c0_i32 = arith.constant 0 : i32
    %c0_i32_0 = arith.constant 0 : i32
    %c0_i32_1 = arith.constant 0 : i32
    return %arg0, %c0_i32, %c0_i32_0 : i32, i32, i32
  }
  func.func @transform_23(%arg0: i32) -> (i32, i32, i32) {
    %c0_i32 = arith.constant 0 : i32
    %c0_i32_0 = arith.constant 0 : i32
    %c0_i32_1 = arith.constant 0 : i32
    return %arg0, %c0_i32, %c0_i32_0 : i32, i32, i32
  }
}

module attributes {stable_mosaic.version = 11 : i64} {
  func.func @kernel(%arg0: i32, %arg1: memref<1x3x256xf32, #tpu.memory_space<vmem>>, %arg2: memref<1x2x256xf32, #tpu.memory_space<vmem>>, %arg3: memref<9x256xf32, #tpu.memory_space<vmem>>, %arg4: memref<9x256xf32, #tpu.memory_space<vmem>>, %arg5: memref<2x256xf32, #tpu.memory_space<vmem>>, %arg6: memref<9x8x3xbf16, #tpu.memory_space<vmem>>, %arg7: memref<9x8x1xbf16, #tpu.memory_space<vmem>>, %arg8: memref<8x1xf32, #tpu.memory_space<vmem>>, %arg9: memref<9x8x8xbf16, #tpu.memory_space<vmem>>, %arg10: memref<8x1xf32, #tpu.memory_space<vmem>>, %arg11: memref<9x16x8xbf16, #tpu.memory_space<vmem>>, %arg12: memref<16x1xf32, #tpu.memory_space<vmem>>, %arg13: memref<9x16x16xbf16, #tpu.memory_space<vmem>>, %arg14: memref<16x1xf32, #tpu.memory_space<vmem>>, %arg15: memref<9x8x16xbf16, #tpu.memory_space<vmem>>, %arg16: memref<9x8x8xbf16, #tpu.memory_space<vmem>>, %arg17: memref<8x1xf32, #tpu.memory_space<vmem>>, %arg18: memref<9x8x8xbf16, #tpu.memory_space<vmem>>, %arg19: memref<8x1xf32, #tpu.memory_space<vmem>>, %arg20: memref<2x8xbf16, #tpu.memory_space<vmem>>, %arg21: memref<2x1xf32, #tpu.memory_space<vmem>>, %arg22: memref<1x2x256xf32, #tpu.memory_space<vmem>>, %arg23: memref<1x1x256xf32, #tpu.memory_space<vmem>>, %arg24: memref<1x2x128xf32, #tpu.memory_space<vmem>>, %arg25: memref<8x256xf32, #tpu.memory_space<vmem>>) attributes {dimension_semantics = [#tpu.dimension_semantics<parallel>], iteration_bounds = array<i64: 2>, scalar_prefetch = 0 : i64, scratch_operands = 1 : i64, tpu.core_type = #tpu.core_type<tc>, window_params = [{transform_indices = @transform_0, window_bounds = array<i64: 1, 3, 256>}, {transform_indices = @transform_1, window_bounds = array<i64: 1, 2, 256>}, {pipeline_mode = #tpu.pipeline_mode<synchronous>, transform_indices = @transform_2, window_bounds = array<i64: 9, 256>}, {pipeline_mode = #tpu.pipeline_mode<synchronous>, transform_indices = @transform_3, window_bounds = array<i64: 9, 256>}, {pipeline_mode = #tpu.pipeline_mode<synchronous>, transform_indices = @transform_4, window_bounds = array<i64: 2, 256>}, {pipeline_mode = #tpu.pipeline_mode<synchronous>, transform_indices = @transform_5, window_bounds = array<i64: 9, 8, 3>}, {pipeline_mode = #tpu.pipeline_mode<synchronous>, transform_indices = @transform_6, window_bounds = array<i64: 9, 8, 1>}, {pipeline_mode = #tpu.pipeline_mode<synchronous>, transform_indices = @transform_7, window_bounds = array<i64: 8, 1>}, {pipeline_mode = #tpu.pipeline_mode<synchronous>, transform_indices = @transform_8, window_bounds = array<i64: 9, 8, 8>}, {pipeline_mode = #tpu.pipeline_mode<synchronous>, transform_indices = @transform_9, window_bounds = array<i64: 8, 1>}, {pipeline_mode = #tpu.pipeline_mode<synchronous>, transform_indices = @transform_10, window_bounds = array<i64: 9, 16, 8>}, {pipeline_mode = #tpu.pipeline_mode<synchronous>, transform_indices = @transform_11, window_bounds = array<i64: 16, 1>}, {pipeline_mode = #tpu.pipeline_mode<synchronous>, transform_indices = @transform_12, window_bounds = array<i64: 9, 16, 16>}, {pipeline_mode = #tpu.pipeline_mode<synchronous>, transform_indices = @transform_13, window_bounds = array<i64: 16, 1>}, {pipeline_mode = #tpu.pipeline_mode<synchronous>, transform_indices = @transform_14, window_bounds = array<i64: 9, 8, 16>}, {pipeline_mode = #tpu.pipeline_mode<synchronous>, transform_indices = @transform_15, window_bounds = array<i64: 9, 8, 8>}, {pipeline_mode = #tpu.pipeline_mode<synchronous>, transform_indices = @transform_16, window_bounds = array<i64: 8, 1>}, {pipeline_mode = #tpu.pipeline_mode<synchronous>, transform_indices = @transform_17, window_bounds = array<i64: 9, 8, 8>}, {pipeline_mode = #tpu.pipeline_mode<synchronous>, transform_indices = @transform_18, window_bounds = array<i64: 8, 1>}, {pipeline_mode = #tpu.pipeline_mode<synchronous>, transform_indices = @transform_19, window_bounds = array<i64: 2, 8>}, {pipeline_mode = #tpu.pipeline_mode<synchronous>, transform_indices = @transform_20, window_bounds = array<i64: 2, 1>}, {transform_indices = @transform_21, window_bounds = array<i64: 1, 2, 256>}, {transform_indices = @transform_22, window_bounds = array<i64: 1, 1, 256>}, {transform_indices = @transform_23, window_bounds = array<i64: 1, 2, 128>}]} {
    %c0 = arith.constant 0 : index
    %c0_0 = arith.constant 0 : index
    %c0_1 = arith.constant 0 : index
    %0 = vector.load %arg1[%c0, %c0_0, %c0_1] : memref<1x3x256xf32, #tpu.memory_space<vmem>>, vector<1x3x256xf32>
    %1 = vector.shape_cast %0 : vector<1x3x256xf32> to vector<3x256xf32>
    %c0_2 = arith.constant 0 : index
    %c0_3 = arith.constant 0 : index
    %c0_4 = arith.constant 0 : index
    %2 = vector.load %arg2[%c0_2, %c0_3, %c0_4] : memref<1x2x256xf32, #tpu.memory_space<vmem>>, vector<1x2x256xf32>
    %3 = vector.shape_cast %2 : vector<1x2x256xf32> to vector<2x256xf32>
    %4 = vector.extract_strided_slice %3 {offsets = [0, 0], sizes = [1, 256], strides = [1, 1]} : vector<2x256xf32> to vector<1x256xf32>
    %5 = vector.extract_strided_slice %3 {offsets = [1, 0], sizes = [1, 256], strides = [1, 1]} : vector<2x256xf32> to vector<1x256xf32>
    %6 = arith.mulf %4, %4 : vector<1x256xf32>
    %7 = arith.mulf %5, %5 : vector<1x256xf32>
    %8 = arith.addf %6, %7 : vector<1x256xf32>
    %9 = math.sqrt %8 : vector<1x256xf32>
    %10 = vector.shape_cast %9 : vector<1x256xf32> to vector<1x1x256xf32>
    %cst = arith.constant dense<0.000000e+00> : vector<1xf32>
    %11 = vector.multi_reduction <add>, %10, %cst [1, 2] : vector<1x1x256xf32> to vector<1xf32>
    %12 = vector.shape_cast %11 : vector<1xf32> to vector<1x1x1xf32>
    %13 = vector.extract %12[0, 0, 0] : f32 from vector<1x1x1xf32>
    %cst_5 = arith.constant 3.906250e-04 : f32
    %14 = arith.mulf %13, %cst_5 : f32
    %15 = vector.broadcast %14 : f32 to vector<1x256xf32>
    %16 = arith.cmpf olt, %9, %15 : vector<1x256xf32>
    %17 = arith.extui %16 : vector<1x256xi1> to vector<1x256xi32>
    %18 = arith.sitofp %17 : vector<1x256xi32> to vector<1x256xf32>
    %cst_6 = arith.constant 1.000000e+00 : f32
    %19 = vector.broadcast %cst_6 : f32 to vector<1x256xf32>
    %20 = arith.subf %19, %18 : vector<1x256xf32>
    %c0_7 = arith.constant 0 : index
    %c0_8 = arith.constant 0 : index
    %c0_9 = arith.constant 0 : index
    %21 = vector.load %arg23[%c0_7, %c0_8, %c0_9] : memref<1x1x256xf32, #tpu.memory_space<vmem>>, vector<1x1x256xf32>
    %22 = vector.shape_cast %21 : vector<1x1x256xf32> to vector<1x256xf32>
    %23 = vector.shape_cast %20 : vector<1x256xf32> to vector<1x1x256xf32>
    tpu.vector_store %arg23[%c0_7, %c0_8, %c0_9], %23 {strides = array<i32>} : memref<1x1x256xf32, #tpu.memory_space<vmem>>, vector<1x1x256xf32>,
    %c0_10 = arith.constant 0 : index
    %c0_11 = arith.constant 0 : index
    %24 = vector.load %arg3[%c0_10, %c0_11] : memref<9x256xf32, #tpu.memory_space<vmem>>, vector<1x256xf32>
    %c17_i32 = arith.constant 17 : i32
    %25 = tpu.dynamic_rotate %1 by %c17_i32 dim 1 : vector<3x256xf32>, i32 -> vector<3x256xf32>
    %26 = vector.broadcast %24 : vector<1x256xf32> to vector<3x256xf32>
    %27 = arith.mulf %25, %26 : vector<3x256xf32>
    %c0_12 = arith.constant 0 : index
    %c0_13 = arith.constant 0 : index
    %c0_14 = arith.constant 0 : index
    %28 = vector.load %arg6[%c0_12, %c0_13, %c0_14] : memref<9x8x3xbf16, #tpu.memory_space<vmem>>, vector<1x8x3xbf16>
    %29 = vector.shape_cast %28 : vector<1x8x3xbf16> to vector<8x3xbf16>
    %30 = arith.truncf %27 : vector<3x256xf32> to vector<3x256xbf16>
    %cst_15 = arith.constant dense<0.000000e+00> : vector<8x256xf32>
    %31 = tpu.matmul %29, %30, %cst_15 {dimension_numbers = #tpu.dot_dimension_numbers<[1], [0], [0], [1], [0, 0, 1, 1], [], []>} : vector<8x3xbf16>, vector<3x256xbf16>, vector<8x256xf32> -> vector<8x256xf32>
    %c17_i32_16 = arith.constant 17 : i32
    %32 = tpu.dynamic_rotate %20 by %c17_i32_16 dim 1 : vector<1x256xf32>, i32 -> vector<1x256xf32>
    %33 = arith.mulf %32, %24 : vector<1x256xf32>
    %c0_17 = arith.constant 0 : index
    %c0_18 = arith.constant 0 : index
    %c0_19 = arith.constant 0 : index
    %34 = vector.load %arg7[%c0_17, %c0_18, %c0_19] : memref<9x8x1xbf16, #tpu.memory_space<vmem>>, vector<1x8x1xbf16>
    %35 = vector.shape_cast %34 : vector<1x8x1xbf16> to vector<8x1xbf16>
    %36 = arith.extf %35 : vector<8x1xbf16> to vector<8x1xf32>
    %37 = vector.broadcast %36 : vector<8x1xf32> to vector<8x256xf32>
    %38 = vector.broadcast %33 : vector<1x256xf32> to vector<8x256xf32>
    %39 = arith.mulf %37, %38 : vector<8x256xf32>
    %40 = arith.addf %31, %39 : vector<8x256xf32>
    %c1 = arith.constant 1 : index
    %c0_20 = arith.constant 0 : index
    %41 = vector.load %arg3[%c1, %c0_20] : memref<9x256xf32, #tpu.memory_space<vmem>>, vector<1x256xf32>
    %c16_i32 = arith.constant 16 : i32
    %42 = tpu.dynamic_rotate %1 by %c16_i32 dim 1 : vector<3x256xf32>, i32 -> vector<3x256xf32>
    %43 = vector.broadcast %41 : vector<1x256xf32> to vector<3x256xf32>
    %44 = arith.mulf %42, %43 : vector<3x256xf32>
    %c1_21 = arith.constant 1 : index
    %c0_22 = arith.constant 0 : index
    %c0_23 = arith.constant 0 : index
    %45 = vector.load %arg6[%c1_21, %c0_22, %c0_23] : memref<9x8x3xbf16, #tpu.memory_space<vmem>>, vector<1x8x3xbf16>
    %46 = vector.shape_cast %45 : vector<1x8x3xbf16> to vector<8x3xbf16>
    %47 = arith.truncf %44 : vector<3x256xf32> to vector<3x256xbf16>
    %cst_24 = arith.constant dense<0.000000e+00> : vector<8x256xf32>
    %48 = tpu.matmul %46, %47, %cst_24 {dimension_numbers = #tpu.dot_dimension_numbers<[1], [0], [0], [1], [0, 0, 1, 1], [], []>} : vector<8x3xbf16>, vector<3x256xbf16>, vector<8x256xf32> -> vector<8x256xf32>
    %49 = arith.addf %40, %48 : vector<8x256xf32>
    %c16_i32_25 = arith.constant 16 : i32
    %50 = tpu.dynamic_rotate %20 by %c16_i32_25 dim 1 : vector<1x256xf32>, i32 -> vector<1x256xf32>
    %51 = arith.mulf %50, %41 : vector<1x256xf32>
    %c1_26 = arith.constant 1 : index
    %c0_27 = arith.constant 0 : index
    %c0_28 = arith.constant 0 : index
    %52 = vector.load %arg7[%c1_26, %c0_27, %c0_28] : memref<9x8x1xbf16, #tpu.memory_space<vmem>>, vector<1x8x1xbf16>
    %53 = vector.shape_cast %52 : vector<1x8x1xbf16> to vector<8x1xbf16>
    %54 = arith.extf %53 : vector<8x1xbf16> to vector<8x1xf32>
    %55 = vector.broadcast %54 : vector<8x1xf32> to vector<8x256xf32>
    %56 = vector.broadcast %51 : vector<1x256xf32> to vector<8x256xf32>
    %57 = arith.mulf %55, %56 : vector<8x256xf32>
    %58 = arith.addf %49, %57 : vector<8x256xf32>
    %c2 = arith.constant 2 : index
    %c0_29 = arith.constant 0 : index
    %59 = vector.load %arg3[%c2, %c0_29] : memref<9x256xf32, #tpu.memory_space<vmem>>, vector<1x256xf32>
    %c15_i32 = arith.constant 15 : i32
    %60 = tpu.dynamic_rotate %1 by %c15_i32 dim 1 : vector<3x256xf32>, i32 -> vector<3x256xf32>
    %61 = vector.broadcast %59 : vector<1x256xf32> to vector<3x256xf32>
    %62 = arith.mulf %60, %61 : vector<3x256xf32>
    %c2_30 = arith.constant 2 : index
    %c0_31 = arith.constant 0 : index
    %c0_32 = arith.constant 0 : index
    %63 = vector.load %arg6[%c2_30, %c0_31, %c0_32] : memref<9x8x3xbf16, #tpu.memory_space<vmem>>, vector<1x8x3xbf16>
    %64 = vector.shape_cast %63 : vector<1x8x3xbf16> to vector<8x3xbf16>
    %65 = arith.truncf %62 : vector<3x256xf32> to vector<3x256xbf16>
    %cst_33 = arith.constant dense<0.000000e+00> : vector<8x256xf32>
    %66 = tpu.matmul %64, %65, %cst_33 {dimension_numbers = #tpu.dot_dimension_numbers<[1], [0], [0], [1], [0, 0, 1, 1], [], []>} : vector<8x3xbf16>, vector<3x256xbf16>, vector<8x256xf32> -> vector<8x256xf32>
    %67 = arith.addf %58, %66 : vector<8x256xf32>
    %c15_i32_34 = arith.constant 15 : i32
    %68 = tpu.dynamic_rotate %20 by %c15_i32_34 dim 1 : vector<1x256xf32>, i32 -> vector<1x256xf32>
    %69 = arith.mulf %68, %59 : vector<1x256xf32>
    %c2_35 = arith.constant 2 : index
    %c0_36 = arith.constant 0 : index
    %c0_37 = arith.constant 0 : index
    %70 = vector.load %arg7[%c2_35, %c0_36, %c0_37] : memref<9x8x1xbf16, #tpu.memory_space<vmem>>, vector<1x8x1xbf16>
    %71 = vector.shape_cast %70 : vector<1x8x1xbf16> to vector<8x1xbf16>
    %72 = arith.extf %71 : vector<8x1xbf16> to vector<8x1xf32>
    %73 = vector.broadcast %72 : vector<8x1xf32> to vector<8x256xf32>
    %74 = vector.broadcast %69 : vector<1x256xf32> to vector<8x256xf32>
    %75 = arith.mulf %73, %74 : vector<8x256xf32>
    %76 = arith.addf %67, %75 : vector<8x256xf32>
    %c3 = arith.constant 3 : index
    %c0_38 = arith.constant 0 : index
    %77 = vector.load %arg3[%c3, %c0_38] : memref<9x256xf32, #tpu.memory_space<vmem>>, vector<1x256xf32>
    %c1_i32 = arith.constant 1 : i32
    %78 = tpu.dynamic_rotate %1 by %c1_i32 dim 1 : vector<3x256xf32>, i32 -> vector<3x256xf32>
    %79 = vector.broadcast %77 : vector<1x256xf32> to vector<3x256xf32>
    %80 = arith.mulf %78, %79 : vector<3x256xf32>
    %c3_39 = arith.constant 3 : index
    %c0_40 = arith.constant 0 : index
    %c0_41 = arith.constant 0 : index
    %81 = vector.load %arg6[%c3_39, %c0_40, %c0_41] : memref<9x8x3xbf16, #tpu.memory_space<vmem>>, vector<1x8x3xbf16>
    %82 = vector.shape_cast %81 : vector<1x8x3xbf16> to vector<8x3xbf16>
    %83 = arith.truncf %80 : vector<3x256xf32> to vector<3x256xbf16>
    %cst_42 = arith.constant dense<0.000000e+00> : vector<8x256xf32>
    %84 = tpu.matmul %82, %83, %cst_42 {dimension_numbers = #tpu.dot_dimension_numbers<[1], [0], [0], [1], [0, 0, 1, 1], [], []>} : vector<8x3xbf16>, vector<3x256xbf16>, vector<8x256xf32> -> vector<8x256xf32>
    %85 = arith.addf %76, %84 : vector<8x256xf32>
    %c1_i32_43 = arith.constant 1 : i32
    %86 = tpu.dynamic_rotate %20 by %c1_i32_43 dim 1 : vector<1x256xf32>, i32 -> vector<1x256xf32>
    %87 = arith.mulf %86, %77 : vector<1x256xf32>
    %c3_44 = arith.constant 3 : index
    %c0_45 = arith.constant 0 : index
    %c0_46 = arith.constant 0 : index
    %88 = vector.load %arg7[%c3_44, %c0_45, %c0_46] : memref<9x8x1xbf16, #tpu.memory_space<vmem>>, vector<1x8x1xbf16>
    %89 = vector.shape_cast %88 : vector<1x8x1xbf16> to vector<8x1xbf16>
    %90 = arith.extf %89 : vector<8x1xbf16> to vector<8x1xf32>
    %91 = vector.broadcast %90 : vector<8x1xf32> to vector<8x256xf32>
    %92 = vector.broadcast %87 : vector<1x256xf32> to vector<8x256xf32>
    %93 = arith.mulf %91, %92 : vector<8x256xf32>
    %94 = arith.addf %85, %93 : vector<8x256xf32>
    %c4 = arith.constant 4 : index
    %c0_47 = arith.constant 0 : index
    %c0_48 = arith.constant 0 : index
    %95 = vector.load %arg6[%c4, %c0_47, %c0_48] : memref<9x8x3xbf16, #tpu.memory_space<vmem>>, vector<1x8x3xbf16>
    %96 = vector.shape_cast %95 : vector<1x8x3xbf16> to vector<8x3xbf16>
    %97 = arith.truncf %1 : vector<3x256xf32> to vector<3x256xbf16>
    %cst_49 = arith.constant dense<0.000000e+00> : vector<8x256xf32>
    %98 = tpu.matmul %96, %97, %cst_49 {dimension_numbers = #tpu.dot_dimension_numbers<[1], [0], [0], [1], [0, 0, 1, 1], [], []>} : vector<8x3xbf16>, vector<3x256xbf16>, vector<8x256xf32> -> vector<8x256xf32>
    %99 = arith.addf %94, %98 : vector<8x256xf32>
    %c4_50 = arith.constant 4 : index
    %c0_51 = arith.constant 0 : index
    %c0_52 = arith.constant 0 : index
    %100 = vector.load %arg7[%c4_50, %c0_51, %c0_52] : memref<9x8x1xbf16, #tpu.memory_space<vmem>>, vector<1x8x1xbf16>
    %101 = vector.shape_cast %100 : vector<1x8x1xbf16> to vector<8x1xbf16>
    %102 = arith.extf %101 : vector<8x1xbf16> to vector<8x1xf32>
    %103 = vector.broadcast %102 : vector<8x1xf32> to vector<8x256xf32>
    %104 = vector.broadcast %20 : vector<1x256xf32> to vector<8x256xf32>
    %105 = arith.mulf %103, %104 : vector<8x256xf32>
    %106 = arith.addf %99, %105 : vector<8x256xf32>
    %c5 = arith.constant 5 : index
    %c0_53 = arith.constant 0 : index
    %107 = vector.load %arg3[%c5, %c0_53] : memref<9x256xf32, #tpu.memory_space<vmem>>, vector<1x256xf32>
    %c255_i32 = arith.constant 255 : i32
    %108 = tpu.dynamic_rotate %1 by %c255_i32 dim 1 : vector<3x256xf32>, i32 -> vector<3x256xf32>
    %109 = vector.broadcast %107 : vector<1x256xf32> to vector<3x256xf32>
    %110 = arith.mulf %108, %109 : vector<3x256xf32>
    %c5_54 = arith.constant 5 : index
    %c0_55 = arith.constant 0 : index
    %c0_56 = arith.constant 0 : index
    %111 = vector.load %arg6[%c5_54, %c0_55, %c0_56] : memref<9x8x3xbf16, #tpu.memory_space<vmem>>, vector<1x8x3xbf16>
    %112 = vector.shape_cast %111 : vector<1x8x3xbf16> to vector<8x3xbf16>
    %113 = arith.truncf %110 : vector<3x256xf32> to vector<3x256xbf16>
    %cst_57 = arith.constant dense<0.000000e+00> : vector<8x256xf32>
    %114 = tpu.matmul %112, %113, %cst_57 {dimension_numbers = #tpu.dot_dimension_numbers<[1], [0], [0], [1], [0, 0, 1, 1], [], []>} : vector<8x3xbf16>, vector<3x256xbf16>, vector<8x256xf32> -> vector<8x256xf32>
    %115 = arith.addf %106, %114 : vector<8x256xf32>
    %c255_i32_58 = arith.constant 255 : i32
    %116 = tpu.dynamic_rotate %20 by %c255_i32_58 dim 1 : vector<1x256xf32>, i32 -> vector<1x256xf32>
    %117 = arith.mulf %116, %107 : vector<1x256xf32>
    %c5_59 = arith.constant 5 : index
    %c0_60 = arith.constant 0 : index
    %c0_61 = arith.constant 0 : index
    %118 = vector.load %arg7[%c5_59, %c0_60, %c0_61] : memref<9x8x1xbf16, #tpu.memory_space<vmem>>, vector<1x8x1xbf16>
    %119 = vector.shape_cast %118 : vector<1x8x1xbf16> to vector<8x1xbf16>
    %120 = arith.extf %119 : vector<8x1xbf16> to vector<8x1xf32>
    %121 = vector.broadcast %120 : vector<8x1xf32> to vector<8x256xf32>
    %122 = vector.broadcast %117 : vector<1x256xf32> to vector<8x256xf32>
    %123 = arith.mulf %121, %122 : vector<8x256xf32>
    %124 = arith.addf %115, %123 : vector<8x256xf32>
    %c6 = arith.constant 6 : index
    %c0_62 = arith.constant 0 : index
    %125 = vector.load %arg3[%c6, %c0_62] : memref<9x256xf32, #tpu.memory_space<vmem>>, vector<1x256xf32>
    %c241_i32 = arith.constant 241 : i32
    %126 = tpu.dynamic_rotate %1 by %c241_i32 dim 1 : vector<3x256xf32>, i32 -> vector<3x256xf32>
    %127 = vector.broadcast %125 : vector<1x256xf32> to vector<3x256xf32>
    %128 = arith.mulf %126, %127 : vector<3x256xf32>
    %c6_63 = arith.constant 6 : index
    %c0_64 = arith.constant 0 : index
    %c0_65 = arith.constant 0 : index
    %129 = vector.load %arg6[%c6_63, %c0_64, %c0_65] : memref<9x8x3xbf16, #tpu.memory_space<vmem>>, vector<1x8x3xbf16>
    %130 = vector.shape_cast %129 : vector<1x8x3xbf16> to vector<8x3xbf16>
    %131 = arith.truncf %128 : vector<3x256xf32> to vector<3x256xbf16>
    %cst_66 = arith.constant dense<0.000000e+00> : vector<8x256xf32>
    %132 = tpu.matmul %130, %131, %cst_66 {dimension_numbers = #tpu.dot_dimension_numbers<[1], [0], [0], [1], [0, 0, 1, 1], [], []>} : vector<8x3xbf16>, vector<3x256xbf16>, vector<8x256xf32> -> vector<8x256xf32>
    %133 = arith.addf %124, %132 : vector<8x256xf32>
    %c241_i32_67 = arith.constant 241 : i32
    %134 = tpu.dynamic_rotate %20 by %c241_i32_67 dim 1 : vector<1x256xf32>, i32 -> vector<1x256xf32>
    %135 = arith.mulf %134, %125 : vector<1x256xf32>
    %c6_68 = arith.constant 6 : index
    %c0_69 = arith.constant 0 : index
    %c0_70 = arith.constant 0 : index
    %136 = vector.load %arg7[%c6_68, %c0_69, %c0_70] : memref<9x8x1xbf16, #tpu.memory_space<vmem>>, vector<1x8x1xbf16>
    %137 = vector.shape_cast %136 : vector<1x8x1xbf16> to vector<8x1xbf16>
    %138 = arith.extf %137 : vector<8x1xbf16> to vector<8x1xf32>
    %139 = vector.broadcast %138 : vector<8x1xf32> to vector<8x256xf32>
    %140 = vector.broadcast %135 : vector<1x256xf32> to vector<8x256xf32>
    %141 = arith.mulf %139, %140 : vector<8x256xf32>
    %142 = arith.addf %133, %141 : vector<8x256xf32>
    %c7 = arith.constant 7 : index
    %c0_71 = arith.constant 0 : index
    %143 = vector.load %arg3[%c7, %c0_71] : memref<9x256xf32, #tpu.memory_space<vmem>>, vector<1x256xf32>
    %c240_i32 = arith.constant 240 : i32
    %144 = tpu.dynamic_rotate %1 by %c240_i32 dim 1 : vector<3x256xf32>, i32 -> vector<3x256xf32>
    %145 = vector.broadcast %143 : vector<1x256xf32> to vector<3x256xf32>
    %146 = arith.mulf %144, %145 : vector<3x256xf32>
    %c7_72 = arith.constant 7 : index
    %c0_73 = arith.constant 0 : index
    %c0_74 = arith.constant 0 : index
    %147 = vector.load %arg6[%c7_72, %c0_73, %c0_74] : memref<9x8x3xbf16, #tpu.memory_space<vmem>>, vector<1x8x3xbf16>
    %148 = vector.shape_cast %147 : vector<1x8x3xbf16> to vector<8x3xbf16>
    %149 = arith.truncf %146 : vector<3x256xf32> to vector<3x256xbf16>
    %cst_75 = arith.constant dense<0.000000e+00> : vector<8x256xf32>
    %150 = tpu.matmul %148, %149, %cst_75 {dimension_numbers = #tpu.dot_dimension_numbers<[1], [0], [0], [1], [0, 0, 1, 1], [], []>} : vector<8x3xbf16>, vector<3x256xbf16>, vector<8x256xf32> -> vector<8x256xf32>
    %151 = arith.addf %142, %150 : vector<8x256xf32>
    %c240_i32_76 = arith.constant 240 : i32
    %152 = tpu.dynamic_rotate %20 by %c240_i32_76 dim 1 : vector<1x256xf32>, i32 -> vector<1x256xf32>
    %153 = arith.mulf %152, %143 : vector<1x256xf32>
    %c7_77 = arith.constant 7 : index
    %c0_78 = arith.constant 0 : index
    %c0_79 = arith.constant 0 : index
    %154 = vector.load %arg7[%c7_77, %c0_78, %c0_79] : memref<9x8x1xbf16, #tpu.memory_space<vmem>>, vector<1x8x1xbf16>
    %155 = vector.shape_cast %154 : vector<1x8x1xbf16> to vector<8x1xbf16>
    %156 = arith.extf %155 : vector<8x1xbf16> to vector<8x1xf32>
    %157 = vector.broadcast %156 : vector<8x1xf32> to vector<8x256xf32>
    %158 = vector.broadcast %153 : vector<1x256xf32> to vector<8x256xf32>
    %159 = arith.mulf %157, %158 : vector<8x256xf32>
    %160 = arith.addf %151, %159 : vector<8x256xf32>
    %c8 = arith.constant 8 : index
    %c0_80 = arith.constant 0 : index
    %161 = vector.load %arg3[%c8, %c0_80] : memref<9x256xf32, #tpu.memory_space<vmem>>, vector<1x256xf32>
    %c239_i32 = arith.constant 239 : i32
    %162 = tpu.dynamic_rotate %1 by %c239_i32 dim 1 : vector<3x256xf32>, i32 -> vector<3x256xf32>
    %163 = vector.broadcast %161 : vector<1x256xf32> to vector<3x256xf32>
    %164 = arith.mulf %162, %163 : vector<3x256xf32>
    %c8_81 = arith.constant 8 : index
    %c0_82 = arith.constant 0 : index
    %c0_83 = arith.constant 0 : index
    %165 = vector.load %arg6[%c8_81, %c0_82, %c0_83] : memref<9x8x3xbf16, #tpu.memory_space<vmem>>, vector<1x8x3xbf16>
    %166 = vector.shape_cast %165 : vector<1x8x3xbf16> to vector<8x3xbf16>
    %167 = arith.truncf %164 : vector<3x256xf32> to vector<3x256xbf16>
    %cst_84 = arith.constant dense<0.000000e+00> : vector<8x256xf32>
    %168 = tpu.matmul %166, %167, %cst_84 {dimension_numbers = #tpu.dot_dimension_numbers<[1], [0], [0], [1], [0, 0, 1, 1], [], []>} : vector<8x3xbf16>, vector<3x256xbf16>, vector<8x256xf32> -> vector<8x256xf32>
    %169 = arith.addf %160, %168 : vector<8x256xf32>
    %c239_i32_85 = arith.constant 239 : i32
    %170 = tpu.dynamic_rotate %20 by %c239_i32_85 dim 1 : vector<1x256xf32>, i32 -> vector<1x256xf32>
    %171 = arith.mulf %170, %161 : vector<1x256xf32>
    %c8_86 = arith.constant 8 : index
    %c0_87 = arith.constant 0 : index
    %c0_88 = arith.constant 0 : index
    %172 = vector.load %arg7[%c8_86, %c0_87, %c0_88] : memref<9x8x1xbf16, #tpu.memory_space<vmem>>, vector<1x8x1xbf16>
    %173 = vector.shape_cast %172 : vector<1x8x1xbf16> to vector<8x1xbf16>
    %174 = arith.extf %173 : vector<8x1xbf16> to vector<8x1xf32>
    %175 = vector.broadcast %174 : vector<8x1xf32> to vector<8x256xf32>
    %176 = vector.broadcast %171 : vector<1x256xf32> to vector<8x256xf32>
    %177 = arith.mulf %175, %176 : vector<8x256xf32>
    %178 = arith.addf %169, %177 : vector<8x256xf32>
    %c0_89 = arith.constant 0 : index
    %c0_90 = arith.constant 0 : index
    %179 = vector.load %arg8[%c0_89, %c0_90] : memref<8x1xf32, #tpu.memory_space<vmem>>, vector<8x1xf32>
    %180 = vector.broadcast %179 : vector<8x1xf32> to vector<8x256xf32>
    %181 = arith.addf %178, %180 : vector<8x256xf32>
    %cst_91 = arith.constant 0.000000e+00 : f32
    %182 = vector.broadcast %cst_91 : f32 to vector<8x256xf32>
    %183 = arith.maximumf %181, %182 : vector<8x256xf32>
    %c0_92 = arith.constant 0 : index
    %c0_93 = arith.constant 0 : index
    %184 = vector.load %arg3[%c0_92, %c0_93] : memref<9x256xf32, #tpu.memory_space<vmem>>, vector<1x256xf32>
    %c17_i32_94 = arith.constant 17 : i32
    %185 = tpu.dynamic_rotate %183 by %c17_i32_94 dim 1 : vector<8x256xf32>, i32 -> vector<8x256xf32>
    %186 = vector.broadcast %184 : vector<1x256xf32> to vector<8x256xf32>
    %187 = arith.mulf %185, %186 : vector<8x256xf32>
    %c0_95 = arith.constant 0 : index
    %c0_96 = arith.constant 0 : index
    %c0_97 = arith.constant 0 : index
    %188 = vector.load %arg9[%c0_95, %c0_96, %c0_97] : memref<9x8x8xbf16, #tpu.memory_space<vmem>>, vector<1x8x8xbf16>
    %189 = vector.shape_cast %188 : vector<1x8x8xbf16> to vector<8x8xbf16>
    %190 = arith.truncf %187 : vector<8x256xf32> to vector<8x256xbf16>
    %cst_98 = arith.constant dense<0.000000e+00> : vector<8x256xf32>
    %191 = tpu.matmul %189, %190, %cst_98 {dimension_numbers = #tpu.dot_dimension_numbers<[1], [0], [0], [1], [0, 0, 1, 1], [], []>} : vector<8x8xbf16>, vector<8x256xbf16>, vector<8x256xf32> -> vector<8x256xf32>
    %c1_99 = arith.constant 1 : index
    %c0_100 = arith.constant 0 : index
    %192 = vector.load %arg3[%c1_99, %c0_100] : memref<9x256xf32, #tpu.memory_space<vmem>>, vector<1x256xf32>
    %c16_i32_101 = arith.constant 16 : i32
    %193 = tpu.dynamic_rotate %183 by %c16_i32_101 dim 1 : vector<8x256xf32>, i32 -> vector<8x256xf32>
    %194 = vector.broadcast %192 : vector<1x256xf32> to vector<8x256xf32>
    %195 = arith.mulf %193, %194 : vector<8x256xf32>
    %c1_102 = arith.constant 1 : index
    %c0_103 = arith.constant 0 : index
    %c0_104 = arith.constant 0 : index
    %196 = vector.load %arg9[%c1_102, %c0_103, %c0_104] : memref<9x8x8xbf16, #tpu.memory_space<vmem>>, vector<1x8x8xbf16>
    %197 = vector.shape_cast %196 : vector<1x8x8xbf16> to vector<8x8xbf16>
    %198 = arith.truncf %195 : vector<8x256xf32> to vector<8x256xbf16>
    %cst_105 = arith.constant dense<0.000000e+00> : vector<8x256xf32>
    %199 = tpu.matmul %197, %198, %cst_105 {dimension_numbers = #tpu.dot_dimension_numbers<[1], [0], [0], [1], [0, 0, 1, 1], [], []>} : vector<8x8xbf16>, vector<8x256xbf16>, vector<8x256xf32> -> vector<8x256xf32>
    %200 = arith.addf %191, %199 : vector<8x256xf32>
    %c2_106 = arith.constant 2 : index
    %c0_107 = arith.constant 0 : index
    %201 = vector.load %arg3[%c2_106, %c0_107] : memref<9x256xf32, #tpu.memory_space<vmem>>, vector<1x256xf32>
    %c15_i32_108 = arith.constant 15 : i32
    %202 = tpu.dynamic_rotate %183 by %c15_i32_108 dim 1 : vector<8x256xf32>, i32 -> vector<8x256xf32>
    %203 = vector.broadcast %201 : vector<1x256xf32> to vector<8x256xf32>
    %204 = arith.mulf %202, %203 : vector<8x256xf32>
    %c2_109 = arith.constant 2 : index
    %c0_110 = arith.constant 0 : index
    %c0_111 = arith.constant 0 : index
    %205 = vector.load %arg9[%c2_109, %c0_110, %c0_111] : memref<9x8x8xbf16, #tpu.memory_space<vmem>>, vector<1x8x8xbf16>
    %206 = vector.shape_cast %205 : vector<1x8x8xbf16> to vector<8x8xbf16>
    %207 = arith.truncf %204 : vector<8x256xf32> to vector<8x256xbf16>
    %cst_112 = arith.constant dense<0.000000e+00> : vector<8x256xf32>
    %208 = tpu.matmul %206, %207, %cst_112 {dimension_numbers = #tpu.dot_dimension_numbers<[1], [0], [0], [1], [0, 0, 1, 1], [], []>} : vector<8x8xbf16>, vector<8x256xbf16>, vector<8x256xf32> -> vector<8x256xf32>
    %209 = arith.addf %200, %208 : vector<8x256xf32>
    %c3_113 = arith.constant 3 : index
    %c0_114 = arith.constant 0 : index
    %210 = vector.load %arg3[%c3_113, %c0_114] : memref<9x256xf32, #tpu.memory_space<vmem>>, vector<1x256xf32>
    %c1_i32_115 = arith.constant 1 : i32
    %211 = tpu.dynamic_rotate %183 by %c1_i32_115 dim 1 : vector<8x256xf32>, i32 -> vector<8x256xf32>
    %212 = vector.broadcast %210 : vector<1x256xf32> to vector<8x256xf32>
    %213 = arith.mulf %211, %212 : vector<8x256xf32>
    %c3_116 = arith.constant 3 : index
    %c0_117 = arith.constant 0 : index
    %c0_118 = arith.constant 0 : index
    %214 = vector.load %arg9[%c3_116, %c0_117, %c0_118] : memref<9x8x8xbf16, #tpu.memory_space<vmem>>, vector<1x8x8xbf16>
    %215 = vector.shape_cast %214 : vector<1x8x8xbf16> to vector<8x8xbf16>
    %216 = arith.truncf %213 : vector<8x256xf32> to vector<8x256xbf16>
    %cst_119 = arith.constant dense<0.000000e+00> : vector<8x256xf32>
    %217 = tpu.matmul %215, %216, %cst_119 {dimension_numbers = #tpu.dot_dimension_numbers<[1], [0], [0], [1], [0, 0, 1, 1], [], []>} : vector<8x8xbf16>, vector<8x256xbf16>, vector<8x256xf32> -> vector<8x256xf32>
    %218 = arith.addf %209, %217 : vector<8x256xf32>
    %c4_120 = arith.constant 4 : index
    %c0_121 = arith.constant 0 : index
    %c0_122 = arith.constant 0 : index
    %219 = vector.load %arg9[%c4_120, %c0_121, %c0_122] : memref<9x8x8xbf16, #tpu.memory_space<vmem>>, vector<1x8x8xbf16>
    %220 = vector.shape_cast %219 : vector<1x8x8xbf16> to vector<8x8xbf16>
    %221 = arith.truncf %183 : vector<8x256xf32> to vector<8x256xbf16>
    %cst_123 = arith.constant dense<0.000000e+00> : vector<8x256xf32>
    %222 = tpu.matmul %220, %221, %cst_123 {dimension_numbers = #tpu.dot_dimension_numbers<[1], [0], [0], [1], [0, 0, 1, 1], [], []>} : vector<8x8xbf16>, vector<8x256xbf16>, vector<8x256xf32> -> vector<8x256xf32>
    %223 = arith.addf %218, %222 : vector<8x256xf32>
    %c5_124 = arith.constant 5 : index
    %c0_125 = arith.constant 0 : index
    %224 = vector.load %arg3[%c5_124, %c0_125] : memref<9x256xf32, #tpu.memory_space<vmem>>, vector<1x256xf32>
    %c255_i32_126 = arith.constant 255 : i32
    %225 = tpu.dynamic_rotate %183 by %c255_i32_126 dim 1 : vector<8x256xf32>, i32 -> vector<8x256xf32>
    %226 = vector.broadcast %224 : vector<1x256xf32> to vector<8x256xf32>
    %227 = arith.mulf %225, %226 : vector<8x256xf32>
    %c5_127 = arith.constant 5 : index
    %c0_128 = arith.constant 0 : index
    %c0_129 = arith.constant 0 : index
    %228 = vector.load %arg9[%c5_127, %c0_128, %c0_129] : memref<9x8x8xbf16, #tpu.memory_space<vmem>>, vector<1x8x8xbf16>
    %229 = vector.shape_cast %228 : vector<1x8x8xbf16> to vector<8x8xbf16>
    %230 = arith.truncf %227 : vector<8x256xf32> to vector<8x256xbf16>
    %cst_130 = arith.constant dense<0.000000e+00> : vector<8x256xf32>
    %231 = tpu.matmul %229, %230, %cst_130 {dimension_numbers = #tpu.dot_dimension_numbers<[1], [0], [0], [1], [0, 0, 1, 1], [], []>} : vector<8x8xbf16>, vector<8x256xbf16>, vector<8x256xf32> -> vector<8x256xf32>
    %232 = arith.addf %223, %231 : vector<8x256xf32>
    %c6_131 = arith.constant 6 : index
    %c0_132 = arith.constant 0 : index
    %233 = vector.load %arg3[%c6_131, %c0_132] : memref<9x256xf32, #tpu.memory_space<vmem>>, vector<1x256xf32>
    %c241_i32_133 = arith.constant 241 : i32
    %234 = tpu.dynamic_rotate %183 by %c241_i32_133 dim 1 : vector<8x256xf32>, i32 -> vector<8x256xf32>
    %235 = vector.broadcast %233 : vector<1x256xf32> to vector<8x256xf32>
    %236 = arith.mulf %234, %235 : vector<8x256xf32>
    %c6_134 = arith.constant 6 : index
    %c0_135 = arith.constant 0 : index
    %c0_136 = arith.constant 0 : index
    %237 = vector.load %arg9[%c6_134, %c0_135, %c0_136] : memref<9x8x8xbf16, #tpu.memory_space<vmem>>, vector<1x8x8xbf16>
    %238 = vector.shape_cast %237 : vector<1x8x8xbf16> to vector<8x8xbf16>
    %239 = arith.truncf %236 : vector<8x256xf32> to vector<8x256xbf16>
    %cst_137 = arith.constant dense<0.000000e+00> : vector<8x256xf32>
    %240 = tpu.matmul %238, %239, %cst_137 {dimension_numbers = #tpu.dot_dimension_numbers<[1], [0], [0], [1], [0, 0, 1, 1], [], []>} : vector<8x8xbf16>, vector<8x256xbf16>, vector<8x256xf32> -> vector<8x256xf32>
    %241 = arith.addf %232, %240 : vector<8x256xf32>
    %c7_138 = arith.constant 7 : index
    %c0_139 = arith.constant 0 : index
    %242 = vector.load %arg3[%c7_138, %c0_139] : memref<9x256xf32, #tpu.memory_space<vmem>>, vector<1x256xf32>
    %c240_i32_140 = arith.constant 240 : i32
    %243 = tpu.dynamic_rotate %183 by %c240_i32_140 dim 1 : vector<8x256xf32>, i32 -> vector<8x256xf32>
    %244 = vector.broadcast %242 : vector<1x256xf32> to vector<8x256xf32>
    %245 = arith.mulf %243, %244 : vector<8x256xf32>
    %c7_141 = arith.constant 7 : index
    %c0_142 = arith.constant 0 : index
    %c0_143 = arith.constant 0 : index
    %246 = vector.load %arg9[%c7_141, %c0_142, %c0_143] : memref<9x8x8xbf16, #tpu.memory_space<vmem>>, vector<1x8x8xbf16>
    %247 = vector.shape_cast %246 : vector<1x8x8xbf16> to vector<8x8xbf16>
    %248 = arith.truncf %245 : vector<8x256xf32> to vector<8x256xbf16>
    %cst_144 = arith.constant dense<0.000000e+00> : vector<8x256xf32>
    %249 = tpu.matmul %247, %248, %cst_144 {dimension_numbers = #tpu.dot_dimension_numbers<[1], [0], [0], [1], [0, 0, 1, 1], [], []>} : vector<8x8xbf16>, vector<8x256xbf16>, vector<8x256xf32> -> vector<8x256xf32>
    %250 = arith.addf %241, %249 : vector<8x256xf32>
    %c8_145 = arith.constant 8 : index
    %c0_146 = arith.constant 0 : index
    %251 = vector.load %arg3[%c8_145, %c0_146] : memref<9x256xf32, #tpu.memory_space<vmem>>, vector<1x256xf32>
    %c239_i32_147 = arith.constant 239 : i32
    %252 = tpu.dynamic_rotate %183 by %c239_i32_147 dim 1 : vector<8x256xf32>, i32 -> vector<8x256xf32>
    %253 = vector.broadcast %251 : vector<1x256xf32> to vector<8x256xf32>
    %254 = arith.mulf %252, %253 : vector<8x256xf32>
    %c8_148 = arith.constant 8 : index
    %c0_149 = arith.constant 0 : index
    %c0_150 = arith.constant 0 : index
    %255 = vector.load %arg9[%c8_148, %c0_149, %c0_150] : memref<9x8x8xbf16, #tpu.memory_space<vmem>>, vector<1x8x8xbf16>
    %256 = vector.shape_cast %255 : vector<1x8x8xbf16> to vector<8x8xbf16>
    %257 = arith.truncf %254 : vector<8x256xf32> to vector<8x256xbf16>
    %cst_151 = arith.constant dense<0.000000e+00> : vector<8x256xf32>
    %258 = tpu.matmul %256, %257, %cst_151 {dimension_numbers = #tpu.dot_dimension_numbers<[1], [0], [0], [1], [0, 0, 1, 1], [], []>} : vector<8x8xbf16>, vector<8x256xbf16>, vector<8x256xf32> -> vector<8x256xf32>
    %259 = arith.addf %250, %258 : vector<8x256xf32>
    %c0_152 = arith.constant 0 : index
    %c0_153 = arith.constant 0 : index
    %260 = vector.load %arg10[%c0_152, %c0_153] : memref<8x1xf32, #tpu.memory_space<vmem>>, vector<8x1xf32>
    %261 = vector.broadcast %260 : vector<8x1xf32> to vector<8x256xf32>
    %262 = arith.addf %259, %261 : vector<8x256xf32>
    %cst_154 = arith.constant 0.000000e+00 : f32
    %263 = vector.broadcast %cst_154 : f32 to vector<8x256xf32>
    %264 = arith.maximumf %262, %263 : vector<8x256xf32>
    %c0_155 = arith.constant 0 : index
    %c0_156 = arith.constant 0 : index
    %265 = vector.load %arg25[%c0_155, %c0_156] : memref<8x256xf32, #tpu.memory_space<vmem>>, vector<8x256xf32>
    tpu.vector_store %arg25[%c0_155, %c0_156], %264 {strides = array<i32>} : memref<8x256xf32, #tpu.memory_space<vmem>>, vector<8x256xf32>,
    %c255_i32_157 = arith.constant 255 : i32
    %266 = tpu.dynamic_rotate %264 by %c255_i32_157 dim 1 : vector<8x256xf32>, i32 -> vector<8x256xf32>
    %267 = arith.maximumf %264, %266 : vector<8x256xf32>
    %c240_i32_158 = arith.constant 240 : i32
    %268 = tpu.dynamic_rotate %267 by %c240_i32_158 dim 1 : vector<8x256xf32>, i32 -> vector<8x256xf32>
    %269 = arith.maximumf %267, %268 : vector<8x256xf32>
    %c0_159 = arith.constant 0 : index
    %c0_160 = arith.constant 0 : index
    %270 = vector.load %arg4[%c0_159, %c0_160] : memref<9x256xf32, #tpu.memory_space<vmem>>, vector<1x256xf32>
    %c34_i32 = arith.constant 34 : i32
    %271 = tpu.dynamic_rotate %269 by %c34_i32 dim 1 : vector<8x256xf32>, i32 -> vector<8x256xf32>
    %272 = vector.broadcast %270 : vector<1x256xf32> to vector<8x256xf32>
    %273 = arith.mulf %271, %272 : vector<8x256xf32>
    %c0_161 = arith.constant 0 : index
    %c0_162 = arith.constant 0 : index
    %c0_163 = arith.constant 0 : index
    %274 = vector.load %arg11[%c0_161, %c0_162, %c0_163] : memref<9x16x8xbf16, #tpu.memory_space<vmem>>, vector<1x16x8xbf16>
    %275 = vector.shape_cast %274 : vector<1x16x8xbf16> to vector<16x8xbf16>
    %276 = arith.truncf %273 : vector<8x256xf32> to vector<8x256xbf16>
    %cst_164 = arith.constant dense<0.000000e+00> : vector<16x256xf32>
    %277 = tpu.matmul %275, %276, %cst_164 {dimension_numbers = #tpu.dot_dimension_numbers<[1], [0], [0], [1], [0, 0, 1, 1], [], []>} : vector<16x8xbf16>, vector<8x256xbf16>, vector<16x256xf32> -> vector<16x256xf32>
    %c1_165 = arith.constant 1 : index
    %c0_166 = arith.constant 0 : index
    %278 = vector.load %arg4[%c1_165, %c0_166] : memref<9x256xf32, #tpu.memory_space<vmem>>, vector<1x256xf32>
    %c32_i32 = arith.constant 32 : i32
    %279 = tpu.dynamic_rotate %269 by %c32_i32 dim 1 : vector<8x256xf32>, i32 -> vector<8x256xf32>
    %280 = vector.broadcast %278 : vector<1x256xf32> to vector<8x256xf32>
    %281 = arith.mulf %279, %280 : vector<8x256xf32>
    %c1_167 = arith.constant 1 : index
    %c0_168 = arith.constant 0 : index
    %c0_169 = arith.constant 0 : index
    %282 = vector.load %arg11[%c1_167, %c0_168, %c0_169] : memref<9x16x8xbf16, #tpu.memory_space<vmem>>, vector<1x16x8xbf16>
    %283 = vector.shape_cast %282 : vector<1x16x8xbf16> to vector<16x8xbf16>
    %284 = arith.truncf %281 : vector<8x256xf32> to vector<8x256xbf16>
    %cst_170 = arith.constant dense<0.000000e+00> : vector<16x256xf32>
    %285 = tpu.matmul %283, %284, %cst_170 {dimension_numbers = #tpu.dot_dimension_numbers<[1], [0], [0], [1], [0, 0, 1, 1], [], []>} : vector<16x8xbf16>, vector<8x256xbf16>, vector<16x256xf32> -> vector<16x256xf32>
    %286 = arith.addf %277, %285 : vector<16x256xf32>
    %c2_171 = arith.constant 2 : index
    %c0_172 = arith.constant 0 : index
    %287 = vector.load %arg4[%c2_171, %c0_172] : memref<9x256xf32, #tpu.memory_space<vmem>>, vector<1x256xf32>
    %c30_i32 = arith.constant 30 : i32
    %288 = tpu.dynamic_rotate %269 by %c30_i32 dim 1 : vector<8x256xf32>, i32 -> vector<8x256xf32>
    %289 = vector.broadcast %287 : vector<1x256xf32> to vector<8x256xf32>
    %290 = arith.mulf %288, %289 : vector<8x256xf32>
    %c2_173 = arith.constant 2 : index
    %c0_174 = arith.constant 0 : index
    %c0_175 = arith.constant 0 : index
    %291 = vector.load %arg11[%c2_173, %c0_174, %c0_175] : memref<9x16x8xbf16, #tpu.memory_space<vmem>>, vector<1x16x8xbf16>
    %292 = vector.shape_cast %291 : vector<1x16x8xbf16> to vector<16x8xbf16>
    %293 = arith.truncf %290 : vector<8x256xf32> to vector<8x256xbf16>
    %cst_176 = arith.constant dense<0.000000e+00> : vector<16x256xf32>
    %294 = tpu.matmul %292, %293, %cst_176 {dimension_numbers = #tpu.dot_dimension_numbers<[1], [0], [0], [1], [0, 0, 1, 1], [], []>} : vector<16x8xbf16>, vector<8x256xbf16>, vector<16x256xf32> -> vector<16x256xf32>
    %295 = arith.addf %286, %294 : vector<16x256xf32>
    %c3_177 = arith.constant 3 : index
    %c0_178 = arith.constant 0 : index
    %296 = vector.load %arg4[%c3_177, %c0_178] : memref<9x256xf32, #tpu.memory_space<vmem>>, vector<1x256xf32>
    %c2_i32 = arith.constant 2 : i32
    %297 = tpu.dynamic_rotate %269 by %c2_i32 dim 1 : vector<8x256xf32>, i32 -> vector<8x256xf32>
    %298 = vector.broadcast %296 : vector<1x256xf32> to vector<8x256xf32>
    %299 = arith.mulf %297, %298 : vector<8x256xf32>
    %c3_179 = arith.constant 3 : index
    %c0_180 = arith.constant 0 : index
    %c0_181 = arith.constant 0 : index
    %300 = vector.load %arg11[%c3_179, %c0_180, %c0_181] : memref<9x16x8xbf16, #tpu.memory_space<vmem>>, vector<1x16x8xbf16>
    %301 = vector.shape_cast %300 : vector<1x16x8xbf16> to vector<16x8xbf16>
    %302 = arith.truncf %299 : vector<8x256xf32> to vector<8x256xbf16>
    %cst_182 = arith.constant dense<0.000000e+00> : vector<16x256xf32>
    %303 = tpu.matmul %301, %302, %cst_182 {dimension_numbers = #tpu.dot_dimension_numbers<[1], [0], [0], [1], [0, 0, 1, 1], [], []>} : vector<16x8xbf16>, vector<8x256xbf16>, vector<16x256xf32> -> vector<16x256xf32>
    %304 = arith.addf %295, %303 : vector<16x256xf32>
    %c4_183 = arith.constant 4 : index
    %c0_184 = arith.constant 0 : index
    %c0_185 = arith.constant 0 : index
    %305 = vector.load %arg11[%c4_183, %c0_184, %c0_185] : memref<9x16x8xbf16, #tpu.memory_space<vmem>>, vector<1x16x8xbf16>
    %306 = vector.shape_cast %305 : vector<1x16x8xbf16> to vector<16x8xbf16>
    %307 = arith.truncf %269 : vector<8x256xf32> to vector<8x256xbf16>
    %cst_186 = arith.constant dense<0.000000e+00> : vector<16x256xf32>
    %308 = tpu.matmul %306, %307, %cst_186 {dimension_numbers = #tpu.dot_dimension_numbers<[1], [0], [0], [1], [0, 0, 1, 1], [], []>} : vector<16x8xbf16>, vector<8x256xbf16>, vector<16x256xf32> -> vector<16x256xf32>
    %309 = arith.addf %304, %308 : vector<16x256xf32>
    %c5_187 = arith.constant 5 : index
    %c0_188 = arith.constant 0 : index
    %310 = vector.load %arg4[%c5_187, %c0_188] : memref<9x256xf32, #tpu.memory_space<vmem>>, vector<1x256xf32>
    %c254_i32 = arith.constant 254 : i32
    %311 = tpu.dynamic_rotate %269 by %c254_i32 dim 1 : vector<8x256xf32>, i32 -> vector<8x256xf32>
    %312 = vector.broadcast %310 : vector<1x256xf32> to vector<8x256xf32>
    %313 = arith.mulf %311, %312 : vector<8x256xf32>
    %c5_189 = arith.constant 5 : index
    %c0_190 = arith.constant 0 : index
    %c0_191 = arith.constant 0 : index
    %314 = vector.load %arg11[%c5_189, %c0_190, %c0_191] : memref<9x16x8xbf16, #tpu.memory_space<vmem>>, vector<1x16x8xbf16>
    %315 = vector.shape_cast %314 : vector<1x16x8xbf16> to vector<16x8xbf16>
    %316 = arith.truncf %313 : vector<8x256xf32> to vector<8x256xbf16>
    %cst_192 = arith.constant dense<0.000000e+00> : vector<16x256xf32>
    %317 = tpu.matmul %315, %316, %cst_192 {dimension_numbers = #tpu.dot_dimension_numbers<[1], [0], [0], [1], [0, 0, 1, 1], [], []>} : vector<16x8xbf16>, vector<8x256xbf16>, vector<16x256xf32> -> vector<16x256xf32>
    %318 = arith.addf %309, %317 : vector<16x256xf32>
    %c6_193 = arith.constant 6 : index
    %c0_194 = arith.constant 0 : index
    %319 = vector.load %arg4[%c6_193, %c0_194] : memref<9x256xf32, #tpu.memory_space<vmem>>, vector<1x256xf32>
    %c226_i32 = arith.constant 226 : i32
    %320 = tpu.dynamic_rotate %269 by %c226_i32 dim 1 : vector<8x256xf32>, i32 -> vector<8x256xf32>
    %321 = vector.broadcast %319 : vector<1x256xf32> to vector<8x256xf32>
    %322 = arith.mulf %320, %321 : vector<8x256xf32>
    %c6_195 = arith.constant 6 : index
    %c0_196 = arith.constant 0 : index
    %c0_197 = arith.constant 0 : index
    %323 = vector.load %arg11[%c6_195, %c0_196, %c0_197] : memref<9x16x8xbf16, #tpu.memory_space<vmem>>, vector<1x16x8xbf16>
    %324 = vector.shape_cast %323 : vector<1x16x8xbf16> to vector<16x8xbf16>
    %325 = arith.truncf %322 : vector<8x256xf32> to vector<8x256xbf16>
    %cst_198 = arith.constant dense<0.000000e+00> : vector<16x256xf32>
    %326 = tpu.matmul %324, %325, %cst_198 {dimension_numbers = #tpu.dot_dimension_numbers<[1], [0], [0], [1], [0, 0, 1, 1], [], []>} : vector<16x8xbf16>, vector<8x256xbf16>, vector<16x256xf32> -> vector<16x256xf32>
    %327 = arith.addf %318, %326 : vector<16x256xf32>
    %c7_199 = arith.constant 7 : index
    %c0_200 = arith.constant 0 : index
    %328 = vector.load %arg4[%c7_199, %c0_200] : memref<9x256xf32, #tpu.memory_space<vmem>>, vector<1x256xf32>
    %c224_i32 = arith.constant 224 : i32
    %329 = tpu.dynamic_rotate %269 by %c224_i32 dim 1 : vector<8x256xf32>, i32 -> vector<8x256xf32>
    %330 = vector.broadcast %328 : vector<1x256xf32> to vector<8x256xf32>
    %331 = arith.mulf %329, %330 : vector<8x256xf32>
    %c7_201 = arith.constant 7 : index
    %c0_202 = arith.constant 0 : index
    %c0_203 = arith.constant 0 : index
    %332 = vector.load %arg11[%c7_201, %c0_202, %c0_203] : memref<9x16x8xbf16, #tpu.memory_space<vmem>>, vector<1x16x8xbf16>
    %333 = vector.shape_cast %332 : vector<1x16x8xbf16> to vector<16x8xbf16>
    %334 = arith.truncf %331 : vector<8x256xf32> to vector<8x256xbf16>
    %cst_204 = arith.constant dense<0.000000e+00> : vector<16x256xf32>
    %335 = tpu.matmul %333, %334, %cst_204 {dimension_numbers = #tpu.dot_dimension_numbers<[1], [0], [0], [1], [0, 0, 1, 1], [], []>} : vector<16x8xbf16>, vector<8x256xbf16>, vector<16x256xf32> -> vector<16x256xf32>
    %336 = arith.addf %327, %335 : vector<16x256xf32>
    %c8_205 = arith.constant 8 : index
    %c0_206 = arith.constant 0 : index
    %337 = vector.load %arg4[%c8_205, %c0_206] : memref<9x256xf32, #tpu.memory_space<vmem>>, vector<1x256xf32>
    %c222_i32 = arith.constant 222 : i32
    %338 = tpu.dynamic_rotate %269 by %c222_i32 dim 1 : vector<8x256xf32>, i32 -> vector<8x256xf32>
    %339 = vector.broadcast %337 : vector<1x256xf32> to vector<8x256xf32>
    %340 = arith.mulf %338, %339 : vector<8x256xf32>
    %c8_207 = arith.constant 8 : index
    %c0_208 = arith.constant 0 : index
    %c0_209 = arith.constant 0 : index
    %341 = vector.load %arg11[%c8_207, %c0_208, %c0_209] : memref<9x16x8xbf16, #tpu.memory_space<vmem>>, vector<1x16x8xbf16>
    %342 = vector.shape_cast %341 : vector<1x16x8xbf16> to vector<16x8xbf16>
    %343 = arith.truncf %340 : vector<8x256xf32> to vector<8x256xbf16>
    %cst_210 = arith.constant dense<0.000000e+00> : vector<16x256xf32>
    %344 = tpu.matmul %342, %343, %cst_210 {dimension_numbers = #tpu.dot_dimension_numbers<[1], [0], [0], [1], [0, 0, 1, 1], [], []>} : vector<16x8xbf16>, vector<8x256xbf16>, vector<16x256xf32> -> vector<16x256xf32>
    %345 = arith.addf %336, %344 : vector<16x256xf32>
    %c0_211 = arith.constant 0 : index
    %c0_212 = arith.constant 0 : index
    %346 = vector.load %arg12[%c0_211, %c0_212] : memref<16x1xf32, #tpu.memory_space<vmem>>, vector<16x1xf32>
    %347 = vector.broadcast %346 : vector<16x1xf32> to vector<16x256xf32>
    %348 = arith.addf %345, %347 : vector<16x256xf32>
    %cst_213 = arith.constant 0.000000e+00 : f32
    %349 = vector.broadcast %cst_213 : f32 to vector<16x256xf32>
    %350 = arith.maximumf %348, %349 : vector<16x256xf32>
    %c0_214 = arith.constant 0 : index
    %c0_215 = arith.constant 0 : index
    %351 = vector.load %arg4[%c0_214, %c0_215] : memref<9x256xf32, #tpu.memory_space<vmem>>, vector<1x256xf32>
    %c34_i32_216 = arith.constant 34 : i32
    %352 = tpu.dynamic_rotate %350 by %c34_i32_216 dim 1 : vector<16x256xf32>, i32 -> vector<16x256xf32>
    %353 = vector.broadcast %351 : vector<1x256xf32> to vector<16x256xf32>
    %354 = arith.mulf %352, %353 : vector<16x256xf32>
    %c0_217 = arith.constant 0 : index
    %c0_218 = arith.constant 0 : index
    %c0_219 = arith.constant 0 : index
    %355 = vector.load %arg13[%c0_217, %c0_218, %c0_219] : memref<9x16x16xbf16, #tpu.memory_space<vmem>>, vector<1x16x16xbf16>
    %356 = vector.shape_cast %355 : vector<1x16x16xbf16> to vector<16x16xbf16>
    %357 = arith.truncf %354 : vector<16x256xf32> to vector<16x256xbf16>
    %cst_220 = arith.constant dense<0.000000e+00> : vector<16x256xf32>
    %358 = tpu.matmul %356, %357, %cst_220 {dimension_numbers = #tpu.dot_dimension_numbers<[1], [0], [0], [1], [0, 0, 1, 1], [], []>} : vector<16x16xbf16>, vector<16x256xbf16>, vector<16x256xf32> -> vector<16x256xf32>
    %c1_221 = arith.constant 1 : index
    %c0_222 = arith.constant 0 : index
    %359 = vector.load %arg4[%c1_221, %c0_222] : memref<9x256xf32, #tpu.memory_space<vmem>>, vector<1x256xf32>
    %c32_i32_223 = arith.constant 32 : i32
    %360 = tpu.dynamic_rotate %350 by %c32_i32_223 dim 1 : vector<16x256xf32>, i32 -> vector<16x256xf32>
    %361 = vector.broadcast %359 : vector<1x256xf32> to vector<16x256xf32>
    %362 = arith.mulf %360, %361 : vector<16x256xf32>
    %c1_224 = arith.constant 1 : index
    %c0_225 = arith.constant 0 : index
    %c0_226 = arith.constant 0 : index
    %363 = vector.load %arg13[%c1_224, %c0_225, %c0_226] : memref<9x16x16xbf16, #tpu.memory_space<vmem>>, vector<1x16x16xbf16>
    %364 = vector.shape_cast %363 : vector<1x16x16xbf16> to vector<16x16xbf16>
    %365 = arith.truncf %362 : vector<16x256xf32> to vector<16x256xbf16>
    %cst_227 = arith.constant dense<0.000000e+00> : vector<16x256xf32>
    %366 = tpu.matmul %364, %365, %cst_227 {dimension_numbers = #tpu.dot_dimension_numbers<[1], [0], [0], [1], [0, 0, 1, 1], [], []>} : vector<16x16xbf16>, vector<16x256xbf16>, vector<16x256xf32> -> vector<16x256xf32>
    %367 = arith.addf %358, %366 : vector<16x256xf32>
    %c2_228 = arith.constant 2 : index
    %c0_229 = arith.constant 0 : index
    %368 = vector.load %arg4[%c2_228, %c0_229] : memref<9x256xf32, #tpu.memory_space<vmem>>, vector<1x256xf32>
    %c30_i32_230 = arith.constant 30 : i32
    %369 = tpu.dynamic_rotate %350 by %c30_i32_230 dim 1 : vector<16x256xf32>, i32 -> vector<16x256xf32>
    %370 = vector.broadcast %368 : vector<1x256xf32> to vector<16x256xf32>
    %371 = arith.mulf %369, %370 : vector<16x256xf32>
    %c2_231 = arith.constant 2 : index
    %c0_232 = arith.constant 0 : index
    %c0_233 = arith.constant 0 : index
    %372 = vector.load %arg13[%c2_231, %c0_232, %c0_233] : memref<9x16x16xbf16, #tpu.memory_space<vmem>>, vector<1x16x16xbf16>
    %373 = vector.shape_cast %372 : vector<1x16x16xbf16> to vector<16x16xbf16>
    %374 = arith.truncf %371 : vector<16x256xf32> to vector<16x256xbf16>
    %cst_234 = arith.constant dense<0.000000e+00> : vector<16x256xf32>
    %375 = tpu.matmul %373, %374, %cst_234 {dimension_numbers = #tpu.dot_dimension_numbers<[1], [0], [0], [1], [0, 0, 1, 1], [], []>} : vector<16x16xbf16>, vector<16x256xbf16>, vector<16x256xf32> -> vector<16x256xf32>
    %376 = arith.addf %367, %375 : vector<16x256xf32>
    %c3_235 = arith.constant 3 : index
    %c0_236 = arith.constant 0 : index
    %377 = vector.load %arg4[%c3_235, %c0_236] : memref<9x256xf32, #tpu.memory_space<vmem>>, vector<1x256xf32>
    %c2_i32_237 = arith.constant 2 : i32
    %378 = tpu.dynamic_rotate %350 by %c2_i32_237 dim 1 : vector<16x256xf32>, i32 -> vector<16x256xf32>
    %379 = vector.broadcast %377 : vector<1x256xf32> to vector<16x256xf32>
    %380 = arith.mulf %378, %379 : vector<16x256xf32>
    %c3_238 = arith.constant 3 : index
    %c0_239 = arith.constant 0 : index
    %c0_240 = arith.constant 0 : index
    %381 = vector.load %arg13[%c3_238, %c0_239, %c0_240] : memref<9x16x16xbf16, #tpu.memory_space<vmem>>, vector<1x16x16xbf16>
    %382 = vector.shape_cast %381 : vector<1x16x16xbf16> to vector<16x16xbf16>
    %383 = arith.truncf %380 : vector<16x256xf32> to vector<16x256xbf16>
    %cst_241 = arith.constant dense<0.000000e+00> : vector<16x256xf32>
    %384 = tpu.matmul %382, %383, %cst_241 {dimension_numbers = #tpu.dot_dimension_numbers<[1], [0], [0], [1], [0, 0, 1, 1], [], []>} : vector<16x16xbf16>, vector<16x256xbf16>, vector<16x256xf32> -> vector<16x256xf32>
    %385 = arith.addf %376, %384 : vector<16x256xf32>
    %c4_242 = arith.constant 4 : index
    %c0_243 = arith.constant 0 : index
    %c0_244 = arith.constant 0 : index
    %386 = vector.load %arg13[%c4_242, %c0_243, %c0_244] : memref<9x16x16xbf16, #tpu.memory_space<vmem>>, vector<1x16x16xbf16>
    %387 = vector.shape_cast %386 : vector<1x16x16xbf16> to vector<16x16xbf16>
    %388 = arith.truncf %350 : vector<16x256xf32> to vector<16x256xbf16>
    %cst_245 = arith.constant dense<0.000000e+00> : vector<16x256xf32>
    %389 = tpu.matmul %387, %388, %cst_245 {dimension_numbers = #tpu.dot_dimension_numbers<[1], [0], [0], [1], [0, 0, 1, 1], [], []>} : vector<16x16xbf16>, vector<16x256xbf16>, vector<16x256xf32> -> vector<16x256xf32>
    %390 = arith.addf %385, %389 : vector<16x256xf32>
    %c5_246 = arith.constant 5 : index
    %c0_247 = arith.constant 0 : index
    %391 = vector.load %arg4[%c5_246, %c0_247] : memref<9x256xf32, #tpu.memory_space<vmem>>, vector<1x256xf32>
    %c254_i32_248 = arith.constant 254 : i32
    %392 = tpu.dynamic_rotate %350 by %c254_i32_248 dim 1 : vector<16x256xf32>, i32 -> vector<16x256xf32>
    %393 = vector.broadcast %391 : vector<1x256xf32> to vector<16x256xf32>
    %394 = arith.mulf %392, %393 : vector<16x256xf32>
    %c5_249 = arith.constant 5 : index
    %c0_250 = arith.constant 0 : index
    %c0_251 = arith.constant 0 : index
    %395 = vector.load %arg13[%c5_249, %c0_250, %c0_251] : memref<9x16x16xbf16, #tpu.memory_space<vmem>>, vector<1x16x16xbf16>
    %396 = vector.shape_cast %395 : vector<1x16x16xbf16> to vector<16x16xbf16>
    %397 = arith.truncf %394 : vector<16x256xf32> to vector<16x256xbf16>
    %cst_252 = arith.constant dense<0.000000e+00> : vector<16x256xf32>
    %398 = tpu.matmul %396, %397, %cst_252 {dimension_numbers = #tpu.dot_dimension_numbers<[1], [0], [0], [1], [0, 0, 1, 1], [], []>} : vector<16x16xbf16>, vector<16x256xbf16>, vector<16x256xf32> -> vector<16x256xf32>
    %399 = arith.addf %390, %398 : vector<16x256xf32>
    %c6_253 = arith.constant 6 : index
    %c0_254 = arith.constant 0 : index
    %400 = vector.load %arg4[%c6_253, %c0_254] : memref<9x256xf32, #tpu.memory_space<vmem>>, vector<1x256xf32>
    %c226_i32_255 = arith.constant 226 : i32
    %401 = tpu.dynamic_rotate %350 by %c226_i32_255 dim 1 : vector<16x256xf32>, i32 -> vector<16x256xf32>
    %402 = vector.broadcast %400 : vector<1x256xf32> to vector<16x256xf32>
    %403 = arith.mulf %401, %402 : vector<16x256xf32>
    %c6_256 = arith.constant 6 : index
    %c0_257 = arith.constant 0 : index
    %c0_258 = arith.constant 0 : index
    %404 = vector.load %arg13[%c6_256, %c0_257, %c0_258] : memref<9x16x16xbf16, #tpu.memory_space<vmem>>, vector<1x16x16xbf16>
    %405 = vector.shape_cast %404 : vector<1x16x16xbf16> to vector<16x16xbf16>
    %406 = arith.truncf %403 : vector<16x256xf32> to vector<16x256xbf16>
    %cst_259 = arith.constant dense<0.000000e+00> : vector<16x256xf32>
    %407 = tpu.matmul %405, %406, %cst_259 {dimension_numbers = #tpu.dot_dimension_numbers<[1], [0], [0], [1], [0, 0, 1, 1], [], []>} : vector<16x16xbf16>, vector<16x256xbf16>, vector<16x256xf32> -> vector<16x256xf32>
    %408 = arith.addf %399, %407 : vector<16x256xf32>
    %c7_260 = arith.constant 7 : index
    %c0_261 = arith.constant 0 : index
    %409 = vector.load %arg4[%c7_260, %c0_261] : memref<9x256xf32, #tpu.memory_space<vmem>>, vector<1x256xf32>
    %c224_i32_262 = arith.constant 224 : i32
    %410 = tpu.dynamic_rotate %350 by %c224_i32_262 dim 1 : vector<16x256xf32>, i32 -> vector<16x256xf32>
    %411 = vector.broadcast %409 : vector<1x256xf32> to vector<16x256xf32>
    %412 = arith.mulf %410, %411 : vector<16x256xf32>
    %c7_263 = arith.constant 7 : index
    %c0_264 = arith.constant 0 : index
    %c0_265 = arith.constant 0 : index
    %413 = vector.load %arg13[%c7_263, %c0_264, %c0_265] : memref<9x16x16xbf16, #tpu.memory_space<vmem>>, vector<1x16x16xbf16>
    %414 = vector.shape_cast %413 : vector<1x16x16xbf16> to vector<16x16xbf16>
    %415 = arith.truncf %412 : vector<16x256xf32> to vector<16x256xbf16>
    %cst_266 = arith.constant dense<0.000000e+00> : vector<16x256xf32>
    %416 = tpu.matmul %414, %415, %cst_266 {dimension_numbers = #tpu.dot_dimension_numbers<[1], [0], [0], [1], [0, 0, 1, 1], [], []>} : vector<16x16xbf16>, vector<16x256xbf16>, vector<16x256xf32> -> vector<16x256xf32>
    %417 = arith.addf %408, %416 : vector<16x256xf32>
    %c8_267 = arith.constant 8 : index
    %c0_268 = arith.constant 0 : index
    %418 = vector.load %arg4[%c8_267, %c0_268] : memref<9x256xf32, #tpu.memory_space<vmem>>, vector<1x256xf32>
    %c222_i32_269 = arith.constant 222 : i32
    %419 = tpu.dynamic_rotate %350 by %c222_i32_269 dim 1 : vector<16x256xf32>, i32 -> vector<16x256xf32>
    %420 = vector.broadcast %418 : vector<1x256xf32> to vector<16x256xf32>
    %421 = arith.mulf %419, %420 : vector<16x256xf32>
    %c8_270 = arith.constant 8 : index
    %c0_271 = arith.constant 0 : index
    %c0_272 = arith.constant 0 : index
    %422 = vector.load %arg13[%c8_270, %c0_271, %c0_272] : memref<9x16x16xbf16, #tpu.memory_space<vmem>>, vector<1x16x16xbf16>
    %423 = vector.shape_cast %422 : vector<1x16x16xbf16> to vector<16x16xbf16>
    %424 = arith.truncf %421 : vector<16x256xf32> to vector<16x256xbf16>
    %cst_273 = arith.constant dense<0.000000e+00> : vector<16x256xf32>
    %425 = tpu.matmul %423, %424, %cst_273 {dimension_numbers = #tpu.dot_dimension_numbers<[1], [0], [0], [1], [0, 0, 1, 1], [], []>} : vector<16x16xbf16>, vector<16x256xbf16>, vector<16x256xf32> -> vector<16x256xf32>
    %426 = arith.addf %417, %425 : vector<16x256xf32>
    %c0_274 = arith.constant 0 : index
    %c0_275 = arith.constant 0 : index
    %427 = vector.load %arg14[%c0_274, %c0_275] : memref<16x1xf32, #tpu.memory_space<vmem>>, vector<16x1xf32>
    %428 = vector.broadcast %427 : vector<16x1xf32> to vector<16x256xf32>
    %429 = arith.addf %426, %428 : vector<16x256xf32>
    %cst_276 = arith.constant 0.000000e+00 : f32
    %430 = vector.broadcast %cst_276 : f32 to vector<16x256xf32>
    %431 = arith.maximumf %429, %430 : vector<16x256xf32>
    %c0_277 = arith.constant 0 : index
    %c0_278 = arith.constant 0 : index
    %432 = vector.load %arg5[%c0_277, %c0_278] : memref<2x256xf32, #tpu.memory_space<vmem>>, vector<1x256xf32>
    %c1_279 = arith.constant 1 : index
    %c0_280 = arith.constant 0 : index
    %433 = vector.load %arg5[%c1_279, %c0_280] : memref<2x256xf32, #tpu.memory_space<vmem>>, vector<1x256xf32>
    %c1_i32_281 = arith.constant 1 : i32
    %434 = tpu.dynamic_rotate %431 by %c1_i32_281 dim 1 : vector<16x256xf32>, i32 -> vector<16x256xf32>
    %435 = arith.subf %434, %431 : vector<16x256xf32>
    %436 = vector.broadcast %432 : vector<1x256xf32> to vector<16x256xf32>
    %437 = arith.mulf %436, %435 : vector<16x256xf32>
    %438 = arith.addf %431, %437 : vector<16x256xf32>
    %c16_i32_282 = arith.constant 16 : i32
    %439 = tpu.dynamic_rotate %438 by %c16_i32_282 dim 1 : vector<16x256xf32>, i32 -> vector<16x256xf32>
    %440 = arith.subf %439, %438 : vector<16x256xf32>
    %441 = vector.broadcast %433 : vector<1x256xf32> to vector<16x256xf32>
    %442 = arith.mulf %441, %440 : vector<16x256xf32>
    %443 = arith.addf %438, %442 : vector<16x256xf32>
    %c0_283 = arith.constant 0 : index
    %c0_284 = arith.constant 0 : index
    %444 = vector.load %arg25[%c0_283, %c0_284] : memref<8x256xf32, #tpu.memory_space<vmem>>, vector<8x256xf32>
    %c0_285 = arith.constant 0 : index
    %c0_286 = arith.constant 0 : index
    %445 = vector.load %arg3[%c0_285, %c0_286] : memref<9x256xf32, #tpu.memory_space<vmem>>, vector<1x256xf32>
    %c17_i32_287 = arith.constant 17 : i32
    %446 = tpu.dynamic_rotate %443 by %c17_i32_287 dim 1 : vector<16x256xf32>, i32 -> vector<16x256xf32>
    %447 = vector.broadcast %445 : vector<1x256xf32> to vector<16x256xf32>
    %448 = arith.mulf %446, %447 : vector<16x256xf32>
    %c0_288 = arith.constant 0 : index
    %c0_289 = arith.constant 0 : index
    %c0_290 = arith.constant 0 : index
    %449 = vector.load %arg15[%c0_288, %c0_289, %c0_290] : memref<9x8x16xbf16, #tpu.memory_space<vmem>>, vector<1x8x16xbf16>
    %450 = vector.shape_cast %449 : vector<1x8x16xbf16> to vector<8x16xbf16>
    %451 = arith.truncf %448 : vector<16x256xf32> to vector<16x256xbf16>
    %cst_291 = arith.constant dense<0.000000e+00> : vector<8x256xf32>
    %452 = tpu.matmul %450, %451, %cst_291 {dimension_numbers = #tpu.dot_dimension_numbers<[1], [0], [0], [1], [0, 0, 1, 1], [], []>} : vector<8x16xbf16>, vector<16x256xbf16>, vector<8x256xf32> -> vector<8x256xf32>
    %c17_i32_292 = arith.constant 17 : i32
    %453 = tpu.dynamic_rotate %444 by %c17_i32_292 dim 1 : vector<8x256xf32>, i32 -> vector<8x256xf32>
    %454 = vector.broadcast %445 : vector<1x256xf32> to vector<8x256xf32>
    %455 = arith.mulf %453, %454 : vector<8x256xf32>
    %c0_293 = arith.constant 0 : index
    %c0_294 = arith.constant 0 : index
    %c0_295 = arith.constant 0 : index
    %456 = vector.load %arg16[%c0_293, %c0_294, %c0_295] : memref<9x8x8xbf16, #tpu.memory_space<vmem>>, vector<1x8x8xbf16>
    %457 = vector.shape_cast %456 : vector<1x8x8xbf16> to vector<8x8xbf16>
    %458 = arith.truncf %455 : vector<8x256xf32> to vector<8x256xbf16>
    %cst_296 = arith.constant dense<0.000000e+00> : vector<8x256xf32>
    %459 = tpu.matmul %457, %458, %cst_296 {dimension_numbers = #tpu.dot_dimension_numbers<[1], [0], [0], [1], [0, 0, 1, 1], [], []>} : vector<8x8xbf16>, vector<8x256xbf16>, vector<8x256xf32> -> vector<8x256xf32>
    %460 = arith.addf %452, %459 : vector<8x256xf32>
    %c1_297 = arith.constant 1 : index
    %c0_298 = arith.constant 0 : index
    %461 = vector.load %arg3[%c1_297, %c0_298] : memref<9x256xf32, #tpu.memory_space<vmem>>, vector<1x256xf32>
    %c16_i32_299 = arith.constant 16 : i32
    %462 = tpu.dynamic_rotate %443 by %c16_i32_299 dim 1 : vector<16x256xf32>, i32 -> vector<16x256xf32>
    %463 = vector.broadcast %461 : vector<1x256xf32> to vector<16x256xf32>
    %464 = arith.mulf %462, %463 : vector<16x256xf32>
    %c1_300 = arith.constant 1 : index
    %c0_301 = arith.constant 0 : index
    %c0_302 = arith.constant 0 : index
    %465 = vector.load %arg15[%c1_300, %c0_301, %c0_302] : memref<9x8x16xbf16, #tpu.memory_space<vmem>>, vector<1x8x16xbf16>
    %466 = vector.shape_cast %465 : vector<1x8x16xbf16> to vector<8x16xbf16>
    %467 = arith.truncf %464 : vector<16x256xf32> to vector<16x256xbf16>
    %cst_303 = arith.constant dense<0.000000e+00> : vector<8x256xf32>
    %468 = tpu.matmul %466, %467, %cst_303 {dimension_numbers = #tpu.dot_dimension_numbers<[1], [0], [0], [1], [0, 0, 1, 1], [], []>} : vector<8x16xbf16>, vector<16x256xbf16>, vector<8x256xf32> -> vector<8x256xf32>
    %469 = arith.addf %460, %468 : vector<8x256xf32>
    %c16_i32_304 = arith.constant 16 : i32
    %470 = tpu.dynamic_rotate %444 by %c16_i32_304 dim 1 : vector<8x256xf32>, i32 -> vector<8x256xf32>
    %471 = vector.broadcast %461 : vector<1x256xf32> to vector<8x256xf32>
    %472 = arith.mulf %470, %471 : vector<8x256xf32>
    %c1_305 = arith.constant 1 : index
    %c0_306 = arith.constant 0 : index
    %c0_307 = arith.constant 0 : index
    %473 = vector.load %arg16[%c1_305, %c0_306, %c0_307] : memref<9x8x8xbf16, #tpu.memory_space<vmem>>, vector<1x8x8xbf16>
    %474 = vector.shape_cast %473 : vector<1x8x8xbf16> to vector<8x8xbf16>
    %475 = arith.truncf %472 : vector<8x256xf32> to vector<8x256xbf16>
    %cst_308 = arith.constant dense<0.000000e+00> : vector<8x256xf32>
    %476 = tpu.matmul %474, %475, %cst_308 {dimension_numbers = #tpu.dot_dimension_numbers<[1], [0], [0], [1], [0, 0, 1, 1], [], []>} : vector<8x8xbf16>, vector<8x256xbf16>, vector<8x256xf32> -> vector<8x256xf32>
    %477 = arith.addf %469, %476 : vector<8x256xf32>
    %c2_309 = arith.constant 2 : index
    %c0_310 = arith.constant 0 : index
    %478 = vector.load %arg3[%c2_309, %c0_310] : memref<9x256xf32, #tpu.memory_space<vmem>>, vector<1x256xf32>
    %c15_i32_311 = arith.constant 15 : i32
    %479 = tpu.dynamic_rotate %443 by %c15_i32_311 dim 1 : vector<16x256xf32>, i32 -> vector<16x256xf32>
    %480 = vector.broadcast %478 : vector<1x256xf32> to vector<16x256xf32>
    %481 = arith.mulf %479, %480 : vector<16x256xf32>
    %c2_312 = arith.constant 2 : index
    %c0_313 = arith.constant 0 : index
    %c0_314 = arith.constant 0 : index
    %482 = vector.load %arg15[%c2_312, %c0_313, %c0_314] : memref<9x8x16xbf16, #tpu.memory_space<vmem>>, vector<1x8x16xbf16>
    %483 = vector.shape_cast %482 : vector<1x8x16xbf16> to vector<8x16xbf16>
    %484 = arith.truncf %481 : vector<16x256xf32> to vector<16x256xbf16>
    %cst_315 = arith.constant dense<0.000000e+00> : vector<8x256xf32>
    %485 = tpu.matmul %483, %484, %cst_315 {dimension_numbers = #tpu.dot_dimension_numbers<[1], [0], [0], [1], [0, 0, 1, 1], [], []>} : vector<8x16xbf16>, vector<16x256xbf16>, vector<8x256xf32> -> vector<8x256xf32>
    %486 = arith.addf %477, %485 : vector<8x256xf32>
    %c15_i32_316 = arith.constant 15 : i32
    %487 = tpu.dynamic_rotate %444 by %c15_i32_316 dim 1 : vector<8x256xf32>, i32 -> vector<8x256xf32>
    %488 = vector.broadcast %478 : vector<1x256xf32> to vector<8x256xf32>
    %489 = arith.mulf %487, %488 : vector<8x256xf32>
    %c2_317 = arith.constant 2 : index
    %c0_318 = arith.constant 0 : index
    %c0_319 = arith.constant 0 : index
    %490 = vector.load %arg16[%c2_317, %c0_318, %c0_319] : memref<9x8x8xbf16, #tpu.memory_space<vmem>>, vector<1x8x8xbf16>
    %491 = vector.shape_cast %490 : vector<1x8x8xbf16> to vector<8x8xbf16>
    %492 = arith.truncf %489 : vector<8x256xf32> to vector<8x256xbf16>
    %cst_320 = arith.constant dense<0.000000e+00> : vector<8x256xf32>
    %493 = tpu.matmul %491, %492, %cst_320 {dimension_numbers = #tpu.dot_dimension_numbers<[1], [0], [0], [1], [0, 0, 1, 1], [], []>} : vector<8x8xbf16>, vector<8x256xbf16>, vector<8x256xf32> -> vector<8x256xf32>
    %494 = arith.addf %486, %493 : vector<8x256xf32>
    %c3_321 = arith.constant 3 : index
    %c0_322 = arith.constant 0 : index
    %495 = vector.load %arg3[%c3_321, %c0_322] : memref<9x256xf32, #tpu.memory_space<vmem>>, vector<1x256xf32>
    %c1_i32_323 = arith.constant 1 : i32
    %496 = tpu.dynamic_rotate %443 by %c1_i32_323 dim 1 : vector<16x256xf32>, i32 -> vector<16x256xf32>
    %497 = vector.broadcast %495 : vector<1x256xf32> to vector<16x256xf32>
    %498 = arith.mulf %496, %497 : vector<16x256xf32>
    %c3_324 = arith.constant 3 : index
    %c0_325 = arith.constant 0 : index
    %c0_326 = arith.constant 0 : index
    %499 = vector.load %arg15[%c3_324, %c0_325, %c0_326] : memref<9x8x16xbf16, #tpu.memory_space<vmem>>, vector<1x8x16xbf16>
    %500 = vector.shape_cast %499 : vector<1x8x16xbf16> to vector<8x16xbf16>
    %501 = arith.truncf %498 : vector<16x256xf32> to vector<16x256xbf16>
    %cst_327 = arith.constant dense<0.000000e+00> : vector<8x256xf32>
    %502 = tpu.matmul %500, %501, %cst_327 {dimension_numbers = #tpu.dot_dimension_numbers<[1], [0], [0], [1], [0, 0, 1, 1], [], []>} : vector<8x16xbf16>, vector<16x256xbf16>, vector<8x256xf32> -> vector<8x256xf32>
    %503 = arith.addf %494, %502 : vector<8x256xf32>
    %c1_i32_328 = arith.constant 1 : i32
    %504 = tpu.dynamic_rotate %444 by %c1_i32_328 dim 1 : vector<8x256xf32>, i32 -> vector<8x256xf32>
    %505 = vector.broadcast %495 : vector<1x256xf32> to vector<8x256xf32>
    %506 = arith.mulf %504, %505 : vector<8x256xf32>
    %c3_329 = arith.constant 3 : index
    %c0_330 = arith.constant 0 : index
    %c0_331 = arith.constant 0 : index
    %507 = vector.load %arg16[%c3_329, %c0_330, %c0_331] : memref<9x8x8xbf16, #tpu.memory_space<vmem>>, vector<1x8x8xbf16>
    %508 = vector.shape_cast %507 : vector<1x8x8xbf16> to vector<8x8xbf16>
    %509 = arith.truncf %506 : vector<8x256xf32> to vector<8x256xbf16>
    %cst_332 = arith.constant dense<0.000000e+00> : vector<8x256xf32>
    %510 = tpu.matmul %508, %509, %cst_332 {dimension_numbers = #tpu.dot_dimension_numbers<[1], [0], [0], [1], [0, 0, 1, 1], [], []>} : vector<8x8xbf16>, vector<8x256xbf16>, vector<8x256xf32> -> vector<8x256xf32>
    %511 = arith.addf %503, %510 : vector<8x256xf32>
    %c4_333 = arith.constant 4 : index
    %c0_334 = arith.constant 0 : index
    %c0_335 = arith.constant 0 : index
    %512 = vector.load %arg15[%c4_333, %c0_334, %c0_335] : memref<9x8x16xbf16, #tpu.memory_space<vmem>>, vector<1x8x16xbf16>
    %513 = vector.shape_cast %512 : vector<1x8x16xbf16> to vector<8x16xbf16>
    %514 = arith.truncf %443 : vector<16x256xf32> to vector<16x256xbf16>
    %cst_336 = arith.constant dense<0.000000e+00> : vector<8x256xf32>
    %515 = tpu.matmul %513, %514, %cst_336 {dimension_numbers = #tpu.dot_dimension_numbers<[1], [0], [0], [1], [0, 0, 1, 1], [], []>} : vector<8x16xbf16>, vector<16x256xbf16>, vector<8x256xf32> -> vector<8x256xf32>
    %516 = arith.addf %511, %515 : vector<8x256xf32>
    %c4_337 = arith.constant 4 : index
    %c0_338 = arith.constant 0 : index
    %c0_339 = arith.constant 0 : index
    %517 = vector.load %arg16[%c4_337, %c0_338, %c0_339] : memref<9x8x8xbf16, #tpu.memory_space<vmem>>, vector<1x8x8xbf16>
    %518 = vector.shape_cast %517 : vector<1x8x8xbf16> to vector<8x8xbf16>
    %519 = arith.truncf %444 : vector<8x256xf32> to vector<8x256xbf16>
    %cst_340 = arith.constant dense<0.000000e+00> : vector<8x256xf32>
    %520 = tpu.matmul %518, %519, %cst_340 {dimension_numbers = #tpu.dot_dimension_numbers<[1], [0], [0], [1], [0, 0, 1, 1], [], []>} : vector<8x8xbf16>, vector<8x256xbf16>, vector<8x256xf32> -> vector<8x256xf32>
    %521 = arith.addf %516, %520 : vector<8x256xf32>
    %c5_341 = arith.constant 5 : index
    %c0_342 = arith.constant 0 : index
    %522 = vector.load %arg3[%c5_341, %c0_342] : memref<9x256xf32, #tpu.memory_space<vmem>>, vector<1x256xf32>
    %c255_i32_343 = arith.constant 255 : i32
    %523 = tpu.dynamic_rotate %443 by %c255_i32_343 dim 1 : vector<16x256xf32>, i32 -> vector<16x256xf32>
    %524 = vector.broadcast %522 : vector<1x256xf32> to vector<16x256xf32>
    %525 = arith.mulf %523, %524 : vector<16x256xf32>
    %c5_344 = arith.constant 5 : index
    %c0_345 = arith.constant 0 : index
    %c0_346 = arith.constant 0 : index
    %526 = vector.load %arg15[%c5_344, %c0_345, %c0_346] : memref<9x8x16xbf16, #tpu.memory_space<vmem>>, vector<1x8x16xbf16>
    %527 = vector.shape_cast %526 : vector<1x8x16xbf16> to vector<8x16xbf16>
    %528 = arith.truncf %525 : vector<16x256xf32> to vector<16x256xbf16>
    %cst_347 = arith.constant dense<0.000000e+00> : vector<8x256xf32>
    %529 = tpu.matmul %527, %528, %cst_347 {dimension_numbers = #tpu.dot_dimension_numbers<[1], [0], [0], [1], [0, 0, 1, 1], [], []>} : vector<8x16xbf16>, vector<16x256xbf16>, vector<8x256xf32> -> vector<8x256xf32>
    %530 = arith.addf %521, %529 : vector<8x256xf32>
    %c255_i32_348 = arith.constant 255 : i32
    %531 = tpu.dynamic_rotate %444 by %c255_i32_348 dim 1 : vector<8x256xf32>, i32 -> vector<8x256xf32>
    %532 = vector.broadcast %522 : vector<1x256xf32> to vector<8x256xf32>
    %533 = arith.mulf %531, %532 : vector<8x256xf32>
    %c5_349 = arith.constant 5 : index
    %c0_350 = arith.constant 0 : index
    %c0_351 = arith.constant 0 : index
    %534 = vector.load %arg16[%c5_349, %c0_350, %c0_351] : memref<9x8x8xbf16, #tpu.memory_space<vmem>>, vector<1x8x8xbf16>
    %535 = vector.shape_cast %534 : vector<1x8x8xbf16> to vector<8x8xbf16>
    %536 = arith.truncf %533 : vector<8x256xf32> to vector<8x256xbf16>
    %cst_352 = arith.constant dense<0.000000e+00> : vector<8x256xf32>
    %537 = tpu.matmul %535, %536, %cst_352 {dimension_numbers = #tpu.dot_dimension_numbers<[1], [0], [0], [1], [0, 0, 1, 1], [], []>} : vector<8x8xbf16>, vector<8x256xbf16>, vector<8x256xf32> -> vector<8x256xf32>
    %538 = arith.addf %530, %537 : vector<8x256xf32>
    %c6_353 = arith.constant 6 : index
    %c0_354 = arith.constant 0 : index
    %539 = vector.load %arg3[%c6_353, %c0_354] : memref<9x256xf32, #tpu.memory_space<vmem>>, vector<1x256xf32>
    %c241_i32_355 = arith.constant 241 : i32
    %540 = tpu.dynamic_rotate %443 by %c241_i32_355 dim 1 : vector<16x256xf32>, i32 -> vector<16x256xf32>
    %541 = vector.broadcast %539 : vector<1x256xf32> to vector<16x256xf32>
    %542 = arith.mulf %540, %541 : vector<16x256xf32>
    %c6_356 = arith.constant 6 : index
    %c0_357 = arith.constant 0 : index
    %c0_358 = arith.constant 0 : index
    %543 = vector.load %arg15[%c6_356, %c0_357, %c0_358] : memref<9x8x16xbf16, #tpu.memory_space<vmem>>, vector<1x8x16xbf16>
    %544 = vector.shape_cast %543 : vector<1x8x16xbf16> to vector<8x16xbf16>
    %545 = arith.truncf %542 : vector<16x256xf32> to vector<16x256xbf16>
    %cst_359 = arith.constant dense<0.000000e+00> : vector<8x256xf32>
    %546 = tpu.matmul %544, %545, %cst_359 {dimension_numbers = #tpu.dot_dimension_numbers<[1], [0], [0], [1], [0, 0, 1, 1], [], []>} : vector<8x16xbf16>, vector<16x256xbf16>, vector<8x256xf32> -> vector<8x256xf32>
    %547 = arith.addf %538, %546 : vector<8x256xf32>
    %c241_i32_360 = arith.constant 241 : i32
    %548 = tpu.dynamic_rotate %444 by %c241_i32_360 dim 1 : vector<8x256xf32>, i32 -> vector<8x256xf32>
    %549 = vector.broadcast %539 : vector<1x256xf32> to vector<8x256xf32>
    %550 = arith.mulf %548, %549 : vector<8x256xf32>
    %c6_361 = arith.constant 6 : index
    %c0_362 = arith.constant 0 : index
    %c0_363 = arith.constant 0 : index
    %551 = vector.load %arg16[%c6_361, %c0_362, %c0_363] : memref<9x8x8xbf16, #tpu.memory_space<vmem>>, vector<1x8x8xbf16>
    %552 = vector.shape_cast %551 : vector<1x8x8xbf16> to vector<8x8xbf16>
    %553 = arith.truncf %550 : vector<8x256xf32> to vector<8x256xbf16>
    %cst_364 = arith.constant dense<0.000000e+00> : vector<8x256xf32>
    %554 = tpu.matmul %552, %553, %cst_364 {dimension_numbers = #tpu.dot_dimension_numbers<[1], [0], [0], [1], [0, 0, 1, 1], [], []>} : vector<8x8xbf16>, vector<8x256xbf16>, vector<8x256xf32> -> vector<8x256xf32>
    %555 = arith.addf %547, %554 : vector<8x256xf32>
    %c7_365 = arith.constant 7 : index
    %c0_366 = arith.constant 0 : index
    %556 = vector.load %arg3[%c7_365, %c0_366] : memref<9x256xf32, #tpu.memory_space<vmem>>, vector<1x256xf32>
    %c240_i32_367 = arith.constant 240 : i32
    %557 = tpu.dynamic_rotate %443 by %c240_i32_367 dim 1 : vector<16x256xf32>, i32 -> vector<16x256xf32>
    %558 = vector.broadcast %556 : vector<1x256xf32> to vector<16x256xf32>
    %559 = arith.mulf %557, %558 : vector<16x256xf32>
    %c7_368 = arith.constant 7 : index
    %c0_369 = arith.constant 0 : index
    %c0_370 = arith.constant 0 : index
    %560 = vector.load %arg15[%c7_368, %c0_369, %c0_370] : memref<9x8x16xbf16, #tpu.memory_space<vmem>>, vector<1x8x16xbf16>
    %561 = vector.shape_cast %560 : vector<1x8x16xbf16> to vector<8x16xbf16>
    %562 = arith.truncf %559 : vector<16x256xf32> to vector<16x256xbf16>
    %cst_371 = arith.constant dense<0.000000e+00> : vector<8x256xf32>
    %563 = tpu.matmul %561, %562, %cst_371 {dimension_numbers = #tpu.dot_dimension_numbers<[1], [0], [0], [1], [0, 0, 1, 1], [], []>} : vector<8x16xbf16>, vector<16x256xbf16>, vector<8x256xf32> -> vector<8x256xf32>
    %564 = arith.addf %555, %563 : vector<8x256xf32>
    %c240_i32_372 = arith.constant 240 : i32
    %565 = tpu.dynamic_rotate %444 by %c240_i32_372 dim 1 : vector<8x256xf32>, i32 -> vector<8x256xf32>
    %566 = vector.broadcast %556 : vector<1x256xf32> to vector<8x256xf32>
    %567 = arith.mulf %565, %566 : vector<8x256xf32>
    %c7_373 = arith.constant 7 : index
    %c0_374 = arith.constant 0 : index
    %c0_375 = arith.constant 0 : index
    %568 = vector.load %arg16[%c7_373, %c0_374, %c0_375] : memref<9x8x8xbf16, #tpu.memory_space<vmem>>, vector<1x8x8xbf16>
    %569 = vector.shape_cast %568 : vector<1x8x8xbf16> to vector<8x8xbf16>
    %570 = arith.truncf %567 : vector<8x256xf32> to vector<8x256xbf16>
    %cst_376 = arith.constant dense<0.000000e+00> : vector<8x256xf32>
    %571 = tpu.matmul %569, %570, %cst_376 {dimension_numbers = #tpu.dot_dimension_numbers<[1], [0], [0], [1], [0, 0, 1, 1], [], []>} : vector<8x8xbf16>, vector<8x256xbf16>, vector<8x256xf32> -> vector<8x256xf32>
    %572 = arith.addf %564, %571 : vector<8x256xf32>
    %c8_377 = arith.constant 8 : index
    %c0_378 = arith.constant 0 : index
    %573 = vector.load %arg3[%c8_377, %c0_378] : memref<9x256xf32, #tpu.memory_space<vmem>>, vector<1x256xf32>
    %c239_i32_379 = arith.constant 239 : i32
    %574 = tpu.dynamic_rotate %443 by %c239_i32_379 dim 1 : vector<16x256xf32>, i32 -> vector<16x256xf32>
    %575 = vector.broadcast %573 : vector<1x256xf32> to vector<16x256xf32>
    %576 = arith.mulf %574, %575 : vector<16x256xf32>
    %c8_380 = arith.constant 8 : index
    %c0_381 = arith.constant 0 : index
    %c0_382 = arith.constant 0 : index
    %577 = vector.load %arg15[%c8_380, %c0_381, %c0_382] : memref<9x8x16xbf16, #tpu.memory_space<vmem>>, vector<1x8x16xbf16>
    %578 = vector.shape_cast %577 : vector<1x8x16xbf16> to vector<8x16xbf16>
    %579 = arith.truncf %576 : vector<16x256xf32> to vector<16x256xbf16>
    %cst_383 = arith.constant dense<0.000000e+00> : vector<8x256xf32>
    %580 = tpu.matmul %578, %579, %cst_383 {dimension_numbers = #tpu.dot_dimension_numbers<[1], [0], [0], [1], [0, 0, 1, 1], [], []>} : vector<8x16xbf16>, vector<16x256xbf16>, vector<8x256xf32> -> vector<8x256xf32>
    %581 = arith.addf %572, %580 : vector<8x256xf32>
    %c239_i32_384 = arith.constant 239 : i32
    %582 = tpu.dynamic_rotate %444 by %c239_i32_384 dim 1 : vector<8x256xf32>, i32 -> vector<8x256xf32>
    %583 = vector.broadcast %573 : vector<1x256xf32> to vector<8x256xf32>
    %584 = arith.mulf %582, %583 : vector<8x256xf32>
    %c8_385 = arith.constant 8 : index
    %c0_386 = arith.constant 0 : index
    %c0_387 = arith.constant 0 : index
    %585 = vector.load %arg16[%c8_385, %c0_386, %c0_387] : memref<9x8x8xbf16, #tpu.memory_space<vmem>>, vector<1x8x8xbf16>
    %586 = vector.shape_cast %585 : vector<1x8x8xbf16> to vector<8x8xbf16>
    %587 = arith.truncf %584 : vector<8x256xf32> to vector<8x256xbf16>
    %cst_388 = arith.constant dense<0.000000e+00> : vector<8x256xf32>
    %588 = tpu.matmul %586, %587, %cst_388 {dimension_numbers = #tpu.dot_dimension_numbers<[1], [0], [0], [1], [0, 0, 1, 1], [], []>} : vector<8x8xbf16>, vector<8x256xbf16>, vector<8x256xf32> -> vector<8x256xf32>
    %589 = arith.addf %581, %588 : vector<8x256xf32>
    %c0_389 = arith.constant 0 : index
    %c0_390 = arith.constant 0 : index
    %590 = vector.load %arg17[%c0_389, %c0_390] : memref<8x1xf32, #tpu.memory_space<vmem>>, vector<8x1xf32>
    %591 = vector.broadcast %590 : vector<8x1xf32> to vector<8x256xf32>
    %592 = arith.addf %589, %591 : vector<8x256xf32>
    %cst_391 = arith.constant 0.000000e+00 : f32
    %593 = vector.broadcast %cst_391 : f32 to vector<8x256xf32>
    %594 = arith.maximumf %592, %593 : vector<8x256xf32>
    %c0_392 = arith.constant 0 : index
    %c0_393 = arith.constant 0 : index
    %595 = vector.load %arg3[%c0_392, %c0_393] : memref<9x256xf32, #tpu.memory_space<vmem>>, vector<1x256xf32>
    %c17_i32_394 = arith.constant 17 : i32
    %596 = tpu.dynamic_rotate %594 by %c17_i32_394 dim 1 : vector<8x256xf32>, i32 -> vector<8x256xf32>
    %597 = vector.broadcast %595 : vector<1x256xf32> to vector<8x256xf32>
    %598 = arith.mulf %596, %597 : vector<8x256xf32>
    %c0_395 = arith.constant 0 : index
    %c0_396 = arith.constant 0 : index
    %c0_397 = arith.constant 0 : index
    %599 = vector.load %arg18[%c0_395, %c0_396, %c0_397] : memref<9x8x8xbf16, #tpu.memory_space<vmem>>, vector<1x8x8xbf16>
    %600 = vector.shape_cast %599 : vector<1x8x8xbf16> to vector<8x8xbf16>
    %601 = arith.truncf %598 : vector<8x256xf32> to vector<8x256xbf16>
    %cst_398 = arith.constant dense<0.000000e+00> : vector<8x256xf32>
    %602 = tpu.matmul %600, %601, %cst_398 {dimension_numbers = #tpu.dot_dimension_numbers<[1], [0], [0], [1], [0, 0, 1, 1], [], []>} : vector<8x8xbf16>, vector<8x256xbf16>, vector<8x256xf32> -> vector<8x256xf32>
    %c1_399 = arith.constant 1 : index
    %c0_400 = arith.constant 0 : index
    %603 = vector.load %arg3[%c1_399, %c0_400] : memref<9x256xf32, #tpu.memory_space<vmem>>, vector<1x256xf32>
    %c16_i32_401 = arith.constant 16 : i32
    %604 = tpu.dynamic_rotate %594 by %c16_i32_401 dim 1 : vector<8x256xf32>, i32 -> vector<8x256xf32>
    %605 = vector.broadcast %603 : vector<1x256xf32> to vector<8x256xf32>
    %606 = arith.mulf %604, %605 : vector<8x256xf32>
    %c1_402 = arith.constant 1 : index
    %c0_403 = arith.constant 0 : index
    %c0_404 = arith.constant 0 : index
    %607 = vector.load %arg18[%c1_402, %c0_403, %c0_404] : memref<9x8x8xbf16, #tpu.memory_space<vmem>>, vector<1x8x8xbf16>
    %608 = vector.shape_cast %607 : vector<1x8x8xbf16> to vector<8x8xbf16>
    %609 = arith.truncf %606 : vector<8x256xf32> to vector<8x256xbf16>
    %cst_405 = arith.constant dense<0.000000e+00> : vector<8x256xf32>
    %610 = tpu.matmul %608, %609, %cst_405 {dimension_numbers = #tpu.dot_dimension_numbers<[1], [0], [0], [1], [0, 0, 1, 1], [], []>} : vector<8x8xbf16>, vector<8x256xbf16>, vector<8x256xf32> -> vector<8x256xf32>
    %611 = arith.addf %602, %610 : vector<8x256xf32>
    %c2_406 = arith.constant 2 : index
    %c0_407 = arith.constant 0 : index
    %612 = vector.load %arg3[%c2_406, %c0_407] : memref<9x256xf32, #tpu.memory_space<vmem>>, vector<1x256xf32>
    %c15_i32_408 = arith.constant 15 : i32
    %613 = tpu.dynamic_rotate %594 by %c15_i32_408 dim 1 : vector<8x256xf32>, i32 -> vector<8x256xf32>
    %614 = vector.broadcast %612 : vector<1x256xf32> to vector<8x256xf32>
    %615 = arith.mulf %613, %614 : vector<8x256xf32>
    %c2_409 = arith.constant 2 : index
    %c0_410 = arith.constant 0 : index
    %c0_411 = arith.constant 0 : index
    %616 = vector.load %arg18[%c2_409, %c0_410, %c0_411] : memref<9x8x8xbf16, #tpu.memory_space<vmem>>, vector<1x8x8xbf16>
    %617 = vector.shape_cast %616 : vector<1x8x8xbf16> to vector<8x8xbf16>
    %618 = arith.truncf %615 : vector<8x256xf32> to vector<8x256xbf16>
    %cst_412 = arith.constant dense<0.000000e+00> : vector<8x256xf32>
    %619 = tpu.matmul %617, %618, %cst_412 {dimension_numbers = #tpu.dot_dimension_numbers<[1], [0], [0], [1], [0, 0, 1, 1], [], []>} : vector<8x8xbf16>, vector<8x256xbf16>, vector<8x256xf32> -> vector<8x256xf32>
    %620 = arith.addf %611, %619 : vector<8x256xf32>
    %c3_413 = arith.constant 3 : index
    %c0_414 = arith.constant 0 : index
    %621 = vector.load %arg3[%c3_413, %c0_414] : memref<9x256xf32, #tpu.memory_space<vmem>>, vector<1x256xf32>
    %c1_i32_415 = arith.constant 1 : i32
    %622 = tpu.dynamic_rotate %594 by %c1_i32_415 dim 1 : vector<8x256xf32>, i32 -> vector<8x256xf32>
    %623 = vector.broadcast %621 : vector<1x256xf32> to vector<8x256xf32>
    %624 = arith.mulf %622, %623 : vector<8x256xf32>
    %c3_416 = arith.constant 3 : index
    %c0_417 = arith.constant 0 : index
    %c0_418 = arith.constant 0 : index
    %625 = vector.load %arg18[%c3_416, %c0_417, %c0_418] : memref<9x8x8xbf16, #tpu.memory_space<vmem>>, vector<1x8x8xbf16>
    %626 = vector.shape_cast %625 : vector<1x8x8xbf16> to vector<8x8xbf16>
    %627 = arith.truncf %624 : vector<8x256xf32> to vector<8x256xbf16>
    %cst_419 = arith.constant dense<0.000000e+00> : vector<8x256xf32>
    %628 = tpu.matmul %626, %627, %cst_419 {dimension_numbers = #tpu.dot_dimension_numbers<[1], [0], [0], [1], [0, 0, 1, 1], [], []>} : vector<8x8xbf16>, vector<8x256xbf16>, vector<8x256xf32> -> vector<8x256xf32>
    %629 = arith.addf %620, %628 : vector<8x256xf32>
    %c4_420 = arith.constant 4 : index
    %c0_421 = arith.constant 0 : index
    %c0_422 = arith.constant 0 : index
    %630 = vector.load %arg18[%c4_420, %c0_421, %c0_422] : memref<9x8x8xbf16, #tpu.memory_space<vmem>>, vector<1x8x8xbf16>
    %631 = vector.shape_cast %630 : vector<1x8x8xbf16> to vector<8x8xbf16>
    %632 = arith.truncf %594 : vector<8x256xf32> to vector<8x256xbf16>
    %cst_423 = arith.constant dense<0.000000e+00> : vector<8x256xf32>
    %633 = tpu.matmul %631, %632, %cst_423 {dimension_numbers = #tpu.dot_dimension_numbers<[1], [0], [0], [1], [0, 0, 1, 1], [], []>} : vector<8x8xbf16>, vector<8x256xbf16>, vector<8x256xf32> -> vector<8x256xf32>
    %634 = arith.addf %629, %633 : vector<8x256xf32>
    %c5_424 = arith.constant 5 : index
    %c0_425 = arith.constant 0 : index
    %635 = vector.load %arg3[%c5_424, %c0_425] : memref<9x256xf32, #tpu.memory_space<vmem>>, vector<1x256xf32>
    %c255_i32_426 = arith.constant 255 : i32
    %636 = tpu.dynamic_rotate %594 by %c255_i32_426 dim 1 : vector<8x256xf32>, i32 -> vector<8x256xf32>
    %637 = vector.broadcast %635 : vector<1x256xf32> to vector<8x256xf32>
    %638 = arith.mulf %636, %637 : vector<8x256xf32>
    %c5_427 = arith.constant 5 : index
    %c0_428 = arith.constant 0 : index
    %c0_429 = arith.constant 0 : index
    %639 = vector.load %arg18[%c5_427, %c0_428, %c0_429] : memref<9x8x8xbf16, #tpu.memory_space<vmem>>, vector<1x8x8xbf16>
    %640 = vector.shape_cast %639 : vector<1x8x8xbf16> to vector<8x8xbf16>
    %641 = arith.truncf %638 : vector<8x256xf32> to vector<8x256xbf16>
    %cst_430 = arith.constant dense<0.000000e+00> : vector<8x256xf32>
    %642 = tpu.matmul %640, %641, %cst_430 {dimension_numbers = #tpu.dot_dimension_numbers<[1], [0], [0], [1], [0, 0, 1, 1], [], []>} : vector<8x8xbf16>, vector<8x256xbf16>, vector<8x256xf32> -> vector<8x256xf32>
    %643 = arith.addf %634, %642 : vector<8x256xf32>
    %c6_431 = arith.constant 6 : index
    %c0_432 = arith.constant 0 : index
    %644 = vector.load %arg3[%c6_431, %c0_432] : memref<9x256xf32, #tpu.memory_space<vmem>>, vector<1x256xf32>
    %c241_i32_433 = arith.constant 241 : i32
    %645 = tpu.dynamic_rotate %594 by %c241_i32_433 dim 1 : vector<8x256xf32>, i32 -> vector<8x256xf32>
    %646 = vector.broadcast %644 : vector<1x256xf32> to vector<8x256xf32>
    %647 = arith.mulf %645, %646 : vector<8x256xf32>
    %c6_434 = arith.constant 6 : index
    %c0_435 = arith.constant 0 : index
    %c0_436 = arith.constant 0 : index
    %648 = vector.load %arg18[%c6_434, %c0_435, %c0_436] : memref<9x8x8xbf16, #tpu.memory_space<vmem>>, vector<1x8x8xbf16>
    %649 = vector.shape_cast %648 : vector<1x8x8xbf16> to vector<8x8xbf16>
    %650 = arith.truncf %647 : vector<8x256xf32> to vector<8x256xbf16>
    %cst_437 = arith.constant dense<0.000000e+00> : vector<8x256xf32>
    %651 = tpu.matmul %649, %650, %cst_437 {dimension_numbers = #tpu.dot_dimension_numbers<[1], [0], [0], [1], [0, 0, 1, 1], [], []>} : vector<8x8xbf16>, vector<8x256xbf16>, vector<8x256xf32> -> vector<8x256xf32>
    %652 = arith.addf %643, %651 : vector<8x256xf32>
    %c7_438 = arith.constant 7 : index
    %c0_439 = arith.constant 0 : index
    %653 = vector.load %arg3[%c7_438, %c0_439] : memref<9x256xf32, #tpu.memory_space<vmem>>, vector<1x256xf32>
    %c240_i32_440 = arith.constant 240 : i32
    %654 = tpu.dynamic_rotate %594 by %c240_i32_440 dim 1 : vector<8x256xf32>, i32 -> vector<8x256xf32>
    %655 = vector.broadcast %653 : vector<1x256xf32> to vector<8x256xf32>
    %656 = arith.mulf %654, %655 : vector<8x256xf32>
    %c7_441 = arith.constant 7 : index
    %c0_442 = arith.constant 0 : index
    %c0_443 = arith.constant 0 : index
    %657 = vector.load %arg18[%c7_441, %c0_442, %c0_443] : memref<9x8x8xbf16, #tpu.memory_space<vmem>>, vector<1x8x8xbf16>
    %658 = vector.shape_cast %657 : vector<1x8x8xbf16> to vector<8x8xbf16>
    %659 = arith.truncf %656 : vector<8x256xf32> to vector<8x256xbf16>
    %cst_444 = arith.constant dense<0.000000e+00> : vector<8x256xf32>
    %660 = tpu.matmul %658, %659, %cst_444 {dimension_numbers = #tpu.dot_dimension_numbers<[1], [0], [0], [1], [0, 0, 1, 1], [], []>} : vector<8x8xbf16>, vector<8x256xbf16>, vector<8x256xf32> -> vector<8x256xf32>
    %661 = arith.addf %652, %660 : vector<8x256xf32>
    %c8_445 = arith.constant 8 : index
    %c0_446 = arith.constant 0 : index
    %662 = vector.load %arg3[%c8_445, %c0_446] : memref<9x256xf32, #tpu.memory_space<vmem>>, vector<1x256xf32>
    %c239_i32_447 = arith.constant 239 : i32
    %663 = tpu.dynamic_rotate %594 by %c239_i32_447 dim 1 : vector<8x256xf32>, i32 -> vector<8x256xf32>
    %664 = vector.broadcast %662 : vector<1x256xf32> to vector<8x256xf32>
    %665 = arith.mulf %663, %664 : vector<8x256xf32>
    %c8_448 = arith.constant 8 : index
    %c0_449 = arith.constant 0 : index
    %c0_450 = arith.constant 0 : index
    %666 = vector.load %arg18[%c8_448, %c0_449, %c0_450] : memref<9x8x8xbf16, #tpu.memory_space<vmem>>, vector<1x8x8xbf16>
    %667 = vector.shape_cast %666 : vector<1x8x8xbf16> to vector<8x8xbf16>
    %668 = arith.truncf %665 : vector<8x256xf32> to vector<8x256xbf16>
    %cst_451 = arith.constant dense<0.000000e+00> : vector<8x256xf32>
    %669 = tpu.matmul %667, %668, %cst_451 {dimension_numbers = #tpu.dot_dimension_numbers<[1], [0], [0], [1], [0, 0, 1, 1], [], []>} : vector<8x8xbf16>, vector<8x256xbf16>, vector<8x256xf32> -> vector<8x256xf32>
    %670 = arith.addf %661, %669 : vector<8x256xf32>
    %c0_452 = arith.constant 0 : index
    %c0_453 = arith.constant 0 : index
    %671 = vector.load %arg19[%c0_452, %c0_453] : memref<8x1xf32, #tpu.memory_space<vmem>>, vector<8x1xf32>
    %672 = vector.broadcast %671 : vector<8x1xf32> to vector<8x256xf32>
    %673 = arith.addf %670, %672 : vector<8x256xf32>
    %cst_454 = arith.constant 0.000000e+00 : f32
    %674 = vector.broadcast %cst_454 : f32 to vector<8x256xf32>
    %675 = arith.maximumf %673, %674 : vector<8x256xf32>
    %c0_455 = arith.constant 0 : index
    %c0_456 = arith.constant 0 : index
    %676 = vector.load %arg20[%c0_455, %c0_456] : memref<2x8xbf16, #tpu.memory_space<vmem>>, vector<2x8xbf16>
    %677 = arith.truncf %675 : vector<8x256xf32> to vector<8x256xbf16>
    %cst_457 = arith.constant dense<0.000000e+00> : vector<2x256xf32>
    %678 = tpu.matmul %676, %677, %cst_457 {dimension_numbers = #tpu.dot_dimension_numbers<[1], [0], [0], [1], [0, 0, 1, 1], [], []>} : vector<2x8xbf16>, vector<8x256xbf16>, vector<2x256xf32> -> vector<2x256xf32>
    %c0_458 = arith.constant 0 : index
    %c0_459 = arith.constant 0 : index
    %679 = vector.load %arg21[%c0_458, %c0_459] : memref<2x1xf32, #tpu.memory_space<vmem>>, vector<2x1xf32>
    %680 = vector.broadcast %679 : vector<2x1xf32> to vector<2x256xf32>
    %681 = arith.addf %678, %680 : vector<2x256xf32>
    %c0_460 = arith.constant 0 : index
    %c0_461 = arith.constant 0 : index
    %c0_462 = arith.constant 0 : index
    %682 = vector.load %arg22[%c0_460, %c0_461, %c0_462] : memref<1x2x256xf32, #tpu.memory_space<vmem>>, vector<1x2x256xf32>
    %683 = vector.shape_cast %682 : vector<1x2x256xf32> to vector<2x256xf32>
    %684 = vector.shape_cast %681 : vector<2x256xf32> to vector<1x2x256xf32>
    tpu.vector_store %arg22[%c0_460, %c0_461, %c0_462], %684 {strides = array<i32>} : memref<1x2x256xf32, #tpu.memory_space<vmem>>, vector<1x2x256xf32>,
    %cst_463 = arith.constant 2.000000e+01 : f32
    %685 = vector.broadcast %cst_463 : f32 to vector<2x256xf32>
    %686 = arith.mulf %681, %685 : vector<2x256xf32>
    %687 = arith.subf %686, %3 : vector<2x256xf32>
    %688 = arith.mulf %687, %687 : vector<2x256xf32>
    %689 = vector.shape_cast %688 : vector<2x256xf32> to vector<1x2x256xf32>
    %cst_464 = arith.constant dense<0.000000e+00> : vector<1xf32>
    %690 = vector.multi_reduction <add>, %689, %cst_464 [1, 2] : vector<1x2x256xf32> to vector<1xf32>
    %691 = vector.shape_cast %690 : vector<1xf32> to vector<1x1x1xf32>
    %692 = vector.extract %691[0, 0, 0] : f32 from vector<1x1x1xf32>
    %693 = vector.extract_strided_slice %688 {offsets = [0, 0], sizes = [1, 256], strides = [1, 1]} : vector<2x256xf32> to vector<1x256xf32>
    %694 = vector.extract_strided_slice %688 {offsets = [1, 0], sizes = [1, 256], strides = [1, 1]} : vector<2x256xf32> to vector<1x256xf32>
    %695 = arith.addf %693, %694 : vector<1x256xf32>
    %696 = math.sqrt %695 : vector<1x256xf32>
    %697 = vector.shape_cast %696 : vector<1x256xf32> to vector<1x1x256xf32>
    %cst_465 = arith.constant dense<0.000000e+00> : vector<1xf32>
    %698 = vector.multi_reduction <add>, %697, %cst_465 [1, 2] : vector<1x1x256xf32> to vector<1xf32>
    %699 = vector.shape_cast %698 : vector<1xf32> to vector<1x1x1xf32>
    %700 = vector.extract %699[0, 0, 0] : f32 from vector<1x1x1xf32>
    %cst_466 = arith.constant 1.000000e+00 : f32
    %701 = vector.broadcast %cst_466 : f32 to vector<1x128xf32>
    %702 = vector.broadcast %692 : f32 to vector<1x128xf32>
    %703 = arith.mulf %702, %701 : vector<1x128xf32>
    %c0_467 = arith.constant 0 : index
    %c0_468 = arith.constant 0 : index
    %c0_469 = arith.constant 0 : index
    %704 = vector.load %arg24[%c0_467, %c0_468, %c0_469] : memref<1x2x128xf32, #tpu.memory_space<vmem>>, vector<1x1x128xf32>
    %705 = vector.shape_cast %704 : vector<1x1x128xf32> to vector<1x128xf32>
    %706 = vector.shape_cast %703 : vector<1x128xf32> to vector<1x1x128xf32>
    tpu.vector_store %arg24[%c0_467, %c0_468, %c0_469], %706 {strides = array<i32>} : memref<1x2x128xf32, #tpu.memory_space<vmem>>, vector<1x1x128xf32>,
    %707 = vector.broadcast %700 : f32 to vector<1x128xf32>
    %708 = arith.mulf %707, %701 : vector<1x128xf32>
    %c0_470 = arith.constant 0 : index
    %c1_471 = arith.constant 1 : index
    %c0_472 = arith.constant 0 : index
    %709 = vector.load %arg24[%c0_470, %c1_471, %c0_472] : memref<1x2x128xf32, #tpu.memory_space<vmem>>, vector<1x1x128xf32>
    %710 = vector.shape_cast %709 : vector<1x1x128xf32> to vector<1x128xf32>
    %711 = vector.shape_cast %708 : vector<1x128xf32> to vector<1x1x128xf32>
    tpu.vector_store %arg24[%c0_470, %c1_471, %c0_472], %711 {strides = array<i32>} : memref<1x2x128xf32, #tpu.memory_space<vmem>>, vector<1x1x128xf32>,
    return
  }
  func.func @transform_0(%arg0: i32) -> (i32, i32, i32) {
    %c0_i32 = arith.constant 0 : i32
    %c0_i32_0 = arith.constant 0 : i32
    %c0_i32_1 = arith.constant 0 : i32
    return %arg0, %c0_i32, %c0_i32_0 : i32, i32, i32
  }
  func.func @transform_1(%arg0: i32) -> (i32, i32, i32) {
    %c0_i32 = arith.constant 0 : i32
    %c0_i32_0 = arith.constant 0 : i32
    %c0_i32_1 = arith.constant 0 : i32
    return %arg0, %c0_i32, %c0_i32_0 : i32, i32, i32
  }
  func.func @transform_2(%arg0: i32) -> (i32, i32) {
    %c0_i32 = arith.constant 0 : i32
    %c0_i32_0 = arith.constant 0 : i32
    %c0_i32_1 = arith.constant 0 : i32
    return %c0_i32, %c0_i32_0 : i32, i32
  }
  func.func @transform_3(%arg0: i32) -> (i32, i32) {
    %c0_i32 = arith.constant 0 : i32
    %c0_i32_0 = arith.constant 0 : i32
    %c0_i32_1 = arith.constant 0 : i32
    return %c0_i32, %c0_i32_0 : i32, i32
  }
  func.func @transform_4(%arg0: i32) -> (i32, i32) {
    %c0_i32 = arith.constant 0 : i32
    %c0_i32_0 = arith.constant 0 : i32
    %c0_i32_1 = arith.constant 0 : i32
    return %c0_i32, %c0_i32_0 : i32, i32
  }
  func.func @transform_5(%arg0: i32) -> (i32, i32, i32) {
    %c0_i32 = arith.constant 0 : i32
    %c0_i32_0 = arith.constant 0 : i32
    %c0_i32_1 = arith.constant 0 : i32
    %c0_i32_2 = arith.constant 0 : i32
    return %c0_i32, %c0_i32_0, %c0_i32_1 : i32, i32, i32
  }
  func.func @transform_6(%arg0: i32) -> (i32, i32, i32) {
    %c0_i32 = arith.constant 0 : i32
    %c0_i32_0 = arith.constant 0 : i32
    %c0_i32_1 = arith.constant 0 : i32
    %c0_i32_2 = arith.constant 0 : i32
    return %c0_i32, %c0_i32_0, %c0_i32_1 : i32, i32, i32
  }
  func.func @transform_7(%arg0: i32) -> (i32, i32) {
    %c0_i32 = arith.constant 0 : i32
    %c0_i32_0 = arith.constant 0 : i32
    %c0_i32_1 = arith.constant 0 : i32
    return %c0_i32, %c0_i32_0 : i32, i32
  }
  func.func @transform_8(%arg0: i32) -> (i32, i32, i32) {
    %c0_i32 = arith.constant 0 : i32
    %c0_i32_0 = arith.constant 0 : i32
    %c0_i32_1 = arith.constant 0 : i32
    %c0_i32_2 = arith.constant 0 : i32
    return %c0_i32, %c0_i32_0, %c0_i32_1 : i32, i32, i32
  }
  func.func @transform_9(%arg0: i32) -> (i32, i32) {
    %c0_i32 = arith.constant 0 : i32
    %c0_i32_0 = arith.constant 0 : i32
    %c0_i32_1 = arith.constant 0 : i32
    return %c0_i32, %c0_i32_0 : i32, i32
  }
  func.func @transform_10(%arg0: i32) -> (i32, i32, i32) {
    %c0_i32 = arith.constant 0 : i32
    %c0_i32_0 = arith.constant 0 : i32
    %c0_i32_1 = arith.constant 0 : i32
    %c0_i32_2 = arith.constant 0 : i32
    return %c0_i32, %c0_i32_0, %c0_i32_1 : i32, i32, i32
  }
  func.func @transform_11(%arg0: i32) -> (i32, i32) {
    %c0_i32 = arith.constant 0 : i32
    %c0_i32_0 = arith.constant 0 : i32
    %c0_i32_1 = arith.constant 0 : i32
    return %c0_i32, %c0_i32_0 : i32, i32
  }
  func.func @transform_12(%arg0: i32) -> (i32, i32, i32) {
    %c0_i32 = arith.constant 0 : i32
    %c0_i32_0 = arith.constant 0 : i32
    %c0_i32_1 = arith.constant 0 : i32
    %c0_i32_2 = arith.constant 0 : i32
    return %c0_i32, %c0_i32_0, %c0_i32_1 : i32, i32, i32
  }
  func.func @transform_13(%arg0: i32) -> (i32, i32) {
    %c0_i32 = arith.constant 0 : i32
    %c0_i32_0 = arith.constant 0 : i32
    %c0_i32_1 = arith.constant 0 : i32
    return %c0_i32, %c0_i32_0 : i32, i32
  }
  func.func @transform_14(%arg0: i32) -> (i32, i32, i32) {
    %c0_i32 = arith.constant 0 : i32
    %c0_i32_0 = arith.constant 0 : i32
    %c0_i32_1 = arith.constant 0 : i32
    %c0_i32_2 = arith.constant 0 : i32
    return %c0_i32, %c0_i32_0, %c0_i32_1 : i32, i32, i32
  }
  func.func @transform_15(%arg0: i32) -> (i32, i32, i32) {
    %c0_i32 = arith.constant 0 : i32
    %c0_i32_0 = arith.constant 0 : i32
    %c0_i32_1 = arith.constant 0 : i32
    %c0_i32_2 = arith.constant 0 : i32
    return %c0_i32, %c0_i32_0, %c0_i32_1 : i32, i32, i32
  }
  func.func @transform_16(%arg0: i32) -> (i32, i32) {
    %c0_i32 = arith.constant 0 : i32
    %c0_i32_0 = arith.constant 0 : i32
    %c0_i32_1 = arith.constant 0 : i32
    return %c0_i32, %c0_i32_0 : i32, i32
  }
  func.func @transform_17(%arg0: i32) -> (i32, i32, i32) {
    %c0_i32 = arith.constant 0 : i32
    %c0_i32_0 = arith.constant 0 : i32
    %c0_i32_1 = arith.constant 0 : i32
    %c0_i32_2 = arith.constant 0 : i32
    return %c0_i32, %c0_i32_0, %c0_i32_1 : i32, i32, i32
  }
  func.func @transform_18(%arg0: i32) -> (i32, i32) {
    %c0_i32 = arith.constant 0 : i32
    %c0_i32_0 = arith.constant 0 : i32
    %c0_i32_1 = arith.constant 0 : i32
    return %c0_i32, %c0_i32_0 : i32, i32
  }
  func.func @transform_19(%arg0: i32) -> (i32, i32) {
    %c0_i32 = arith.constant 0 : i32
    %c0_i32_0 = arith.constant 0 : i32
    %c0_i32_1 = arith.constant 0 : i32
    return %c0_i32, %c0_i32_0 : i32, i32
  }
  func.func @transform_20(%arg0: i32) -> (i32, i32) {
    %c0_i32 = arith.constant 0 : i32
    %c0_i32_0 = arith.constant 0 : i32
    %c0_i32_1 = arith.constant 0 : i32
    return %c0_i32, %c0_i32_0 : i32, i32
  }
  func.func @transform_21(%arg0: i32) -> (i32, i32, i32) {
    %c0_i32 = arith.constant 0 : i32
    %c0_i32_0 = arith.constant 0 : i32
    %c0_i32_1 = arith.constant 0 : i32
    return %arg0, %c0_i32, %c0_i32_0 : i32, i32, i32
  }
  func.func @transform_22(%arg0: i32) -> (i32, i32, i32) {
    %c0_i32 = arith.constant 0 : i32
    %c0_i32_0 = arith.constant 0 : i32
    %c0_i32_1 = arith.constant 0 : i32
    return %arg0, %c0_i32, %c0_i32_0 : i32, i32, i32
  }
  func.func @transform_23(%arg0: i32) -> (i32, i32, i32) {
    %c0_i32 = arith.constant 0 : i32
    %c0_i32_0 = arith.constant 0 : i32
    %c0_i32_1 = arith.constant 0 : i32
    return %arg0, %c0_i32, %c0_i32_0 : i32, i32, i32
  }
}

</mosaic_0001>

<bundles_post_ra>
// kernel: forward.1
= control target key start
LH: loop header
LB: loop body
LE: loop exit
PB: predicated region body
PF: predicated region fallthrough
CT: control target
= control target key end

     0   :  { %s8296_s0 = inlined_call_operand.vmem [shape: f32[2,3,256], index: 0, kind: input, shape index: {}]   ;;  %s8297_s1 = inlined_call_operand.vmem [shape: f32[2,2,256], index: 1, kind: input, shape index: {}]   ;;  %s8298_s2 = inlined_call_operand.vmem [shape: f32[9,256], index: 2, kind: input, shape index: {}]   ;;  %s8299_s3 = inlined_call_operand.vmem [shape: f32[9,256], index: 3, kind: input, shape index: {}]   ;;  %s8300_s4 = inlined_call_operand.vmem [shape: f32[2,256], index: 4, kind: input, shape index: {}]   ;;  %s8301_s5 = inlined_call_operand.vmem [shape: bf16[9,8,3], index: 5, kind: input, shape index: {}]   ;;  %s8302_s6 = inlined_call_operand.vmem [shape: bf16[9,8,1], index: 6, kind: input, shape index: {}]   ;;  %s8303_s7 = inlined_call_operand.vmem [shape: f32[8,1], index: 7, kind: input, shape index: {}]   ;;  %s8304_s8 = inlined_call_operand.vmem [shape: bf16[9,8,8], index: 8, kind: input, shape index: {}]   ;;  %s8305_s9 = inlined_call_operand.vmem [shape: f32[8,1], index: 9, kind: input, shape index: {}]   ;;  %s8306_s10 = inlined_call_operand.vmem [shape: bf16[9,16,8], index: 10, kind: input, shape index: {}]   ;;  %s8307_s11 = inlined_call_operand.vmem [shape: f32[16,1], index: 11, kind: input, shape index: {}]   ;;  %s8308_s12 = inlined_call_operand.vmem [shape: bf16[9,16,16], index: 12, kind: input, shape index: {}]   ;;  %s8309_s13 = inlined_call_operand.vmem [shape: f32[16,1], index: 13, kind: input, shape index: {}]   ;;  %s8310_s14 = inlined_call_operand.vmem [shape: bf16[9,8,16], index: 14, kind: input, shape index: {}]   ;;  %s8311_s15 = inlined_call_operand.vmem [shape: bf16[9,8,8], index: 15, kind: input, shape index: {}]   ;;  %s8312_s16 = inlined_call_operand.vmem [shape: f32[8,1], index: 16, kind: input, shape index: {}]   ;;  %s8313_s17 = inlined_call_operand.vmem [shape: bf16[9,8,8], index: 17, kind: input, shape index: {}]   ;;  %s8314_s18 = inlined_call_operand.vmem [shape: f32[8,1], index: 18, kind: input, shape index: {}]   ;;  %s8315_s19 = inlined_call_operand.vmem [shape: bf16[2,8], index: 19, kind: input, shape index: {}]   ;;  %s8316_s20 = inlined_call_operand.vmem [shape: f32[2,1], index: 20, kind: input, shape index: {}]   ;;  %s8317_s21 = inlined_call_operand.vmem [shape: f32[2,2,256], index: 21, kind: output, shape index: {0}]   ;;  %s8318_s22 = inlined_call_operand.vmem [shape: f32[2,1,256], index: 22, kind: output, shape index: {1}]   ;;  %s8319_s23 = inlined_call_operand.vmem [shape: f32[2,2,128], index: 23, kind: output, shape index: {2}]  }
   0x1   :  { %8364 = sst [smem:[#allocation4_spill]] %s8296_s0 }
   0x2   :  { %8365 = sst [smem:[#allocation5_spill]] %s8297_s1 }
   0x3   :  { %8366 = sst [smem:[#allocation6_spill]] %s8298_s2 }
   0x4   :  { %8367 = sst [smem:[#allocation7_spill]] %s8299_s3 }
   0x5   :  { %8368 = sst [smem:[#allocation8_spill]] %s8300_s4  ;;  %s6510_s4 = smov 0  }
   0x6   :  { %8369 = sst [smem:[#allocation9_spill]] %s8301_s5 }
   0x7   :  { %8370 = sst [smem:[#allocation10_spill]] %s8302_s6 }
   0x8   :  { %8371 = sst [smem:[#allocation11_spill]] %s8303_s7 }
   0x9   :  { %8372 = sst [smem:[#allocation12_spill]] %s8304_s8 }
   0xa   :  { %8373 = sst [smem:[#allocation13_spill]] %s8305_s9 }
   0xb   :  { %8374 = sst [smem:[#allocation14_spill]] %s8318_s22 }
   0xc   :  { %8375 = sst [smem:[#allocation15_spill]] %s8319_s23 }
   0xd LB: > { %8376 = sst [smem:[#allocation3_spill]] %s6368_s4  ;;  %s5972_s30 = sadd.s32 4294967295, %s6368_s4   ;;  %s6368_s4 = sphi %s6510_s4, %s34_s4  }
   0xe   : > { %p5976_p0 = scmp.ge.s32.totalorder %s6368_s4, 1  ;;  %p652_p1 = scmp.lt.s32.totalorder %s6368_s4, 3 }
  0x10   : > { %p653_p2 = pnand %p5976_p0, %p652_p1 }
  0x11   : > { %p729_p3 = scmp.lt.s32.totalorder (!%p653_p2), %s5972_s30, 1  ;;  %s8377_s1 = sld [smem:[#allocation4_spill]] (!%p653_p2)  ;;  %v6372_v2 = vmov (!%p653_p2), 0   ;;  %v769_v8 = vlaneseq (!%p653_p2)  ;;  %vm8360_vm2 = vcmask (!%p653_p2), 1040384   ;;  %vm8361_vm5 = vcmask (!%p653_p2), 1041408  }
  0x12   : > { %656 = sbr.rel (%p653_p2) target bundleno = 3491 (0xda3), region = 104  ;;  %s8332_s2 = smov (!%p653_p2), 16   ;;  %921 = vmatprep.mubr.bf16.mxu0 (!%p653_p2), %v6372_v2  ;;  %997 = vmatprep.mubr.bf16.mxu1 (!%p653_p2), %v6372_v2  ;;  %v6379_v40 = vmov (!%p653_p2), 65535   ;;  %vm876_vm8 = vcmask (!%p653_p2), 23552   ;;  %vm1785_vm15 = vcmask (!%p653_p2), 1043456  }
  0x13   : > { %s8341_s6 = smov (!%p653_p2), 17   ;;  %6313 = vset.pattern.permute.xlu1 (!%p653_p2), %v6372_v2  ;;  %6334 = vset.pattern.permute.xlu0 (!%p653_p2), %v6372_v2  ;;  %s8378_s29 = sld [smem:[#allocation5_spill]] (!%p653_p2)  ;;  %v6576_v10 = vshrl.u32 (!%p653_p2), %v769_v8, 7  ;;  %v6598_v29 = vand.u32 (!%p653_p2), 127, %v769_v8  ;;  %v881_v41 = vsel (!%p653_p2), %vm8360_vm2, 4294967295, %v6379_v40  ;;  %vm809_vm14 = vcmp.lt.s32.totalorder (!%p653_p2), %v769_v8, 256 }
  0x14   : > { %s8328_s0 = smov (!%p653_p2), 15   ;;  %s8326_s25 = smov (!%p653_p2), 127   ;;  %v6650_v55 = vsel (!%p653_p2), %vm8361_vm5, %v881_v41, 0 }
  0x15   : > { %s8337_s5 = smov (!%p653_p2), 113   ;;  %v6579_v13 = vsub.s32 (!%p653_p2), 0, %v6576_v10  ;;  %v775_v14 = vsub.s32 (!%p653_p2), 2, %v6576_v10  ;;  %v6601_v30 = vsub.s32 (!%p653_p2), 1, %v6576_v10  ;;  %vm936_vm3 = vcmp.lt.s32.totalorder (!%p653_p2), %v6598_v29, 16  ;;  %s8382_s22 = sld [smem:[#allocation14_spill]] (!%p653_p2) }
  0x16   : > { %vm822_vm4 = vcmp.lt.s32.totalorder (!%p653_p2), %v6598_v29, 17  ;;  %vm1042_vm6 = vcmp.lt.s32.totalorder (!%p653_p2), %v6598_v29, 15  ;;  %vm1148_vm7 = vcmp.lt.s32.totalorder (!%p653_p2), %v6598_v29, 1  ;;  %vm1330_vm9 = vcmp.lt.s32.totalorder (!%p653_p2), %v6598_v29, 127  ;;  %s8392_s9 = sld [smem:[#allocation13_spill]] (!%p653_p2)  ;;  %s8393_s8 = sld [smem:[#allocation12_spill]] (!%p653_p2) }
  0x17   : > { %vm1436_vm10 = vcmp.lt.s32.totalorder (!%p653_p2), %v6598_v29, 113  ;;  %vm8363_vm11 = vcmp.lt.s32.totalorder (!%p653_p2), %v6598_v29, 112  ;;  %vm8362_vm12 = vcmp.lt.s32.totalorder (!%p653_p2), %v6598_v29, 111  ;;  %vm2853_vm5 = vcmp.lt.s32.totalorder (!%p653_p2), %v6598_v29, 98  ;;  %s8395_s23 = smov (!%p653_p2), 32   ;;  %s8396_s4 = smov (!%p653_p2), 34  }
  0x19   : > { %s8428_s30 = smov (!%p729_p3, %s5972_s30), 1 }
  0x1a   : > { %s6211_s24 = sshll.u32 %s8428_s30, 3  ;;  %s8325_s27 = sshll.u32 %s8428_s30, 2 }
  0x1b   : > { %s733_s26 = scalar_lea.vmem %s8377_s1, %s6211_s24  ;;  %s6548_s3 = scalar_lea.vmem %s8378_s29, %s8325_s27 }
  0x1c   : > { %v6524_v0 = vld [vmem:[%s733_s26] sm:$0x77]  ;;  %s8339_s24 = smov 1   ;;  %s8334_s1 = smov 112  }
  0x1d   : > { %932 = vrot.lane.b32.xlu1 %v6524_v0, %s8332_s2  ;;  %816 = vrot.lane.b32.xlu0 %v6524_v0, %s8341_s6  ;;  %v6532_v1 = vcombine.high %v6524_v0, %v6524_v0  ;;  %v754_v3 = vld [vmem:[%s6548_s3] sm:$0xf]  ;;  %s8330_s26 = smov 111   ;;  %s8379_s29 = sld [smem:[#allocation10_spill]] }
  0x1e   : > { %v755_v4 = vmul.f32 %v754_v3, %v754_v3  ;;  %s8336_s28 = sshll.u32 %s8428_s30, 1  ;;  %s8385_s27 = smov 111  }
  0x20   : > { %v5985_v5 = vrot.slane %v755_v4, 9 }
  0x21   : > { %934 = vrot.lane.b32.xlu1 %v6532_v1, %s8332_s2  ;;  %818 = vrot.lane.b32.xlu0 %v6532_v1, %s8341_s6  ;;  %s8381_s2 = sld [smem:[#allocation9_spill]] }
  0x22   : > { %v760_v6 = vadd.f32 %v5985_v5, %v755_v4 }
  0x23   : > { %v859_v21 = vld [vmem:[%s8379_s29] sm:$0xff]   ;;  %v5995_v24 = vld [vmem:[%s8379_s29 + $0x8] sm:$0xff]   ;;  %v6002_v8 = vld [vmem:[%s8379_s29 + $0x10] sm:$0xff]  }
  0x24   : > { %6354 = vrsqrt.f32 %v760_v6  ;;  %vm763_vm0 = vcmp.eq.f32.partialorder %v760_v6, inf  ;;  %v766_v11 = vand.u32 2147483648, %v760_v6  ;;  %vm765_vm1 = vcmp.eq.f32.partialorder %v760_v6, 0.0 }
  0x25   : > { %1040 = vrot.lane.b32.xlu1 %v6532_v1, %s8328_s0  ;;  %1038 = vrot.lane.b32.xlu0 %v6524_v0, %s8328_s0  ;;  %v860_v22 = vunpack.c.l.bf16 %v859_v21  ;;  %v1018_v23 = vunpack.c.h.bf16 %v859_v21  ;;  %v1124_v25 = vunpack.c.l.bf16 %v5995_v24  ;;  %v1230_v26 = vunpack.c.h.bf16 %v5995_v24  ;;  %s8380_s0 = sld [smem:[#allocation6_spill]] }
  0x27   : > { %v6314_v27 = vpack.i.bf16 %v1018_v23, %v860_v22  ;;  %v6319_v28 = vpack.i.bf16 %v1230_v26, %v1124_v25 }
  0x29   : > { %1146 = vrot.lane.b32.xlu1 %v6532_v1, %s8339_s24  ;;  %1144 = vrot.lane.b32.xlu0 %v6524_v0, %s8339_s24 }
  0x2b   : > { %v812_v31 = vld [vmem:[%s8380_s0] ss:$8 sm:$0x3]  ;;  %v5988_v32 = vld [vmem:[%s8380_s0 + $0x1] ss:$8 sm:$0x3] }
  0x2c   : > { %v5992_v35 = vld [vmem:[%s8380_s0 + $0x2] ss:$8 sm:$0x3]  ;;  %v6615_v36 = vrot.slane %v812_v31, %v6601_v30  ;;  %v6618_v37 = vrot.slane %v812_v31, %v6579_v13  ;;  %v6621_v38 = vrot.slane %v5988_v32, %v6601_v30  ;;  %v6624_v39 = vrot.slane %v5988_v32, %v6579_v13  ;;  %v5996_v51 = vld [vmem:[%s8380_s0 + $0x3] ss:$8 sm:$0x3] }
  0x2d   : > { %1328 = vrot.lane.b32.xlu1 %v6532_v1, %s8326_s25  ;;  %1326 = vrot.lane.b32.xlu0 %v6524_v0, %s8326_s25  ;;  %v6629_v44 = vrot.slane %v5992_v35, %v6579_v13  ;;  %v6632_v45 = vrot.slane %v5992_v35, %v6601_v30  ;;  %v6658_v3 = vrot.slane %v5996_v51, %v6579_v13  ;;  %v6003_v5 = vld [vmem:[%s8380_s0 + $0x5] ss:$8 sm:$0x3]  ;;  %v6007_v26 = vld [vmem:[%s8380_s0 + $0x6] ss:$8 sm:$0x3] }
  0x2e   : > { %v6355_v7 = vpop.eup %6354  ;;  %v6661_v4 = vrot.slane %v5996_v51, %v6601_v30  ;;  %v6675_v22 = vrot.slane %v6003_v5, %v6579_v13  ;;  %v6686_v25 = vrot.slane %v6003_v5, %v6601_v30  ;;  %s8391_s25 = smov 17  }
  0x2f   : > { %v762_v9 = vmul.f32 %v6355_v7, %v760_v6 }
  0x31   : > { %1434 = vrot.lane.b32.xlu1 %v6532_v1, %s8337_s5  ;;  %1432 = vrot.lane.b32.xlu0 %v6524_v0, %s8337_s5  ;;  %v764_v12 = vsel %vm763_vm0, %v760_v6, %v762_v9  ;;  %vm1781_vm0 = vcmask 64512  }
  0x32   : > { %v6582_v15 = vsel %vm765_vm1, %v766_v11, %v764_v12  ;;  %vm2382_vm1 = vcmp.lt.s32.totalorder %v6598_v29, 32 }
  0x33   : > { %v772_v16 = vrot.slane %v6582_v15, %v6579_v13  ;;  %v776_v17 = vrot.slane %v6582_v15, %v775_v14 }
  0x35   : > { %1540 = vrot.lane.b32.xlu1 %v6532_v1, %s8334_s1  ;;  %1538 = vrot.lane.b32.xlu0 %v6524_v0, %s8334_s1  ;;  %v780_v18 = vsel %vm8360_vm2, %v772_v16, 0.0  ;;  %v781_v19 = vsel %vm8360_vm2, %v776_v17, 0.0  ;;  %v1251_v17 = vpack.c.bf16 %v6532_v1, %v6532_v1  ;;  %vm2765_vm2 = vcmp.lt.s32.totalorder %v6598_v29, 126 }
  0x36   : > { %v782_v20 = vadd.f32 %v781_v19, %v780_v18 }
  0x39   : > { %1646 = vrot.lane.b32.xlu1 %v6532_v1, %s8330_s26  ;;  %1644 = vrot.lane.b32.xlu0 %v6524_v0, %s8330_s26  ;;  %v838_v1 = vld [vmem:[%s8381_s2] sm:$0xf]  ;;  %s747_s26 = scalar_lea.vmem %s8382_s22, %s8336_s28  ;;  %s8388_s28 = smov 1  }
  0x3a   : > { %s8389_s22 = smov 127  }
  0x3d   : > { %6315 = vperm.xlu1 %6313, %v6314_v27  }
  0x41   : > { %6320 = vperm.xlu1 %6313, %v6319_v28  }
  0x58   : > { %783 = vadd.xlane.f32.xlu0 %v782_v20 }
  0x8f   : > { %v933_v33 = vpop.permute.xlu1 %932  ;;  %v817_v34 = vpop.permute.xlu0 %816 }
  0x93   : > { %v935_v42 = vpop.permute.xlu1 %934  ;;  %v819_v43 = vpop.permute.xlu0 %818 }
  0x94   : > { %v938_v46 = vsel %vm936_vm3, %v935_v42, %v933_v33  ;;  %v824_v47 = vsel %vm822_vm4, %v819_v43, %v817_v34  ;;  %v823_v48 = vsel %vm822_vm4, %v817_v34, %v819_v43  ;;  %v937_v49 = vsel %vm936_vm3, %v933_v33, %v935_v42  ;;  %v5989_v33 = vld [vmem:[%s8381_s2 + $0x4] sm:$0xf] }
  0x95   : > { %v837_v50 = vmul.f32 %v6615_v36, %v823_v48  ;;  %v836_v52 = vmul.f32 %v6618_v37, %v824_v47  ;;  %v951_v53 = vmul.f32 %v6621_v38, %v937_v49  ;;  %v950_v54 = vmul.f32 %v6624_v39, %v938_v46 }
  0x96   : > { %v1259_v34 = vand.u32 %v1251_v17, %v6650_v55  ;;  %v6701_v43 = vrot.slane %v6007_v26, %v6601_v30  ;;  %v1250_v48 = vpack.c.bf16 %v6524_v0, %v6524_v0 }
  0x97   : > { %v1041_v56 = vpop.permute.xlu1 %1040  ;;  %v1039_v57 = vpop.permute.xlu0 %1038  ;;  %v840_v58 = vpack.c.bf16 %v837_v50, %v837_v50  ;;  %v839_v59 = vpack.c.bf16 %v836_v52, %v836_v52  ;;  %v955_v60 = vpack.c.bf16 %v951_v53, %v951_v53  ;;  %v954_v61 = vpack.c.bf16 %v950_v54, %v950_v54  ;;  %v6011_v53 = vld [vmem:[%s8380_s0 + $0x7] ss:$8 sm:$0x3] }
  0x98   : > { %v1043_v62 = vsel %vm1042_vm6, %v1039_v57, %v1041_v56  ;;  %v1044_v63 = vsel %vm1042_vm6, %v1041_v56, %v1039_v57  ;;  %v6720_v54 = vrot.slane %v6007_v26, %v6579_v13 }
  0x99   : > { %v1056_v6 = vmul.f32 %v6629_v44, %v1044_v63  ;;  %v1057_v7 = vmul.f32 %v6632_v45, %v1043_v62  ;;  %v887_v9 = vand.u32 %v6650_v55, %v840_v58  ;;  %v884_v11 = vand.u32 %v6650_v55, %v839_v59 }
  0x9a   : > { %v963_v12 = vand.u32 %v955_v60, %v6650_v55  ;;  %v960_v16 = vand.u32 %v954_v61, %v6650_v55  ;;  %v5993_v61 = vld [vmem:[%s8381_s2 + $0x8] sm:$0xf]  ;;  %v6732_v62 = vrot.slane %v6011_v53, %v6579_v13  ;;  %v1256_v63 = vand.u32 %v1250_v48, %v6650_v55  ;;  %v6004_v48 = vld [vmem:[%s8381_s2 + $0x14] sm:$0xf] }
  0x9b   : > { %v1060_v18 = vpack.c.bf16 %v1056_v6, %v1056_v6  ;;  %v1061_v19 = vpack.c.bf16 %v1057_v7, %v1057_v7  ;;  %v1147_v20 = vpop.permute.xlu1 %1146  ;;  %889 = vmatprep.subr.bf16.mxu0 %v887_v9  ;;  %v1145_v21 = vpop.permute.xlu0 %1144  ;;  %v6739_v9 = vrot.slane %v6011_v53, %v6601_v30 }
  0x9c   : > { %v1149_v23 = vsel %vm1148_vm7, %v1145_v21, %v1147_v20  ;;  %v1150_v24 = vsel %vm1148_vm7, %v1147_v20, %v1145_v21  ;;  %890 = vmatpush1.bf16.msra.mxu0 %v884_v11  ;;  %965 = vmatprep.subr.bf16.mxu1 %v963_v12  ;;  %v5997_v11 = vld [vmem:[%s8381_s2 + $0xc] sm:$0xf] }
  0x9d   : > { %v1066_v27 = vand.u32 %v1060_v18, %v6650_v55  ;;  %v1162_v28 = vmul.f32 %v6658_v3, %v1150_v24  ;;  %v1163_v31 = vmul.f32 %v6661_v4, %v1149_v23  ;;  %966 = vmatpush1.bf16.msra.mxu1 %v960_v16  ;;  %v1069_v32 = vand.u32 %v1061_v19, %v6650_v55  ;;  %v6015_v16 = vld [vmem:[%s8380_s0 + $0x10] ss:$8 sm:$0x3] }
  0x9f   : > { %v1166_v35 = vpack.c.bf16 %v1162_v28, %v1162_v28  ;;  %v1167_v40 = vpack.c.bf16 %v1163_v31, %v1163_v31  ;;  %v1329_v41 = vpop.permute.xlu1 %1328  ;;  %5987 = vmatmul.mubr.msk.bf16.vlgmr.msra.gmra.mrb[0].mxu0 %vm876_vm8, %v838_v1  ;;  %1071 = vmatprep.subr.bf16.mxu0 %v1069_v32  ;;  %v1327_v42 = vpop.permute.xlu0 %1326  ;;  %v6758_v1 = vrot.slane %v6015_v16, %v6601_v30 }
  0xa0   : > { %v1331_v46 = vsel %vm1330_vm9, %v1327_v42, %v1329_v41  ;;  %v1332_v47 = vsel %vm1330_vm9, %v1329_v41, %v1327_v42  ;;  %5990 = vmatmul.mubr.msk.bf16.vlgmr.msra.gmra.mrb[0].mxu1 %vm876_vm8, %v5989_v33  ;;  %1072 = vmatpush1.bf16.msra.mxu0 %v1066_v27  ;;  %v6762_v28 = vrot.slane %v6015_v16, %v6579_v13  ;;  %v6000_v41 = vld [vmem:[%s8381_s2 + $0x10] sm:$0xf] }
  0xa1   : > { %v1172_v49 = vand.u32 %v1166_v35, %v6650_v55  ;;  %v1344_v50 = vmul.f32 %v6675_v22, %v1331_v46  ;;  %v1345_v51 = vmul.f32 %v6686_v25, %v1332_v47  ;;  %v1175_v52 = vand.u32 %v1167_v40, %v6650_v55  ;;  %1103 = vmatprep.mubr.bf16.mxu0 %v6372_v2 }
  0xa2   : > { %1209 = vmatprep.mubr.bf16.mxu1 %v6372_v2  ;;  %1261 = vmatprep.subr.bf16.mxu0 %v1259_v34 }
  0xa3   : > { %v1348_v0 = vpack.c.bf16 %v1344_v50, %v1344_v50  ;;  %v1349_v56 = vpack.c.bf16 %v1345_v51, %v1345_v51  ;;  %v1435_v57 = vpop.permute.xlu1 %1434  ;;  %1177 = vmatprep.subr.bf16.mxu1 %v1175_v52  ;;  %v1433_v58 = vpop.permute.xlu0 %1432 }
  0xa4   : > { %v1437_v59 = vsel %vm1436_vm10, %v1433_v58, %v1435_v57  ;;  %v1438_v60 = vsel %vm1436_vm10, %v1435_v57, %v1433_v58  ;;  %1178 = vmatpush1.bf16.msra.mxu1 %v1172_v49  ;;  %v6016_v58 = vld [vmem:[%s8381_s2 + $0x20] sm:$0xf] }
  0xa5   : > { %v1354_v5 = vand.u32 %v1348_v0, %v6650_v55  ;;  %v1451_v6 = vmul.f32 %v6701_v43, %v1438_v60  ;;  %v1357_v7 = vand.u32 %v1349_v56, %v6650_v55  ;;  %v1450_v12 = vmul.f32 %v6720_v54, %v1437_v59  ;;  %v6008_v0 = vld [vmem:[%s8381_s2 + $0x18] sm:$0xf]  ;;  %v6012_v56 = vld [vmem:[%s8381_s2 + $0x1c] sm:$0xf]  ;;  %s8390_s2 = smov 113  }
  0xa7   : > { %v1455_v17 = vpack.c.bf16 %v1451_v6, %v1451_v6  ;;  %v1541_v18 = vpop.permute.xlu1 %1540  ;;  %5994 = vmatmul.mubr.msk.bf16.vlgmr.msra.gmra.mrb[4].mxu0 %vm876_vm8, %v5993_v61  ;;  %1359 = vmatprep.subr.bf16.mxu1 %v1357_v7  ;;  %v1539_v19 = vpop.permute.xlu0 %1538  ;;  %v1454_v27 = vpack.c.bf16 %v1450_v12, %v1450_v12  ;;  %v6380_v7 = vmov 1966171168  }
  0xa8   : > { %v1543_v20 = vsel %vm8363_vm11, %v1539_v19, %v1541_v18  ;;  %v1544_v21 = vsel %vm8363_vm11, %v1541_v18, %v1539_v19  ;;  %5998 = vmatmul.mubr.msk.bf16.vlgmr.msra.gmra.mrb[4].mxu1 %vm876_vm8, %v5997_v11  ;;  %1262 = vmatpush1.bf16.msra.mxu0 %v1256_v63  ;;  %v800_v11 = vunpack.c.l.s4 %v6380_v7  ;;  %v6381_v18 = vmov 0.0  }
  0xa9   : > { %v1556_v23 = vmul.f32 %v6732_v62, %v1543_v20  ;;  %v1557_v24 = vmul.f32 %v6739_v9, %v1544_v21  ;;  %1360 = vmatpush1.bf16.msra.mxu1 %v1354_v5  ;;  %v1463_v26 = vand.u32 %v1455_v17, %v6650_v55  ;;  %1293 = vmatprep.mubr.bf16.mxu0 %v6372_v2 }
  0xaa   : > { %1391 = vmatprep.mubr.bf16.mxu1 %v6372_v2  ;;  %v1460_v49 = vand.u32 %v1454_v27, %v6650_v55  ;;  %v801_v12 = vunpack.c.0.s8 %v800_v11 }
  0xab   : > { %v1560_v31 = vpack.c.bf16 %v1556_v23, %v1556_v23  ;;  %v1561_v32 = vpack.c.bf16 %v1557_v24, %v1557_v24  ;;  %v1647_v33 = vpop.permute.xlu1 %1646  ;;  %v1645_v34 = vpop.permute.xlu0 %1644  ;;  %1465 = vmatprep.subr.bf16.mxu0 %v1463_v26  ;;  %v1412_v24 = vunpack.c.h.bf16 %v6002_v8  ;;  %v6010_v26 = vld [vmem:[%s8379_s29 + $0x18] sm:$0xff]  }
  0xac   : > { %v1649_v35 = vsel %vm8362_vm12, %v1645_v34, %v1647_v33  ;;  %v1650_v40 = vsel %vm8362_vm12, %v1647_v33, %v1645_v34  ;;  %v804_v17 = vsub.s32 %v801_v12, %v6576_v10  ;;  %v6018_v34 = vld [vmem:[%s8379_s29 + $0x20] sm:$0xf]  ;;  %s8397_s29 = smov 30  }
  0xad   : > { %v1566_v42 = vand.u32 %v1560_v31, %v6650_v55  ;;  %v1663_v46 = vmul.f32 %v6758_v1, %v1650_v40  ;;  %v1569_v47 = vand.u32 %v1561_v32, %v6650_v55  ;;  %v1662_v50 = vmul.f32 %v6762_v28, %v1649_v35 }
  0xae   : > { %v1518_v31 = vunpack.c.l.bf16 %v6010_v26  ;;  %v1624_v32 = vunpack.c.h.bf16 %v6010_v26  ;;  %v1730_v35 = vunpack.c.l.bf16 %v6018_v34 }
  0xaf   : > { %v1667_v51 = vpack.c.bf16 %v1663_v46, %v1663_v46  ;;  %6001 = vmatmul.mubr.msk.bf16.vlgmr.msra.gmra.mrb[8].mxu0 %vm876_vm8, %v6000_v41  ;;  %1571 = vmatprep.subr.bf16.mxu1 %v1569_v47  ;;  %v1666_v53 = vpack.c.bf16 %v1662_v50, %v1662_v50 }
  0xb0   : > { %1466 = vmatpush1.bf16.msra.mxu0 %v1460_v49  ;;  %6005 = vmatmul.mubr.msk.bf16.vlgmr.msra.gmra.mrb[8].mxu1 %vm876_vm8, %v6004_v48  ;;  %v6329_v33 = vpack.i.bf16 %v1624_v32, %v1518_v31 }
  0xb1   : > { %1572 = vmatpush1.bf16.msra.mxu1 %v1566_v42  ;;  %v1675_v52 = vand.u32 %v1667_v51, %v6650_v55  ;;  %1497 = vmatprep.mubr.bf16.mxu0 %v6372_v2  ;;  %v1672_v57 = vand.u32 %v1666_v53, %v6650_v55 }
  0xb2   : > { %1603 = vmatprep.mubr.bf16.mxu1 %v6372_v2 }
  0xb3   : > { %1677 = vmatprep.subr.bf16.mxu0 %v1675_v52 }
  0xb7   : > { %6009 = vmatmul.mubr.msk.bf16.vlgmr.msra.gmra.mrb[12].mxu0 %vm876_vm8, %v6008_v0 }
  0xb8   : > { %1678 = vmatpush1.bf16.msra.mxu0 %v1672_v57  ;;  %6013 = vmatmul.mubr.msk.bf16.vlgmr.msra.gmra.mrb[12].mxu1 %vm876_vm8, %v6012_v56 }
  0xb9   : > { %1709 = vmatprep.mubr.bf16.mxu0 %v6372_v2  ;;  %1824 = vmatprep.mubr.bf16.mxu1 %v6372_v2 }
  0xbf   : > { %6017 = vmatmul.mubr.msk.bf16.vlgmr.msra.gmra.mrb[16].mxu0 %vm876_vm8, %v6016_v58  ;;  %vm2356_vm8 = vcmp.lt.s32.totalorder %v6598_v29, 34 }
  0xc0   : > { %1874 = vmatprep.mubr.bf16.mxu0 %v6372_v2 }
  0xe5   : > { %v784_v59 = vpop.xlane.xlu0 %783 }
  0xe6   : > { %v785_v55 = vrot.slane %v784_v59, 4 }
  0xe8   : > { %v786_v60 = vadd.f32 %v785_v55, %v784_v59 }
  0xea   : > { %v787_v61 = vrot.slane %v786_v60, 2 }
  0xec   : > { %v788_v63 = vadd.f32 %v787_v61, %v786_v60 }
  0xee   : > { %v789_v5 = vrot.slane %v788_v63, 1 }
  0xf0   : > { %v790_v6 = vadd.f32 %v789_v5, %v788_v63 }
  0xf2   : > { %6278 = vpush %v790_v6 }
 0x123   : > { %s6279_s7 = spop %6278 }
 0x124   : > { %s792_s1 = smul.f32 0.000390625, %s6279_s7  ;;  %s8383_s7 = smov 112  }
 0x126   : > { %v793_v16 = vstv %s792_s1  ;;  %s8384_s1 = smov 16  }
 0x127   : > { %vm794_vm13 = vcmp.lt.f32.partialorder %v6582_v15, %v793_v16 }
 0x128   : > { %v5986_v19 = vsel %vm794_vm13, 1.0, %v6381_v18  ;;  %vm2523_vm13 = vcmp.lt.s32.totalorder %v6598_v29, 30 }
 0x129   : > { %v797_v20 = vsub.f32 1.0, %v5986_v19 }
 0x12b   : > { %v805_v21 = vrot.slane %v797_v20, %v804_v17  ;;  %v6812_v23 = vrot.slane %v797_v20, %v6579_v13  ;;  %v6820_v15 = vrot.slane %v797_v20, %v775_v14  ;;  %v1306_v14 = vunpack.c.l.bf16 %v6002_v8 }
 0x12d   : > { %1220 = vrot.lane.b32.xlu0 %v6812_v23, %s8339_s24  ;;  %851 = vrot.lane.b32.xlu1 %v6812_v23, %s8341_s6  ;;  %811 = vst.msk [vmem:[%s747_s26] sm:$0x3] %vm809_vm14, %v805_v21  ;;  %s8386_s24 = sld [smem:[#allocation11_spill]]  ;;  %v6324_v27 = vpack.i.bf16 %v1412_v24, %v1306_v14  ;;  %v6316_v14 = vpop.permute.xlu1 %6315  ;;  %s8350_s26 = smov 2   ;;  %vm2611_vm14 = vcmp.lt.s32.totalorder %v6598_v29, 2 }
 0x131   : > { %1510 = vrot.lane.b32.xlu0 %v6820_v15, %s8337_s5  ;;  %853 = vrot.lane.b32.xlu1 %v6820_v15, %s8341_s6  ;;  %s8387_s6 = smov 15   ;;  %v6321_v31 = vpop.permute.xlu1 %6320  ;;  %s8346_s5 = smov 34  }
 0x133   : > { %v1748_v10 = vld [vmem:[%s8386_s24] sm:$0xff]  ;;  %s8348_s24 = smov 30  }
 0x135   : > { %1616 = vrot.lane.b32.xlu0 %v6820_v15, %s8383_s7  ;;  %1008 = vrot.lane.b32.xlu1 %v6812_v23, %s8384_s1 }
 0x139   : > { %1720 = vrot.lane.b32.xlu0 %v6812_v23, %s8385_s27  ;;  %1010 = vrot.lane.b32.xlu1 %v6820_v15, %s8384_s1 }
 0x13d   : > { %1114 = vrot.lane.b32.xlu1 %v6812_v23, %s8387_s6  ;;  %1751 = vperm.xlu0 %6334, %v1748_v10  }
 0x141   : > { %1116 = vrot.lane.b32.xlu1 %v6820_v15, %s8387_s6 }
 0x145   : > { %6325 = vperm.xlu1 %6313, %v6324_v27  }
 0x149   : > { %6330 = vperm.xlu1 %6313, %v6329_v33  }
 0x14d   : > { %1733 = vperm.xlu1 %6313, %v1730_v35  }
 0x151   : > { %1222 = vrot.lane.b32.xlu1 %v6820_v15, %s8388_s28 }
 0x155   : > { %1402 = vrot.lane.b32.xlu1 %v6812_v23, %s8389_s22 }
 0x159   : > { %1404 = vrot.lane.b32.xlu1 %v6820_v15, %s8389_s22 }
 0x15d   : > { %1508 = vrot.lane.b32.xlu1 %v6812_v23, %s8390_s2 }
 0x161   : > { %1614 = vrot.lane.b32.xlu1 %v6812_v23, %s8383_s7 }
 0x165   : > { %1722 = vrot.lane.b32.xlu1 %v6820_v15, %s8385_s27 }
 0x172   : > { %v923_v40 = vpop.f32.mrb[0].mxu0 }
 0x173   : > { %v925_v41 = vpop.f32.mrb[1].mxu0  ;;  %v999_v42 = vpop.f32.mrb[0].mxu1 }
 0x174   : > { %v1001_v46 = vpop.f32.mrb[1].mxu1  ;;  %v927_v47 = vpop.f32.mrb[2].mxu0 }
 0x175   : > { %v928_v48 = vpop.f32.mrb[3].mxu0  ;;  %v1003_v49 = vpop.f32.mrb[2].mxu1 }
 0x176   : > { %v1004_v50 = vpop.f32.mrb[3].mxu1  ;;  %v6317_v49 = vunpack.i.l.bf16 %v6316_v14 }
 0x17a   : > { %v6862_v51 = vpop.f32.mrb[4].mxu0 }
 0x17b   : > { %v6864_v52 = vpop.f32.mrb[5].mxu0  ;;  %v6866_v53 = vpop.f32.mrb[4].mxu1 }
 0x17c   : > { %v6868_v0 = vpop.f32.mrb[5].mxu1  ;;  %v1109_v56 = vpop.f32.mrb[6].mxu0 }
 0x17d   : > { %v1110_v57 = vpop.f32.mrb[7].mxu0  ;;  %v1215_v58 = vpop.f32.mrb[6].mxu1 }
 0x17e   : > { %v1216_v59 = vpop.f32.mrb[7].mxu1 }
 0x182   : > { %v6870_v55 = vpop.f32.mrb[8].mxu0 }
 0x183   : > { %v6872_v60 = vpop.f32.mrb[9].mxu0  ;;  %v6874_v61 = vpop.f32.mrb[8].mxu1 }
 0x184   : > { %v1299_v63 = vpop.f32.mrb[10].mxu0  ;;  %v6876_v5 = vpop.f32.mrb[9].mxu1 }
 0x185   : > { %v1300_v6 = vpop.f32.mrb[11].mxu0  ;;  %v1397_v7 = vpop.f32.mrb[10].mxu1 }
 0x186   : > { %v1398_v11 = vpop.f32.mrb[11].mxu1 }
 0x18a   : > { %v6878_v12 = vpop.f32.mrb[12].mxu0 }
 0x18b   : > { %v6880_v16 = vpop.f32.mrb[13].mxu0  ;;  %v6882_v17 = vpop.f32.mrb[12].mxu1 }
 0x18c   : > { %v1503_v18 = vpop.f32.mrb[14].mxu0  ;;  %v6884_v19 = vpop.f32.mrb[13].mxu1 }
 0x18d   : > { %v1504_v20 = vpop.f32.mrb[15].mxu0  ;;  %v1609_v21 = vpop.f32.mrb[14].mxu1 }
 0x18e   : > { %v1610_v8 = vpop.f32.mrb[15].mxu1 }
 0x192   : > { %v6886_v10 = vpop.f32.mrb[16].mxu0 }
 0x193   : > { %v6888_v24 = vpop.f32.mrb[17].mxu0 }
 0x194   : > { %v1715_v26 = vpop.f32.mrb[18].mxu0 }
 0x195   : > { %v1716_v27 = vpop.f32.mrb[19].mxu0 }
 0x196   : > { %v6318_v27 = vunpack.i.h.bf16 %v6316_v14 }
 0x19f   : > { %v852_v32 = vpop.permute.xlu1 %851 }
 0x1a3   : > { %v854_v33 = vpop.permute.xlu1 %853 }
 0x1a4   : > { %v855_v34 = vsel %vm822_vm4, %v852_v32, %v854_v33  ;;  %v856_v35 = vsel %vm822_vm4, %v854_v33, %v852_v32 }
 0x1a5   : > { %v857_v47 = vmul.f32 %v856_v35, %v6618_v37  ;;  %v858_v48 = vmul.f32 %v855_v34, %v6615_v36 }
 0x1a7   : > { %v1009_v50 = vpop.permute.xlu1 %1008  ;;  %v869_v56 = vrot.slane %v857_v47, %v6579_v13  ;;  %v873_v57 = vrot.slane %v858_v48, %v6579_v13 }
 0x1a9   : > { %v874_v58 = vmul.f32 %v6317_v49, %v869_v56  ;;  %v875_v59 = vmul.f32 %v6317_v49, %v873_v57  ;;  %v6322_v57 = vunpack.i.l.bf16 %v6321_v31 }
 0x1ab   : > { %v924_v63 = vadd.f32 %v923_v40, %v874_v58  ;;  %v926_v6 = vadd.f32 %v925_v41, %v875_v59  ;;  %v1011_v7 = vpop.permute.xlu1 %1010 }
 0x1ac   : > { %v1012_v11 = vsel %vm936_vm3, %v1009_v50, %v1011_v7  ;;  %v1013_v18 = vsel %vm936_vm3, %v1011_v7, %v1009_v50 }
 0x1ad   : > { %v1006_v20 = vadd.f32 %v999_v42, %v924_v63  ;;  %v1014_v21 = vmul.f32 %v1013_v18, %v6624_v39  ;;  %v1015_v8 = vmul.f32 %v1012_v11, %v6621_v38  ;;  %v1007_v26 = vadd.f32 %v1001_v46, %v926_v6 }
 0x1af   : > { %v1115_v32 = vpop.permute.xlu1 %1114  ;;  %v1027_v33 = vrot.slane %v1014_v21, %v6579_v13  ;;  %v1031_v40 = vrot.slane %v1015_v8, %v6579_v13 }
 0x1b1   : > { %v1032_v41 = vmul.f32 %v6318_v27, %v1027_v33  ;;  %v1033_v34 = vmul.f32 %v6318_v27, %v1031_v40 }
 0x1b3   : > { %v1034_v35 = vadd.f32 %v1032_v41, %v1006_v20  ;;  %v1117_v47 = vpop.permute.xlu1 %1116  ;;  %v1035_v48 = vadd.f32 %v1033_v34, %v1007_v26  ;;  %v1221_v26 = vpop.permute.xlu0 %1220 }
 0x1b4   : > { %v1118_v49 = vsel %vm1042_vm6, %v1115_v32, %v1117_v47  ;;  %v1119_v42 = vsel %vm1042_vm6, %v1117_v47, %v1115_v32 }
 0x1b5   : > { %v1112_v50 = vadd.f32 %v6862_v51, %v1034_v35  ;;  %v1120_v46 = vmul.f32 %v1119_v42, %v6629_v44  ;;  %v1121_v14 = vmul.f32 %v1118_v49, %v6632_v45  ;;  %v1113_v56 = vadd.f32 %v6864_v52, %v1035_v48 }
 0x1b6   : > { %v1315_v49 = vrot.slane %v6812_v23, %v6579_v13  ;;  %v1319_v42 = vrot.slane %v6820_v15, %v6579_v13 }
 0x1b7   : > { %v1133_v58 = vrot.slane %v1120_v46, %v6579_v13  ;;  %v1137_v59 = vrot.slane %v1121_v14, %v6579_v13 }
 0x1b9   : > { %v1138_v63 = vmul.f32 %v6322_v57, %v1133_v58  ;;  %v1139_v6 = vmul.f32 %v6322_v57, %v1137_v59 }
 0x1bb   : > { %v1140_v7 = vadd.f32 %v1138_v63, %v1112_v50  ;;  %v1141_v11 = vadd.f32 %v1139_v6, %v1113_v56  ;;  %v1511_v50 = vpop.permute.xlu0 %1510 }
 0x1bd   : > { %v1218_v18 = vadd.f32 %v6866_v53, %v1140_v7  ;;  %v1219_v20 = vadd.f32 %v6868_v0, %v1141_v11  ;;  %v6323_v53 = vunpack.i.h.bf16 %v6321_v31 }
 0x1c4   : > { %v6326_v51 = vpop.permute.xlu1 %6325 }
 0x1c5   : > { %v6327_v35 = vunpack.i.l.bf16 %v6326_v51 }
 0x1c7   : > { %v1320_v58 = vmul.f32 %v6327_v35, %v1315_v49  ;;  %v1321_v59 = vmul.f32 %v6327_v35, %v1319_v42 }
 0x1c8   : > { %v6918_v21 = vpop.permute.xlu1 %6330 }
 0x1cc   : > { %v6920_v8 = vpop.permute.xlu1 %1733 }
 0x1d0   : > { %v1223_v52 = vpop.permute.xlu1 %1222 }
 0x1d1   : > { %v1224_v27 = vsel %vm1148_vm7, %v1221_v26, %v1223_v52  ;;  %v1225_v32 = vsel %vm1148_vm7, %v1223_v52, %v1221_v26  ;;  %v6328_v52 = vunpack.i.h.bf16 %v6326_v51 }
 0x1d2   : > { %v1226_v33 = vmul.f32 %v1225_v32, %v6658_v3  ;;  %v1227_v40 = vmul.f32 %v1224_v27, %v6661_v4  ;;  %v1617_v32 = vpop.permute.xlu0 %1616 }
 0x1d4   : > { %v1403_v41 = vpop.permute.xlu1 %1402  ;;  %v1239_v0 = vrot.slane %v1226_v33, %v6579_v13  ;;  %v1243_v34 = vrot.slane %v1227_v40, %v6579_v13 }
 0x1d6   : > { %v1244_v47 = vmul.f32 %v6323_v53, %v1239_v0  ;;  %v1245_v48 = vmul.f32 %v6323_v53, %v1243_v34  ;;  %v6332_v34 = vunpack.i.l.bf16 %v6918_v21 }
 0x1d8   : > { %v1246_v46 = vadd.f32 %v1244_v47, %v1218_v18  ;;  %v1247_v14 = vadd.f32 %v1245_v48, %v1219_v20  ;;  %v1405_v56 = vpop.permute.xlu1 %1404 }
 0x1d9   : > { %v1406_v31 = vsel %vm1330_vm9, %v1403_v41, %v1405_v56  ;;  %v1407_v57 = vsel %vm1330_vm9, %v1405_v56, %v1403_v41 }
 0x1da   : > { %v1302_v63 = vadd.f32 %v6870_v55, %v1246_v46  ;;  %v1303_v6 = vadd.f32 %v6872_v60, %v1247_v14  ;;  %v1408_v23 = vmul.f32 %v1406_v31, %v6675_v22  ;;  %v1409_v15 = vmul.f32 %v1407_v57, %v6686_v25  ;;  %v1721_v57 = vpop.permute.xlu0 %1720 }
 0x1dc   : > { %v1322_v7 = vadd.f32 %v1320_v58, %v1302_v63  ;;  %v1323_v11 = vadd.f32 %v1321_v59, %v1303_v6  ;;  %v1509_v18 = vpop.permute.xlu1 %1508  ;;  %v1421_v20 = vrot.slane %v1408_v23, %v6579_v13  ;;  %v1425_v26 = vrot.slane %v1409_v15, %v6579_v13 }
 0x1dd   : > { %v1512_v27 = vsel %vm1436_vm10, %v1509_v18, %v1511_v50  ;;  %v1513_v55 = vsel %vm1436_vm10, %v1511_v50, %v1509_v18  ;;  %v6333_v58 = vunpack.i.h.bf16 %v6918_v21 }
 0x1de   : > { %v1400_v60 = vadd.f32 %v6874_v61, %v1322_v7  ;;  %v1401_v33 = vadd.f32 %v6876_v5, %v1323_v11  ;;  %v1514_v40 = vmul.f32 %v1512_v27, %v6720_v54  ;;  %v1515_v53 = vmul.f32 %v1513_v55, %v6701_v43 }
 0x1df   : > { %v1426_v41 = vmul.f32 %v6328_v52, %v1421_v20  ;;  %v1427_v0 = vmul.f32 %v6328_v52, %v1425_v26 }
 0x1e0   : > { %v1615_v51 = vpop.permute.xlu1 %1614  ;;  %v1527_v35 = vrot.slane %v1514_v40, %v6579_v13  ;;  %v1531_v47 = vrot.slane %v1515_v53, %v6579_v13 }
 0x1e1   : > { %v1428_v48 = vadd.f32 %v1426_v41, %v1400_v60  ;;  %v1429_v49 = vadd.f32 %v1427_v0, %v1401_v33  ;;  %v1618_v61 = vsel %vm8363_vm11, %v1615_v51, %v1617_v32  ;;  %v1619_v5 = vsel %vm8363_vm11, %v1617_v32, %v1615_v51  ;;  %v1752_v41 = vpop.permute.xlu0 %1751 }
 0x1e2   : > { %v1620_v42 = vmul.f32 %v1618_v61, %v6732_v62  ;;  %v1621_v50 = vmul.f32 %v1619_v5, %v6739_v9  ;;  %v1532_v46 = vmul.f32 %v6332_v34, %v1527_v35  ;;  %v1533_v14 = vmul.f32 %v6332_v34, %v1531_v47 }
 0x1e3   : > { %v1506_v56 = vadd.f32 %v6878_v12, %v1428_v48  ;;  %v1507_v31 = vadd.f32 %v6880_v16, %v1429_v49 }
 0x1e4   : > { %v1723_v59 = vpop.permute.xlu1 %1722  ;;  %v1633_v63 = vrot.slane %v1620_v42, %v6579_v13  ;;  %v1637_v6 = vrot.slane %v1621_v50, %v6579_v13 }
 0x1e5   : > { %v1534_v23 = vadd.f32 %v1532_v46, %v1506_v56  ;;  %v1535_v15 = vadd.f32 %v1533_v14, %v1507_v31  ;;  %v1724_v7 = vsel %vm8362_vm12, %v1721_v57, %v1723_v59  ;;  %v1725_v11 = vsel %vm8362_vm12, %v1723_v59, %v1721_v57 }
 0x1e6   : > { %v1726_v12 = vmul.f32 %v1724_v7, %v6762_v28  ;;  %v1727_v16 = vmul.f32 %v1725_v11, %v6758_v1  ;;  %v1638_v18 = vmul.f32 %v6333_v58, %v1633_v63  ;;  %v1639_v20 = vmul.f32 %v6333_v58, %v1637_v6 }
 0x1e7   : > { %v1612_v21 = vadd.f32 %v6882_v17, %v1534_v23  ;;  %v1613_v26 = vadd.f32 %v6884_v19, %v1535_v15 }
 0x1e8   : > { %v1739_v52 = vrot.slane %v1726_v12, %v6579_v13  ;;  %v1743_v27 = vrot.slane %v1727_v16, %v6579_v13  ;;  %v1766_v16 = vld [vmem:[%s8393_s8] sm:$0xf] }
 0x1e9   : > { %v1640_v55 = vadd.f32 %v1638_v18, %v1612_v21  ;;  %v1641_v32 = vadd.f32 %v1639_v20, %v1613_v26 }
 0x1ea   : > { %v1744_v60 = vmul.f32 %v1739_v52, %v6920_v8  ;;  %v1745_v33 = vmul.f32 %v1743_v27, %v6920_v8 }
 0x1eb   : > { %v1718_v40 = vadd.f32 %v6886_v10, %v1640_v55  ;;  %v1719_v53 = vadd.f32 %v6888_v24, %v1641_v32  ;;  %v2323_v10 = vld [vmem:[%s8392_s9] sm:$0xff]  ;;  %s8344_s9 = smov 32  }
 0x1ed   : > { %v1746_v0 = vadd.f32 %v1744_v60, %v1718_v40  ;;  %v1747_v34 = vadd.f32 %v1745_v33, %v1719_v53  ;;  %v6024_v60 = vld [vmem:[%s8393_s8 + $0x8] sm:$0xf] }
 0x1ef   : > { %v1754_v17 = vadd.f32 %v1752_v41, %v1746_v0  ;;  %v1755_v51 = vadd.f32 %v1752_v41, %v1747_v34 }
 0x1f1   : > { %v6980_v19 = vmax.f32 %v1754_v17, 0.0  ;;  %v6986_v35 = vmax.f32 %v1755_v51, 0.0 }
 0x1f3   : > { %1758 = vrot.lane.b32.xlu0 %v6980_v19, %s8391_s25  ;;  %1769 = vrot.lane.b32.xlu1 %v6980_v19, %s8384_s1  ;;  %v2014_v26 = vpack.c.bf16 %v6986_v35, %v6986_v35  ;;  %v2013_v32 = vpack.c.bf16 %v6980_v19, %v6980_v19 }
 0x1f5   : > { %v2019_v51 = vsel %vm1785_vm15, %v2013_v32, 0 }
 0x1f7   : > { %1883 = vrot.lane.b32.xlu0 %v6980_v19, %s8387_s6  ;;  %1771 = vrot.lane.b32.xlu1 %v6986_v35, %s8384_s1 }
 0x1fb   : > { %1947 = vrot.lane.b32.xlu0 %v6980_v19, %s8388_s28  ;;  %1760 = vrot.lane.b32.xlu1 %v6986_v35, %s8391_s25 }
 0x1ff   : > { %2067 = vrot.lane.b32.xlu0 %v6980_v19, %s8389_s22  ;;  %1885 = vrot.lane.b32.xlu1 %v6986_v35, %s8387_s6 }
 0x203   : > { %2131 = vrot.lane.b32.xlu0 %v6980_v19, %s8390_s2  ;;  %1949 = vrot.lane.b32.xlu1 %v6986_v35, %s8388_s28 }
 0x207   : > { %2195 = vrot.lane.b32.xlu0 %v6980_v19, %s8383_s7  ;;  %2069 = vrot.lane.b32.xlu1 %v6986_v35, %s8389_s22 }
 0x20b   : > { %2259 = vrot.lane.b32.xlu0 %v6980_v19, %s8385_s27  ;;  %2133 = vrot.lane.b32.xlu1 %v6986_v35, %s8390_s2  ;;  %v6027_v19 = vld [vmem:[%s8393_s8 + $0xc] sm:$0xf] }
 0x20f   : > { %2326 = vperm.xlu0 %6334, %v2323_v10   ;;  %2197 = vrot.lane.b32.xlu1 %v6986_v35, %s8383_s7 }
 0x213   : > { %2261 = vrot.lane.b32.xlu1 %v6986_v35, %s8385_s27 }
 0x265   : > { %v1759_v24 = vpop.permute.xlu0 %1758  ;;  %v1770_v8 = vpop.permute.xlu1 %1769 }
 0x269   : > { %v1884_v47 = vpop.permute.xlu0 %1883  ;;  %v1772_v48 = vpop.permute.xlu1 %1771 }
 0x26a   : > { %v1773_v49 = vsel %vm936_vm3, %v1770_v8, %v1772_v48  ;;  %v1774_v61 = vsel %vm936_vm3, %v1772_v48, %v1770_v8 }
 0x26b   : > { %v1775_v5 = vmul.f32 %v1774_v61, %v6624_v39  ;;  %v1776_v42 = vmul.f32 %v1773_v49, %v6621_v38  ;;  %v6019_v38 = vld [vmem:[%s8393_s8 + $0x4] sm:$0xf]  ;;  %v6030_v61 = vld [vmem:[%s8393_s8 + $0x10] sm:$0xf] }
 0x26d   : > { %v1779_v50 = vpack.c.bf16 %v1775_v5, %v1775_v5  ;;  %v1780_v46 = vpack.c.bf16 %v1776_v42, %v1776_v42  ;;  %v1948_v14 = vpop.permute.xlu0 %1947  ;;  %v1761_v56 = vpop.permute.xlu1 %1760 }
 0x26e   : > { %v1762_v31 = vsel %vm822_vm4, %v1759_v24, %v1761_v56  ;;  %v1763_v57 = vsel %vm822_vm4, %v1761_v56, %v1759_v24 }
 0x26f   : > { %v1764_v58 = vmul.f32 %v1763_v57, %v6618_v37  ;;  %v1765_v59 = vmul.f32 %v1762_v31, %v6615_v36  ;;  %6020 = vmatprep.subr.msk.bf16.mxu1 %vm1785_vm15, %v1780_v46  ;;  %v1787_v39 = vsel %vm1785_vm15, %v1779_v50, 0  ;;  %v6033_v31 = vld [vmem:[%s8393_s8 + $0x14] sm:$0xf] }
 0x270   : > { %1793 = vmatpush1.bf16.msra.mxu1 %v1787_v39 }
 0x271   : > { %v1767_v63 = vpack.c.bf16 %v1764_v58, %v1764_v58  ;;  %v1768_v6 = vpack.c.bf16 %v1765_v59, %v1765_v59  ;;  %v1886_v23 = vpop.permute.xlu1 %1885  ;;  %v2068_v36 = vpop.permute.xlu0 %2067 }
 0x272   : > { %v1887_v15 = vsel %vm1042_vm6, %v1884_v47, %v1886_v23  ;;  %v1888_v37 = vsel %vm1042_vm6, %v1886_v23, %v1884_v47  ;;  %v6036_v23 = vld [vmem:[%s8393_s8 + $0x18] sm:$0xf] }
 0x273   : > { %v1889_v7 = vmul.f32 %v1888_v37, %v6629_v44  ;;  %v1890_v11 = vmul.f32 %v1887_v15, %v6632_v45  ;;  %6021 = vmatmul.mubr.msk.bf16.vlgmr.msra.gmra.mrb[16].mxu1 %vm1781_vm0, %v6019_v38  ;;  %6022 = vmatprep.subr.msk.bf16.mxu0 %vm1785_vm15, %v1768_v6  ;;  %v1837_v12 = vsel %vm1785_vm15, %v1767_v63, 0 }
 0x274   : > { %1843 = vmatpush1.bf16.msra.mxu0 %v1837_v12  ;;  %1936 = vmatprep.mubr.bf16.mxu1 %v6372_v2 }
 0x275   : > { %v1893_v18 = vpack.c.bf16 %v1889_v7, %v1889_v7  ;;  %v1894_v20 = vpack.c.bf16 %v1890_v11, %v1890_v11  ;;  %v1950_v21 = vpop.permute.xlu1 %1949  ;;  %v2132_v33 = vpop.permute.xlu0 %2131 }
 0x276   : > { %v1951_v44 = vsel %vm1148_vm7, %v1948_v14, %v1950_v21  ;;  %v1952_v45 = vsel %vm1148_vm7, %v1950_v21, %v1948_v14 }
 0x277   : > { %v1953_v52 = vmul.f32 %v1952_v45, %v6658_v3  ;;  %v1954_v27 = vmul.f32 %v1951_v44, %v6661_v4  ;;  %6023 = vmatmul.mubr.msk.bf16.vlgmr.msra.gmra.mrb[20].mxu0 %vm1781_vm0, %v1766_v16  ;;  %6025 = vmatprep.subr.msk.bf16.mxu1 %vm1785_vm15, %v1894_v20  ;;  %v1899_v55 = vsel %vm1785_vm15, %v1893_v18, 0 }
 0x278   : > { %1905 = vmatpush1.bf16.msra.mxu1 %v1899_v55  ;;  %2000 = vmatprep.mubr.bf16.mxu0 %v6372_v2 }
 0x279   : > { %v1957_v3 = vpack.c.bf16 %v1953_v52, %v1953_v52  ;;  %v1958_v40 = vpack.c.bf16 %v1954_v27, %v1954_v27  ;;  %v2070_v4 = vpop.permute.xlu1 %2069  ;;  %6031 = vmatprep.subr.msk.bf16.mxu1 %vm1785_vm15, %v2014_v26  ;;  %v2196_v8 = vpop.permute.xlu0 %2195 }
 0x27a   : > { %v2071_v53 = vsel %vm1330_vm9, %v2068_v36, %v2070_v4  ;;  %v2072_v41 = vsel %vm1330_vm9, %v2070_v4, %v2068_v36  ;;  %v6042_v36 = vld [vmem:[%s8393_s8 + $0x20] sm:$0xf] }
 0x27b   : > { %v2073_v0 = vmul.f32 %v2071_v53, %v6675_v22  ;;  %v2074_v34 = vmul.f32 %v2072_v41, %v6686_v25  ;;  %6026 = vmatmul.mubr.msk.bf16.vlgmr.msra.gmra.mrb[20].mxu1 %vm1781_vm0, %v6024_v60  ;;  %6028 = vmatprep.subr.msk.bf16.mxu0 %vm1785_vm15, %v1958_v40  ;;  %v1963_v17 = vsel %vm1785_vm15, %v1957_v3, 0 }
 0x27c   : > { %1969 = vmatpush1.bf16.msra.mxu0 %v1963_v17  ;;  %2025 = vmatpush1.bf16.msra.mxu1 %v2019_v51 }
 0x27d   : > { %v2077_v35 = vpack.c.bf16 %v2073_v0, %v2073_v0  ;;  %v2078_v10 = vpack.c.bf16 %v2074_v34, %v2074_v34  ;;  %v2134_v24 = vpop.permute.xlu1 %2133  ;;  %2056 = vmatprep.mubr.bf16.mxu1 %v6372_v2  ;;  %v2260_v57 = vpop.permute.xlu0 %2259 }
 0x27e   : > { %v2135_v22 = vsel %vm1436_vm10, %v2132_v33, %v2134_v24  ;;  %v2136_v25 = vsel %vm1436_vm10, %v2134_v24, %v2132_v33 }
 0x27f   : > { %v2137_v47 = vmul.f32 %v2135_v22, %v6720_v54  ;;  %v2138_v48 = vmul.f32 %v2136_v25, %v6701_v43  ;;  %6029 = vmatmul.mubr.msk.bf16.vlgmr.msra.gmra.mrb[24].mxu0 %vm1781_vm0, %v6027_v19  ;;  %6034 = vmatprep.subr.msk.bf16.mxu0 %vm1785_vm15, %v2078_v10  ;;  %v2083_v49 = vsel %vm1785_vm15, %v2077_v35, 0 }
 0x280   : > { %2089 = vmatpush1.bf16.msra.mxu0 %v2083_v49  ;;  %2120 = vmatprep.mubr.bf16.mxu0 %v6372_v2 }
 0x281   : > { %v2141_v5 = vpack.c.bf16 %v2137_v47, %v2137_v47  ;;  %v2142_v42 = vpack.c.bf16 %v2138_v48, %v2138_v48  ;;  %v2198_v50 = vpop.permute.xlu1 %2197 }
 0x282   : > { %v2199_v54 = vsel %vm8363_vm11, %v2196_v8, %v2198_v50  ;;  %v2200_v43 = vsel %vm8363_vm11, %v2198_v50, %v2196_v8 }
 0x283   : > { %v2201_v46 = vmul.f32 %v2199_v54, %v6732_v62  ;;  %v2202_v14 = vmul.f32 %v2200_v43, %v6739_v9  ;;  %6032 = vmatmul.mubr.msk.bf16.vlgmr.msra.gmra.mrb[24].mxu1 %vm1781_vm0, %v6030_v61  ;;  %6037 = vmatprep.subr.msk.bf16.mxu1 %vm1785_vm15, %v2142_v42  ;;  %v2147_v56 = vsel %vm1785_vm15, %v2141_v5, 0 }
 0x284   : > { %2153 = vmatpush1.bf16.msra.mxu1 %v2147_v56  ;;  %2184 = vmatprep.mubr.bf16.mxu1 %v6372_v2 }
 0x285   : > { %v2205_v58 = vpack.c.bf16 %v2201_v46, %v2201_v46  ;;  %v2206_v59 = vpack.c.bf16 %v2202_v14, %v2202_v14  ;;  %v2262_v39 = vpop.permute.xlu1 %2261 }
 0x286   : > { %v2263_v62 = vsel %vm8362_vm12, %v2260_v57, %v2262_v39  ;;  %v2264_v9 = vsel %vm8362_vm12, %v2262_v39, %v2260_v57  ;;  %vm2941_vm12 = vcmp.lt.s32.totalorder %v6598_v29, 96 }
 0x287   : > { %v2265_v38 = vmul.f32 %v2263_v62, %v6762_v28  ;;  %v2266_v63 = vmul.f32 %v2264_v9, %v6758_v1  ;;  %6035 = vmatmul.mubr.msk.bf16.vlgmr.msra.gmra.mrb[28].mxu0 %vm1781_vm0, %v6033_v31  ;;  %6040 = vmatprep.subr.msk.bf16.mxu0 %vm1785_vm15, %v2206_v59  ;;  %v2211_v6 = vsel %vm1785_vm15, %v2205_v58, 0  ;;  %v6039_v28 = vld [vmem:[%s8393_s8 + $0x1c] sm:$0xf]  ;;  %s8399_s8 = smov 126  }
 0x288   : > { %2217 = vmatpush1.bf16.msra.mxu0 %v2211_v6  ;;  %2248 = vmatprep.mubr.bf16.mxu0 %v6372_v2 }
 0x289   : > { %v2269_v15 = vpack.c.bf16 %v2265_v38, %v2265_v38  ;;  %v2270_v37 = vpack.c.bf16 %v2266_v63, %v2266_v63 }
 0x28b   : > { %6038 = vmatmul.mubr.msk.bf16.vlgmr.msra.gmra.mrb[28].mxu1 %vm1781_vm0, %v6036_v23  ;;  %6043 = vmatprep.subr.msk.bf16.mxu1 %vm1785_vm15, %v2270_v37  ;;  %v2275_v1 = vsel %vm1785_vm15, %v2269_v15, 0 }
 0x28c   : > { %2281 = vmatpush1.bf16.msra.mxu1 %v2275_v1  ;;  %2312 = vmatprep.mubr.bf16.mxu1 %v6372_v2 }
 0x28e   : > { %v2327_v62 = vpop.permute.xlu0 %2326 }
 0x28f   : > { %6041 = vmatmul.mubr.msk.bf16.vlgmr.msra.gmra.mrb[32].mxu0 %vm1781_vm0, %v6039_v28 }
 0x290   : > { %2449 = vmatprep.mubr.bf16.mxu0 %v6372_v2 }
 0x293   : > { %6044 = vmatmul.mubr.msk.bf16.vlgmr.msra.gmra.mrb[32].mxu1 %vm1781_vm0, %v6042_v36 }
 0x294   : > { %3213 = vmatprep.mubr.bf16.mxu1 %v6372_v2 }
 0x346   : > { %v1826_v7 = vpop.f32.mrb[16].mxu1 }
 0x347   : > { %v1828_v11 = vpop.f32.mrb[17].mxu1 }
 0x348   : > { %v1830_v12 = vpop.f32.mrb[18].mxu1 }
 0x349   : > { %v1831_v16 = vpop.f32.mrb[19].mxu1 }
 0x34a   : > { %v1876_v18 = vpop.f32.mrb[20].mxu0 }
 0x34b   : > { %v1877_v20 = vadd.f32 %v1876_v18, %v1826_v7  ;;  %v1878_v21 = vpop.f32.mrb[21].mxu0 }
 0x34c   : > { %v1879_v44 = vadd.f32 %v1878_v21, %v1828_v11  ;;  %v1880_v45 = vpop.f32.mrb[22].mxu0 }
 0x34d   : > { %v1881_v26 = vpop.f32.mrb[23].mxu0 }
 0x34e   : > { %v1938_v52 = vpop.f32.mrb[20].mxu1  ;;  %v3112_v26 = vld [vmem:[%s8307_s11 + $0x8] sm:$0xff] }
 0x34f   : > { %v1945_v27 = vadd.f32 %v1938_v52, %v1877_v20  ;;  %v1940_v55 = vpop.f32.mrb[21].mxu1  ;;  %v3111_v52 = vld [vmem:[%s8307_s11] sm:$0xff] }
 0x350   : > { %v1946_v32 = vadd.f32 %v1940_v55, %v1879_v44  ;;  %v1942_v60 = vpop.f32.mrb[22].mxu1 }
 0x351   : > { %v1943_v33 = vpop.f32.mrb[23].mxu1 }
 0x352   : > { %v2002_v3 = vpop.f32.mrb[24].mxu0 }
 0x353   : > { %v2009_v40 = vadd.f32 %v2002_v3, %v1945_v27  ;;  %v2004_v4 = vpop.f32.mrb[25].mxu0 }
 0x354   : > { %v2010_v53 = vadd.f32 %v2004_v4, %v1946_v32  ;;  %v2006_v41 = vpop.f32.mrb[26].mxu0 }
 0x355   : > { %v2007_v0 = vpop.f32.mrb[27].mxu0 }
 0x356   : > { %v2058_v34 = vpop.f32.mrb[24].mxu1 }
 0x357   : > { %v2065_v17 = vadd.f32 %v2058_v34, %v2009_v40  ;;  %v2060_v51 = vpop.f32.mrb[25].mxu1 }
 0x358   : > { %v2066_v19 = vadd.f32 %v2060_v51, %v2010_v53  ;;  %v2062_v35 = vpop.f32.mrb[26].mxu1 }
 0x359   : > { %v2063_v10 = vpop.f32.mrb[27].mxu1 }
 0x35a   : > { %v2122_v24 = vpop.f32.mrb[28].mxu0 }
 0x35b   : > { %v2129_v22 = vadd.f32 %v2122_v24, %v2065_v17  ;;  %v2124_v25 = vpop.f32.mrb[29].mxu0 }
 0x35c   : > { %v2130_v8 = vadd.f32 %v2124_v25, %v2066_v19  ;;  %v2126_v47 = vpop.f32.mrb[30].mxu0 }
 0x35d   : > { %v2127_v48 = vpop.f32.mrb[31].mxu0 }
 0x35e   : > { %v2186_v49 = vpop.f32.mrb[28].mxu1 }
 0x35f   : > { %v2193_v61 = vadd.f32 %v2186_v49, %v2129_v22  ;;  %v2188_v5 = vpop.f32.mrb[29].mxu1  ;;  %v6336_v49 = vld [vmem:[%s8306_s10 + $0x8] sm:$0xff]  }
 0x360   : > { %v2194_v42 = vadd.f32 %v2188_v5, %v2130_v8  ;;  %v2190_v50 = vpop.f32.mrb[30].mxu1 }
 0x361   : > { %v2191_v54 = vpop.f32.mrb[31].mxu1 }
 0x362   : > { %v2250_v43 = vpop.f32.mrb[32].mxu0 }
 0x363   : > { %v2257_v46 = vadd.f32 %v2250_v43, %v2193_v61  ;;  %v2252_v14 = vpop.f32.mrb[33].mxu0 }
 0x364   : > { %v2258_v56 = vadd.f32 %v2252_v14, %v2194_v42  ;;  %v2254_v31 = vpop.f32.mrb[34].mxu0 }
 0x365   : > { %v2255_v57 = vpop.f32.mrb[35].mxu0 }
 0x366   : > { %v2314_v58 = vpop.f32.mrb[32].mxu1 }
 0x367   : > { %v2321_v59 = vadd.f32 %v2314_v58, %v2257_v46  ;;  %v2316_v39 = vpop.f32.mrb[33].mxu1 }
 0x368   : > { %v2322_v9 = vadd.f32 %v2316_v39, %v2258_v56  ;;  %v2318_v38 = vpop.f32.mrb[34].mxu1 }
 0x369   : > { %v2329_v63 = vadd.f32 %v2327_v62, %v2321_v59  ;;  %v2319_v6 = vpop.f32.mrb[35].mxu1 }
 0x36a   : > { %v2330_v23 = vadd.f32 %v2327_v62, %v2322_v9  ;;  %v6337_v6 = vld [vmem:[%s8306_s10] sm:$0xff]  }
 0x36b   : > { %v7134_v15 = vmax.f32 %v2329_v63, 0.0 }
 0x36c   : > { %v7136_v37 = vmax.f32 %v2330_v23, 0.0 }
 0x36d   : > { %2335 = vrot.lane.b32.xlu1 %v7134_v15, %s8389_s22 }
 0x36e   : > { %2337 = vrot.lane.b32.xlu0 %v7136_v37, %s8389_s22 }
 0x3df   : > { %v2336_v1 = vpop.permute.xlu1 %2335 }
 0x3e0   : > { %v2338_v28 = vpop.permute.xlu0 %2337 }
 0x3e1   : > { %v2339_v36 = vsel %vm1330_vm9, %v2336_v1, %v2338_v28  ;;  %v2340_v7 = vsel %vm1330_vm9, %v2338_v28, %v2336_v1 }
 0x3e2   : > { %v2342_v11 = vmax.f32 %v7136_v37, %v2340_v7  ;;  %v2341_v12 = vmax.f32 %v7134_v15, %v2339_v36 }
 0x3e4   : > { %2345 = vrot.lane.b32.xlu0 %v2342_v11, %s8383_s7  ;;  %2343 = vrot.lane.b32.xlu1 %v2341_v12, %s8383_s7 }
 0x456   : > { %v2346_v16 = vpop.permute.xlu0 %2345  ;;  %v2344_v18 = vpop.permute.xlu1 %2343 }
 0x457   : > { %v2347_v20 = vsel %vm8363_vm11, %v2344_v18, %v2346_v16  ;;  %v2348_v21 = vsel %vm8363_vm11, %v2346_v16, %v2344_v18  ;;  %vm3029_vm11 = vcmp.lt.s32.totalorder %v6598_v29, 94 }
 0x458   : > { %v7154_v44 = vmax.f32 %v2341_v12, %v2347_v20  ;;  %v7156_v45 = vmax.f32 %v2342_v11, %v2348_v21  ;;  %v6338_v12 = vld [vmem:[%s8306_s10 + $0x10] sm:$0xff]  }
 0x45a   : > { %2380 = vrot.lane.b32.xlu0 %v7156_v45, %s8344_s9  ;;  %2378 = vrot.lane.b32.xlu1 %v7154_v44, %s8344_s9  ;;  %s8352_s9 = smov 126   ;;  %v2697_v18 = vpack.c.bf16 %v7156_v45, %v7156_v45 }
 0x45e   : > { %2354 = vrot.lane.b32.xlu0 %v7156_v45, %s8346_s5  ;;  %2352 = vrot.lane.b32.xlu1 %v7154_v44, %s8346_s5  ;;  %s8355_s5 = smov 98  }
 0x462   : > { %2521 = vrot.lane.b32.xlu0 %v7156_v45, %s8348_s24  ;;  %2519 = vrot.lane.b32.xlu1 %v7154_v44, %s8348_s24  ;;  %s8358_s24 = smov 96  }
 0x466   : > { %2609 = vrot.lane.b32.xlu0 %v7156_v45, %s8350_s26  ;;  %2607 = vrot.lane.b32.xlu1 %v7154_v44, %s8350_s26  ;;  %s6389_s26 = smov 94  }
 0x46a   : > { %2763 = vrot.lane.b32.xlu0 %v7156_v45, %s8352_s9  ;;  %2761 = vrot.lane.b32.xlu1 %v7154_v44, %s8352_s9  ;;  %s8400_s9 = smov 98  }
 0x46e   : > { %2851 = vrot.lane.b32.xlu0 %v7156_v45, %s8355_s5  ;;  %2849 = vrot.lane.b32.xlu1 %v7154_v44, %s8355_s5  ;;  %s8398_s5 = smov 2  }
 0x472   : > { %2939 = vrot.lane.b32.xlu0 %v7156_v45, %s8358_s24  ;;  %2937 = vrot.lane.b32.xlu1 %v7154_v44, %s8358_s24  ;;  %s8394_s24 = sld [smem:[#allocation7_spill]] }
 0x476   : > { %3027 = vrot.lane.b32.xlu0 %v7156_v45, %s6389_s26  ;;  %3025 = vrot.lane.b32.xlu1 %v7154_v44, %s6389_s26 }
 0x478   : > { %v6045_v27 = vld [vmem:[%s8394_s24 + $0x1] ss:$8 sm:$0x3]  ;;  %v2351_v60 = vld [vmem:[%s8394_s24] ss:$8 sm:$0x3] }
 0x479   : > { %v7201_v55 = vrot.slane %v6045_v27, %v6579_v13  ;;  %v7204_v32 = vrot.slane %v6045_v27, %v6601_v30  ;;  %v7217_v0 = vrot.slane %v2351_v60, %v6579_v13  ;;  %v7220_v34 = vrot.slane %v2351_v60, %v6601_v30  ;;  %v6054_v17 = vld [vmem:[%s8394_s24 + $0x2] ss:$8 sm:$0x3]  ;;  %v6060_v31 = vld [vmem:[%s8394_s24 + $0x3] ss:$8 sm:$0x3] }
 0x47a   : > { %3120 = vperm.xlu0 %6334, %v3112_v26   ;;  %3115 = vperm.xlu1 %6313, %v3111_v52   ;;  %v7235_v48 = vrot.slane %v6054_v17, %v6601_v30  ;;  %v7243_v43 = vrot.slane %v6054_v17, %v6579_v13  ;;  %v7258_v62 = vrot.slane %v6060_v31, %v6601_v30  ;;  %v6071_v20 = vld [vmem:[%s8394_s24 + $0x5] ss:$8 sm:$0x3]  ;;  %v6339_v60 = vld [vmem:[%s8306_s10 + $0x18] sm:$0xff]  }
 0x47b   : > { %v7268_v23 = vrot.slane %v6060_v31, %v6579_v13  ;;  %v7291_v52 = vrot.slane %v6071_v20, %v6601_v30  ;;  %v6341_v31 = vld [vmem:[%s8306_s10 + $0x28] sm:$0xff]  }
 0x4cc   : > { %v2381_v33 = vpop.permute.xlu0 %2380  ;;  %v2379_v3 = vpop.permute.xlu1 %2378 }
 0x4cd   : > { %v2383_v40 = vsel %vm2382_vm1, %v2379_v3, %v2381_v33  ;;  %v2384_v4 = vsel %vm2382_vm1, %v2381_v33, %v2379_v3  ;;  %v2696_v33 = vpack.c.bf16 %v7154_v44, %v7154_v44  ;;  %v7302_v3 = vrot.slane %v6071_v20, %v6579_v13 }
 0x4ce   : > { %v2396_v53 = vmul.f32 %v7201_v55, %v2384_v4  ;;  %v2397_v41 = vmul.f32 %v7204_v32, %v2383_v40 }
 0x4cf   : > { %v2707_v4 = vsel %vm1785_vm15, %v2696_v33, 0 }
 0x4d0   : > { %v2401_v51 = vpack.c.bf16 %v2396_v53, %v2396_v53  ;;  %v2402_v19 = vpack.c.bf16 %v2397_v41, %v2397_v41  ;;  %v2355_v35 = vpop.permute.xlu0 %2354  ;;  %v2353_v10 = vpop.permute.xlu1 %2352  ;;  %v6077_v41 = vld [vmem:[%s8394_s24 + $0x6] ss:$8 sm:$0x3] }
 0x4d1   : > { %v2357_v24 = vsel %vm2356_vm8, %v2353_v10, %v2355_v35  ;;  %v2358_v22 = vsel %vm2356_vm8, %v2355_v35, %v2353_v10 }
 0x4d2   : > { %v2370_v25 = vmul.f32 %v7217_v0, %v2358_v22  ;;  %v2371_v8 = vmul.f32 %v7220_v34, %v2357_v24  ;;  %6049 = vmatprep.subr.msk.bf16.mxu0 %vm1785_vm15, %v2402_v19  ;;  %v2412_v47 = vsel %vm1785_vm15, %v2401_v51, 0  ;;  %v7316_v19 = vrot.slane %v6077_v41, %v6601_v30  ;;  %v6340_v22 = vld [vmem:[%s8306_s10 + $0x20] sm:$0xff]  }
 0x4d3   : > { %2418 = vmatpush1.bf16.msra.mxu0 %v2412_v47 }
 0x4d4   : > { %v2374_v61 = vpack.c.bf16 %v2370_v25, %v2370_v25  ;;  %v2375_v5 = vpack.c.bf16 %v2371_v8, %v2371_v8  ;;  %v2522_v42 = vpop.permute.xlu0 %2521  ;;  %v2520_v50 = vpop.permute.xlu1 %2519  ;;  %v7325_v25 = vrot.slane %v6077_v41, %v6579_v13 }
 0x4d5   : > { %v2524_v54 = vsel %vm2523_vm13, %v2520_v50, %v2522_v42  ;;  %v2525_v56 = vsel %vm2523_vm13, %v2522_v42, %v2520_v50 }
 0x4d6   : > { %v2538_v46 = vmul.f32 %v7235_v48, %v2524_v54  ;;  %6050 = vmatmul.mubr.msk.bf16.vlgmr.msra.gmra.mrb[36].mxu0 %vm1781_vm0, %v6336_v49  ;;  %6052 = vmatprep.subr.msk.bf16.mxu0 %vm1785_vm15, %v2375_v5  ;;  %v2469_v14 = vsel %vm1785_vm15, %v2374_v61, 0  ;;  %v2537_v39 = vmul.f32 %v7243_v43, %v2525_v56  ;;  %v6083_v61 = vld [vmem:[%s8394_s24 + $0x7] ss:$8 sm:$0x3] }
 0x4d7   : > { %2475 = vmatpush1.bf16.msra.mxu0 %v2469_v14  ;;  %2506 = vmatprep.mubr.bf16.mxu0 %v6372_v2  ;;  %v7339_v54 = vrot.slane %v6083_v61, %v6601_v30 }
 0x4d8   : > { %v2543_v57 = vpack.c.bf16 %v2538_v46, %v2538_v46  ;;  %v2610_v58 = vpop.permute.xlu0 %2609  ;;  %v2608_v59 = vpop.permute.xlu1 %2607  ;;  %v2542_v38 = vpack.c.bf16 %v2537_v39, %v2537_v39 }
 0x4d9   : > { %v2612_v9 = vsel %vm2611_vm14, %v2608_v59, %v2610_v58  ;;  %v2613_v36 = vsel %vm2611_vm14, %v2610_v58, %v2608_v59 }
 0x4da   : > { %6058 = vmatprep.subr.msk.bf16.mxu0 %vm1785_vm15, %v2543_v57  ;;  %v2626_v63 = vmul.f32 %v7258_v62, %v2612_v9  ;;  %v2553_v28 = vsel %vm1785_vm15, %v2542_v38, 0  ;;  %v2625_v7 = vmul.f32 %v7268_v23, %v2613_v36  ;;  %v7348_v57 = vrot.slane %v6083_v61, %v6579_v13  ;;  %v6089_v9 = vld [vmem:[%s8394_s24 + $0x10] ss:$8 sm:$0x3] }
 0x4dc   : > { %v2631_v1 = vpack.c.bf16 %v2626_v63, %v2626_v63  ;;  %v2630_v11 = vpack.c.bf16 %v2625_v7, %v2625_v7  ;;  %v2764_v21 = vpop.permute.xlu0 %2763  ;;  %v2762_v26 = vpop.permute.xlu1 %2761 }
 0x4dd   : > { %v2767_v27 = vsel %vm2765_vm2, %v2764_v21, %v2762_v26  ;;  %v2766_v53 = vsel %vm2765_vm2, %v2762_v26, %v2764_v21 }
 0x4de   : > { %v2641_v16 = vsel %vm1785_vm15, %v2630_v11, 0  ;;  %v2780_v45 = vmul.f32 %v7291_v52, %v2767_v27  ;;  %v2779_v51 = vmul.f32 %v7302_v3, %v2766_v53  ;;  %v6342_v11 = vld [vmem:[%s8306_s10 + $0x30] sm:$0xff]   ;;  %v6343_v27 = vld [vmem:[%s8306_s10 + $0x38] sm:$0xff]  }
 0x4e0   : > { %v2785_v40 = vpack.c.bf16 %v2780_v45, %v2780_v45  ;;  %v2852_v17 = vpop.permute.xlu0 %2851  ;;  %v2850_v44 = vpop.permute.xlu1 %2849  ;;  %v2784_v10 = vpack.c.bf16 %v2779_v51, %v2779_v51 }
 0x4e1   : > { %v2855_v35 = vsel %vm2853_vm5, %v2852_v17, %v2850_v44  ;;  %v2854_v49 = vsel %vm2853_vm5, %v2850_v44, %v2852_v17 }
 0x4e2   : > { %6053 = vmatmul.mubr.msk.bf16.vlgmr.msra.gmra.mrb[36].mxu0 %vm1781_vm0, %v6337_v6  ;;  %v2868_v24 = vmul.f32 %v7316_v19, %v2855_v35  ;;  %v2795_v47 = vsel %vm1785_vm15, %v2784_v10, 0  ;;  %v2867_v50 = vmul.f32 %v7325_v25, %v2854_v49 }
 0x4e3   : > { %2559 = vmatpush1.bf16.msra.mxu0 %v2553_v28  ;;  %2590 = vmatprep.mubr.bf16.mxu0 %v6372_v2 }
 0x4e4   : > { %6064 = vmatprep.subr.msk.bf16.mxu0 %vm1785_vm15, %v2631_v1  ;;  %v2873_v8 = vpack.c.bf16 %v2868_v24, %v2868_v24  ;;  %v2940_v5 = vpop.permute.xlu0 %2939  ;;  %v2938_v42 = vpop.permute.xlu1 %2937  ;;  %v2872_v14 = vpack.c.bf16 %v2867_v50, %v2867_v50  ;;  %v7362_v1 = vrot.slane %v6089_v9, %v6601_v30 }
 0x4e5   : > { %v2943_v46 = vsel %vm2941_vm12, %v2940_v5, %v2938_v42  ;;  %v2942_v39 = vsel %vm2941_vm12, %v2938_v42, %v2940_v5  ;;  %v3791_v5 = vld [vmem:[%s8309_s13] sm:$0xff]  ;;  %v3792_v42 = vld [vmem:[%s8309_s13 + $0x8] sm:$0xff] }
 0x4e6   : > { %v2956_v56 = vmul.f32 %v7339_v54, %v2943_v46  ;;  %v2883_v59 = vsel %vm1785_vm15, %v2872_v14, 0  ;;  %v2955_v6 = vmul.f32 %v7348_v57, %v2942_v39 }
 0x4e8   : > { %v2961_v58 = vpack.c.bf16 %v2956_v56, %v2956_v56  ;;  %v3028_v38 = vpop.permute.xlu0 %3027  ;;  %v3026_v63 = vpop.permute.xlu1 %3025  ;;  %v2960_v36 = vpack.c.bf16 %v2955_v6, %v2955_v6 }
 0x4e9   : > { %v3031_v28 = vsel %vm3029_vm11, %v3028_v38, %v3026_v63  ;;  %v3030_v20 = vsel %vm3029_vm11, %v3026_v63, %v3028_v38 }
 0x4ea   : > { %v3044_v7 = vmul.f32 %v7362_v1, %v3031_v28 }
 0x4ee   : > { %6059 = vmatmul.mubr.msk.bf16.vlgmr.msra.gmra.mrb[36].mxu0 %vm1781_vm0, %v6338_v12  ;;  %v7371_v12 = vrot.slane %v6089_v9, %v6579_v13 }
 0x4ef   : > { %2647 = vmatpush1.bf16.msra.mxu0 %v2641_v16  ;;  %2678 = vmatprep.mubr.bf16.mxu0 %v6372_v2  ;;  %v3049_v16 = vpack.c.bf16 %v3044_v7, %v3044_v7 }
 0x4f0   : > { %6069 = vmatprep.subr.msk.bf16.mxu0 %vm1785_vm15, %v2697_v18  ;;  %v2971_v18 = vsel %vm1785_vm15, %v2960_v36, 0  ;;  %v3043_v21 = vmul.f32 %v7371_v12, %v3030_v20 }
 0x4f2   : > { %v3048_v26 = vpack.c.bf16 %v3043_v21, %v3043_v21 }
 0x4f4   : > { %v3059_v45 = vsel %vm1785_vm15, %v3048_v26, 0 }
 0x4f9   : > { %v3116_v33 = vpop.permute.xlu1 %3115  ;;  %v3121_v41 = vpop.permute.xlu0 %3120 }
 0x4fa   : > { %6065 = vmatmul.mubr.msk.bf16.vlgmr.msra.gmra.mrb[36].mxu0 %vm1781_vm0, %v6339_v60  ;;  %v6344_v60 = vld [vmem:[%s8306_s10 + $0x40] sm:$0xff]  }
 0x4fb   : > { %2713 = vmatpush1.bf16.msra.mxu0 %v2707_v4  ;;  %2744 = vmatprep.mubr.bf16.mxu0 %v6372_v2 }
 0x4fc   : > { %6075 = vmatprep.subr.msk.bf16.mxu0 %vm1785_vm15, %v2785_v40 }
 0x506   : > { %6070 = vmatmul.mubr.msk.bf16.vlgmr.msra.gmra.mrb[36].mxu0 %vm1781_vm0, %v6340_v22 }
 0x507   : > { %2801 = vmatpush1.bf16.msra.mxu0 %v2795_v47  ;;  %2832 = vmatprep.mubr.bf16.mxu0 %v6372_v2 }
 0x508   : > { %6081 = vmatprep.subr.msk.bf16.mxu0 %vm1785_vm15, %v2873_v8 }
 0x512   : > { %6076 = vmatmul.mubr.msk.bf16.vlgmr.msra.gmra.mrb[36].mxu0 %vm1781_vm0, %v6341_v31 }
 0x513   : > { %2889 = vmatpush1.bf16.msra.mxu0 %v2883_v59  ;;  %2920 = vmatprep.mubr.bf16.mxu0 %v6372_v2 }
 0x514   : > { %6087 = vmatprep.subr.msk.bf16.mxu0 %vm1785_vm15, %v2961_v58 }
 0x51e   : > { %6082 = vmatmul.mubr.msk.bf16.vlgmr.msra.gmra.mrb[36].mxu0 %vm1781_vm0, %v6342_v11 }
 0x51f   : > { %2977 = vmatpush1.bf16.msra.mxu0 %v2971_v18  ;;  %3008 = vmatprep.mubr.bf16.mxu0 %v6372_v2  ;;  %v6345_v18 = vld [vmem:[%s8308_s12 + $0x8] sm:$0xff]  }
 0x520   : > { %6093 = vmatprep.subr.msk.bf16.mxu0 %vm1785_vm15, %v3049_v16 }
 0x52a   : > { %6088 = vmatmul.mubr.msk.bf16.vlgmr.msra.gmra.mrb[36].mxu0 %vm1781_vm0, %v6343_v27 }
 0x52b   : > { %3065 = vmatpush1.bf16.msra.mxu0 %v3059_v45  ;;  %3096 = vmatprep.mubr.bf16.mxu0 %v6372_v2 }
 0x536   : > { %6094 = vmatmul.mubr.msk.bf16.vlgmr.msra.gmra.mrb[36].mxu0 %vm1781_vm0, %v6344_v60 }
 0x537   : > { %3969 = vmatprep.mubr.bf16.mxu0 %v6372_v2 }
 0x609   : > { %v3098_v40 = vpop.f32.mrb[36].mxu0 }
 0x60a   : > { %v3123_v4 = vadd.f32 %v3116_v33, %v3098_v40  ;;  %v3100_v53 = vpop.f32.mrb[37].mxu0 }
 0x60b   : > { %v3124_v17 = vadd.f32 %v3116_v33, %v3100_v53  ;;  %v3102_v44 = vpop.f32.mrb[38].mxu0 }
 0x60c   : > { %v7391_v51 = vmax.f32 %v3123_v4, 0.0  ;;  %v3125_v35 = vadd.f32 %v3121_v41, %v3102_v44  ;;  %v3104_v10 = vpop.f32.mrb[39].mxu0 }
 0x60d   : > { %v3126_v24 = vadd.f32 %v3121_v41, %v3104_v10  ;;  %v7397_v8 = vmax.f32 %v3124_v17, 0.0 }
 0x60e   : > { %v7393_v22 = vmax.f32 %v3125_v35, 0.0  ;;  %3151 = vrot.lane.b32.xlu1 %v7391_v51, %s8395_s23 }
 0x60f   : > { %v7399_v47 = vmax.f32 %v3126_v24, 0.0 }
 0x610   : > { %3153 = vrot.lane.b32.xlu0 %v7393_v22, %s8395_s23  ;;  %v3430_v49 = vpack.c.bf16 %v7393_v22, %v7391_v51 }
 0x611   : > { %v3431_v61 = vpack.c.bf16 %v7399_v47, %v7397_v8 }
 0x612   : > { %3155 = vrot.lane.b32.xlu1 %v7397_v8, %s8395_s23 }
 0x614   : > { %3157 = vrot.lane.b32.xlu0 %v7399_v47, %s8395_s23  ;;  %s8401_s23 = smov 96  }
 0x616   : > { %3131 = vrot.lane.b32.xlu1 %v7391_v51, %s8396_s4 }
 0x618   : > { %3133 = vrot.lane.b32.xlu0 %v7393_v22, %s8396_s4 }
 0x61a   : > { %3135 = vrot.lane.b32.xlu1 %v7397_v8, %s8396_s4 }
 0x61c   : > { %3137 = vrot.lane.b32.xlu0 %v7399_v47, %s8396_s4 }
 0x61e   : > { %3275 = vrot.lane.b32.xlu1 %v7391_v51, %s8397_s29 }
 0x620   : > { %3277 = vrot.lane.b32.xlu0 %v7393_v22, %s8397_s29 }
 0x622   : > { %3279 = vrot.lane.b32.xlu1 %v7397_v8, %s8397_s29 }
 0x624   : > { %3281 = vrot.lane.b32.xlu0 %v7399_v47, %s8397_s29  ;;  %s8419_s29 = sshll.u32 %s8428_s30, 2 }
 0x626   : > { %3351 = vrot.lane.b32.xlu1 %v7391_v51, %s8398_s5 }
 0x628   : > { %3353 = vrot.lane.b32.xlu0 %v7393_v22, %s8398_s5 }
 0x62a   : > { %3355 = vrot.lane.b32.xlu1 %v7397_v8, %s8398_s5 }
 0x62c   : > { %3357 = vrot.lane.b32.xlu0 %v7399_v47, %s8398_s5 }
 0x62e   : > { %3487 = vrot.lane.b32.xlu1 %v7391_v51, %s8399_s8 }
 0x630   : > { %3489 = vrot.lane.b32.xlu0 %v7393_v22, %s8399_s8 }
 0x632   : > { %3491 = vrot.lane.b32.xlu1 %v7397_v8, %s8399_s8 }
 0x634   : > { %3493 = vrot.lane.b32.xlu0 %v7399_v47, %s8399_s8  ;;  %s8402_s8 = sld [smem:[#allocation8_spill]] }
 0x636   : > { %3563 = vrot.lane.b32.xlu1 %v7391_v51, %s8400_s9 }
 0x638   : > { %3565 = vrot.lane.b32.xlu0 %v7393_v22, %s8400_s9 }
 0x63a   : > { %3567 = vrot.lane.b32.xlu1 %v7397_v8, %s8400_s9 }
 0x63c   : > { %3569 = vrot.lane.b32.xlu0 %v7399_v47, %s8400_s9  ;;  %s743_s9 = scalar_lea.vmem %s8317_s21, %s8419_s29 }
 0x63e   : > { %3639 = vrot.lane.b32.xlu1 %v7391_v51, %s8401_s23 }
 0x640   : > { %3641 = vrot.lane.b32.xlu0 %v7393_v22, %s8401_s23 }
 0x642   : > { %3643 = vrot.lane.b32.xlu1 %v7397_v8, %s8401_s23 }
 0x644   : > { %3645 = vrot.lane.b32.xlu0 %v7399_v47, %s8401_s23 }
 0x646   : > { %3715 = vrot.lane.b32.xlu1 %v7391_v51, %s6389_s26 }
 0x648   : > { %3717 = vrot.lane.b32.xlu0 %v7393_v22, %s6389_s26 }
 0x64a   : > { %3719 = vrot.lane.b32.xlu1 %v7397_v8, %s6389_s26 }
 0x64c   : > { %3721 = vrot.lane.b32.xlu0 %v7399_v47, %s6389_s26 }
 0x64e   : > { %3795 = vperm.xlu1 %6313, %v3791_v5  }
 0x650   : > { %3800 = vperm.xlu0 %6334, %v3792_v42  }
 0x680   : > { %v3152_v50 = vpop.permute.xlu1 %3151 }
 0x682   : > { %v3154_v46 = vpop.permute.xlu0 %3153 }
 0x684   : > { %v3156_v14 = vpop.permute.xlu1 %3155 }
 0x685   : > { %v3159_v56 = vsel %vm2382_vm1, %v3152_v50, %v3156_v14  ;;  %v3161_v31 = vsel %vm2382_vm1, %v3156_v14, %v3152_v50  ;;  %v6346_v14 = vld [vmem:[%s8308_s12] sm:$0xff]  }
 0x686   : > { %v3158_v58 = vpop.permute.xlu0 %3157  ;;  %v3163_v9 = vmul.f32 %v3161_v31, %v7201_v55  ;;  %v3164_v38 = vmul.f32 %v3159_v56, %v7204_v32 }
 0x687   : > { %v3160_v59 = vsel %vm2382_vm1, %v3154_v46, %v3158_v58  ;;  %v3162_v39 = vsel %vm2382_vm1, %v3158_v58, %v3154_v46  ;;  %vm3177_vm1 = vcmask 130048  }
 0x688   : > { %v3165_v63 = vmul.f32 %v3162_v39, %v7201_v55  ;;  %v3166_v6 = vmul.f32 %v3160_v59, %v7204_v32  ;;  %v3132_v28 = vpop.permute.xlu1 %3131 }
 0x68a   : > { %v3170_v36 = vpack.c.bf16 %v3165_v63, %v3163_v9  ;;  %v3134_v7 = vpop.permute.xlu0 %3133  ;;  %v3171_v11 = vpack.c.bf16 %v3166_v6, %v3164_v38 }
 0x68c   : > { %v3136_v16 = vpop.permute.xlu1 %3135  ;;  %3181 = vmatprep.subr.bf16.mxu1 %v3171_v11  ;;  %v6347_v11 = vld [vmem:[%s8308_s12 + $0x10] sm:$0xff]  }
 0x68d   : > { %v3139_v20 = vsel %vm2356_vm8, %v3132_v28, %v3136_v16  ;;  %v3141_v21 = vsel %vm2356_vm8, %v3136_v16, %v3132_v28  ;;  %3182 = vmatpush1.bf16.msra.mxu1 %v3170_v36 }
 0x68e   : > { %v3138_v55 = vpop.permute.xlu0 %3137  ;;  %v3143_v27 = vmul.f32 %v3141_v21, %v7217_v0  ;;  %v3144_v45 = vmul.f32 %v3139_v20, %v7220_v34 }
 0x68f   : > { %v3140_v32 = vsel %vm2356_vm8, %v3134_v7, %v3138_v55  ;;  %v3142_v26 = vsel %vm2356_vm8, %v3138_v55, %v3134_v7 }
 0x690   : > { %v3145_v60 = vmul.f32 %v3142_v26, %v7217_v0  ;;  %v3146_v33 = vmul.f32 %v3140_v32, %v7220_v34  ;;  %v3276_v40 = vpop.permute.xlu1 %3275  ;;  %6098 = vmatmul.mubr.msk.bf16.vlgmr.msra.gmra.mrb[36].mxu1 %vm3177_vm1, %v6345_v18 }
 0x691   : > { %3264 = vmatprep.mubr.bf16.mxu1 %v6372_v2 }
 0x692   : > { %v3149_v4 = vpack.c.bf16 %v3145_v60, %v3143_v27  ;;  %v3278_v53 = vpop.permute.xlu0 %3277  ;;  %v3150_v41 = vpack.c.bf16 %v3146_v33, %v3144_v45  ;;  %v6348_v27 = vld [vmem:[%s8308_s12 + $0x18] sm:$0xff]  }
 0x694   : > { %v3280_v17 = vpop.permute.xlu1 %3279  ;;  %3232 = vmatprep.subr.bf16.mxu1 %v3150_v41 }
 0x695   : > { %v3283_v44 = vsel %vm2523_vm13, %v3276_v40, %v3280_v17  ;;  %v3285_v35 = vsel %vm2523_vm13, %v3280_v17, %v3276_v40  ;;  %3233 = vmatpush1.bf16.msra.mxu1 %v3149_v4 }
 0x696   : > { %v3282_v0 = vpop.permute.xlu0 %3281  ;;  %v3287_v24 = vmul.f32 %v3285_v35, %v7243_v43  ;;  %v3288_v5 = vmul.f32 %v3283_v44, %v7235_v48 }
 0x697   : > { %v3284_v34 = vsel %vm2523_vm13, %v3278_v53, %v3282_v0  ;;  %v3286_v10 = vsel %vm2523_vm13, %v3282_v0, %v3278_v53  ;;  %v6349_v53 = vld [vmem:[%s8308_s12 + $0x20] sm:$0xff]  }
 0x698   : > { %v3289_v42 = vmul.f32 %v3286_v10, %v7243_v43  ;;  %v3290_v50 = vmul.f32 %v3284_v34, %v7235_v48  ;;  %v3352_v46 = vpop.permute.xlu1 %3351 }
 0x69a   : > { %v3294_v56 = vpack.c.bf16 %v3289_v42, %v3287_v24  ;;  %v3354_v31 = vpop.permute.xlu0 %3353  ;;  %v3295_v58 = vpack.c.bf16 %v3290_v50, %v3288_v5 }
 0x69c   : > { %v3356_v59 = vpop.permute.xlu1 %3355  ;;  %6100 = vmatmul.mubr.msk.bf16.vlgmr.msra.gmra.mrb[36].mxu1 %vm3177_vm1, %v6346_v14  ;;  %3304 = vmatprep.subr.bf16.mxu1 %v3295_v58  ;;  %v6350_v14 = vld [vmem:[%s8308_s12 + $0x28] sm:$0xff]  }
 0x69d   : > { %v3359_v39 = vsel %vm2611_vm14, %v3352_v46, %v3356_v59  ;;  %3305 = vmatpush1.bf16.msra.mxu1 %v3294_v56  ;;  %3336 = vmatprep.mubr.bf16.mxu1 %v6372_v2  ;;  %v3361_v6 = vsel %vm2611_vm14, %v3356_v59, %v3352_v46 }
 0x69e   : > { %v3358_v43 = vpop.permute.xlu0 %3357  ;;  %v3364_v9 = vmul.f32 %v3359_v39, %v7258_v62  ;;  %v3363_v16 = vmul.f32 %v3361_v6, %v7268_v23 }
 0x69f   : > { %v3360_v48 = vsel %vm2611_vm14, %v3354_v31, %v3358_v43  ;;  %v3362_v38 = vsel %vm2611_vm14, %v3358_v43, %v3354_v31  ;;  %vm8409_vm14 = vcmp.lt.s32.totalorder %v6598_v29, 111 }
 0x6a0   : > { %v3366_v63 = vmul.f32 %v3360_v48, %v7258_v62  ;;  %v3365_v36 = vmul.f32 %v3362_v38, %v7268_v23  ;;  %v3488_v18 = vpop.permute.xlu1 %3487 }
 0x6a2   : > { %v3371_v28 = vpack.c.bf16 %v3366_v63, %v3364_v9  ;;  %v3490_v7 = vpop.permute.xlu0 %3489  ;;  %v3370_v20 = vpack.c.bf16 %v3365_v36, %v3363_v16 }
 0x6a4   : > { %3380 = vmatprep.subr.bf16.mxu1 %v3371_v28  ;;  %v3492_v21 = vpop.permute.xlu1 %3491  ;;  %v6351_v28 = vld [vmem:[%s8308_s12 + $0x30] sm:$0xff]  }
 0x6a5   : > { %v3497_v32 = vsel %vm2765_vm2, %v3492_v21, %v3488_v18 }
 0x6a6   : > { %v3494_v62 = vpop.permute.xlu0 %3493  ;;  %v3500_v45 = vmul.f32 %v3497_v32, %v7291_v52 }
 0x6a7   : > { %v3498_v55 = vsel %vm2765_vm2, %v3494_v62, %v3490_v7 }
 0x6a8   : > { %6104 = vmatmul.mubr.msk.bf16.vlgmr.msra.gmra.mrb[36].mxu1 %vm3177_vm1, %v6347_v11  ;;  %v3502_v23 = vmul.f32 %v3498_v55, %v7291_v52  ;;  %v3564_v60 = vpop.permute.xlu1 %3563  ;;  %v3495_v52 = vsel %vm2765_vm2, %v3488_v18, %v3492_v21  ;;  %v6353_v55 = vld [vmem:[%s8308_s12 + $0x40] sm:$0xff]  }
 0x6a9   : > { %3381 = vmatpush1.bf16.msra.mxu1 %v3370_v20  ;;  %3412 = vmatprep.mubr.bf16.mxu1 %v6372_v2  ;;  %v3499_v41 = vmul.f32 %v3495_v52, %v7302_v3 }
 0x6aa   : > { %3440 = vmatprep.subr.bf16.mxu1 %v3431_v61  ;;  %v3566_v26 = vpop.permute.xlu0 %3565  ;;  %v3507_v8 = vpack.c.bf16 %v3502_v23, %v3500_v45  ;;  %v3496_v61 = vsel %vm2765_vm2, %v3490_v7, %v3494_v62  ;;  %vm8403_vm2 = vcmp.lt.s32.totalorder %v6598_v29, 112 }
 0x6ab   : > { %v3501_v4 = vmul.f32 %v3496_v61, %v7302_v3  ;;  %vm8407_vm8 = vmmov %vm8403_vm2 }
 0x6ac   : > { %v3568_v33 = vpop.permute.xlu1 %3567  ;;  %vm8408_vm13 = vmmov %vm8403_vm2 }
 0x6ad   : > { %v3573_v51 = vsel %vm2853_vm5, %v3568_v33, %v3564_v60  ;;  %v3506_v35 = vpack.c.bf16 %v3501_v4, %v3499_v41  ;;  %v3571_v3 = vsel %vm2853_vm5, %v3564_v60, %v3568_v33 }
 0x6ae   : > { %v3570_v47 = vpop.permute.xlu0 %3569  ;;  %v3576_v17 = vmul.f32 %v3573_v51, %v7316_v19  ;;  %v3575_v56 = vmul.f32 %v3571_v3, %v7325_v25 }
 0x6af   : > { %v3574_v40 = vsel %vm2853_vm5, %v3570_v47, %v3566_v26  ;;  %v3572_v10 = vsel %vm2853_vm5, %v3566_v26, %v3570_v47  ;;  %vm8404_vm5 = vmmov %vm8403_vm2 }
 0x6b0   : > { %v3578_v22 = vmul.f32 %v3574_v40, %v7316_v19  ;;  %v3640_v44 = vpop.permute.xlu1 %3639  ;;  %v3577_v19 = vmul.f32 %v3572_v10, %v7325_v25 }
 0x6b2   : > { %v3583_v0 = vpack.c.bf16 %v3578_v22, %v3576_v17  ;;  %v3582_v59 = vpack.c.bf16 %v3577_v19, %v3575_v56  ;;  %v3811_v22 = vld [vmem:[%s8402_s8] ss:$2 sm:$0x3] }
 0x6b4   : > { %6108 = vmatmul.mubr.msk.bf16.vlgmr.msra.gmra.mrb[36].mxu1 %vm3177_vm1, %v6348_v27  ;;  %v3644_v24 = vpop.permute.xlu1 %3643 }
 0x6b5   : > { %3441 = vmatpush1.bf16.msra.mxu1 %v3430_v49  ;;  %3472 = vmatprep.mubr.bf16.mxu1 %v6372_v2  ;;  %v3642_v49 = vpop.permute.xlu0 %3641  ;;  %v3649_v42 = vsel %vm2941_vm12, %v3644_v24, %v3640_v44  ;;  %v3647_v25 = vsel %vm2941_vm12, %v3640_v44, %v3644_v24 }
 0x6b6   : > { %3516 = vmatprep.subr.bf16.mxu1 %v3507_v8  ;;  %v3652_v31 = vmul.f32 %v3649_v42, %v7339_v54  ;;  %v3651_v36 = vmul.f32 %v3647_v25, %v7348_v57  ;;  %v3886_v25 = vld [vmem:[%s8380_s0] ss:$8 sm:$0x3] }
 0x6b8   : > { %v3716_v58 = vpop.permute.xlu1 %3715 }
 0x6b9   : > { %v3646_v34 = vpop.permute.xlu0 %3645 }
 0x6ba   : > { %v3650_v5 = vsel %vm2941_vm12, %v3646_v34, %v3642_v49  ;;  %v3648_v48 = vsel %vm2941_vm12, %v3642_v49, %v3646_v34  ;;  %vm8406_vm12 = vmmov %vm8403_vm2 }
 0x6bb   : > { %v3654_v50 = vmul.f32 %v3650_v5, %v7339_v54  ;;  %v3653_v54 = vmul.f32 %v3648_v48, %v7348_v57  ;;  %v6352_v57 = vld [vmem:[%s8308_s12 + $0x38] sm:$0xff]  }
 0x6bc   : > { %v3720_v9 = vpop.permute.xlu1 %3719 }
 0x6bd   : > { %v3718_v46 = vpop.permute.xlu0 %3717  ;;  %v3659_v39 = vpack.c.bf16 %v3654_v50, %v3652_v31  ;;  %v3725_v63 = vsel %vm3029_vm11, %v3720_v9, %v3716_v58  ;;  %v3658_v11 = vpack.c.bf16 %v3653_v54, %v3651_v36  ;;  %v3723_v20 = vsel %vm3029_vm11, %v3716_v58, %v3720_v9 }
 0x6be   : > { %v3728_v7 = vmul.f32 %v3725_v63, %v7362_v1 }
 0x6c0   : > { %6112 = vmatmul.mubr.msk.bf16.vlgmr.msra.gmra.mrb[36].mxu1 %vm3177_vm1, %v6349_v53  ;;  %v3834_v53 = vrot.slane %v3811_v22, %v6579_v13 }
 0x6c1   : > { %3517 = vmatpush1.bf16.msra.mxu1 %v3506_v35  ;;  %3548 = vmatprep.mubr.bf16.mxu1 %v6372_v2  ;;  %v3722_v43 = vpop.permute.xlu0 %3721  ;;  %v3838_v35 = vrot.slane %v3811_v22, %v6601_v30  ;;  %v3925_v22 = vld [vmem:[%s8311_s15] sm:$0xf] }
 0x6c2   : > { %3592 = vmatprep.subr.bf16.mxu1 %v3583_v0  ;;  %v3726_v38 = vsel %vm3029_vm11, %v3722_v43, %v3718_v46  ;;  %v3724_v18 = vsel %vm3029_vm11, %v3718_v46, %v3722_v43  ;;  %v6129_v43 = vld [vmem:[%s8402_s8 + $0x1] ss:$2 sm:$0x3]  ;;  %vm8405_vm11 = vmmov %vm8403_vm2 }
 0x6c3   : > { %v3730_v6 = vmul.f32 %v3726_v38, %v7362_v1  ;;  %v3729_v62 = vmul.f32 %v3724_v18, %v7371_v12  ;;  %v3727_v1 = vmul.f32 %v3723_v20, %v7371_v12  ;;  %v3869_v9 = vrot.slane %v6129_v43, %v6579_v13 }
 0x6c4   : > { %v7678_v18 = vrot.slane %v3886_v25, %v6579_v13 }
 0x6c5   : > { %v3735_v16 = vpack.c.bf16 %v3730_v6, %v3728_v7  ;;  %v3734_v21 = vpack.c.bf16 %v3729_v62, %v3727_v1  ;;  %v3873_v6 = vrot.slane %v6129_v43, %v6601_v30  ;;  %v7681_v1 = vrot.slane %v3886_v25, %v6601_v30 }
 0x6cc   : > { %6116 = vmatmul.mubr.msk.bf16.vlgmr.msra.gmra.mrb[36].mxu1 %vm3177_vm1, %v6350_v14 }
 0x6cd   : > { %3593 = vmatpush1.bf16.msra.mxu1 %v3582_v59  ;;  %3624 = vmatprep.mubr.bf16.mxu1 %v6372_v2  ;;  %v3796_v32 = vpop.permute.xlu1 %3795 }
 0x6ce   : > { %3668 = vmatprep.subr.bf16.mxu1 %v3659_v39 }
 0x6cf   : > { %v3801_v45 = vpop.permute.xlu0 %3800 }
 0x6d8   : > { %6120 = vmatmul.mubr.msk.bf16.vlgmr.msra.gmra.mrb[36].mxu1 %vm3177_vm1, %v6351_v28 }
 0x6d9   : > { %3669 = vmatpush1.bf16.msra.mxu1 %v3658_v11  ;;  %3700 = vmatprep.mubr.bf16.mxu1 %v6372_v2 }
 0x6da   : > { %3744 = vmatprep.subr.bf16.mxu1 %v3735_v16 }
 0x6e4   : > { %6124 = vmatmul.mubr.msk.bf16.vlgmr.msra.gmra.mrb[36].mxu1 %vm3177_vm1, %v6352_v57 }
 0x6e5   : > { %3745 = vmatpush1.bf16.msra.mxu1 %v3734_v21  ;;  %3776 = vmatprep.mubr.bf16.mxu1 %v6372_v2 }
 0x6f0   : > { %6128 = vmatmul.mubr.msk.bf16.vlgmr.msra.gmra.mrb[36].mxu1 %vm3177_vm1, %v6353_v55 }
 0x6f1   : > { %4013 = vmatprep.mubr.bf16.mxu1 %v6372_v2 }
 0x7c3   : > { %v3778_v23 = vpop.f32.mrb[36].mxu1 }
 0x7c4   : > { %v3803_v26 = vadd.f32 %v3796_v32, %v3778_v23  ;;  %v3780_v27 = vpop.f32.mrb[37].mxu1 }
 0x7c5   : > { %v3782_v12 = vpop.f32.mrb[38].mxu1  ;;  %v3804_v8 = vadd.f32 %v3796_v32, %v3780_v27 }
 0x7c6   : > { %v3807_v60 = vmax.f32 %v3803_v26, 0.0  ;;  %v3805_v47 = vadd.f32 %v3801_v45, %v3782_v12  ;;  %v3784_v61 = vpop.f32.mrb[39].mxu1 }
 0x7c7   : > { %v3806_v40 = vadd.f32 %v3801_v45, %v3784_v61  ;;  %v3808_v52 = vmax.f32 %v3804_v8, 0.0 }
 0x7c8   : > { %v3809_v33 = vmax.f32 %v3805_v47, 0.0  ;;  %3814 = vrot.lane.b32.xlu1 %v3807_v60, %s8388_s28 }
 0x7c9   : > { %v3810_v4 = vmax.f32 %v3806_v40, 0.0 }
 0x7ca   : > { %3816 = vrot.lane.b32.xlu0 %v3809_v33, %s8388_s28 }
 0x7cc   : > { %3818 = vrot.lane.b32.xlu1 %v3808_v52, %s8388_s28 }
 0x7ce   : > { %3820 = vrot.lane.b32.xlu0 %v3810_v4, %s8388_s28 }
 0x83a   : > { %v3815_v51 = vpop.permute.xlu1 %3814 }
 0x83c   : > { %v3817_v49 = vpop.permute.xlu0 %3816 }
 0x83e   : > { %v3819_v41 = vpop.permute.xlu1 %3818 }
 0x83f   : > { %v3822_v17 = vsel %vm1148_vm7, %v3815_v51, %v3819_v41  ;;  %v3824_v44 = vsel %vm1148_vm7, %v3819_v41, %v3815_v51 }
 0x840   : > { %v3826_v0 = vsub.f32 %v3824_v44, %v3807_v60  ;;  %v3827_v34 = vsub.f32 %v3822_v17, %v3808_v52  ;;  %v3821_v10 = vpop.permute.xlu0 %3820 }
 0x841   : > { %v3823_v24 = vsel %vm1148_vm7, %v3817_v49, %v3821_v10  ;;  %v3825_v5 = vsel %vm1148_vm7, %v3821_v10, %v3817_v49  ;;  %v5122_v49 = vld [vmem:[%s8312_s16] sm:$0xff] }
 0x842   : > { %v3841_v3 = vmul.f32 %v3834_v53, %v3826_v0  ;;  %v3828_v19 = vsub.f32 %v3825_v5, %v3809_v33  ;;  %v3829_v42 = vsub.f32 %v3823_v24, %v3810_v4  ;;  %v3842_v50 = vmul.f32 %v3838_v35, %v3827_v34  ;;  %v6133_v24 = vld [vmem:[%s8380_s0 + $0x1] ss:$8 sm:$0x3] }
 0x844   : > { %v3845_v46 = vadd.f32 %v3841_v3, %v3807_v60  ;;  %v3843_v14 = vmul.f32 %v3834_v53, %v3828_v19  ;;  %v3844_v56 = vmul.f32 %v3838_v35, %v3829_v42  ;;  %v3846_v58 = vadd.f32 %v3842_v50, %v3808_v52 }
 0x845   : > { %v7797_v3 = vrot.slane %v6133_v24, %v6579_v13  ;;  %v7800_v42 = vrot.slane %v6133_v24, %v6601_v30 }
 0x846   : > { %v3847_v31 = vadd.f32 %v3843_v14, %v3809_v33  ;;  %3849 = vrot.lane.b32.xlu1 %v3845_v46, %s8384_s1  ;;  %v3848_v59 = vadd.f32 %v3844_v56, %v3810_v4 }
 0x848   : > { %3851 = vrot.lane.b32.xlu0 %v3847_v31, %s8384_s1 }
 0x84a   : > { %3853 = vrot.lane.b32.xlu1 %v3846_v58, %s8384_s1 }
 0x84c   : > { %3855 = vrot.lane.b32.xlu0 %v3848_v59, %s8384_s1 }
 0x84e   : > { %3917 = vrot.lane.b32.xlu1 %v7134_v15, %s8391_s25 }
 0x850   : > { %3919 = vrot.lane.b32.xlu0 %v7136_v37, %s8391_s25 }
 0x852   : > { %4100 = vrot.lane.b32.xlu1 %v7134_v15, %s8384_s1 }
 0x854   : > { %4102 = vrot.lane.b32.xlu0 %v7136_v37, %s8384_s1 }
 0x856   : > { %4242 = vrot.lane.b32.xlu1 %v7134_v15, %s8387_s6 }
 0x858   : > { %4244 = vrot.lane.b32.xlu0 %v7136_v37, %s8387_s6 }
 0x85a   : > { %4384 = vrot.lane.b32.xlu1 %v7134_v15, %s8388_s28 }
 0x85c   : > { %4386 = vrot.lane.b32.xlu0 %v7136_v37, %s8388_s28 }
 0x85e   : > { %4632 = vrot.lane.b32.xlu1 %v7134_v15, %s8389_s22 }
 0x860   : > { %4634 = vrot.lane.b32.xlu0 %v7136_v37, %s8389_s22 }
 0x8b8   : > { %v3850_v39 = vpop.permute.xlu1 %3849 }
 0x8ba   : > { %v3852_v48 = vpop.permute.xlu0 %3851 }
 0x8bc   : > { %v3854_v38 = vpop.permute.xlu1 %3853 }
 0x8bd   : > { %v3857_v54 = vsel %vm936_vm3, %v3850_v39, %v3854_v38  ;;  %v3859_v63 = vsel %vm936_vm3, %v3854_v38, %v3850_v39 }
 0x8be   : > { %v3861_v28 = vsub.f32 %v3859_v63, %v3845_v46  ;;  %v3862_v36 = vsub.f32 %v3857_v54, %v3846_v58  ;;  %v3856_v7 = vpop.permute.xlu0 %3855 }
 0x8bf   : > { %v3858_v11 = vsel %vm936_vm3, %v3852_v48, %v3856_v7  ;;  %v3860_v16 = vsel %vm936_vm3, %v3856_v7, %v3852_v48 }
 0x8c0   : > { %v3876_v20 = vmul.f32 %v3869_v9, %v3861_v28  ;;  %v3863_v62 = vsub.f32 %v3860_v16, %v3847_v31  ;;  %v3864_v57 = vsub.f32 %v3858_v11, %v3848_v59  ;;  %v3877_v21 = vmul.f32 %v3873_v6, %v3862_v36  ;;  %v3918_v23 = vpop.permute.xlu1 %3917 }
 0x8c2   : > { %v7683_v55 = vadd.f32 %v3876_v20, %v3845_v46  ;;  %v3878_v32 = vmul.f32 %v3869_v9, %v3863_v62  ;;  %v3920_v26 = vpop.permute.xlu0 %3919  ;;  %v3879_v12 = vmul.f32 %v3873_v6, %v3864_v57  ;;  %v7695_v61 = vadd.f32 %v3877_v21, %v3846_v58  ;;  %v6139_v46 = vld [vmem:[%s8380_s0 + $0x2] ss:$8 sm:$0x3] }
 0x8c3   : > { %v3921_v27 = vsel %vm822_vm4, %v3918_v23, %v3920_v26  ;;  %v3922_v45 = vsel %vm822_vm4, %v3920_v26, %v3918_v23  ;;  %v7815_v39 = vrot.slane %v6139_v46, %v6601_v30  ;;  %v7829_v11 = vrot.slane %v6139_v46, %v6579_v13 }
 0x8c4   : > { %v7689_v60 = vadd.f32 %v3878_v32, %v3847_v31  ;;  %v3923_v8 = vmul.f32 %v3922_v45, %v7678_v18  ;;  %v3924_v47 = vmul.f32 %v3921_v27, %v7681_v1  ;;  %3887 = vrot.lane.b32.xlu1 %v7683_v55, %s8391_s25  ;;  %v7701_v4 = vadd.f32 %v3879_v12, %v3848_v59  ;;  %v4101_v53 = vpop.permute.xlu1 %4100  ;;  %v6145_v32 = vld [vmem:[%s8380_s0 + $0x3] ss:$8 sm:$0x3] }
 0x8c5   : > { %v3914_v12 = vld [vmem:[%s8310_s14] sm:$0xf] }
 0x8c6   : > { %v3926_v33 = vpack.c.bf16 %v3923_v8, %v3923_v8  ;;  %v3927_v40 = vpack.c.bf16 %v3924_v47, %v3924_v47  ;;  %3889 = vrot.lane.b32.xlu0 %v7689_v60, %s8391_s25  ;;  %v4450_v52 = vpack.c.bf16 %v7689_v60, %v7683_v55  ;;  %v4103_v41 = vpop.permute.xlu0 %4102  ;;  %v7846_v47 = vrot.slane %v6145_v32, %v6601_v30 }
 0x8c7   : > { %v4105_v50 = vsel %vm936_vm3, %v4103_v41, %v4101_v53  ;;  %v4104_v14 = vsel %vm936_vm3, %v4101_v53, %v4103_v41 }
 0x8c8   : > { %3891 = vrot.lane.b32.xlu1 %v7695_v61, %s8391_s25  ;;  %6130 = vmatprep.subr.msk.bf16.mxu0 %vm1785_vm15, %v3927_v40  ;;  %v3932_v51 = vsel %vm1785_vm15, %v3926_v33, 0  ;;  %v4243_v17 = vpop.permute.xlu1 %4242  ;;  %v4106_v59 = vmul.f32 %v4105_v50, %v7797_v3  ;;  %v4107_v48 = vmul.f32 %v4104_v14, %v7800_v42 }
 0x8c9   : > { %3938 = vmatpush1.bf16.msra.mxu0 %v3932_v51 }
 0x8ca   : > { %3893 = vrot.lane.b32.xlu0 %v7701_v4, %s8391_s25  ;;  %v4245_v44 = vpop.permute.xlu0 %4244  ;;  %v4110_v7 = vpack.c.bf16 %v4106_v59, %v4106_v59  ;;  %v4111_v23 = vpack.c.bf16 %v4107_v48, %v4107_v48 }
 0x8cb   : > { %v4246_v9 = vsel %vm1042_vm6, %v4243_v17, %v4245_v44  ;;  %v4247_v57 = vsel %vm1042_vm6, %v4245_v44, %v4243_v17 }
 0x8cc   : > { %4023 = vrot.lane.b32.xlu1 %v7683_v55, %s8384_s1  ;;  %6131 = vmatmul.mubr.msk.bf16.vlgmr.msra.gmra.mrb[40].mxu0 %vm1781_vm0, %v3925_v22  ;;  %v7785_v35 = vpop.permute.xlu1 %4384  ;;  %v4249_v21 = vmul.f32 %v4246_v9, %v7815_v39  ;;  %v4248_v8 = vmul.f32 %v4247_v57, %v7829_v11  ;;  %v4116_v40 = vsel %vm1785_vm15, %v4110_v7, 0  ;;  %v6134_v9 = vld [vmem:[%s8310_s14 + $0x4] sm:$0xf] }
 0x8cd   : > { %4089 = vmatprep.mubr.bf16.mxu0 %v6372_v2 }
 0x8ce   : > { %4025 = vrot.lane.b32.xlu0 %v7689_v60, %s8384_s1  ;;  %v7787_v0 = vpop.permute.xlu0 %4386  ;;  %v4253_v51 = vpack.c.bf16 %v4249_v21, %v4249_v21 }
 0x8cf   : > { %v4388_v22 = vsel %vm1148_vm7, %v7785_v35, %v7787_v0 }
 0x8d0   : > { %4027 = vrot.lane.b32.xlu1 %v7695_v61, %s8384_s1  ;;  %v7789_v34 = vpop.permute.xlu1 %4632 }
 0x8d2   : > { %4029 = vrot.lane.b32.xlu0 %v7701_v4, %s8384_s1  ;;  %v7791_v10 = vpop.permute.xlu0 %4634 }
 0x8d4   : > { %4165 = vrot.lane.b32.xlu1 %v7683_v55, %s8387_s6 }
 0x8d6   : > { %4167 = vrot.lane.b32.xlu0 %v7689_v60, %s8387_s6 }
 0x8d8   : > { %4169 = vrot.lane.b32.xlu1 %v7695_v61, %s8387_s6 }
 0x8da   : > { %4171 = vrot.lane.b32.xlu0 %v7701_v4, %s8387_s6 }
 0x8dc   : > { %4307 = vrot.lane.b32.xlu1 %v7683_v55, %s8388_s28 }
 0x8de   : > { %4309 = vrot.lane.b32.xlu0 %v7689_v60, %s8388_s28 }
 0x8e0   : > { %4311 = vrot.lane.b32.xlu1 %v7695_v61, %s8388_s28 }
 0x8e2   : > { %4313 = vrot.lane.b32.xlu0 %v7701_v4, %s8388_s28 }
 0x8e4   : > { %4774 = vrot.lane.b32.xlu1 %v7134_v15, %s8390_s2 }
 0x8e6   : > { %4776 = vrot.lane.b32.xlu0 %v7136_v37, %s8390_s2 }
 0x8e8   : > { %4555 = vrot.lane.b32.xlu1 %v7683_v55, %s8389_s22 }
 0x8ea   : > { %4918 = vrot.lane.b32.xlu0 %v7136_v37, %s8383_s7 }
 0x8ec   : > { %4559 = vrot.lane.b32.xlu1 %v7695_v61, %s8389_s22 }
 0x8ee   : > { %4557 = vrot.lane.b32.xlu0 %v7689_v60, %s8389_s22 }
 0x8f0   : > { %4697 = vrot.lane.b32.xlu1 %v7683_v55, %s8390_s2 }
 0x8f2   : > { %4561 = vrot.lane.b32.xlu0 %v7701_v4, %s8389_s22 }
 0x8f4   : > { %4701 = vrot.lane.b32.xlu1 %v7695_v61, %s8390_s2 }
 0x8f6   : > { %4699 = vrot.lane.b32.xlu0 %v7689_v60, %s8390_s2 }
 0x8f8   : > { %4839 = vrot.lane.b32.xlu1 %v7683_v55, %s8383_s7 }
 0x8fa   : > { %4703 = vrot.lane.b32.xlu0 %v7701_v4, %s8390_s2 }
 0x8fc   : > { %4843 = vrot.lane.b32.xlu1 %v7695_v61, %s8383_s7 }
 0x8fe   : > { %4841 = vrot.lane.b32.xlu0 %v7689_v60, %s8383_s7 }
 0x900   : > { %4916 = vrot.lane.b32.xlu1 %v7134_v15, %s8383_s7 }
 0x902   : > { %4845 = vrot.lane.b32.xlu0 %v7701_v4, %s8383_s7 }
 0x904   : > { %4981 = vrot.lane.b32.xlu1 %v7683_v55, %s8385_s27 }
 0x906   : > { %4983 = vrot.lane.b32.xlu0 %v7689_v60, %s8385_s27 }
 0x908   : > { %4985 = vrot.lane.b32.xlu1 %v7695_v61, %s8385_s27 }
 0x90a   : > { %4987 = vrot.lane.b32.xlu0 %v7701_v4, %s8385_s27 }
 0x90c   : > { %5058 = vrot.lane.b32.xlu1 %v7134_v15, %s8385_s27 }
 0x90e   : > { %5060 = vrot.lane.b32.xlu0 %v7136_v37, %s8385_s27 }
 0x910   : > { %5125 = vperm.xlu1 %6313, %v5122_v49  }
 0x936   : > { %v3888_v5 = vpop.permute.xlu1 %3887 }
 0x938   : > { %v3890_v19 = vpop.permute.xlu0 %3889 }
 0x93a   : > { %v3892_v56 = vpop.permute.xlu1 %3891 }
 0x93b   : > { %v3895_v31 = vsel %vm822_vm4, %v3888_v5, %v3892_v56  ;;  %v3897_v58 = vsel %vm822_vm4, %v3892_v56, %v3888_v5  ;;  %v4389_v56 = vsel %vm1148_vm7, %v7787_v0, %v7785_v35  ;;  %v6136_v35 = vld [vmem:[%s8311_s15 + $0x4] sm:$0xf] }
 0x93c   : > { %v3894_v43 = vpop.permute.xlu0 %3893  ;;  %v3910_v54 = vmul.f32 %v7678_v18, %v3897_v58  ;;  %v3911_v63 = vmul.f32 %v7681_v1, %v3895_v31  ;;  %v4391_v31 = vmul.f32 %v4388_v22, %v7846_v47  ;;  %v4252_v58 = vpack.c.bf16 %v4248_v8, %v4248_v8  ;;  %v6142_v8 = vld [vmem:[%s8311_s15 + $0x8] sm:$0xf] }
 0x93d   : > { %v3896_v38 = vsel %vm822_vm4, %v3890_v19, %v3894_v43  ;;  %v3898_v25 = vsel %vm822_vm4, %v3894_v43, %v3890_v19  ;;  %v7865_v19 = vrot.slane %v6145_v32, %v6579_v13 }
 0x93e   : > { %v3912_v6 = vmul.f32 %v7678_v18, %v3898_v25  ;;  %v3913_v28 = vmul.f32 %v7681_v1, %v3896_v38  ;;  %v4024_v36 = vpop.permute.xlu1 %4023  ;;  %v4395_v25 = vpack.c.bf16 %v4391_v31, %v4391_v31 }
 0x93f   : > { %v4390_v0 = vmul.f32 %v4389_v56, %v7865_v19 }
 0x940   : > { %v3915_v16 = vpack.c.bf16 %v3912_v6, %v3910_v54  ;;  %v4026_v20 = vpop.permute.xlu0 %4025  ;;  %v3916_v62 = vpack.c.bf16 %v3913_v28, %v3911_v63 }
 0x941   : > { %v4394_v32 = vpack.c.bf16 %v4390_v0, %v4390_v0  ;;  %v6148_v0 = vld [vmem:[%s8311_s15 + $0xc] sm:$0xf] }
 0x942   : > { %v4028_v26 = vpop.permute.xlu1 %4027  ;;  %3981 = vmatprep.subr.bf16.mxu1 %v3916_v62 }
 0x943   : > { %v4031_v27 = vsel %vm936_vm3, %v4024_v36, %v4028_v26  ;;  %v4033_v45 = vsel %vm936_vm3, %v4028_v26, %v4024_v36  ;;  %3982 = vmatpush1.bf16.msra.mxu1 %v3915_v16 }
 0x944   : > { %6137 = vmatprep.subr.msk.bf16.mxu1 %vm1785_vm15, %v4111_v23  ;;  %v4030_v33 = vpop.permute.xlu0 %4029  ;;  %v4046_v41 = vmul.f32 %v7797_v3, %v4033_v45  ;;  %v4047_v17 = vmul.f32 %v7800_v42, %v4031_v27  ;;  %v6156_v23 = vld [vmem:[%s8380_s0 + $0x5] ss:$8 sm:$0x3] }
 0x945   : > { %v4032_v49 = vsel %vm936_vm3, %v4026_v20, %v4030_v33  ;;  %v4034_v53 = vsel %vm936_vm3, %v4030_v33, %v4026_v20  ;;  %v4258_v20 = vsel %vm1785_vm15, %v4252_v58, 0  ;;  %v7935_v56 = vrot.slane %v6156_v23, %v6579_v13  ;;  %v6162_v58 = vld [vmem:[%s8380_s0 + $0x6] ss:$8 sm:$0x3] }
 0x946   : > { %v4048_v44 = vmul.f32 %v7797_v3, %v4034_v53  ;;  %v4049_v24 = vmul.f32 %v7800_v42, %v4032_v49  ;;  %v4166_v5 = vpop.permute.xlu1 %4165  ;;  %6132 = vmatmul.mubr.msk.bf16.vlgmr.msra.gmra.mrb[40].mxu1 %vm3177_vm1, %v3914_v12  ;;  %v6140_v12 = vld [vmem:[%s8310_s14 + $0x8] sm:$0xf] }
 0x947   : > { %4122 = vmatpush1.bf16.msra.mxu1 %v4116_v40  ;;  %4153 = vmatprep.mubr.bf16.mxu1 %v6372_v2  ;;  %v4501_v40 = vpack.c.bf16 %v7136_v37, %v7136_v37  ;;  %v4400_v37 = vsel %vm1785_vm15, %v4394_v32, 0 }
 0x948   : > { %v4052_v50 = vpack.c.bf16 %v4048_v44, %v4046_v41  ;;  %6143 = vmatprep.subr.msk.bf16.mxu1 %vm1785_vm15, %v4253_v51  ;;  %v4168_v46 = vpop.permute.xlu0 %4167  ;;  %v4053_v14 = vpack.c.bf16 %v4049_v24, %v4047_v17  ;;  %v7914_v51 = vrot.slane %v6156_v23, %v6601_v30 }
 0x94a   : > { %v4170_v59 = vpop.permute.xlu1 %4169  ;;  %4057 = vmatprep.subr.bf16.mxu0 %v4053_v14 }
 0x94b   : > { %v4173_v43 = vsel %vm1042_vm6, %v4166_v5, %v4170_v59  ;;  %v4175_v48 = vsel %vm1042_vm6, %v4170_v59, %v4166_v5  ;;  %4058 = vmatpush1.bf16.msra.mxu0 %v4052_v50  ;;  %v4637_v5 = vsel %vm1330_vm9, %v7791_v10, %v7789_v34 }
 0x94c   : > { %v4172_v38 = vpop.permute.xlu0 %4171  ;;  %v4188_v54 = vmul.f32 %v7829_v11, %v4175_v48  ;;  %v4189_v28 = vmul.f32 %v7815_v39, %v4173_v43  ;;  %v4639_v31 = vmul.f32 %v4637_v5, %v7914_v51  ;;  %v4451_v43 = vpack.c.bf16 %v7701_v4, %v7695_v61 }
 0x94d   : > { %v4174_v63 = vsel %vm1042_vm6, %v4168_v46, %v4172_v38  ;;  %v4176_v6 = vsel %vm1042_vm6, %v4172_v38, %v4168_v46  ;;  %v4500_v48 = vpack.c.bf16 %v7134_v15, %v7134_v15  ;;  %v7958_v61 = vrot.slane %v6162_v58, %v6601_v30 }
 0x94e   : > { %v4190_v36 = vmul.f32 %v7829_v11, %v4176_v6  ;;  %v4191_v7 = vmul.f32 %v7815_v39, %v4174_v63  ;;  %v4308_v16 = vpop.permute.xlu1 %4307  ;;  %6135 = vmatmul.mubr.msk.bf16.vlgmr.msra.gmra.mrb[44].mxu0 %vm3177_vm1, %v6134_v9  ;;  %6138 = vmatmul.mubr.msk.bf16.vlgmr.msra.gmra.mrb[44].mxu1 %vm1781_vm0, %v6136_v35  ;;  %v4636_v9 = vsel %vm1330_vm9, %v7789_v34, %v7791_v10  ;;  %v6146_v35 = vld [vmem:[%s8310_s14 + $0xc] sm:$0xf] }
 0x94f   : > { %4264 = vmatpush1.bf16.msra.mxu1 %v4258_v20  ;;  %4231 = vmatprep.mubr.bf16.mxu0 %v6372_v2  ;;  %v4638_v15 = vmul.f32 %v4636_v9, %v7935_v56  ;;  %v4643_v4 = vpack.c.bf16 %v4639_v31, %v4639_v31 }
 0x950   : > { %v4194_v62 = vpack.c.bf16 %v4190_v36, %v4188_v54  ;;  %6149 = vmatprep.subr.msk.bf16.mxu1 %vm1785_vm15, %v4395_v25  ;;  %v4310_v57 = vpop.permute.xlu0 %4309  ;;  %v4195_v21 = vpack.c.bf16 %v4191_v7, %v4189_v28  ;;  %4295 = vmatprep.mubr.bf16.mxu1 %v6372_v2  ;;  %v4506_v25 = vsel %vm1785_vm15, %v4500_v48, 0  ;;  %v7970_v54 = vrot.slane %v6162_v58, %v6579_v13  ;;  %v6151_v7 = vld [vmem:[%s8310_s14 + $0x10] sm:$0xf] }
 0x951   : > { %v4642_v36 = vpack.c.bf16 %v4638_v15, %v4638_v15 }
 0x952   : > { %v4312_v26 = vpop.permute.xlu1 %4311  ;;  %4199 = vmatprep.subr.bf16.mxu0 %v4195_v21 }
 0x953   : > { %v4315_v27 = vsel %vm1148_vm7, %v4308_v16, %v4312_v26  ;;  %v4317_v45 = vsel %vm1148_vm7, %v4312_v26, %v4308_v16  ;;  %4200 = vmatpush1.bf16.msra.mxu0 %v4194_v62  ;;  %v6153_v16 = vld [vmem:[%s8311_s15 + $0x10] sm:$0xf] }
 0x954   : > { %v4314_v33 = vpop.permute.xlu0 %4313  ;;  %v4330_v22 = vmul.f32 %v7865_v19, %v4317_v45  ;;  %v4331_v41 = vmul.f32 %v7846_v47, %v4315_v27 }
 0x955   : > { %v4316_v49 = vsel %vm1148_vm7, %v4310_v57, %v4314_v33  ;;  %v4318_v53 = vsel %vm1148_vm7, %v4314_v33, %v4310_v57 }
 0x956   : > { %v4332_v17 = vmul.f32 %v7865_v19, %v4318_v53  ;;  %v4333_v44 = vmul.f32 %v7846_v47, %v4316_v49  ;;  %v4775_v24 = vpop.permute.xlu1 %4774  ;;  %6141 = vmatmul.mubr.msk.bf16.vlgmr.msra.gmra.mrb[48].mxu0 %vm3177_vm1, %v6140_v12  ;;  %6144 = vmatmul.mubr.msk.bf16.vlgmr.msra.gmra.mrb[48].mxu1 %vm1781_vm0, %v6142_v8  ;;  %v4648_v8 = vsel %vm1785_vm15, %v4642_v36, 0 }
 0x957   : > { %4406 = vmatpush1.bf16.msra.mxu1 %v4400_v37  ;;  %4373 = vmatprep.mubr.bf16.mxu0 %v6372_v2 }
 0x958   : > { %v4336_v50 = vpack.c.bf16 %v4332_v17, %v4330_v22  ;;  %6154 = vmatprep.subr.msk.bf16.mxu1 %vm1785_vm15, %v4501_v40  ;;  %v4777_v46 = vpop.permute.xlu0 %4776  ;;  %v4337_v14 = vpack.c.bf16 %v4333_v44, %v4331_v41  ;;  %4437 = vmatprep.mubr.bf16.mxu1 %v6372_v2  ;;  %v6157_v44 = vld [vmem:[%s8310_s14 + $0x14] sm:$0xf] }
 0x959   : > { %v4779_v34 = vsel %vm1436_vm10, %v4777_v46, %v4775_v24  ;;  %v4778_v6 = vsel %vm1436_vm10, %v4775_v24, %v4777_v46  ;;  %v6159_v24 = vld [vmem:[%s8311_s15 + $0x14] sm:$0xf] }
 0x95a   : > { %v4556_v59 = vpop.permute.xlu1 %4555  ;;  %4341 = vmatprep.subr.bf16.mxu0 %v4337_v14  ;;  %v4781_v28 = vmul.f32 %v4779_v34, %v7958_v61  ;;  %v4780_v20 = vmul.f32 %v4778_v6, %v7970_v54 }
 0x95b   : > { %4342 = vmatpush1.bf16.msra.mxu0 %v4336_v50 }
 0x95c   : > { %4455 = vmatprep.subr.bf16.mxu0 %v4451_v43  ;;  %v7955_v38 = vpop.permute.xlu0 %4918  ;;  %v4785_v57 = vpack.c.bf16 %v4781_v28, %v4781_v28  ;;  %v4784_v49 = vpack.c.bf16 %v4780_v20, %v4780_v20  ;;  %v6163_v28 = vld [vmem:[%s8310_s14 + $0x18] sm:$0xf] }
 0x95e   : > { %v4560_v10 = vpop.permute.xlu1 %4559  ;;  %6147 = vmatmul.mubr.msk.bf16.vlgmr.msra.gmra.mrb[52].mxu0 %vm3177_vm1, %v6146_v35  ;;  %6150 = vmatmul.mubr.msk.bf16.vlgmr.msra.gmra.mrb[52].mxu1 %vm1781_vm0, %v6148_v0  ;;  %v4790_v48 = vsel %vm1785_vm15, %v4784_v49, 0 }
 0x95f   : > { %4512 = vmatpush1.bf16.msra.mxu1 %v4506_v25  ;;  %4456 = vmatpush1.bf16.msra.mxu0 %v4450_v52  ;;  %v4563_v55 = vsel %vm1330_vm9, %v4556_v59, %v4560_v10  ;;  %v4565_v52 = vsel %vm1330_vm9, %v4560_v10, %v4556_v59  ;;  %v6168_v59 = vld [vmem:[%s8380_s0 + $0x7] ss:$8 sm:$0x3] }
 0x960   : > { %6160 = vmatprep.subr.msk.bf16.mxu1 %vm1785_vm15, %v4643_v4  ;;  %v4558_v63 = vpop.permute.xlu0 %4557  ;;  %4487 = vmatprep.mubr.bf16.mxu0 %v6372_v2  ;;  %v4578_v21 = vmul.f32 %v7935_v56, %v4563_v55  ;;  %v4579_v26 = vmul.f32 %v7914_v51, %v4565_v52  ;;  %v8030_v15 = vrot.slane %v6168_v59, %v6579_v13  ;;  %v6165_v52 = vld [vmem:[%s8311_s15 + $0x18] sm:$0xf] }
 0x961   : > { %4543 = vmatprep.mubr.bf16.mxu1 %v6372_v2  ;;  %v8033_v4 = vrot.slane %v6168_v59, %v6601_v30 }
 0x962   : > { %v4698_v60 = vpop.permute.xlu1 %4697 }
 0x964   : > { %v4562_v62 = vpop.permute.xlu0 %4561 }
 0x965   : > { %v4564_v32 = vsel %vm1330_vm9, %v4558_v63, %v4562_v62  ;;  %v4566_v23 = vsel %vm1330_vm9, %v4562_v62, %v4558_v63 }
 0x966   : > { %v4580_v27 = vmul.f32 %v7935_v56, %v4564_v32  ;;  %v4581_v45 = vmul.f32 %v7914_v51, %v4566_v23  ;;  %v4702_v12 = vpop.permute.xlu1 %4701  ;;  %6152 = vmatmul.mubr.msk.bf16.vlgmr.msra.gmra.mrb[56].mxu0 %vm3177_vm1, %v6151_v7  ;;  %6155 = vmatmul.mubr.msk.bf16.vlgmr.msra.gmra.mrb[56].mxu1 %vm1781_vm0, %v6153_v16 }
 0x967   : > { %4654 = vmatpush1.bf16.msra.mxu1 %v4648_v8  ;;  %4621 = vmatprep.mubr.bf16.mxu0 %v6372_v2  ;;  %v4705_v53 = vsel %vm1436_vm10, %v4698_v60, %v4702_v12  ;;  %v4707_v17 = vsel %vm1436_vm10, %v4702_v12, %v4698_v60 }
 0x968   : > { %v4584_v33 = vpack.c.bf16 %v4580_v27, %v4578_v21  ;;  %6166 = vmatprep.subr.msk.bf16.mxu1 %vm1785_vm15, %v4785_v57  ;;  %v4700_v40 = vpop.permute.xlu0 %4699  ;;  %v4585_v22 = vpack.c.bf16 %v4581_v45, %v4579_v26  ;;  %4685 = vmatprep.mubr.bf16.mxu1 %v6372_v2  ;;  %v4720_v5 = vmul.f32 %v7970_v54, %v4705_v53  ;;  %v6174_v26 = vld [vmem:[%s8380_s0 + $0x10] ss:$8 sm:$0x3] }
 0x969   : > { %v4721_v14 = vmul.f32 %v7958_v61, %v4707_v17 }
 0x96a   : > { %v4840_v41 = vpop.permute.xlu1 %4839  ;;  %4589 = vmatprep.subr.bf16.mxu0 %v4585_v22 }
 0x96b   : > { %4590 = vmatpush1.bf16.msra.mxu0 %v4584_v33  ;;  %v8071_v33 = vrot.slane %v6174_v26, %v6579_v13  ;;  %v6171_v13 = vld [vmem:[%s8311_s15 + $0x1c] sm:$0xf] }
 0x96c   : > { %v4704_v37 = vpop.permute.xlu0 %4703 }
 0x96d   : > { %v4706_v50 = vsel %vm1436_vm10, %v4700_v40, %v4704_v37  ;;  %v4708_v46 = vsel %vm1436_vm10, %v4704_v37, %v4700_v40  ;;  %v8074_v40 = vrot.slane %v6174_v26, %v6601_v30 }
 0x96e   : > { %v4722_v31 = vmul.f32 %v7970_v54, %v4706_v50  ;;  %v4723_v58 = vmul.f32 %v7958_v61, %v4708_v46  ;;  %v4844_v43 = vpop.permute.xlu1 %4843  ;;  %6158 = vmatmul.mubr.msk.bf16.vlgmr.msra.gmra.mrb[60].mxu0 %vm3177_vm1, %v6157_v44  ;;  %6161 = vmatmul.mubr.msk.bf16.vlgmr.msra.gmra.mrb[60].mxu1 %vm1781_vm0, %v6159_v24 }
 0x96f   : > { %4796 = vmatpush1.bf16.msra.mxu1 %v4790_v48  ;;  %4763 = vmatprep.mubr.bf16.mxu0 %v6372_v2  ;;  %v4847_v34 = vsel %vm8403_vm2, %v4840_v41, %v4844_v43  ;;  %v4849_v10 = vsel %vm8404_vm5, %v4844_v43, %v4840_v41  ;;  %vm8410_vm2 = vmmov %vm8409_vm14  ;;  %v6169_v41 = vld [vmem:[%s8310_s14 + $0x1c] sm:$0xf] }
 0x970   : > { %v4726_v9 = vpack.c.bf16 %v4722_v31, %v4720_v5  ;;  %v4842_v35 = vpop.permute.xlu0 %4841  ;;  %v4727_v0 = vpack.c.bf16 %v4723_v58, %v4721_v14  ;;  %4827 = vmatprep.mubr.bf16.mxu1 %v6372_v2  ;;  %v4862_v7 = vmul.f32 %v8030_v15, %v4847_v34  ;;  %v4863_v16 = vmul.f32 %v8033_v4, %v4849_v10  ;;  %vm8411_vm5 = vmmov %vm8410_vm2 }
 0x972   : > { %v4917_v25 = vpop.permute.xlu1 %4916  ;;  %4731 = vmatprep.subr.bf16.mxu0 %v4727_v0 }
 0x973   : > { %v4920_v63 = vsel %vm8405_vm11, %v4917_v25, %v7955_v38  ;;  %v4921_v6 = vsel %vm8406_vm12, %v7955_v38, %v4917_v25  ;;  %4732 = vmatpush1.bf16.msra.mxu0 %v4726_v9  ;;  %vm8412_vm11 = vmmov %vm8410_vm2  ;;  %v6177_v25 = vld [vmem:[%s8311_s15 + $0x20] sm:$0xf] }
 0x974   : > { %v4922_v36 = vmul.f32 %v4920_v63, %v8030_v15  ;;  %v4923_v55 = vmul.f32 %v4921_v6, %v8033_v4  ;;  %v4846_v60 = vpop.permute.xlu0 %4845  ;;  %vm8413_vm12 = vmmov %vm8410_vm2 }
 0x975   : > { %v4848_v38 = vsel %vm8407_vm8, %v4842_v35, %v4846_v60  ;;  %v4850_v20 = vsel %vm8408_vm13, %v4846_v60, %v4842_v35  ;;  %vm8414_vm8 = vmmov %vm8410_vm2  ;;  %v6175_v35 = vld [vmem:[%s8310_s14 + $0x20] sm:$0xf] }
 0x976   : > { %v4926_v62 = vpack.c.bf16 %v4922_v36, %v4922_v36  ;;  %v4927_v57 = vpack.c.bf16 %v4923_v55, %v4923_v55  ;;  %v4864_v21 = vmul.f32 %v8030_v15, %v4848_v38  ;;  %v4865_v32 = vmul.f32 %v8033_v4, %v4850_v20  ;;  %v4982_v23 = vpop.permute.xlu1 %4981  ;;  %6164 = vmatmul.mubr.msk.bf16.vlgmr.msra.gmra.mrb[64].mxu0 %vm3177_vm1, %v6163_v28 }
 0x977   : > { %6167 = vmatmul.mubr.msk.bf16.vlgmr.msra.gmra.mrb[64].mxu1 %vm1781_vm0, %v6165_v52  ;;  %4905 = vmatprep.mubr.bf16.mxu0 %v6372_v2 }
 0x978   : > { %v4868_v27 = vpack.c.bf16 %v4864_v21, %v4862_v7  ;;  %v4984_v45 = vpop.permute.xlu0 %4983  ;;  %6172 = vmatprep.subr.msk.bf16.mxu1 %vm1785_vm15, %v4927_v57  ;;  %v4932_v12 = vsel %vm1785_vm15, %v4926_v62, 0  ;;  %v4869_v8 = vpack.c.bf16 %v4865_v32, %v4863_v16  ;;  %4969 = vmatprep.mubr.bf16.mxu1 %v6372_v2 }
 0x979   : > { %4938 = vmatpush1.bf16.msra.mxu1 %v4932_v12 }
 0x97a   : > { %v4986_v22 = vpop.permute.xlu1 %4985  ;;  %4873 = vmatprep.subr.bf16.mxu0 %v4869_v8 }
 0x97b   : > { %v4989_v49 = vsel %vm8409_vm14, %v4982_v23, %v4986_v22  ;;  %v4991_v53 = vsel %vm8410_vm2, %v4986_v22, %v4982_v23  ;;  %4874 = vmatpush1.bf16.msra.mxu0 %v4868_v27  ;;  %vm8422_vm14 = vcmask 1040384  }
 0x97c   : > { %v4988_v17 = vpop.permute.xlu0 %4987  ;;  %v5004_v24 = vmul.f32 %v8071_v33, %v4989_v49  ;;  %v5005_v37 = vmul.f32 %v8074_v40, %v4991_v53 }
 0x97d   : > { %v4990_v30 = vsel %vm8411_vm5, %v4984_v45, %v4988_v17  ;;  %v4992_v44 = vsel %vm8412_vm11, %v4988_v17, %v4984_v45 }
 0x97e   : > { %v5006_v5 = vmul.f32 %v8071_v33, %v4990_v30  ;;  %v5007_v50 = vmul.f32 %v8074_v40, %v4992_v44  ;;  %6170 = vmatmul.mubr.msk.bf16.vlgmr.msra.gmra.mrb[68].mxu0 %vm3177_vm1, %v6169_v41  ;;  %v5059_v14 = vpop.permute.xlu1 %5058 }
 0x97f   : > { %6173 = vmatmul.mubr.msk.bf16.vlgmr.msra.gmra.mrb[68].mxu1 %vm1781_vm0, %v6171_v13  ;;  %5047 = vmatprep.mubr.bf16.mxu0 %v6372_v2 }
 0x980   : > { %v5010_v46 = vpack.c.bf16 %v5006_v5, %v5004_v24  ;;  %v5061_v31 = vpop.permute.xlu0 %5060  ;;  %v5011_v58 = vpack.c.bf16 %v5007_v50, %v5005_v37  ;;  %5111 = vmatprep.mubr.bf16.mxu1 %v6372_v2 }
 0x981   : > { %v5062_v59 = vsel %vm8413_vm12, %v5059_v14, %v5061_v31  ;;  %v5063_v43 = vsel %vm8414_vm8, %v5061_v31, %v5059_v14 }
 0x982   : > { %v5064_v48 = vmul.f32 %v5062_v59, %v8071_v33  ;;  %v5065_v9 = vmul.f32 %v5063_v43, %v8074_v40  ;;  %5015 = vmatprep.subr.bf16.mxu0 %v5011_v58 }
 0x983   : > { %5016 = vmatpush1.bf16.msra.mxu0 %v5010_v46 }
 0x984   : > { %v5068_v0 = vpack.c.bf16 %v5064_v48, %v5064_v48  ;;  %v5069_v34 = vpack.c.bf16 %v5065_v9, %v5065_v9 }
 0x986   : > { %6176 = vmatmul.mubr.msk.bf16.vlgmr.msra.gmra.mrb[72].mxu0 %vm3177_vm1, %v6175_v35  ;;  %6178 = vmatprep.subr.msk.bf16.mxu1 %vm1785_vm15, %v5069_v34  ;;  %v5074_v10 = vsel %vm1785_vm15, %v5068_v0, 0 }
 0x987   : > { %5080 = vmatpush1.bf16.msra.mxu1 %v5074_v10  ;;  %5196 = vmatprep.mubr.bf16.mxu0 %v6372_v2 }
 0x98a   : > { %6179 = vmatmul.mubr.msk.bf16.vlgmr.msra.gmra.mrb[72].mxu1 %vm1781_vm0, %v6177_v25 }
 0x98b   : > { %5246 = vmatprep.mubr.bf16.mxu1 %v6372_v2 }
 0x99f   : > { %v3971_v63 = vpop.f32.mrb[40].mxu0 }
 0x9a0   : > { %v3973_v6 = vpop.f32.mrb[41].mxu0 }
 0x9a1   : > { %v3975_v28 = vpop.f32.mrb[42].mxu0 }
 0x9a2   : > { %v3976_v36 = vpop.f32.mrb[43].mxu0 }
 0xa19   : > { %v4015_v55 = vpop.f32.mrb[40].mxu1 }
 0xa1a   : > { %v4016_v60 = vadd.f32 %v4015_v55, %v3971_v63  ;;  %v4017_v52 = vpop.f32.mrb[41].mxu1 }
 0xa1b   : > { %v4018_v7 = vadd.f32 %v4017_v52, %v3973_v6  ;;  %v4019_v16 = vpop.f32.mrb[42].mxu1 }
 0xa1c   : > { %v4020_v38 = vpop.f32.mrb[43].mxu1 }
 0xa21   : > { %v4091_v20 = vpop.f32.mrb[44].mxu0  ;;  %v4155_v62 = vpop.f32.mrb[44].mxu1 }
 0xa22   : > { %v4098_v57 = vadd.f32 %v4091_v20, %v4016_v60  ;;  %v4093_v21 = vpop.f32.mrb[45].mxu0  ;;  %v4157_v32 = vpop.f32.mrb[45].mxu1 }
 0xa23   : > { %v4099_v23 = vadd.f32 %v4093_v21, %v4018_v7  ;;  %v4095_v26 = vpop.f32.mrb[46].mxu0  ;;  %v4159_v27 = vpop.f32.mrb[46].mxu1 }
 0xa24   : > { %v4162_v45 = vadd.f32 %v4155_v62, %v4098_v57  ;;  %v4096_v12 = vpop.f32.mrb[47].mxu0  ;;  %v4160_v8 = vpop.f32.mrb[47].mxu1 }
 0xa25   : > { %v4163_v22 = vadd.f32 %v4157_v32, %v4099_v23 }
 0xa29   : > { %v4233_v49 = vpop.f32.mrb[48].mxu0  ;;  %v4297_v53 = vpop.f32.mrb[48].mxu1 }
 0xa2a   : > { %v4240_v41 = vadd.f32 %v4233_v49, %v4162_v45  ;;  %v4235_v17 = vpop.f32.mrb[49].mxu0  ;;  %v4299_v13 = vpop.f32.mrb[49].mxu1 }
 0xa2b   : > { %v4241_v30 = vadd.f32 %v4235_v17, %v4163_v22  ;;  %v4237_v44 = vpop.f32.mrb[50].mxu0  ;;  %v4301_v24 = vpop.f32.mrb[50].mxu1 }
 0xa2c   : > { %v4304_v37 = vadd.f32 %v4297_v53, %v4240_v41  ;;  %v4238_v5 = vpop.f32.mrb[51].mxu0  ;;  %v4302_v50 = vpop.f32.mrb[51].mxu1 }
 0xa2d   : > { %v4305_v46 = vadd.f32 %v4299_v13, %v4241_v30 }
 0xa31   : > { %v4375_v14 = vpop.f32.mrb[52].mxu0  ;;  %v4439_v31 = vpop.f32.mrb[52].mxu1 }
 0xa32   : > { %v4382_v58 = vadd.f32 %v4375_v14, %v4304_v37  ;;  %v4377_v59 = vpop.f32.mrb[53].mxu0  ;;  %v4441_v43 = vpop.f32.mrb[53].mxu1 }
 0xa33   : > { %v4383_v48 = vadd.f32 %v4377_v59, %v4305_v46  ;;  %v4379_v9 = vpop.f32.mrb[54].mxu0  ;;  %v4443_v35 = vpop.f32.mrb[54].mxu1 }
 0xa34   : > { %v4446_v0 = vadd.f32 %v4439_v31, %v4382_v58  ;;  %v4380_v34 = vpop.f32.mrb[55].mxu0  ;;  %v4444_v10 = vpop.f32.mrb[55].mxu1 }
 0xa35   : > { %v4447_v25 = vadd.f32 %v4441_v43, %v4383_v48 }
 0xa39   : > { %v4489_v63 = vpop.f32.mrb[56].mxu0  ;;  %v4545_v6 = vpop.f32.mrb[56].mxu1 }
 0xa3a   : > { %v4496_v28 = vadd.f32 %v4489_v63, %v4446_v0  ;;  %v4491_v36 = vpop.f32.mrb[57].mxu0  ;;  %v4547_v55 = vpop.f32.mrb[57].mxu1 }
 0xa3b   : > { %v4497_v60 = vadd.f32 %v4491_v36, %v4447_v25  ;;  %v4493_v52 = vpop.f32.mrb[58].mxu0  ;;  %v4549_v7 = vpop.f32.mrb[58].mxu1 }
 0xa3c   : > { %v4552_v16 = vadd.f32 %v4545_v6, %v4496_v28  ;;  %v4494_v38 = vpop.f32.mrb[59].mxu0  ;;  %v4550_v20 = vpop.f32.mrb[59].mxu1 }
 0xa3d   : > { %v4553_v62 = vadd.f32 %v4547_v55, %v4497_v60 }
 0xa41   : > { %v4623_v57 = vpop.f32.mrb[60].mxu0  ;;  %v4687_v21 = vpop.f32.mrb[60].mxu1 }
 0xa42   : > { %v4630_v32 = vadd.f32 %v4623_v57, %v4552_v16  ;;  %v4625_v23 = vpop.f32.mrb[61].mxu0  ;;  %v4689_v26 = vpop.f32.mrb[61].mxu1 }
 0xa43   : > { %v4631_v27 = vadd.f32 %v4625_v23, %v4553_v62  ;;  %v4627_v45 = vpop.f32.mrb[62].mxu0  ;;  %v4691_v12 = vpop.f32.mrb[62].mxu1 }
 0xa44   : > { %v4694_v8 = vadd.f32 %v4687_v21, %v4630_v32  ;;  %v4628_v22 = vpop.f32.mrb[63].mxu0  ;;  %v4692_v49 = vpop.f32.mrb[63].mxu1  ;;  %v5695_v12 = vld [vmem:[%s8314_s18] sm:$0xff] }
 0xa45   : > { %v4695_v53 = vadd.f32 %v4689_v26, %v4631_v27  ;;  %v5126_v62 = vpop.permute.xlu1 %5125 }
 0xa49   : > { %v4765_v41 = vpop.f32.mrb[64].mxu0 }
 0xa4a   : > { %v4772_v17 = vadd.f32 %v4765_v41, %v4694_v8  ;;  %v4767_v13 = vpop.f32.mrb[65].mxu0  ;;  %v4829_v30 = vpop.f32.mrb[64].mxu1  ;;  %v5708_v8 = vld [vmem:[%s8316_s20] sm:$0x3] }
 0xa4b   : > { %v4773_v44 = vadd.f32 %v4767_v13, %v4695_v53  ;;  %v4769_v24 = vpop.f32.mrb[66].mxu0  ;;  %v4831_v37 = vpop.f32.mrb[65].mxu1 }
 0xa4c   : > { %v4836_v5 = vadd.f32 %v4829_v30, %v4772_v17  ;;  %v4770_v50 = vpop.f32.mrb[67].mxu0  ;;  %v4833_v46 = vpop.f32.mrb[66].mxu1 }
 0xa4d   : > { %v4837_v14 = vadd.f32 %v4831_v37, %v4773_v44  ;;  %v4834_v31 = vpop.f32.mrb[67].mxu1 }
 0xa51   : > { %v4907_v58 = vpop.f32.mrb[68].mxu0 }
 0xa52   : > { %v4914_v59 = vadd.f32 %v4907_v58, %v4836_v5  ;;  %v4909_v43 = vpop.f32.mrb[69].mxu0  ;;  %v4971_v48 = vpop.f32.mrb[68].mxu1 }
 0xa53   : > { %v4915_v9 = vadd.f32 %v4909_v43, %v4837_v14  ;;  %v4911_v35 = vpop.f32.mrb[70].mxu0  ;;  %v4973_v0 = vpop.f32.mrb[69].mxu1 }
 0xa54   : > { %v4978_v34 = vadd.f32 %v4971_v48, %v4914_v59  ;;  %v4912_v10 = vpop.f32.mrb[71].mxu0  ;;  %v4975_v25 = vpop.f32.mrb[70].mxu1 }
 0xa55   : > { %v4979_v63 = vadd.f32 %v4973_v0, %v4915_v9  ;;  %v4976_v6 = vpop.f32.mrb[71].mxu1 }
 0xa59   : > { %v5049_v28 = vpop.f32.mrb[72].mxu0 }
 0xa5a   : > { %v5056_v36 = vadd.f32 %v5049_v28, %v4978_v34  ;;  %v5051_v55 = vpop.f32.mrb[73].mxu0  ;;  %v5140_v34 = vld [vmem:[%s8313_s17] sm:$0xf] }
 0xa5b   : > { %v5057_v60 = vadd.f32 %v5051_v55, %v4979_v63  ;;  %v5053_v52 = vpop.f32.mrb[74].mxu0 }
 0xa5c   : > { %v5054_v7 = vpop.f32.mrb[75].mxu0 }
 0xa5d   : > { %v5113_v16 = vpop.f32.mrb[72].mxu1  ;;  %v6185_v7 = vld [vmem:[%s8313_s17 + $0x8] sm:$0xf] }
 0xa5e   : > { %v5120_v38 = vadd.f32 %v5113_v16, %v5056_v36  ;;  %v5115_v20 = vpop.f32.mrb[73].mxu1 }
 0xa5f   : > { %v5121_v57 = vadd.f32 %v5115_v20, %v5057_v60  ;;  %v5117_v21 = vpop.f32.mrb[74].mxu1 }
 0xa60   : > { %v5128_v32 = vadd.f32 %v5126_v62, %v5120_v38  ;;  %v5118_v23 = vpop.f32.mrb[75].mxu1 }
 0xa61   : > { %v5129_v26 = vadd.f32 %v5126_v62, %v5121_v57 }
 0xa62   : > { %v8116_v27 = vmax.f32 %v5128_v32, 0.0 }
 0xa63   : > { %v8118_v45 = vmax.f32 %v5129_v26, 0.0  ;;  %v6188_v26 = vld [vmem:[%s8313_s17 + $0xc] sm:$0xf] }
 0xa64   : > { %5143 = vrot.lane.b32.xlu0 %v8116_v27, %s8384_s1  ;;  %v5385_v6 = vpack.c.bf16 %v8116_v27, %v8116_v27 }
 0xa65   : > { %5145 = vrot.lane.b32.xlu1 %v8118_v45, %s8384_s1  ;;  %v5386_v60 = vpack.c.bf16 %v8118_v45, %v8118_v45 }
 0xa66   : > { %v5391_v32 = vsel %vm1785_vm15, %v5385_v6, 0 }
 0xa68   : > { %5132 = vrot.lane.b32.xlu0 %v8116_v27, %s8391_s25 }
 0xa69   : > { %5134 = vrot.lane.b32.xlu1 %v8118_v45, %s8391_s25 }
 0xa6c   : > { %5255 = vrot.lane.b32.xlu0 %v8116_v27, %s8387_s6 }
 0xa6d   : > { %5257 = vrot.lane.b32.xlu1 %v8118_v45, %s8387_s6 }
 0xa70   : > { %5319 = vrot.lane.b32.xlu0 %v8116_v27, %s8388_s28 }
 0xa71   : > { %5321 = vrot.lane.b32.xlu1 %v8118_v45, %s8388_s28  ;;  %s8425_s28 = sld [smem:[#allocation15_spill]] }
 0xa74   : > { %5439 = vrot.lane.b32.xlu0 %v8116_v27, %s8389_s22 }
 0xa75   : > { %5441 = vrot.lane.b32.xlu1 %v8118_v45, %s8389_s22 }
 0xa78   : > { %5503 = vrot.lane.b32.xlu0 %v8116_v27, %s8390_s2 }
 0xa79   : > { %5505 = vrot.lane.b32.xlu1 %v8118_v45, %s8390_s2 }
 0xa7c   : > { %5567 = vrot.lane.b32.xlu0 %v8116_v27, %s8383_s7 }
 0xa7d   : > { %5569 = vrot.lane.b32.xlu1 %v8118_v45, %s8383_s7 }
 0xa80   : > { %5631 = vrot.lane.b32.xlu0 %v8116_v27, %s8385_s27 }
 0xa81   : > { %5633 = vrot.lane.b32.xlu1 %v8118_v45, %s8385_s27 }
 0xa84   : > { %5698 = vperm.xlu0 %6334, %v5695_v12  }
 0xa85   : > { %5711 = vperm.xlu1 %6313, %v5708_v8  }
 0xad6   : > { %v5144_v22 = vpop.permute.xlu0 %5143 }
 0xad7   : > { %v5146_v49 = vpop.permute.xlu1 %5145 }
 0xad8   : > { %v5147_v53 = vsel %vm936_vm3, %v5144_v22, %v5146_v49  ;;  %v5148_v41 = vsel %vm936_vm3, %v5146_v49, %v5144_v22  ;;  %vm8415_vm3 = vmmov %vm8408_vm13 }
 0xad9   : > { %v5149_v17 = vmul.f32 %v5148_v41, %v7797_v3  ;;  %v5150_v13 = vmul.f32 %v5147_v53, %v7800_v42  ;;  %v6180_v42 = vld [vmem:[%s8313_s17 + $0x4] sm:$0xf]  ;;  %v6191_v41 = vld [vmem:[%s8313_s17 + $0x10] sm:$0xf] }
 0xada   : > { %v5133_v30 = vpop.permute.xlu0 %5132 }
 0xadb   : > { %v5153_v44 = vpack.c.bf16 %v5149_v17, %v5149_v17  ;;  %v5154_v24 = vpack.c.bf16 %v5150_v13, %v5150_v13  ;;  %v5135_v37 = vpop.permute.xlu1 %5134 }
 0xadc   : > { %v5136_v5 = vsel %vm822_vm4, %v5133_v30, %v5135_v37  ;;  %v5137_v50 = vsel %vm822_vm4, %v5135_v37, %v5133_v30  ;;  %vm8416_vm4 = vmmov %vm8415_vm3 }
 0xadd   : > { %v5138_v46 = vmul.f32 %v5137_v50, %v7678_v18  ;;  %v5139_v14 = vmul.f32 %v5136_v5, %v7681_v1  ;;  %6181 = vmatprep.subr.msk.bf16.mxu0 %vm1785_vm15, %v5154_v24  ;;  %v5159_v3 = vsel %vm1785_vm15, %v5153_v44, 0  ;;  %v6194_v50 = vld [vmem:[%s8313_s17 + $0x14] sm:$0xf] }
 0xade   : > { %v5256_v31 = vpop.permute.xlu0 %5255  ;;  %5165 = vmatpush1.bf16.msra.mxu0 %v5159_v3 }
 0xadf   : > { %v5141_v58 = vpack.c.bf16 %v5138_v46, %v5138_v46  ;;  %v5142_v59 = vpack.c.bf16 %v5139_v14, %v5139_v14  ;;  %v5258_v43 = vpop.permute.xlu1 %5257 }
 0xae0   : > { %v5259_v48 = vsel %vm1042_vm6, %v5256_v31, %v5258_v43  ;;  %v5260_v18 = vsel %vm1042_vm6, %v5258_v43, %v5256_v31  ;;  %vm8417_vm6 = vmmov %vm8410_vm2 }
 0xae1   : > { %v5261_v1 = vmul.f32 %v5260_v18, %v7829_v11  ;;  %v5262_v9 = vmul.f32 %v5259_v48, %v7815_v39  ;;  %6182 = vmatmul.mubr.msk.bf16.vlgmr.msra.gmra.mrb[76].mxu0 %vm1781_vm0, %v6180_v42  ;;  %6183 = vmatprep.subr.msk.bf16.mxu1 %vm1785_vm15, %v5142_v59  ;;  %v5209_v35 = vsel %vm1785_vm15, %v5141_v58, 0  ;;  %v6197_v59 = vld [vmem:[%s8313_s17 + $0x18] sm:$0xf]  ;;  %v6203_v48 = vld [vmem:[%s8313_s17 + $0x20] sm:$0xf] }
 0xae2   : > { %v5320_v0 = vpop.permute.xlu0 %5319  ;;  %5215 = vmatpush1.bf16.msra.mxu1 %v5209_v35  ;;  %5308 = vmatprep.mubr.bf16.mxu0 %v6372_v2 }
 0xae3   : > { %v5265_v10 = vpack.c.bf16 %v5261_v1, %v5261_v1  ;;  %v5266_v25 = vpack.c.bf16 %v5262_v9, %v5262_v9  ;;  %v5322_v63 = vpop.permute.xlu1 %5321 }
 0xae4   : > { %v5323_v39 = vsel %vm1148_vm7, %v5320_v0, %v5322_v63  ;;  %v5324_v11 = vsel %vm1148_vm7, %v5322_v63, %v5320_v0  ;;  %vm8418_vm7 = vmmov %vm8410_vm2 }
 0xae5   : > { %v5325_v28 = vmul.f32 %v5324_v11, %v7865_v19  ;;  %v5326_v36 = vmul.f32 %v5323_v39, %v7846_v47  ;;  %6184 = vmatmul.mubr.msk.bf16.vlgmr.msra.gmra.mrb[76].mxu1 %vm1781_vm0, %v5140_v34  ;;  %6186 = vmatprep.subr.msk.bf16.mxu0 %vm1785_vm15, %v5266_v25  ;;  %v5271_v55 = vsel %vm1785_vm15, %v5265_v10, 0  ;;  %vm8423_vm2 = vmmov %vm8422_vm14 }
 0xae6   : > { %v5440_v52 = vpop.permute.xlu0 %5439  ;;  %5277 = vmatpush1.bf16.msra.mxu0 %v5271_v55  ;;  %5372 = vmatprep.mubr.bf16.mxu1 %v6372_v2 }
 0xae7   : > { %v5329_v19 = vpack.c.bf16 %v5325_v28, %v5325_v28  ;;  %v5330_v16 = vpack.c.bf16 %v5326_v36, %v5326_v36  ;;  %v5442_v47 = vpop.permute.xlu1 %5441  ;;  %6192 = vmatprep.subr.msk.bf16.mxu0 %vm1785_vm15, %v5386_v60 }
 0xae8   : > { %v5443_v38 = vsel %vm1330_vm9, %v5440_v52, %v5442_v47  ;;  %v5444_v20 = vsel %vm1330_vm9, %v5442_v47, %v5440_v52  ;;  %vm8420_vm9 = vcmask 1041408  }
 0xae9   : > { %v5445_v62 = vmul.f32 %v5443_v38, %v7935_v56  ;;  %v5446_v57 = vmul.f32 %v5444_v20, %v7914_v51  ;;  %6187 = vmatmul.mubr.msk.bf16.vlgmr.msra.gmra.mrb[80].mxu0 %vm1781_vm0, %v6185_v7  ;;  %6189 = vmatprep.subr.msk.bf16.mxu1 %vm1785_vm15, %v5330_v16  ;;  %v5335_v21 = vsel %vm1785_vm15, %v5329_v19, 0 }
 0xaea   : > { %v5504_v23 = vpop.permute.xlu0 %5503  ;;  %5341 = vmatpush1.bf16.msra.mxu1 %v5335_v21  ;;  %5397 = vmatpush1.bf16.msra.mxu0 %v5391_v32 }
 0xaeb   : > { %v5449_v27 = vpack.c.bf16 %v5445_v62, %v5445_v62  ;;  %v5450_v45 = vpack.c.bf16 %v5446_v57, %v5446_v57  ;;  %v5506_v56 = vpop.permute.xlu1 %5505  ;;  %5428 = vmatprep.mubr.bf16.mxu0 %v6372_v2 }
 0xaec   : > { %v5507_v51 = vsel %vm1436_vm10, %v5504_v23, %v5506_v56  ;;  %v5508_v12 = vsel %vm1436_vm10, %v5506_v56, %v5504_v23  ;;  %vm8421_vm10 = vmmov %vm8420_vm9 }
 0xaed   : > { %v5509_v8 = vmul.f32 %v5507_v51, %v7970_v54  ;;  %v5510_v22 = vmul.f32 %v5508_v12, %v7958_v61  ;;  %6190 = vmatmul.mubr.msk.bf16.vlgmr.msra.gmra.mrb[80].mxu1 %vm1781_vm0, %v6188_v26  ;;  %6195 = vmatprep.subr.msk.bf16.mxu1 %vm1785_vm15, %v5450_v45  ;;  %v5455_v49 = vsel %vm1785_vm15, %v5449_v27, 0 }
 0xaee   : > { %v5568_v53 = vpop.permute.xlu0 %5567  ;;  %5461 = vmatpush1.bf16.msra.mxu1 %v5455_v49  ;;  %5492 = vmatprep.mubr.bf16.mxu1 %v6372_v2 }
 0xaef   : > { %v5513_v17 = vpack.c.bf16 %v5509_v8, %v5509_v8  ;;  %v5514_v13 = vpack.c.bf16 %v5510_v22, %v5510_v22  ;;  %v5570_v30 = vpop.permute.xlu1 %5569 }
 0xaf0   : > { %v5571_v61 = vsel %vm8415_vm3, %v5568_v53, %v5570_v30  ;;  %v5572_v54 = vsel %vm8416_vm4, %v5570_v30, %v5568_v53 }
 0xaf1   : > { %v5573_v44 = vmul.f32 %v5571_v61, %v8030_v15  ;;  %v5574_v24 = vmul.f32 %v5572_v54, %v8033_v4  ;;  %6193 = vmatmul.mubr.msk.bf16.vlgmr.msra.gmra.mrb[84].mxu0 %vm1781_vm0, %v6191_v41  ;;  %6198 = vmatprep.subr.msk.bf16.mxu0 %vm1785_vm15, %v5514_v13  ;;  %v5519_v37 = vsel %vm1785_vm15, %v5513_v17, 0 }
 0xaf2   : > { %v5632_v5 = vpop.permute.xlu0 %5631  ;;  %5525 = vmatpush1.bf16.msra.mxu0 %v5519_v37  ;;  %5556 = vmatprep.mubr.bf16.mxu0 %v6372_v2 }
 0xaf3   : > { %v5577_v46 = vpack.c.bf16 %v5573_v44, %v5573_v44  ;;  %v5578_v14 = vpack.c.bf16 %v5574_v24, %v5574_v24  ;;  %v5634_v3 = vpop.permute.xlu1 %5633 }
 0xaf4   : > { %v5635_v15 = vsel %vm8417_vm6, %v5632_v5, %v5634_v3  ;;  %v5636_v4 = vsel %vm8418_vm7, %v5634_v3, %v5632_v5 }
 0xaf5   : > { %v5637_v31 = vmul.f32 %v5635_v15, %v8071_v33  ;;  %v5638_v42 = vmul.f32 %v5636_v4, %v8074_v40  ;;  %6196 = vmatmul.mubr.msk.bf16.vlgmr.msra.gmra.mrb[84].mxu1 %vm1781_vm0, %v6194_v50  ;;  %6201 = vmatprep.subr.msk.bf16.mxu1 %vm1785_vm15, %v5578_v14  ;;  %v5583_v58 = vsel %vm1785_vm15, %v5577_v46, 0  ;;  %v6200_v40 = vld [vmem:[%s8313_s17 + $0x1c] sm:$0xf] }
 0xaf6   : > { %5589 = vmatpush1.bf16.msra.mxu1 %v5583_v58  ;;  %5620 = vmatprep.mubr.bf16.mxu1 %v6372_v2 }
 0xaf7   : > { %v5641_v43 = vpack.c.bf16 %v5637_v31, %v5637_v31  ;;  %v5642_v29 = vpack.c.bf16 %v5638_v42, %v5638_v42 }
 0xaf9   : > { %6199 = vmatmul.mubr.msk.bf16.vlgmr.msra.gmra.mrb[88].mxu0 %vm1781_vm0, %v6197_v59  ;;  %6204 = vmatprep.subr.msk.bf16.mxu0 %vm1785_vm15, %v5642_v29  ;;  %v5647_v33 = vsel %vm1785_vm15, %v5641_v43, 0  ;;  %v5705_v29 = vld [vmem:[%s8315_s19] sm:$0x1] }
 0xafa   : > { %5653 = vmatpush1.bf16.msra.mxu0 %v5647_v33  ;;  %5684 = vmatprep.mubr.bf16.mxu0 %v6372_v2  ;;  %v6361_v33 = vld.sshfl [vmem:[%s6548_s3] sm:$0x33 pattern:$0x76325410]  ;;  %s8424_s3 = sshll.u32 %s8428_s30, 1 }
 0xafb   : > { %s751_s22 = scalar_lea.vmem %s8425_s28, %s8424_s3 }
 0xafd   : > { %6202 = vmatmul.mubr.msk.bf16.vlgmr.msra.gmra.mrb[88].mxu1 %vm1781_vm0, %v6200_v40 }
 0xafe   : > { %5755 = vmatprep.mubr.bf16.mxu1 %v6372_v2 }
 0xb01   : > { %6205 = vmatmul.mubr.msk.bf16.vlgmr.msra.gmra.mrb[92].mxu0 %vm1781_vm0, %v6203_v48 }
 0xb03   : > { %v5699_v50 = vpop.permute.xlu0 %5698 }
 0xb04   : > { %v5712_v40 = vpop.permute.xlu1 %5711 }
 0xbb4   : > { %v5198_v18 = vpop.f32.mrb[76].mxu0 }
 0xbb5   : > { %v5200_v1 = vpop.f32.mrb[77].mxu0 }
 0xbb6   : > { %v5202_v9 = vpop.f32.mrb[78].mxu0 }
 0xbb7   : > { %v5203_v35 = vpop.f32.mrb[79].mxu0 }
 0xbb8   : > { %v5248_v0 = vpop.f32.mrb[76].mxu1  ;;  %v5786_v35 = vcombine.high %v6361_v33, %v6361_v33 }
 0xbb9   : > { %v5249_v34 = vadd.f32 %v5248_v0, %v5198_v18  ;;  %v5250_v10 = vpop.f32.mrb[77].mxu1 }
 0xbba   : > { %v5251_v25 = vadd.f32 %v5250_v10, %v5200_v1  ;;  %v5252_v63 = vpop.f32.mrb[78].mxu1 }
 0xbbb   : > { %v5253_v39 = vpop.f32.mrb[79].mxu1 }
 0xbbc   : > { %v5310_v11 = vpop.f32.mrb[80].mxu0 }
 0xbbd   : > { %v5317_v6 = vadd.f32 %v5310_v11, %v5249_v34  ;;  %v5312_v28 = vpop.f32.mrb[81].mxu0 }
 0xbbe   : > { %v5318_v36 = vadd.f32 %v5312_v28, %v5251_v25  ;;  %v5314_v55 = vpop.f32.mrb[82].mxu0 }
 0xbbf   : > { %v5315_v60 = vpop.f32.mrb[83].mxu0 }
 0xbc0   : > { %v5374_v52 = vpop.f32.mrb[80].mxu1 }
 0xbc1   : > { %v5381_v2 = vadd.f32 %v5374_v52, %v5317_v6  ;;  %v5376_v7 = vpop.f32.mrb[81].mxu1 }
 0xbc2   : > { %v5382_v19 = vadd.f32 %v5376_v7, %v5318_v36  ;;  %v5378_v16 = vpop.f32.mrb[82].mxu1 }
 0xbc3   : > { %v5379_v47 = vpop.f32.mrb[83].mxu1 }
 0xbc4   : > { %v5430_v38 = vpop.f32.mrb[84].mxu0 }
 0xbc5   : > { %v5437_v20 = vadd.f32 %v5430_v38, %v5381_v2  ;;  %v5432_v62 = vpop.f32.mrb[85].mxu0 }
 0xbc6   : > { %v5438_v57 = vadd.f32 %v5432_v62, %v5382_v19  ;;  %v5434_v21 = vpop.f32.mrb[86].mxu0 }
 0xbc7   : > { %v5435_v32 = vpop.f32.mrb[87].mxu0 }
 0xbc8   : > { %v5494_v23 = vpop.f32.mrb[84].mxu1 }
 0xbc9   : > { %v5501_v26 = vadd.f32 %v5494_v23, %v5437_v20  ;;  %v5496_v27 = vpop.f32.mrb[85].mxu1 }
 0xbca   : > { %v5502_v45 = vadd.f32 %v5496_v27, %v5438_v57  ;;  %v5498_v56 = vpop.f32.mrb[86].mxu1 }
 0xbcb   : > { %v5499_v51 = vpop.f32.mrb[87].mxu1 }
 0xbcc   : > { %v5558_v12 = vpop.f32.mrb[88].mxu0 }
 0xbcd   : > { %v5565_v8 = vadd.f32 %v5558_v12, %v5501_v26  ;;  %v5560_v22 = vpop.f32.mrb[89].mxu0 }
 0xbce   : > { %v5566_v49 = vadd.f32 %v5560_v22, %v5502_v45  ;;  %v5562_v53 = vpop.f32.mrb[90].mxu0 }
 0xbcf   : > { %v5563_v41 = vpop.f32.mrb[91].mxu0 }
 0xbd0   : > { %v5622_v17 = vpop.f32.mrb[88].mxu1 }
 0xbd1   : > { %v5629_v13 = vadd.f32 %v5622_v17, %v5565_v8  ;;  %v5624_v30 = vpop.f32.mrb[89].mxu1 }
 0xbd2   : > { %v5630_v61 = vadd.f32 %v5624_v30, %v5566_v49  ;;  %v5626_v54 = vpop.f32.mrb[90].mxu1 }
 0xbd3   : > { %v5627_v44 = vpop.f32.mrb[91].mxu1 }
 0xbd4   : > { %v5686_v24 = vpop.f32.mrb[92].mxu0 }
 0xbd5   : > { %v5693_v37 = vadd.f32 %v5686_v24, %v5629_v13  ;;  %v5688_v5 = vpop.f32.mrb[93].mxu0 }
 0xbd6   : > { %v5694_v46 = vadd.f32 %v5688_v5, %v5630_v61  ;;  %v5690_v14 = vpop.f32.mrb[94].mxu0 }
 0xbd7   : > { %v5701_v3 = vadd.f32 %v5699_v50, %v5693_v37  ;;  %v5691_v15 = vpop.f32.mrb[95].mxu0 }
 0xbd8   : > { %v5702_v4 = vadd.f32 %v5699_v50, %v5694_v46 }
 0xbd9   : > { %v5703_v31 = vmax.f32 %v5701_v3, 0.0 }
 0xbda   : > { %v5704_v42 = vmax.f32 %v5702_v4, 0.0 }
 0xbdb   : > { %v5706_v58 = vpack.c.bf16 %v5703_v31, %v5703_v31 }
 0xbdc   : > { %v5707_v59 = vpack.c.bf16 %v5704_v42, %v5704_v42 }
 0xbdd   : > { %v5718_v43 = vsel %vm1785_vm15, %v5706_v58, 0 }
 0xbde   : > { %6206 = vmatprep.subr.msk.bf16.mxu1 %vm1785_vm15, %v5707_v59 }
 0xbdf   : > { %5724 = vmatpush1.bf16.msra.mxu1 %v5718_v43 }
 0xbe2   : > { %6207 = vmatmul.mubr.msk.bf16.vlgmr.msra.gmra.mrb[92].mxu1 %vm1781_vm0, %v5705_v29 }
 0xcb5   : > { %v5757_v48 = vpop.f32.mrb[92].mxu1 }
 0xcb6   : > { %v5758_v18 = vadd.f32 %v5757_v48, %v5712_v40  ;;  %v5759_v1 = vpop.f32.mrb[93].mxu1 }
 0xcb7   : > { %v5760_v9 = vadd.f32 %v5759_v1, %v5712_v40  ;;  %v5761_v0 = vpop.f32.mrb[94].mxu1 }
 0xcb8   : > { %v5776_v34 = vmul.f32 20.0, %v5758_v18  ;;  %v5762_v10 = vpop.f32.mrb[95].mxu1 }
 0xcb9   : > { %v5766_v25 = vcombine.low %v5758_v18, %v5760_v9  ;;  %v5777_v63 = vmul.f32 20.0, %v5760_v9 }
 0xcba   : > { %v5789_v39 = vsub.f32 %v5776_v34, %v6361_v33 }
 0xcbb   : > { %6208 = vst.sshfl [vmem:[%s743_s9] sm:$0x33 pattern:$0x76325410] %v5766_v25  ;;  %v5790_v11 = vsub.f32 %v5777_v63, %v5786_v35 }
 0xcbc   : > { %v5791_v6 = vmul.f32 %v5789_v39, %v5789_v39 }
 0xcbd   : > { %v5792_v28 = vmul.f32 %v5790_v11, %v5790_v11 }
 0xcbe   : > { %v5807_v36 = vrot.slane %v5791_v6, 1  ;;  %v5793_v55 = vsel %vm8420_vm9, %v5791_v6, 0.0 }
 0xcbf   : > { %v5808_v60 = vrot.slane %v5792_v28, 1  ;;  %v5794_v52 = vsel %vm8421_vm10, %v5792_v28, 0.0 }
 0xcc0   : > { %v5811_v2 = vadd.f32 %v5807_v36, %v5791_v6  ;;  %v5795_v7 = vadd.f32 %v5794_v52, %v5793_v55 }
 0xcc1   : > { %v5812_v19 = vadd.f32 %v5808_v60, %v5792_v28 }
 0xcc2   : > { %5796 = vadd.xlane.f32.xlu0 %v5795_v7  ;;  %6356 = vrsqrt.f32 %v5811_v2  ;;  %vm5815_vm15 = vcmp.eq.f32.partialorder %v5811_v2, inf  ;;  %v5818_v20 = vand.u32 2147483648, %v5811_v2  ;;  %vm5817_vm0 = vcmp.eq.f32.partialorder %v5811_v2, 0.0 }
 0xcc3   : > { %6358 = vrsqrt.f32 %v5812_v19  ;;  %vm5822_vm1 = vcmp.eq.f32.partialorder %v5812_v19, inf  ;;  %v5825_v21 = vand.u32 2147483648, %v5812_v19  ;;  %vm5824_vm13 = vcmp.eq.f32.partialorder %v5812_v19, 0.0 }
 0xccc   : > { %v6357_v16 = vpop.eup %6356 }
 0xccd   : > { %v6359_v47 = vpop.eup %6358  ;;  %v5814_v38 = vmul.f32 %v6357_v16, %v5811_v2 }
 0xcce   : > { %v5821_v62 = vmul.f32 %v6359_v47, %v5812_v19 }
 0xccf   : > { %v5816_v57 = vsel %vm5815_vm15, %v5811_v2, %v5814_v38 }
 0xcd0   : > { %v5819_v32 = vsel %vm5817_vm0, %v5818_v20, %v5816_v57  ;;  %v5823_v23 = vsel %vm5822_vm1, %v5812_v19, %v5821_v62 }
 0xcd1   : > { %v5826_v26 = vsel %vm5824_vm13, %v5825_v21, %v5823_v23  ;;  %v5827_v27 = vsel %vm8422_vm14, %v5819_v32, 0.0 }
 0xcd2   : > { %v5828_v45 = vsel %vm8423_vm2, %v5826_v26, 0.0 }
 0xcd3   : > { %v5829_v56 = vadd.f32 %v5828_v45, %v5827_v27 }
 0xcd5   : > { %5830 = vadd.xlane.f32.xlu1 %v5829_v56 }
 0xd4f   : > { %v5797_v51 = vpop.xlane.xlu0 %5796 }
 0xd50   : > { %v5798_v12 = vrot.slane %v5797_v51, 4 }
 0xd52   : > { %v5799_v8 = vadd.f32 %v5798_v12, %v5797_v51 }
 0xd54   : > { %v5800_v22 = vrot.slane %v5799_v8, 2 }
 0xd56   : > { %v5801_v49 = vadd.f32 %v5800_v22, %v5799_v8 }
 0xd58   : > { %v5802_v53 = vrot.slane %v5801_v49, 1 }
 0xd5a   : > { %v5803_v41 = vadd.f32 %v5802_v53, %v5801_v49 }
 0xd5c   : > { %6280 = vpush %v5803_v41 }
 0xd62   : > { %v5831_v17 = vpop.xlane.xlu1 %5830 }
 0xd63   : > { %v5832_v13 = vrot.slane %v5831_v17, 4 }
 0xd65   : > { %v5833_v30 = vadd.f32 %v5832_v13, %v5831_v17 }
 0xd67   : > { %v5834_v61 = vrot.slane %v5833_v30, 2 }
 0xd69   : > { %v5835_v54 = vadd.f32 %v5834_v61, %v5833_v30 }
 0xd6b   : > { %v5836_v44 = vrot.slane %v5835_v54, 1 }
 0xd6d   : > { %v5837_v24 = vadd.f32 %v5836_v44, %v5835_v54 }
 0xd6f   : > { %6282 = vpush %v5837_v24 }
 0xd8d   : > { %s6281_s7 = spop %6280 }
 0xd8e   : > { %v5839_v37 = vstv %s6281_s7 }
 0xd8f   : > { %5840 = vst [vmem:[%s751_s22] sm:$0x1] %v5839_v37 }
 0xda0   : > { %s6283_s27 = spop %6282 }
 0xda1   : > { %v5841_v5 = vstv %s6283_s27 }
 0xda2   : > { %5842 = vst [vmem:[%s751_s22 + $0x1] sm:$0x1] %v5841_v5 }
 0xda3 PF: > { %s8426_s2 = sld [smem:[#allocation3_spill]] }
 0xda9   : > { %s34_s4 = sadd.s32 1, %s8426_s2  }
 0xdaa   : > { %p31_p4 = scmp.ge.s32.totalorder %s34_s4, 4  }
 0xdac   :  { %33 = sbr.rel (!%p31_p4) target bundleno = 13 (0xd), region = 240 }

// kernel: forward.1
= control target key start
LH: loop header
LB: loop body
LE: loop exit
PB: predicated region body
PF: predicated region fallthrough
CT: control target
= control target key end

     0   :  { %s8296_s0 = inlined_call_operand.vmem [shape: f32[2,3,256], index: 0, kind: input, shape index: {}]   ;;  %s8297_s1 = inlined_call_operand.vmem [shape: f32[2,2,256], index: 1, kind: input, shape index: {}]   ;;  %s8298_s2 = inlined_call_operand.vmem [shape: f32[9,256], index: 2, kind: input, shape index: {}]   ;;  %s8299_s3 = inlined_call_operand.vmem [shape: f32[9,256], index: 3, kind: input, shape index: {}]   ;;  %s8300_s4 = inlined_call_operand.vmem [shape: f32[2,256], index: 4, kind: input, shape index: {}]   ;;  %s8301_s5 = inlined_call_operand.vmem [shape: bf16[9,8,3], index: 5, kind: input, shape index: {}]   ;;  %s8302_s6 = inlined_call_operand.vmem [shape: bf16[9,8,1], index: 6, kind: input, shape index: {}]   ;;  %s8303_s7 = inlined_call_operand.vmem [shape: f32[8,1], index: 7, kind: input, shape index: {}]   ;;  %s8304_s8 = inlined_call_operand.vmem [shape: bf16[9,8,8], index: 8, kind: input, shape index: {}]   ;;  %s8305_s9 = inlined_call_operand.vmem [shape: f32[8,1], index: 9, kind: input, shape index: {}]   ;;  %s8306_s10 = inlined_call_operand.vmem [shape: bf16[9,16,8], index: 10, kind: input, shape index: {}]   ;;  %s8307_s11 = inlined_call_operand.vmem [shape: f32[16,1], index: 11, kind: input, shape index: {}]   ;;  %s8308_s12 = inlined_call_operand.vmem [shape: bf16[9,16,16], index: 12, kind: input, shape index: {}]   ;;  %s8309_s13 = inlined_call_operand.vmem [shape: f32[16,1], index: 13, kind: input, shape index: {}]   ;;  %s8310_s14 = inlined_call_operand.vmem [shape: bf16[9,8,16], index: 14, kind: input, shape index: {}]   ;;  %s8311_s15 = inlined_call_operand.vmem [shape: bf16[9,8,8], index: 15, kind: input, shape index: {}]   ;;  %s8312_s16 = inlined_call_operand.vmem [shape: f32[8,1], index: 16, kind: input, shape index: {}]   ;;  %s8313_s17 = inlined_call_operand.vmem [shape: bf16[9,8,8], index: 17, kind: input, shape index: {}]   ;;  %s8314_s18 = inlined_call_operand.vmem [shape: f32[8,1], index: 18, kind: input, shape index: {}]   ;;  %s8315_s19 = inlined_call_operand.vmem [shape: bf16[2,8], index: 19, kind: input, shape index: {}]   ;;  %s8316_s20 = inlined_call_operand.vmem [shape: f32[2,1], index: 20, kind: input, shape index: {}]   ;;  %s8317_s21 = inlined_call_operand.vmem [shape: f32[2,2,256], index: 21, kind: output, shape index: {0}]   ;;  %s8318_s22 = inlined_call_operand.vmem [shape: f32[2,1,256], index: 22, kind: output, shape index: {1}]   ;;  %s8319_s23 = inlined_call_operand.vmem [shape: f32[2,2,128], index: 23, kind: output, shape index: {2}]  }
   0x1   :  { %8364 = sst [smem:[#allocation4_spill]] %s8296_s0 }
   0x2   :  { %8365 = sst [smem:[#allocation5_spill]] %s8297_s1 }
   0x3   :  { %8366 = sst [smem:[#allocation6_spill]] %s8298_s2 }
   0x4   :  { %8367 = sst [smem:[#allocation7_spill]] %s8299_s3 }
   0x5   :  { %8368 = sst [smem:[#allocation8_spill]] %s8300_s4  ;;  %s6510_s4 = smov 0  }
   0x6   :  { %8369 = sst [smem:[#allocation9_spill]] %s8301_s5 }
   0x7   :  { %8370 = sst [smem:[#allocation10_spill]] %s8302_s6 }
   0x8   :  { %8371 = sst [smem:[#allocation11_spill]] %s8303_s7 }
   0x9   :  { %8372 = sst [smem:[#allocation12_spill]] %s8304_s8 }
   0xa   :  { %8373 = sst [smem:[#allocation13_spill]] %s8305_s9 }
   0xb   :  { %8374 = sst [smem:[#allocation14_spill]] %s8318_s22 }
   0xc   :  { %8375 = sst [smem:[#allocation15_spill]] %s8319_s23 }
   0xd LB: > { %8376 = sst [smem:[#allocation3_spill]] %s6368_s4  ;;  %s5972_s30 = sadd.s32 4294967295, %s6368_s4   ;;  %s6368_s4 = sphi %s6510_s4, %s34_s4  }
   0xe   : > { %p5976_p0 = scmp.ge.s32.totalorder %s6368_s4, 1  ;;  %p652_p1 = scmp.lt.s32.totalorder %s6368_s4, 3 }
  0x10   : > { %p653_p2 = pnand %p5976_p0, %p652_p1 }
  0x11   : > { %p729_p3 = scmp.lt.s32.totalorder (!%p653_p2), %s5972_s30, 1  ;;  %s8377_s1 = sld [smem:[#allocation4_spill]] (!%p653_p2)  ;;  %v6372_v2 = vmov (!%p653_p2), 0   ;;  %v769_v8 = vlaneseq (!%p653_p2)  ;;  %vm8360_vm2 = vcmask (!%p653_p2), 1040384   ;;  %vm8361_vm5 = vcmask (!%p653_p2), 1041408  }
  0x12   : > { %656 = sbr.rel (%p653_p2) target bundleno = 3491 (0xda3), region = 104  ;;  %s8332_s2 = smov (!%p653_p2), 16   ;;  %921 = vmatprep.mubr.bf16.mxu0 (!%p653_p2), %v6372_v2  ;;  %997 = vmatprep.mubr.bf16.mxu1 (!%p653_p2), %v6372_v2  ;;  %v6379_v40 = vmov (!%p653_p2), 65535   ;;  %vm876_vm8 = vcmask (!%p653_p2), 23552   ;;  %vm1785_vm15 = vcmask (!%p653_p2), 1043456  }
  0x13   : > { %s8341_s6 = smov (!%p653_p2), 17   ;;  %6313 = vset.pattern.permute.xlu1 (!%p653_p2), %v6372_v2  ;;  %6334 = vset.pattern.permute.xlu0 (!%p653_p2), %v6372_v2  ;;  %s8378_s29 = sld [smem:[#allocation5_spill]] (!%p653_p2)  ;;  %v6576_v10 = vshrl.u32 (!%p653_p2), %v769_v8, 7  ;;  %v6598_v29 = vand.u32 (!%p653_p2), 127, %v769_v8  ;;  %v881_v41 = vsel (!%p653_p2), %vm8360_vm2, 4294967295, %v6379_v40  ;;  %vm809_vm14 = vcmp.lt.s32.totalorder (!%p653_p2), %v769_v8, 256 }
  0x14   : > { %s8328_s0 = smov (!%p653_p2), 15   ;;  %s8326_s25 = smov (!%p653_p2), 127   ;;  %v6650_v55 = vsel (!%p653_p2), %vm8361_vm5, %v881_v41, 0 }
  0x15   : > { %s8337_s5 = smov (!%p653_p2), 113   ;;  %v6579_v13 = vsub.s32 (!%p653_p2), 0, %v6576_v10  ;;  %v775_v14 = vsub.s32 (!%p653_p2), 2, %v6576_v10  ;;  %v6601_v30 = vsub.s32 (!%p653_p2), 1, %v6576_v10  ;;  %vm936_vm3 = vcmp.lt.s32.totalorder (!%p653_p2), %v6598_v29, 16  ;;  %s8382_s22 = sld [smem:[#allocation14_spill]] (!%p653_p2) }
  0x16   : > { %vm822_vm4 = vcmp.lt.s32.totalorder (!%p653_p2), %v6598_v29, 17  ;;  %vm1042_vm6 = vcmp.lt.s32.totalorder (!%p653_p2), %v6598_v29, 15  ;;  %vm1148_vm7 = vcmp.lt.s32.totalorder (!%p653_p2), %v6598_v29, 1  ;;  %vm1330_vm9 = vcmp.lt.s32.totalorder (!%p653_p2), %v6598_v29, 127  ;;  %s8392_s9 = sld [smem:[#allocation13_spill]] (!%p653_p2)  ;;  %s8393_s8 = sld [smem:[#allocation12_spill]] (!%p653_p2) }
  0x17   : > { %vm1436_vm10 = vcmp.lt.s32.totalorder (!%p653_p2), %v6598_v29, 113  ;;  %vm8363_vm11 = vcmp.lt.s32.totalorder (!%p653_p2), %v6598_v29, 112  ;;  %vm8362_vm12 = vcmp.lt.s32.totalorder (!%p653_p2), %v6598_v29, 111  ;;  %vm2853_vm5 = vcmp.lt.s32.totalorder (!%p653_p2), %v6598_v29, 98  ;;  %s8395_s23 = smov (!%p653_p2), 32   ;;  %s8396_s4 = smov (!%p653_p2), 34  }
  0x19   : > { %s8428_s30 = smov (!%p729_p3, %s5972_s30), 1 }
  0x1a   : > { %s6211_s24 = sshll.u32 %s8428_s30, 3  ;;  %s8325_s27 = sshll.u32 %s8428_s30, 2 }
  0x1b   : > { %s733_s26 = scalar_lea.vmem %s8377_s1, %s6211_s24  ;;  %s6548_s3 = scalar_lea.vmem %s8378_s29, %s8325_s27 }
  0x1c   : > { %v6524_v0 = vld [vmem:[%s733_s26] sm:$0x77]  ;;  %s8339_s24 = smov 1   ;;  %s8334_s1 = smov 112  }
  0x1d   : > { %932 = vrot.lane.b32.xlu1 %v6524_v0, %s8332_s2  ;;  %816 = vrot.lane.b32.xlu0 %v6524_v0, %s8341_s6  ;;  %v6532_v1 = vcombine.high %v6524_v0, %v6524_v0  ;;  %v754_v3 = vld [vmem:[%s6548_s3] sm:$0xf]  ;;  %s8330_s26 = smov 111   ;;  %s8379_s29 = sld [smem:[#allocation10_spill]] }
  0x1e   : > { %v755_v4 = vmul.f32 %v754_v3, %v754_v3  ;;  %s8336_s28 = sshll.u32 %s8428_s30, 1  ;;  %s8385_s27 = smov 111  }
  0x20   : > { %v5985_v5 = vrot.slane %v755_v4, 9 }
  0x21   : > { %934 = vrot.lane.b32.xlu1 %v6532_v1, %s8332_s2  ;;  %818 = vrot.lane.b32.xlu0 %v6532_v1, %s8341_s6  ;;  %s8381_s2 = sld [smem:[#allocation9_spill]] }
  0x22   : > { %v760_v6 = vadd.f32 %v5985_v5, %v755_v4 }
  0x23   : > { %v859_v21 = vld [vmem:[%s8379_s29] sm:$0xff]   ;;  %v5995_v24 = vld [vmem:[%s8379_s29 + $0x8] sm:$0xff]   ;;  %v6002_v8 = vld [vmem:[%s8379_s29 + $0x10] sm:$0xff]  }
  0x24   : > { %6354 = vrsqrt.f32 %v760_v6  ;;  %vm763_vm0 = vcmp.eq.f32.partialorder %v760_v6, inf  ;;  %v766_v11 = vand.u32 2147483648, %v760_v6  ;;  %vm765_vm1 = vcmp.eq.f32.partialorder %v760_v6, 0.0 }
  0x25   : > { %1040 = vrot.lane.b32.xlu1 %v6532_v1, %s8328_s0  ;;  %1038 = vrot.lane.b32.xlu0 %v6524_v0, %s8328_s0  ;;  %v860_v22 = vunpack.c.l.bf16 %v859_v21  ;;  %v1018_v23 = vunpack.c.h.bf16 %v859_v21  ;;  %v1124_v25 = vunpack.c.l.bf16 %v5995_v24  ;;  %v1230_v26 = vunpack.c.h.bf16 %v5995_v24  ;;  %s8380_s0 = sld [smem:[#allocation6_spill]] }
  0x27   : > { %v6314_v27 = vpack.i.bf16 %v1018_v23, %v860_v22  ;;  %v6319_v28 = vpack.i.bf16 %v1230_v26, %v1124_v25 }
  0x29   : > { %1146 = vrot.lane.b32.xlu1 %v6532_v1, %s8339_s24  ;;  %1144 = vrot.lane.b32.xlu0 %v6524_v0, %s8339_s24 }
  0x2b   : > { %v812_v31 = vld [vmem:[%s8380_s0] ss:$8 sm:$0x3]  ;;  %v5988_v32 = vld [vmem:[%s8380_s0 + $0x1] ss:$8 sm:$0x3] }
  0x2c   : > { %v5992_v35 = vld [vmem:[%s8380_s0 + $0x2] ss:$8 sm:$0x3]  ;;  %v6615_v36 = vrot.slane %v812_v31, %v6601_v30  ;;  %v6618_v37 = vrot.slane %v812_v31, %v6579_v13  ;;  %v6621_v38 = vrot.slane %v5988_v32, %v6601_v30  ;;  %v6624_v39 = vrot.slane %v5988_v32, %v6579_v13  ;;  %v5996_v51 = vld [vmem:[%s8380_s0 + $0x3] ss:$8 sm:$0x3] }
  0x2d   : > { %1328 = vrot.lane.b32.xlu1 %v6532_v1, %s8326_s25  ;;  %1326 = vrot.lane.b32.xlu0 %v6524_v0, %s8326_s25  ;;  %v6629_v44 = vrot.slane %v5992_v35, %v6579_v13  ;;  %v6632_v45 = vrot.slane %v5992_v35, %v6601_v30  ;;  %v6658_v3 = vrot.slane %v5996_v51, %v6579_v13  ;;  %v6003_v5 = vld [vmem:[%s8380_s0 + $0x5] ss:$8 sm:$0x3]  ;;  %v6007_v26 = vld [vmem:[%s8380_s0 + $0x6] ss:$8 sm:$0x3] }
  0x2e   : > { %v6355_v7 = vpop.eup %6354  ;;  %v6661_v4 = vrot.slane %v5996_v51, %v6601_v30  ;;  %v6675_v22 = vrot.slane %v6003_v5, %v6579_v13  ;;  %v6686_v25 = vrot.slane %v6003_v5, %v6601_v30  ;;  %s8391_s25 = smov 17  }
  0x2f   : > { %v762_v9 = vmul.f32 %v6355_v7, %v760_v6 }
  0x31   : > { %1434 = vrot.lane.b32.xlu1 %v6532_v1, %s8337_s5  ;;  %1432 = vrot.lane.b32.xlu0 %v6524_v0, %s8337_s5  ;;  %v764_v12 = vsel %vm763_vm0, %v760_v6, %v762_v9  ;;  %vm1781_vm0 = vcmask 64512  }
  0x32   : > { %v6582_v15 = vsel %vm765_vm1, %v766_v11, %v764_v12  ;;  %vm2382_vm1 = vcmp.lt.s32.totalorder %v6598_v29, 32 }
  0x33   : > { %v772_v16 = vrot.slane %v6582_v15, %v6579_v13  ;;  %v776_v17 = vrot.slane %v6582_v15, %v775_v14 }
  0x35   : > { %1540 = vrot.lane.b32.xlu1 %v6532_v1, %s8334_s1  ;;  %1538 = vrot.lane.b32.xlu0 %v6524_v0, %s8334_s1  ;;  %v780_v18 = vsel %vm8360_vm2, %v772_v16, 0.0  ;;  %v781_v19 = vsel %vm8360_vm2, %v776_v17, 0.0  ;;  %v1251_v17 = vpack.c.bf16 %v6532_v1, %v6532_v1  ;;  %vm2765_vm2 = vcmp.lt.s32.totalorder %v6598_v29, 126 }
  0x36   : > { %v782_v20 = vadd.f32 %v781_v19, %v780_v18 }
  0x39   : > { %1646 = vrot.lane.b32.xlu1 %v6532_v1, %s8330_s26  ;;  %1644 = vrot.lane.b32.xlu0 %v6524_v0, %s8330_s26  ;;  %v838_v1 = vld [vmem:[%s8381_s2] sm:$0xf]  ;;  %s747_s26 = scalar_lea.vmem %s8382_s22, %s8336_s28  ;;  %s8388_s28 = smov 1  }
  0x3a   : > { %s8389_s22 = smov 127  }
  0x3d   : > { %6315 = vperm.xlu1 %6313, %v6314_v27  }
  0x41   : > { %6320 = vperm.xlu1 %6313, %v6319_v28  }
  0x58   : > { %783 = vadd.xlane.f32.xlu0 %v782_v20 }
  0x8f   : > { %v933_v33 = vpop.permute.xlu1 %932  ;;  %v817_v34 = vpop.permute.xlu0 %816 }
  0x93   : > { %v935_v42 = vpop.permute.xlu1 %934  ;;  %v819_v43 = vpop.permute.xlu0 %818 }
  0x94   : > { %v938_v46 = vsel %vm936_vm3, %v935_v42, %v933_v33  ;;  %v824_v47 = vsel %vm822_vm4, %v819_v43, %v817_v34  ;;  %v823_v48 = vsel %vm822_vm4, %v817_v34, %v819_v43  ;;  %v937_v49 = vsel %vm936_vm3, %v933_v33, %v935_v42  ;;  %v5989_v33 = vld [vmem:[%s8381_s2 + $0x4] sm:$0xf] }
  0x95   : > { %v837_v50 = vmul.f32 %v6615_v36, %v823_v48  ;;  %v836_v52 = vmul.f32 %v6618_v37, %v824_v47  ;;  %v951_v53 = vmul.f32 %v6621_v38, %v937_v49  ;;  %v950_v54 = vmul.f32 %v6624_v39, %v938_v46 }
  0x96   : > { %v1259_v34 = vand.u32 %v1251_v17, %v6650_v55  ;;  %v6701_v43 = vrot.slane %v6007_v26, %v6601_v30  ;;  %v1250_v48 = vpack.c.bf16 %v6524_v0, %v6524_v0 }
  0x97   : > { %v1041_v56 = vpop.permute.xlu1 %1040  ;;  %v1039_v57 = vpop.permute.xlu0 %1038  ;;  %v840_v58 = vpack.c.bf16 %v837_v50, %v837_v50  ;;  %v839_v59 = vpack.c.bf16 %v836_v52, %v836_v52  ;;  %v955_v60 = vpack.c.bf16 %v951_v53, %v951_v53  ;;  %v954_v61 = vpack.c.bf16 %v950_v54, %v950_v54  ;;  %v6011_v53 = vld [vmem:[%s8380_s0 + $0x7] ss:$8 sm:$0x3] }
  0x98   : > { %v1043_v62 = vsel %vm1042_vm6, %v1039_v57, %v1041_v56  ;;  %v1044_v63 = vsel %vm1042_vm6, %v1041_v56, %v1039_v57  ;;  %v6720_v54 = vrot.slane %v6007_v26, %v6579_v13 }
  0x99   : > { %v1056_v6 = vmul.f32 %v6629_v44, %v1044_v63  ;;  %v1057_v7 = vmul.f32 %v6632_v45, %v1043_v62  ;;  %v887_v9 = vand.u32 %v6650_v55, %v840_v58  ;;  %v884_v11 = vand.u32 %v6650_v55, %v839_v59 }
  0x9a   : > { %v963_v12 = vand.u32 %v955_v60, %v6650_v55  ;;  %v960_v16 = vand.u32 %v954_v61, %v6650_v55  ;;  %v5993_v61 = vld [vmem:[%s8381_s2 + $0x8] sm:$0xf]  ;;  %v6732_v62 = vrot.slane %v6011_v53, %v6579_v13  ;;  %v1256_v63 = vand.u32 %v1250_v48, %v6650_v55  ;;  %v6004_v48 = vld [vmem:[%s8381_s2 + $0x14] sm:$0xf] }
  0x9b   : > { %v1060_v18 = vpack.c.bf16 %v1056_v6, %v1056_v6  ;;  %v1061_v19 = vpack.c.bf16 %v1057_v7, %v1057_v7  ;;  %v1147_v20 = vpop.permute.xlu1 %1146  ;;  %889 = vmatprep.subr.bf16.mxu0 %v887_v9  ;;  %v1145_v21 = vpop.permute.xlu0 %1144  ;;  %v6739_v9 = vrot.slane %v6011_v53, %v6601_v30 }
  0x9c   : > { %v1149_v23 = vsel %vm1148_vm7, %v1145_v21, %v1147_v20  ;;  %v1150_v24 = vsel %vm1148_vm7, %v1147_v20, %v1145_v21  ;;  %890 = vmatpush1.bf16.msra.mxu0 %v884_v11  ;;  %965 = vmatprep.subr.bf16.mxu1 %v963_v12  ;;  %v5997_v11 = vld [vmem:[%s8381_s2 + $0xc] sm:$0xf] }
  0x9d   : > { %v1066_v27 = vand.u32 %v1060_v18, %v6650_v55  ;;  %v1162_v28 = vmul.f32 %v6658_v3, %v1150_v24  ;;  %v1163_v31 = vmul.f32 %v6661_v4, %v1149_v23  ;;  %966 = vmatpush1.bf16.msra.mxu1 %v960_v16  ;;  %v1069_v32 = vand.u32 %v1061_v19, %v6650_v55  ;;  %v6015_v16 = vld [vmem:[%s8380_s0 + $0x10] ss:$8 sm:$0x3] }
  0x9f   : > { %v1166_v35 = vpack.c.bf16 %v1162_v28, %v1162_v28  ;;  %v1167_v40 = vpack.c.bf16 %v1163_v31, %v1163_v31  ;;  %v1329_v41 = vpop.permute.xlu1 %1328  ;;  %5987 = vmatmul.mubr.msk.bf16.vlgmr.msra.gmra.mrb[0].mxu0 %vm876_vm8, %v838_v1  ;;  %1071 = vmatprep.subr.bf16.mxu0 %v1069_v32  ;;  %v1327_v42 = vpop.permute.xlu0 %1326  ;;  %v6758_v1 = vrot.slane %v6015_v16, %v6601_v30 }
  0xa0   : > { %v1331_v46 = vsel %vm1330_vm9, %v1327_v42, %v1329_v41  ;;  %v1332_v47 = vsel %vm1330_vm9, %v1329_v41, %v1327_v42  ;;  %5990 = vmatmul.mubr.msk.bf16.vlgmr.msra.gmra.mrb[0].mxu1 %vm876_vm8, %v5989_v33  ;;  %1072 = vmatpush1.bf16.msra.mxu0 %v1066_v27  ;;  %v6762_v28 = vrot.slane %v6015_v16, %v6579_v13  ;;  %v6000_v41 = vld [vmem:[%s8381_s2 + $0x10] sm:$0xf] }
  0xa1   : > { %v1172_v49 = vand.u32 %v1166_v35, %v6650_v55  ;;  %v1344_v50 = vmul.f32 %v6675_v22, %v1331_v46  ;;  %v1345_v51 = vmul.f32 %v6686_v25, %v1332_v47  ;;  %v1175_v52 = vand.u32 %v1167_v40, %v6650_v55  ;;  %1103 = vmatprep.mubr.bf16.mxu0 %v6372_v2 }
  0xa2   : > { %1209 = vmatprep.mubr.bf16.mxu1 %v6372_v2  ;;  %1261 = vmatprep.subr.bf16.mxu0 %v1259_v34 }
  0xa3   : > { %v1348_v0 = vpack.c.bf16 %v1344_v50, %v1344_v50  ;;  %v1349_v56 = vpack.c.bf16 %v1345_v51, %v1345_v51  ;;  %v1435_v57 = vpop.permute.xlu1 %1434  ;;  %1177 = vmatprep.subr.bf16.mxu1 %v1175_v52  ;;  %v1433_v58 = vpop.permute.xlu0 %1432 }
  0xa4   : > { %v1437_v59 = vsel %vm1436_vm10, %v1433_v58, %v1435_v57  ;;  %v1438_v60 = vsel %vm1436_vm10, %v1435_v57, %v1433_v58  ;;  %1178 = vmatpush1.bf16.msra.mxu1 %v1172_v49  ;;  %v6016_v58 = vld [vmem:[%s8381_s2 + $0x20] sm:$0xf] }
  0xa5   : > { %v1354_v5 = vand.u32 %v1348_v0, %v6650_v55  ;;  %v1451_v6 = vmul.f32 %v6701_v43, %v1438_v60  ;;  %v1357_v7 = vand.u32 %v1349_v56, %v6650_v55  ;;  %v1450_v12 = vmul.f32 %v6720_v54, %v1437_v59  ;;  %v6008_v0 = vld [vmem:[%s8381_s2 + $0x18] sm:$0xf]  ;;  %v6012_v56 = vld [vmem:[%s8381_s2 + $0x1c] sm:$0xf]  ;;  %s8390_s2 = smov 113  }
  0xa7   : > { %v1455_v17 = vpack.c.bf16 %v1451_v6, %v1451_v6  ;;  %v1541_v18 = vpop.permute.xlu1 %1540  ;;  %5994 = vmatmul.mubr.msk.bf16.vlgmr.msra.gmra.mrb[4].mxu0 %vm876_vm8, %v5993_v61  ;;  %1359 = vmatprep.subr.bf16.mxu1 %v1357_v7  ;;  %v1539_v19 = vpop.permute.xlu0 %1538  ;;  %v1454_v27 = vpack.c.bf16 %v1450_v12, %v1450_v12  ;;  %v6380_v7 = vmov 1966171168  }
  0xa8   : > { %v1543_v20 = vsel %vm8363_vm11, %v1539_v19, %v1541_v18  ;;  %v1544_v21 = vsel %vm8363_vm11, %v1541_v18, %v1539_v19  ;;  %5998 = vmatmul.mubr.msk.bf16.vlgmr.msra.gmra.mrb[4].mxu1 %vm876_vm8, %v5997_v11  ;;  %1262 = vmatpush1.bf16.msra.mxu0 %v1256_v63  ;;  %v800_v11 = vunpack.c.l.s4 %v6380_v7  ;;  %v6381_v18 = vmov 0.0  }
  0xa9   : > { %v1556_v23 = vmul.f32 %v6732_v62, %v1543_v20  ;;  %v1557_v24 = vmul.f32 %v6739_v9, %v1544_v21  ;;  %1360 = vmatpush1.bf16.msra.mxu1 %v1354_v5  ;;  %v1463_v26 = vand.u32 %v1455_v17, %v6650_v55  ;;  %1293 = vmatprep.mubr.bf16.mxu0 %v6372_v2 }
  0xaa   : > { %1391 = vmatprep.mubr.bf16.mxu1 %v6372_v2  ;;  %v1460_v49 = vand.u32 %v1454_v27, %v6650_v55  ;;  %v801_v12 = vunpack.c.0.s8 %v800_v11 }
  0xab   : > { %v1560_v31 = vpack.c.bf16 %v1556_v23, %v1556_v23  ;;  %v1561_v32 = vpack.c.bf16 %v1557_v24, %v1557_v24  ;;  %v1647_v33 = vpop.permute.xlu1 %1646  ;;  %v1645_v34 = vpop.permute.xlu0 %1644  ;;  %1465 = vmatprep.subr.bf16.mxu0 %v1463_v26  ;;  %v1412_v24 = vunpack.c.h.bf16 %v6002_v8  ;;  %v6010_v26 = vld [vmem:[%s8379_s29 + $0x18] sm:$0xff]  }
  0xac   : > { %v1649_v35 = vsel %vm8362_vm12, %v1645_v34, %v1647_v33  ;;  %v1650_v40 = vsel %vm8362_vm12, %v1647_v33, %v1645_v34  ;;  %v804_v17 = vsub.s32 %v801_v12, %v6576_v10  ;;  %v6018_v34 = vld [vmem:[%s8379_s29 + $0x20] sm:$0xf]  ;;  %s8397_s29 = smov 30  }
  0xad   : > { %v1566_v42 = vand.u32 %v1560_v31, %v6650_v55  ;;  %v1663_v46 = vmul.f32 %v6758_v1, %v1650_v40  ;;  %v1569_v47 = vand.u32 %v1561_v32, %v6650_v55  ;;  %v1662_v50 = vmul.f32 %v6762_v28, %v1649_v35 }
  0xae   : > { %v1518_v31 = vunpack.c.l.bf16 %v6010_v26  ;;  %v1624_v32 = vunpack.c.h.bf16 %v6010_v26  ;;  %v1730_v35 = vunpack.c.l.bf16 %v6018_v34 }
  0xaf   : > { %v1667_v51 = vpack.c.bf16 %v1663_v46, %v1663_v46  ;;  %6001 = vmatmul.mubr.msk.bf16.vlgmr.msra.gmra.mrb[8].mxu0 %vm876_vm8, %v6000_v41  ;;  %1571 = vmatprep.subr.bf16.mxu1 %v1569_v47  ;;  %v1666_v53 = vpack.c.bf16 %v1662_v50, %v1662_v50 }
  0xb0   : > { %1466 = vmatpush1.bf16.msra.mxu0 %v1460_v49  ;;  %6005 = vmatmul.mubr.msk.bf16.vlgmr.msra.gmra.mrb[8].mxu1 %vm876_vm8, %v6004_v48  ;;  %v6329_v33 = vpack.i.bf16 %v1624_v32, %v1518_v31 }
  0xb1   : > { %1572 = vmatpush1.bf16.msra.mxu1 %v1566_v42  ;;  %v1675_v52 = vand.u32 %v1667_v51, %v6650_v55  ;;  %1497 = vmatprep.mubr.bf16.mxu0 %v6372_v2  ;;  %v1672_v57 = vand.u32 %v1666_v53, %v6650_v55 }
  0xb2   : > { %1603 = vmatprep.mubr.bf16.mxu1 %v6372_v2 }
  0xb3   : > { %1677 = vmatprep.subr.bf16.mxu0 %v1675_v52 }
  0xb7   : > { %6009 = vmatmul.mubr.msk.bf16.vlgmr.msra.gmra.mrb[12].mxu0 %vm876_vm8, %v6008_v0 }
  0xb8   : > { %1678 = vmatpush1.bf16.msra.mxu0 %v1672_v57  ;;  %6013 = vmatmul.mubr.msk.bf16.vlgmr.msra.gmra.mrb[12].mxu1 %vm876_vm8, %v6012_v56 }
  0xb9   : > { %1709 = vmatprep.mubr.bf16.mxu0 %v6372_v2  ;;  %1824 = vmatprep.mubr.bf16.mxu1 %v6372_v2 }
  0xbf   : > { %6017 = vmatmul.mubr.msk.bf16.vlgmr.msra.gmra.mrb[16].mxu0 %vm876_vm8, %v6016_v58  ;;  %vm2356_vm8 = vcmp.lt.s32.totalorder %v6598_v29, 34 }
  0xc0   : > { %1874 = vmatprep.mubr.bf16.mxu0 %v6372_v2 }
  0xe5   : > { %v784_v59 = vpop.xlane.xlu0 %783 }
  0xe6   : > { %v785_v55 = vrot.slane %v784_v59, 4 }
  0xe8   : > { %v786_v60 = vadd.f32 %v785_v55, %v784_v59 }
  0xea   : > { %v787_v61 = vrot.slane %v786_v60, 2 }
  0xec   : > { %v788_v63 = vadd.f32 %v787_v61, %v786_v60 }
  0xee   : > { %v789_v5 = vrot.slane %v788_v63, 1 }
  0xf0   : > { %v790_v6 = vadd.f32 %v789_v5, %v788_v63 }
  0xf2   : > { %6278 = vpush %v790_v6 }
 0x123   : > { %s6279_s7 = spop %6278 }
 0x124   : > { %s792_s1 = smul.f32 0.000390625, %s6279_s7  ;;  %s8383_s7 = smov 112  }
 0x126   : > { %v793_v16 = vstv %s792_s1  ;;  %s8384_s1 = smov 16  }
 0x127   : > { %vm794_vm13 = vcmp.lt.f32.partialorder %v6582_v15, %v793_v16 }
 0x128   : > { %v5986_v19 = vsel %vm794_vm13, 1.0, %v6381_v18  ;;  %vm2523_vm13 = vcmp.lt.s32.totalorder %v6598_v29, 30 }
 0x129   : > { %v797_v20 = vsub.f32 1.0, %v5986_v19 }
 0x12b   : > { %v805_v21 = vrot.slane %v797_v20, %v804_v17  ;;  %v6812_v23 = vrot.slane %v797_v20, %v6579_v13  ;;  %v6820_v15 = vrot.slane %v797_v20, %v775_v14  ;;  %v1306_v14 = vunpack.c.l.bf16 %v6002_v8 }
 0x12d   : > { %1220 = vrot.lane.b32.xlu0 %v6812_v23, %s8339_s24  ;;  %851 = vrot.lane.b32.xlu1 %v6812_v23, %s8341_s6  ;;  %811 = vst.msk [vmem:[%s747_s26] sm:$0x3] %vm809_vm14, %v805_v21  ;;  %s8386_s24 = sld [smem:[#allocation11_spill]]  ;;  %v6324_v27 = vpack.i.bf16 %v1412_v24, %v1306_v14  ;;  %v6316_v14 = vpop.permute.xlu1 %6315  ;;  %s8350_s26 = smov 2   ;;  %vm2611_vm14 = vcmp.lt.s32.totalorder %v6598_v29, 2 }
 0x131   : > { %1510 = vrot.lane.b32.xlu0 %v6820_v15, %s8337_s5  ;;  %853 = vrot.lane.b32.xlu1 %v6820_v15, %s8341_s6  ;;  %s8387_s6 = smov 15   ;;  %v6321_v31 = vpop.permute.xlu1 %6320  ;;  %s8346_s5 = smov 34  }
 0x133   : > { %v1748_v10 = vld [vmem:[%s8386_s24] sm:$0xff]  ;;  %s8348_s24 = smov 30  }
 0x135   : > { %1616 = vrot.lane.b32.xlu0 %v6820_v15, %s8383_s7  ;;  %1008 = vrot.lane.b32.xlu1 %v6812_v23, %s8384_s1 }
 0x139   : > { %1720 = vrot.lane.b32.xlu0 %v6812_v23, %s8385_s27  ;;  %1010 = vrot.lane.b32.xlu1 %v6820_v15, %s8384_s1 }
 0x13d   : > { %1114 = vrot.lane.b32.xlu1 %v6812_v23, %s8387_s6  ;;  %1751 = vperm.xlu0 %6334, %v1748_v10  }
 0x141   : > { %1116 = vrot.lane.b32.xlu1 %v6820_v15, %s8387_s6 }
 0x145   : > { %6325 = vperm.xlu1 %6313, %v6324_v27  }
 0x149   : > { %6330 = vperm.xlu1 %6313, %v6329_v33  }
 0x14d   : > { %1733 = vperm.xlu1 %6313, %v1730_v35  }
 0x151   : > { %1222 = vrot.lane.b32.xlu1 %v6820_v15, %s8388_s28 }
 0x155   : > { %1402 = vrot.lane.b32.xlu1 %v6812_v23, %s8389_s22 }
 0x159   : > { %1404 = vrot.lane.b32.xlu1 %v6820_v15, %s8389_s22 }
 0x15d   : > { %1508 = vrot.lane.b32.xlu1 %v6812_v23, %s8390_s2 }
 0x161   : > { %1614 = vrot.lane.b32.xlu1 %v6812_v23, %s8383_s7 }
 0x165   : > { %1722 = vrot.lane.b32.xlu1 %v6820_v15, %s8385_s27 }
 0x172   : > { %v923_v40 = vpop.f32.mrb[0].mxu0 }
 0x173   : > { %v925_v41 = vpop.f32.mrb[1].mxu0  ;;  %v999_v42 = vpop.f32.mrb[0].mxu1 }
 0x174   : > { %v1001_v46 = vpop.f32.mrb[1].mxu1  ;;  %v927_v47 = vpop.f32.mrb[2].mxu0 }
 0x175   : > { %v928_v48 = vpop.f32.mrb[3].mxu0  ;;  %v1003_v49 = vpop.f32.mrb[2].mxu1 }
 0x176   : > { %v1004_v50 = vpop.f32.mrb[3].mxu1  ;;  %v6317_v49 = vunpack.i.l.bf16 %v6316_v14 }
 0x17a   : > { %v6862_v51 = vpop.f32.mrb[4].mxu0 }
 0x17b   : > { %v6864_v52 = vpop.f32.mrb[5].mxu0  ;;  %v6866_v53 = vpop.f32.mrb[4].mxu1 }
 0x17c   : > { %v6868_v0 = vpop.f32.mrb[5].mxu1  ;;  %v1109_v56 = vpop.f32.mrb[6].mxu0 }
 0x17d   : > { %v1110_v57 = vpop.f32.mrb[7].mxu0  ;;  %v1215_v58 = vpop.f32.mrb[6].mxu1 }
 0x17e   : > { %v1216_v59 = vpop.f32.mrb[7].mxu1 }
 0x182   : > { %v6870_v55 = vpop.f32.mrb[8].mxu0 }
 0x183   : > { %v6872_v60 = vpop.f32.mrb[9].mxu0  ;;  %v6874_v61 = vpop.f32.mrb[8].mxu1 }
 0x184   : > { %v1299_v63 = vpop.f32.mrb[10].mxu0  ;;  %v6876_v5 = vpop.f32.mrb[9].mxu1 }
 0x185   : > { %v1300_v6 = vpop.f32.mrb[11].mxu0  ;;  %v1397_v7 = vpop.f32.mrb[10].mxu1 }
 0x186   : > { %v1398_v11 = vpop.f32.mrb[11].mxu1 }
 0x18a   : > { %v6878_v12 = vpop.f32.mrb[12].mxu0 }
 0x18b   : > { %v6880_v16 = vpop.f32.mrb[13].mxu0  ;;  %v6882_v17 = vpop.f32.mrb[12].mxu1 }
 0x18c   : > { %v1503_v18 = vpop.f32.mrb[14].mxu0  ;;  %v6884_v19 = vpop.f32.mrb[13].mxu1 }
 0x18d   : > { %v1504_v20 = vpop.f32.mrb[15].mxu0  ;;  %v1609_v21 = vpop.f32.mrb[14].mxu1 }
 0x18e   : > { %v1610_v8 = vpop.f32.mrb[15].mxu1 }
 0x192   : > { %v6886_v10 = vpop.f32.mrb[16].mxu0 }
 0x193   : > { %v6888_v24 = vpop.f32.mrb[17].mxu0 }
 0x194   : > { %v1715_v26 = vpop.f32.mrb[18].mxu0 }
 0x195   : > { %v1716_v27 = vpop.f32.mrb[19].mxu0 }
 0x196   : > { %v6318_v27 = vunpack.i.h.bf16 %v6316_v14 }
 0x19f   : > { %v852_v32 = vpop.permute.xlu1 %851 }
 0x1a3   : > { %v854_v33 = vpop.permute.xlu1 %853 }
 0x1a4   : > { %v855_v34 = vsel %vm822_vm4, %v852_v32, %v854_v33  ;;  %v856_v35 = vsel %vm822_vm4, %v854_v33, %v852_v32 }
 0x1a5   : > { %v857_v47 = vmul.f32 %v856_v35, %v6618_v37  ;;  %v858_v48 = vmul.f32 %v855_v34, %v6615_v36 }
 0x1a7   : > { %v1009_v50 = vpop.permute.xlu1 %1008  ;;  %v869_v56 = vrot.slane %v857_v47, %v6579_v13  ;;  %v873_v57 = vrot.slane %v858_v48, %v6579_v13 }
 0x1a9   : > { %v874_v58 = vmul.f32 %v6317_v49, %v869_v56  ;;  %v875_v59 = vmul.f32 %v6317_v49, %v873_v57  ;;  %v6322_v57 = vunpack.i.l.bf16 %v6321_v31 }
 0x1ab   : > { %v924_v63 = vadd.f32 %v923_v40, %v874_v58  ;;  %v926_v6 = vadd.f32 %v925_v41, %v875_v59  ;;  %v1011_v7 = vpop.permute.xlu1 %1010 }
 0x1ac   : > { %v1012_v11 = vsel %vm936_vm3, %v1009_v50, %v1011_v7  ;;  %v1013_v18 = vsel %vm936_vm3, %v1011_v7, %v1009_v50 }
 0x1ad   : > { %v1006_v20 = vadd.f32 %v999_v42, %v924_v63  ;;  %v1014_v21 = vmul.f32 %v1013_v18, %v6624_v39  ;;  %v1015_v8 = vmul.f32 %v1012_v11, %v6621_v38  ;;  %v1007_v26 = vadd.f32 %v1001_v46, %v926_v6 }
 0x1af   : > { %v1115_v32 = vpop.permute.xlu1 %1114  ;;  %v1027_v33 = vrot.slane %v1014_v21, %v6579_v13  ;;  %v1031_v40 = vrot.slane %v1015_v8, %v6579_v13 }
 0x1b1   : > { %v1032_v41 = vmul.f32 %v6318_v27, %v1027_v33  ;;  %v1033_v34 = vmul.f32 %v6318_v27, %v1031_v40 }
 0x1b3   : > { %v1034_v35 = vadd.f32 %v1032_v41, %v1006_v20  ;;  %v1117_v47 = vpop.permute.xlu1 %1116  ;;  %v1035_v48 = vadd.f32 %v1033_v34, %v1007_v26  ;;  %v1221_v26 = vpop.permute.xlu0 %1220 }
 0x1b4   : > { %v1118_v49 = vsel %vm1042_vm6, %v1115_v32, %v1117_v47  ;;  %v1119_v42 = vsel %vm1042_vm6, %v1117_v47, %v1115_v32 }
 0x1b5   : > { %v1112_v50 = vadd.f32 %v6862_v51, %v1034_v35  ;;  %v1120_v46 = vmul.f32 %v1119_v42, %v6629_v44  ;;  %v1121_v14 = vmul.f32 %v1118_v49, %v6632_v45  ;;  %v1113_v56 = vadd.f32 %v6864_v52, %v1035_v48 }
 0x1b6   : > { %v1315_v49 = vrot.slane %v6812_v23, %v6579_v13  ;;  %v1319_v42 = vrot.slane %v6820_v15, %v6579_v13 }
 0x1b7   : > { %v1133_v58 = vrot.slane %v1120_v46, %v6579_v13  ;;  %v1137_v59 = vrot.slane %v1121_v14, %v6579_v13 }
 0x1b9   : > { %v1138_v63 = vmul.f32 %v6322_v57, %v1133_v58  ;;  %v1139_v6 = vmul.f32 %v6322_v57, %v1137_v59 }
 0x1bb   : > { %v1140_v7 = vadd.f32 %v1138_v63, %v1112_v50  ;;  %v1141_v11 = vadd.f32 %v1139_v6, %v1113_v56  ;;  %v1511_v50 = vpop.permute.xlu0 %1510 }
 0x1bd   : > { %v1218_v18 = vadd.f32 %v6866_v53, %v1140_v7  ;;  %v1219_v20 = vadd.f32 %v6868_v0, %v1141_v11  ;;  %v6323_v53 = vunpack.i.h.bf16 %v6321_v31 }
 0x1c4   : > { %v6326_v51 = vpop.permute.xlu1 %6325 }
 0x1c5   : > { %v6327_v35 = vunpack.i.l.bf16 %v6326_v51 }
 0x1c7   : > { %v1320_v58 = vmul.f32 %v6327_v35, %v1315_v49  ;;  %v1321_v59 = vmul.f32 %v6327_v35, %v1319_v42 }
 0x1c8   : > { %v6918_v21 = vpop.permute.xlu1 %6330 }
 0x1cc   : > { %v6920_v8 = vpop.permute.xlu1 %1733 }
 0x1d0   : > { %v1223_v52 = vpop.permute.xlu1 %1222 }
 0x1d1   : > { %v1224_v27 = vsel %vm1148_vm7, %v1221_v26, %v1223_v52  ;;  %v1225_v32 = vsel %vm1148_vm7, %v1223_v52, %v1221_v26  ;;  %v6328_v52 = vunpack.i.h.bf16 %v6326_v51 }
 0x1d2   : > { %v1226_v33 = vmul.f32 %v1225_v32, %v6658_v3  ;;  %v1227_v40 = vmul.f32 %v1224_v27, %v6661_v4  ;;  %v1617_v32 = vpop.permute.xlu0 %1616 }
 0x1d4   : > { %v1403_v41 = vpop.permute.xlu1 %1402  ;;  %v1239_v0 = vrot.slane %v1226_v33, %v6579_v13  ;;  %v1243_v34 = vrot.slane %v1227_v40, %v6579_v13 }
 0x1d6   : > { %v1244_v47 = vmul.f32 %v6323_v53, %v1239_v0  ;;  %v1245_v48 = vmul.f32 %v6323_v53, %v1243_v34  ;;  %v6332_v34 = vunpack.i.l.bf16 %v6918_v21 }
 0x1d8   : > { %v1246_v46 = vadd.f32 %v1244_v47, %v1218_v18  ;;  %v1247_v14 = vadd.f32 %v1245_v48, %v1219_v20  ;;  %v1405_v56 = vpop.permute.xlu1 %1404 }
 0x1d9   : > { %v1406_v31 = vsel %vm1330_vm9, %v1403_v41, %v1405_v56  ;;  %v1407_v57 = vsel %vm1330_vm9, %v1405_v56, %v1403_v41 }
 0x1da   : > { %v1302_v63 = vadd.f32 %v6870_v55, %v1246_v46  ;;  %v1303_v6 = vadd.f32 %v6872_v60, %v1247_v14  ;;  %v1408_v23 = vmul.f32 %v1406_v31, %v6675_v22  ;;  %v1409_v15 = vmul.f32 %v1407_v57, %v6686_v25  ;;  %v1721_v57 = vpop.permute.xlu0 %1720 }
 0x1dc   : > { %v1322_v7 = vadd.f32 %v1320_v58, %v1302_v63  ;;  %v1323_v11 = vadd.f32 %v1321_v59, %v1303_v6  ;;  %v1509_v18 = vpop.permute.xlu1 %1508  ;;  %v1421_v20 = vrot.slane %v1408_v23, %v6579_v13  ;;  %v1425_v26 = vrot.slane %v1409_v15, %v6579_v13 }
 0x1dd   : > { %v1512_v27 = vsel %vm1436_vm10, %v1509_v18, %v1511_v50  ;;  %v1513_v55 = vsel %vm1436_vm10, %v1511_v50, %v1509_v18  ;;  %v6333_v58 = vunpack.i.h.bf16 %v6918_v21 }
 0x1de   : > { %v1400_v60 = vadd.f32 %v6874_v61, %v1322_v7  ;;  %v1401_v33 = vadd.f32 %v6876_v5, %v1323_v11  ;;  %v1514_v40 = vmul.f32 %v1512_v27, %v6720_v54  ;;  %v1515_v53 = vmul.f32 %v1513_v55, %v6701_v43 }
 0x1df   : > { %v1426_v41 = vmul.f32 %v6328_v52, %v1421_v20  ;;  %v1427_v0 = vmul.f32 %v6328_v52, %v1425_v26 }
 0x1e0   : > { %v1615_v51 = vpop.permute.xlu1 %1614  ;;  %v1527_v35 = vrot.slane %v1514_v40, %v6579_v13  ;;  %v1531_v47 = vrot.slane %v1515_v53, %v6579_v13 }
 0x1e1   : > { %v1428_v48 = vadd.f32 %v1426_v41, %v1400_v60  ;;  %v1429_v49 = vadd.f32 %v1427_v0, %v1401_v33  ;;  %v1618_v61 = vsel %vm8363_vm11, %v1615_v51, %v1617_v32  ;;  %v1619_v5 = vsel %vm8363_vm11, %v1617_v32, %v1615_v51  ;;  %v1752_v41 = vpop.permute.xlu0 %1751 }
 0x1e2   : > { %v1620_v42 = vmul.f32 %v1618_v61, %v6732_v62  ;;  %v1621_v50 = vmul.f32 %v1619_v5, %v6739_v9  ;;  %v1532_v46 = vmul.f32 %v6332_v34, %v1527_v35  ;;  %v1533_v14 = vmul.f32 %v6332_v34, %v1531_v47 }
 0x1e3   : > { %v1506_v56 = vadd.f32 %v6878_v12, %v1428_v48  ;;  %v1507_v31 = vadd.f32 %v6880_v16, %v1429_v49 }
 0x1e4   : > { %v1723_v59 = vpop.permute.xlu1 %1722  ;;  %v1633_v63 = vrot.slane %v1620_v42, %v6579_v13  ;;  %v1637_v6 = vrot.slane %v1621_v50, %v6579_v13 }
 0x1e5   : > { %v1534_v23 = vadd.f32 %v1532_v46, %v1506_v56  ;;  %v1535_v15 = vadd.f32 %v1533_v14, %v1507_v31  ;;  %v1724_v7 = vsel %vm8362_vm12, %v1721_v57, %v1723_v59  ;;  %v1725_v11 = vsel %vm8362_vm12, %v1723_v59, %v1721_v57 }
 0x1e6   : > { %v1726_v12 = vmul.f32 %v1724_v7, %v6762_v28  ;;  %v1727_v16 = vmul.f32 %v1725_v11, %v6758_v1  ;;  %v1638_v18 = vmul.f32 %v6333_v58, %v1633_v63  ;;  %v1639_v20 = vmul.f32 %v6333_v58, %v1637_v6 }
 0x1e7   : > { %v1612_v21 = vadd.f32 %v6882_v17, %v1534_v23  ;;  %v1613_v26 = vadd.f32 %v6884_v19, %v1535_v15 }
 0x1e8   : > { %v1739_v52 = vrot.slane %v1726_v12, %v6579_v13  ;;  %v1743_v27 = vrot.slane %v1727_v16, %v6579_v13  ;;  %v1766_v16 = vld [vmem:[%s8393_s8] sm:$0xf] }
 0x1e9   : > { %v1640_v55 = vadd.f32 %v1638_v18, %v1612_v21  ;;  %v1641_v32 = vadd.f32 %v1639_v20, %v1613_v26 }
 0x1ea   : > { %v1744_v60 = vmul.f32 %v1739_v52, %v6920_v8  ;;  %v1745_v33 = vmul.f32 %v1743_v27, %v6920_v8 }
 0x1eb   : > { %v1718_v40 = vadd.f32 %v6886_v10, %v1640_v55  ;;  %v1719_v53 = vadd.f32 %v6888_v24, %v1641_v32  ;;  %v2323_v10 = vld [vmem:[%s8392_s9] sm:$0xff]  ;;  %s8344_s9 = smov 32  }
 0x1ed   : > { %v1746_v0 = vadd.f32 %v1744_v60, %v1718_v40  ;;  %v1747_v34 = vadd.f32 %v1745_v33, %v1719_v53  ;;  %v6024_v60 = vld [vmem:[%s8393_s8 + $0x8] sm:$0xf] }
 0x1ef   : > { %v1754_v17 = vadd.f32 %v1752_v41, %v1746_v0  ;;  %v1755_v51 = vadd.f32 %v1752_v41, %v1747_v34 }
 0x1f1   : > { %v6980_v19 = vmax.f32 %v1754_v17, 0.0  ;;  %v6986_v35 = vmax.f32 %v1755_v51, 0.0 }
 0x1f3   : > { %1758 = vrot.lane.b32.xlu0 %v6980_v19, %s8391_s25  ;;  %1769 = vrot.lane.b32.xlu1 %v6980_v19, %s8384_s1  ;;  %v2014_v26 = vpack.c.bf16 %v6986_v35, %v6986_v35  ;;  %v2013_v32 = vpack.c.bf16 %v6980_v19, %v6980_v19 }
 0x1f5   : > { %v2019_v51 = vsel %vm1785_vm15, %v2013_v32, 0 }
 0x1f7   : > { %1883 = vrot.lane.b32.xlu0 %v6980_v19, %s8387_s6  ;;  %1771 = vrot.lane.b32.xlu1 %v6986_v35, %s8384_s1 }
 0x1fb   : > { %1947 = vrot.lane.b32.xlu0 %v6980_v19, %s8388_s28  ;;  %1760 = vrot.lane.b32.xlu1 %v6986_v35, %s8391_s25 }
 0x1ff   : > { %2067 = vrot.lane.b32.xlu0 %v6980_v19, %s8389_s22  ;;  %1885 = vrot.lane.b32.xlu1 %v6986_v35, %s8387_s6 }
 0x203   : > { %2131 = vrot.lane.b32.xlu0 %v6980_v19, %s8390_s2  ;;  %1949 = vrot.lane.b32.xlu1 %v6986_v35, %s8388_s28 }
 0x207   : > { %2195 = vrot.lane.b32.xlu0 %v6980_v19, %s8383_s7  ;;  %2069 = vrot.lane.b32.xlu1 %v6986_v35, %s8389_s22 }
 0x20b   : > { %2259 = vrot.lane.b32.xlu0 %v6980_v19, %s8385_s27  ;;  %2133 = vrot.lane.b32.xlu1 %v6986_v35, %s8390_s2  ;;  %v6027_v19 = vld [vmem:[%s8393_s8 + $0xc] sm:$0xf] }
 0x20f   : > { %2326 = vperm.xlu0 %6334, %v2323_v10   ;;  %2197 = vrot.lane.b32.xlu1 %v6986_v35, %s8383_s7 }
 0x213   : > { %2261 = vrot.lane.b32.xlu1 %v6986_v35, %s8385_s27 }
 0x265   : > { %v1759_v24 = vpop.permute.xlu0 %1758  ;;  %v1770_v8 = vpop.permute.xlu1 %1769 }
 0x269   : > { %v1884_v47 = vpop.permute.xlu0 %1883  ;;  %v1772_v48 = vpop.permute.xlu1 %1771 }
 0x26a   : > { %v1773_v49 = vsel %vm936_vm3, %v1770_v8, %v1772_v48  ;;  %v1774_v61 = vsel %vm936_vm3, %v1772_v48, %v1770_v8 }
 0x26b   : > { %v1775_v5 = vmul.f32 %v1774_v61, %v6624_v39  ;;  %v1776_v42 = vmul.f32 %v1773_v49, %v6621_v38  ;;  %v6019_v38 = vld [vmem:[%s8393_s8 + $0x4] sm:$0xf]  ;;  %v6030_v61 = vld [vmem:[%s8393_s8 + $0x10] sm:$0xf] }
 0x26d   : > { %v1779_v50 = vpack.c.bf16 %v1775_v5, %v1775_v5  ;;  %v1780_v46 = vpack.c.bf16 %v1776_v42, %v1776_v42  ;;  %v1948_v14 = vpop.permute.xlu0 %1947  ;;  %v1761_v56 = vpop.permute.xlu1 %1760 }
 0x26e   : > { %v1762_v31 = vsel %vm822_vm4, %v1759_v24, %v1761_v56  ;;  %v1763_v57 = vsel %vm822_vm4, %v1761_v56, %v1759_v24 }
 0x26f   : > { %v1764_v58 = vmul.f32 %v1763_v57, %v6618_v37  ;;  %v1765_v59 = vmul.f32 %v1762_v31, %v6615_v36  ;;  %6020 = vmatprep.subr.msk.bf16.mxu1 %vm1785_vm15, %v1780_v46  ;;  %v1787_v39 = vsel %vm1785_vm15, %v1779_v50, 0  ;;  %v6033_v31 = vld [vmem:[%s8393_s8 + $0x14] sm:$0xf] }
 0x270   : > { %1793 = vmatpush1.bf16.msra.mxu1 %v1787_v39 }
 0x271   : > { %v1767_v63 = vpack.c.bf16 %v1764_v58, %v1764_v58  ;;  %v1768_v6 = vpack.c.bf16 %v1765_v59, %v1765_v59  ;;  %v1886_v23 = vpop.permute.xlu1 %1885  ;;  %v2068_v36 = vpop.permute.xlu0 %2067 }
 0x272   : > { %v1887_v15 = vsel %vm1042_vm6, %v1884_v47, %v1886_v23  ;;  %v1888_v37 = vsel %vm1042_vm6, %v1886_v23, %v1884_v47  ;;  %v6036_v23 = vld [vmem:[%s8393_s8 + $0x18] sm:$0xf] }
 0x273   : > { %v1889_v7 = vmul.f32 %v1888_v37, %v6629_v44  ;;  %v1890_v11 = vmul.f32 %v1887_v15, %v6632_v45  ;;  %6021 = vmatmul.mubr.msk.bf16.vlgmr.msra.gmra.mrb[16].mxu1 %vm1781_vm0, %v6019_v38  ;;  %6022 = vmatprep.subr.msk.bf16.mxu0 %vm1785_vm15, %v1768_v6  ;;  %v1837_v12 = vsel %vm1785_vm15, %v1767_v63, 0 }
 0x274   : > { %1843 = vmatpush1.bf16.msra.mxu0 %v1837_v12  ;;  %1936 = vmatprep.mubr.bf16.mxu1 %v6372_v2 }
 0x275   : > { %v1893_v18 = vpack.c.bf16 %v1889_v7, %v1889_v7  ;;  %v1894_v20 = vpack.c.bf16 %v1890_v11, %v1890_v11  ;;  %v1950_v21 = vpop.permute.xlu1 %1949  ;;  %v2132_v33 = vpop.permute.xlu0 %2131 }
 0x276   : > { %v1951_v44 = vsel %vm1148_vm7, %v1948_v14, %v1950_v21  ;;  %v1952_v45 = vsel %vm1148_vm7, %v1950_v21, %v1948_v14 }
 0x277   : > { %v1953_v52 = vmul.f32 %v1952_v45, %v6658_v3  ;;  %v1954_v27 = vmul.f32 %v1951_v44, %v6661_v4  ;;  %6023 = vmatmul.mubr.msk.bf16.vlgmr.msra.gmra.mrb[20].mxu0 %vm1781_vm0, %v1766_v16  ;;  %6025 = vmatprep.subr.msk.bf16.mxu1 %vm1785_vm15, %v1894_v20  ;;  %v1899_v55 = vsel %vm1785_vm15, %v1893_v18, 0 }
 0x278   : > { %1905 = vmatpush1.bf16.msra.mxu1 %v1899_v55  ;;  %2000 = vmatprep.mubr.bf16.mxu0 %v6372_v2 }
 0x279   : > { %v1957_v3 = vpack.c.bf16 %v1953_v52, %v1953_v52  ;;  %v1958_v40 = vpack.c.bf16 %v1954_v27, %v1954_v27  ;;  %v2070_v4 = vpop.permute.xlu1 %2069  ;;  %6031 = vmatprep.subr.msk.bf16.mxu1 %vm1785_vm15, %v2014_v26  ;;  %v2196_v8 = vpop.permute.xlu0 %2195 }
 0x27a   : > { %v2071_v53 = vsel %vm1330_vm9, %v2068_v36, %v2070_v4  ;;  %v2072_v41 = vsel %vm1330_vm9, %v2070_v4, %v2068_v36  ;;  %v6042_v36 = vld [vmem:[%s8393_s8 + $0x20] sm:$0xf] }
 0x27b   : > { %v2073_v0 = vmul.f32 %v2071_v53, %v6675_v22  ;;  %v2074_v34 = vmul.f32 %v2072_v41, %v6686_v25  ;;  %6026 = vmatmul.mubr.msk.bf16.vlgmr.msra.gmra.mrb[20].mxu1 %vm1781_vm0, %v6024_v60  ;;  %6028 = vmatprep.subr.msk.bf16.mxu0 %vm1785_vm15, %v1958_v40  ;;  %v1963_v17 = vsel %vm1785_vm15, %v1957_v3, 0 }
 0x27c   : > { %1969 = vmatpush1.bf16.msra.mxu0 %v1963_v17  ;;  %2025 = vmatpush1.bf16.msra.mxu1 %v2019_v51 }
 0x27d   : > { %v2077_v35 = vpack.c.bf16 %v2073_v0, %v2073_v0  ;;  %v2078_v10 = vpack.c.bf16 %v2074_v34, %v2074_v34  ;;  %v2134_v24 = vpop.permute.xlu1 %2133  ;;  %2056 = vmatprep.mubr.bf16.mxu1 %v6372_v2  ;;  %v2260_v57 = vpop.permute.xlu0 %2259 }
 0x27e   : > { %v2135_v22 = vsel %vm1436_vm10, %v2132_v33, %v2134_v24  ;;  %v2136_v25 = vsel %vm1436_vm10, %v2134_v24, %v2132_v33 }
 0x27f   : > { %v2137_v47 = vmul.f32 %v2135_v22, %v6720_v54  ;;  %v2138_v48 = vmul.f32 %v2136_v25, %v6701_v43  ;;  %6029 = vmatmul.mubr.msk.bf16.vlgmr.msra.gmra.mrb[24].mxu0 %vm1781_vm0, %v6027_v19  ;;  %6034 = vmatprep.subr.msk.bf16.mxu0 %vm1785_vm15, %v2078_v10  ;;  %v2083_v49 = vsel %vm1785_vm15, %v2077_v35, 0 }
 0x280   : > { %2089 = vmatpush1.bf16.msra.mxu0 %v2083_v49  ;;  %2120 = vmatprep.mubr.bf16.mxu0 %v6372_v2 }
 0x281   : > { %v2141_v5 = vpack.c.bf16 %v2137_v47, %v2137_v47  ;;  %v2142_v42 = vpack.c.bf16 %v2138_v48, %v2138_v48  ;;  %v2198_v50 = vpop.permute.xlu1 %2197 }
 0x282   : > { %v2199_v54 = vsel %vm8363_vm11, %v2196_v8, %v2198_v50  ;;  %v2200_v43 = vsel %vm8363_vm11, %v2198_v50, %v2196_v8 }
 0x283   : > { %v2201_v46 = vmul.f32 %v2199_v54, %v6732_v62  ;;  %v2202_v14 = vmul.f32 %v2200_v43, %v6739_v9  ;;  %6032 = vmatmul.mubr.msk.bf16.vlgmr.msra.gmra.mrb[24].mxu1 %vm1781_vm0, %v6030_v61  ;;  %6037 = vmatprep.subr.msk.bf16.mxu1 %vm1785_vm15, %v2142_v42  ;;  %v2147_v56 = vsel %vm1785_vm15, %v2141_v5, 0 }
 0x284   : > { %2153 = vmatpush1.bf16.msra.mxu1 %v2147_v56  ;;  %2184 = vmatprep.mubr.bf16.mxu1 %v6372_v2 }
 0x285   : > { %v2205_v58 = vpack.c.bf16 %v2201_v46, %v2201_v46  ;;  %v2206_v59 = vpack.c.bf16 %v2202_v14, %v2202_v14  ;;  %v2262_v39 = vpop.permute.xlu1 %2261 }
 0x286   : > { %v2263_v62 = vsel %vm8362_vm12, %v2260_v57, %v2262_v39  ;;  %v2264_v9 = vsel %vm8362_vm12, %v2262_v39, %v2260_v57  ;;  %vm2941_vm12 = vcmp.lt.s32.totalorder %v6598_v29, 96 }
 0x287   : > { %v2265_v38 = vmul.f32 %v2263_v62, %v6762_v28  ;;  %v2266_v63 = vmul.f32 %v2264_v9, %v6758_v1  ;;  %6035 = vmatmul.mubr.msk.bf16.vlgmr.msra.gmra.mrb[28].mxu0 %vm1781_vm0, %v6033_v31  ;;  %6040 = vmatprep.subr.msk.bf16.mxu0 %vm1785_vm15, %v2206_v59  ;;  %v2211_v6 = vsel %vm1785_vm15, %v2205_v58, 0  ;;  %v6039_v28 = vld [vmem:[%s8393_s8 + $0x1c] sm:$0xf]  ;;  %s8399_s8 = smov 126  }
 0x288   : > { %2217 = vmatpush1.bf16.msra.mxu0 %v2211_v6  ;;  %2248 = vmatprep.mubr.bf16.mxu0 %v6372_v2 }
 0x289   : > { %v2269_v15 = vpack.c.bf16 %v2265_v38, %v2265_v38  ;;  %v2270_v37 = vpack.c.bf16 %v2266_v63, %v2266_v63 }
 0x28b   : > { %6038 = vmatmul.mubr.msk.bf16.vlgmr.msra.gmra.mrb[28].mxu1 %vm1781_vm0, %v6036_v23  ;;  %6043 = vmatprep.subr.msk.bf16.mxu1 %vm1785_vm15, %v2270_v37  ;;  %v2275_v1 = vsel %vm1785_vm15, %v2269_v15, 0 }
 0x28c   : > { %2281 = vmatpush1.bf16.msra.mxu1 %v2275_v1  ;;  %2312 = vmatprep.mubr.bf16.mxu1 %v6372_v2 }
 0x28e   : > { %v2327_v62 = vpop.permute.xlu0 %2326 }
 0x28f   : > { %6041 = vmatmul.mubr.msk.bf16.vlgmr.msra.gmra.mrb[32].mxu0 %vm1781_vm0, %v6039_v28 }
 0x290   : > { %2449 = vmatprep.mubr.bf16.mxu0 %v6372_v2 }
 0x293   : > { %6044 = vmatmul.mubr.msk.bf16.vlgmr.msra.gmra.mrb[32].mxu1 %vm1781_vm0, %v6042_v36 }
 0x294   : > { %3213 = vmatprep.mubr.bf16.mxu1 %v6372_v2 }
 0x346   : > { %v1826_v7 = vpop.f32.mrb[16].mxu1 }
 0x347   : > { %v1828_v11 = vpop.f32.mrb[17].mxu1 }
 0x348   : > { %v1830_v12 = vpop.f32.mrb[18].mxu1 }
 0x349   : > { %v1831_v16 = vpop.f32.mrb[19].mxu1 }
 0x34a   : > { %v1876_v18 = vpop.f32.mrb[20].mxu0 }
 0x34b   : > { %v1877_v20 = vadd.f32 %v1876_v18, %v1826_v7  ;;  %v1878_v21 = vpop.f32.mrb[21].mxu0 }
 0x34c   : > { %v1879_v44 = vadd.f32 %v1878_v21, %v1828_v11  ;;  %v1880_v45 = vpop.f32.mrb[22].mxu0 }
 0x34d   : > { %v1881_v26 = vpop.f32.mrb[23].mxu0 }
 0x34e   : > { %v1938_v52 = vpop.f32.mrb[20].mxu1  ;;  %v3112_v26 = vld [vmem:[%s8307_s11 + $0x8] sm:$0xff] }
 0x34f   : > { %v1945_v27 = vadd.f32 %v1938_v52, %v1877_v20  ;;  %v1940_v55 = vpop.f32.mrb[21].mxu1  ;;  %v3111_v52 = vld [vmem:[%s8307_s11] sm:$0xff] }
 0x350   : > { %v1946_v32 = vadd.f32 %v1940_v55, %v1879_v44  ;;  %v1942_v60 = vpop.f32.mrb[22].mxu1 }
 0x351   : > { %v1943_v33 = vpop.f32.mrb[23].mxu1 }
 0x352   : > { %v2002_v3 = vpop.f32.mrb[24].mxu0 }
 0x353   : > { %v2009_v40 = vadd.f32 %v2002_v3, %v1945_v27  ;;  %v2004_v4 = vpop.f32.mrb[25].mxu0 }
 0x354   : > { %v2010_v53 = vadd.f32 %v2004_v4, %v1946_v32  ;;  %v2006_v41 = vpop.f32.mrb[26].mxu0 }
 0x355   : > { %v2007_v0 = vpop.f32.mrb[27].mxu0 }
 0x356   : > { %v2058_v34 = vpop.f32.mrb[24].mxu1 }
 0x357   : > { %v2065_v17 = vadd.f32 %v2058_v34, %v2009_v40  ;;  %v2060_v51 = vpop.f32.mrb[25].mxu1 }
 0x358   : > { %v2066_v19 = vadd.f32 %v2060_v51, %v2010_v53  ;;  %v2062_v35 = vpop.f32.mrb[26].mxu1 }
 0x359   : > { %v2063_v10 = vpop.f32.mrb[27].mxu1 }
 0x35a   : > { %v2122_v24 = vpop.f32.mrb[28].mxu0 }
 0x35b   : > { %v2129_v22 = vadd.f32 %v2122_v24, %v2065_v17  ;;  %v2124_v25 = vpop.f32.mrb[29].mxu0 }
 0x35c   : > { %v2130_v8 = vadd.f32 %v2124_v25, %v2066_v19  ;;  %v2126_v47 = vpop.f32.mrb[30].mxu0 }
 0x35d   : > { %v2127_v48 = vpop.f32.mrb[31].mxu0 }
 0x35e   : > { %v2186_v49 = vpop.f32.mrb[28].mxu1 }
 0x35f   : > { %v2193_v61 = vadd.f32 %v2186_v49, %v2129_v22  ;;  %v2188_v5 = vpop.f32.mrb[29].mxu1  ;;  %v6336_v49 = vld [vmem:[%s8306_s10 + $0x8] sm:$0xff]  }
 0x360   : > { %v2194_v42 = vadd.f32 %v2188_v5, %v2130_v8  ;;  %v2190_v50 = vpop.f32.mrb[30].mxu1 }
 0x361   : > { %v2191_v54 = vpop.f32.mrb[31].mxu1 }
 0x362   : > { %v2250_v43 = vpop.f32.mrb[32].mxu0 }
 0x363   : > { %v2257_v46 = vadd.f32 %v2250_v43, %v2193_v61  ;;  %v2252_v14 = vpop.f32.mrb[33].mxu0 }
 0x364   : > { %v2258_v56 = vadd.f32 %v2252_v14, %v2194_v42  ;;  %v2254_v31 = vpop.f32.mrb[34].mxu0 }
 0x365   : > { %v2255_v57 = vpop.f32.mrb[35].mxu0 }
 0x366   : > { %v2314_v58 = vpop.f32.mrb[32].mxu1 }
 0x367   : > { %v2321_v59 = vadd.f32 %v2314_v58, %v2257_v46  ;;  %v2316_v39 = vpop.f32.mrb[33].mxu1 }
 0x368   : > { %v2322_v9 = vadd.f32 %v2316_v39, %v2258_v56  ;;  %v2318_v38 = vpop.f32.mrb[34].mxu1 }
 0x369   : > { %v2329_v63 = vadd.f32 %v2327_v62, %v2321_v59  ;;  %v2319_v6 = vpop.f32.mrb[35].mxu1 }
 0x36a   : > { %v2330_v23 = vadd.f32 %v2327_v62, %v2322_v9  ;;  %v6337_v6 = vld [vmem:[%s8306_s10] sm:$0xff]  }
 0x36b   : > { %v7134_v15 = vmax.f32 %v2329_v63, 0.0 }
 0x36c   : > { %v7136_v37 = vmax.f32 %v2330_v23, 0.0 }
 0x36d   : > { %2335 = vrot.lane.b32.xlu1 %v7134_v15, %s8389_s22 }
 0x36e   : > { %2337 = vrot.lane.b32.xlu0 %v7136_v37, %s8389_s22 }
 0x3df   : > { %v2336_v1 = vpop.permute.xlu1 %2335 }
 0x3e0   : > { %v2338_v28 = vpop.permute.xlu0 %2337 }
 0x3e1   : > { %v2339_v36 = vsel %vm1330_vm9, %v2336_v1, %v2338_v28  ;;  %v2340_v7 = vsel %vm1330_vm9, %v2338_v28, %v2336_v1 }
 0x3e2   : > { %v2342_v11 = vmax.f32 %v7136_v37, %v2340_v7  ;;  %v2341_v12 = vmax.f32 %v7134_v15, %v2339_v36 }
 0x3e4   : > { %2345 = vrot.lane.b32.xlu0 %v2342_v11, %s8383_s7  ;;  %2343 = vrot.lane.b32.xlu1 %v2341_v12, %s8383_s7 }
 0x456   : > { %v2346_v16 = vpop.permute.xlu0 %2345  ;;  %v2344_v18 = vpop.permute.xlu1 %2343 }
 0x457   : > { %v2347_v20 = vsel %vm8363_vm11, %v2344_v18, %v2346_v16  ;;  %v2348_v21 = vsel %vm8363_vm11, %v2346_v16, %v2344_v18  ;;  %vm3029_vm11 = vcmp.lt.s32.totalorder %v6598_v29, 94 }
 0x458   : > { %v7154_v44 = vmax.f32 %v2341_v12, %v2347_v20  ;;  %v7156_v45 = vmax.f32 %v2342_v11, %v2348_v21  ;;  %v6338_v12 = vld [vmem:[%s8306_s10 + $0x10] sm:$0xff]  }
 0x45a   : > { %2380 = vrot.lane.b32.xlu0 %v7156_v45, %s8344_s9  ;;  %2378 = vrot.lane.b32.xlu1 %v7154_v44, %s8344_s9  ;;  %s8352_s9 = smov 126   ;;  %v2697_v18 = vpack.c.bf16 %v7156_v45, %v7156_v45 }
 0x45e   : > { %2354 = vrot.lane.b32.xlu0 %v7156_v45, %s8346_s5  ;;  %2352 = vrot.lane.b32.xlu1 %v7154_v44, %s8346_s5  ;;  %s8355_s5 = smov 98  }
 0x462   : > { %2521 = vrot.lane.b32.xlu0 %v7156_v45, %s8348_s24  ;;  %2519 = vrot.lane.b32.xlu1 %v7154_v44, %s8348_s24  ;;  %s8358_s24 = smov 96  }
 0x466   : > { %2609 = vrot.lane.b32.xlu0 %v7156_v45, %s8350_s26  ;;  %2607 = vrot.lane.b32.xlu1 %v7154_v44, %s8350_s26  ;;  %s6389_s26 = smov 94  }
 0x46a   : > { %2763 = vrot.lane.b32.xlu0 %v7156_v45, %s8352_s9  ;;  %2761 = vrot.lane.b32.xlu1 %v7154_v44, %s8352_s9  ;;  %s8400_s9 = smov 98  }
 0x46e   : > { %2851 = vrot.lane.b32.xlu0 %v7156_v45, %s8355_s5  ;;  %2849 = vrot.lane.b32.xlu1 %v7154_v44, %s8355_s5  ;;  %s8398_s5 = smov 2  }
 0x472   : > { %2939 = vrot.lane.b32.xlu0 %v7156_v45, %s8358_s24  ;;  %2937 = vrot.lane.b32.xlu1 %v7154_v44, %s8358_s24  ;;  %s8394_s24 = sld [smem:[#allocation7_spill]] }
 0x476   : > { %3027 = vrot.lane.b32.xlu0 %v7156_v45, %s6389_s26  ;;  %3025 = vrot.lane.b32.xlu1 %v7154_v44, %s6389_s26 }
 0x478   : > { %v6045_v27 = vld [vmem:[%s8394_s24 + $0x1] ss:$8 sm:$0x3]  ;;  %v2351_v60 = vld [vmem:[%s8394_s24] ss:$8 sm:$0x3] }
 0x479   : > { %v7201_v55 = vrot.slane %v6045_v27, %v6579_v13  ;;  %v7204_v32 = vrot.slane %v6045_v27, %v6601_v30  ;;  %v7217_v0 = vrot.slane %v2351_v60, %v6579_v13  ;;  %v7220_v34 = vrot.slane %v2351_v60, %v6601_v30  ;;  %v6054_v17 = vld [vmem:[%s8394_s24 + $0x2] ss:$8 sm:$0x3]  ;;  %v6060_v31 = vld [vmem:[%s8394_s24 + $0x3] ss:$8 sm:$0x3] }
 0x47a   : > { %3120 = vperm.xlu0 %6334, %v3112_v26   ;;  %3115 = vperm.xlu1 %6313, %v3111_v52   ;;  %v7235_v48 = vrot.slane %v6054_v17, %v6601_v30  ;;  %v7243_v43 = vrot.slane %v6054_v17, %v6579_v13  ;;  %v7258_v62 = vrot.slane %v6060_v31, %v6601_v30  ;;  %v6071_v20 = vld [vmem:[%s8394_s24 + $0x5] ss:$8 sm:$0x3]  ;;  %v6339_v60 = vld [vmem:[%s8306_s10 + $0x18] sm:$0xff]  }
 0x47b   : > { %v7268_v23 = vrot.slane %v6060_v31, %v6579_v13  ;;  %v7291_v52 = vrot.slane %v6071_v20, %v6601_v30  ;;  %v6341_v31 = vld [vmem:[%s8306_s10 + $0x28] sm:$0xff]  }
 0x4cc   : > { %v2381_v33 = vpop.permute.xlu0 %2380  ;;  %v2379_v3 = vpop.permute.xlu1 %2378 }
 0x4cd   : > { %v2383_v40 = vsel %vm2382_vm1, %v2379_v3, %v2381_v33  ;;  %v2384_v4 = vsel %vm2382_vm1, %v2381_v33, %v2379_v3  ;;  %v2696_v33 = vpack.c.bf16 %v7154_v44, %v7154_v44  ;;  %v7302_v3 = vrot.slane %v6071_v20, %v6579_v13 }
 0x4ce   : > { %v2396_v53 = vmul.f32 %v7201_v55, %v2384_v4  ;;  %v2397_v41 = vmul.f32 %v7204_v32, %v2383_v40 }
 0x4cf   : > { %v2707_v4 = vsel %vm1785_vm15, %v2696_v33, 0 }
 0x4d0   : > { %v2401_v51 = vpack.c.bf16 %v2396_v53, %v2396_v53  ;;  %v2402_v19 = vpack.c.bf16 %v2397_v41, %v2397_v41  ;;  %v2355_v35 = vpop.permute.xlu0 %2354  ;;  %v2353_v10 = vpop.permute.xlu1 %2352  ;;  %v6077_v41 = vld [vmem:[%s8394_s24 + $0x6] ss:$8 sm:$0x3] }
 0x4d1   : > { %v2357_v24 = vsel %vm2356_vm8, %v2353_v10, %v2355_v35  ;;  %v2358_v22 = vsel %vm2356_vm8, %v2355_v35, %v2353_v10 }
 0x4d2   : > { %v2370_v25 = vmul.f32 %v7217_v0, %v2358_v22  ;;  %v2371_v8 = vmul.f32 %v7220_v34, %v2357_v24  ;;  %6049 = vmatprep.subr.msk.bf16.mxu0 %vm1785_vm15, %v2402_v19  ;;  %v2412_v47 = vsel %vm1785_vm15, %v2401_v51, 0  ;;  %v7316_v19 = vrot.slane %v6077_v41, %v6601_v30  ;;  %v6340_v22 = vld [vmem:[%s8306_s10 + $0x20] sm:$0xff]  }
 0x4d3   : > { %2418 = vmatpush1.bf16.msra.mxu0 %v2412_v47 }
 0x4d4   : > { %v2374_v61 = vpack.c.bf16 %v2370_v25, %v2370_v25  ;;  %v2375_v5 = vpack.c.bf16 %v2371_v8, %v2371_v8  ;;  %v2522_v42 = vpop.permute.xlu0 %2521  ;;  %v2520_v50 = vpop.permute.xlu1 %2519  ;;  %v7325_v25 = vrot.slane %v6077_v41, %v6579_v13 }
 0x4d5   : > { %v2524_v54 = vsel %vm2523_vm13, %v2520_v50, %v2522_v42  ;;  %v2525_v56 = vsel %vm2523_vm13, %v2522_v42, %v2520_v50 }
 0x4d6   : > { %v2538_v46 = vmul.f32 %v7235_v48, %v2524_v54  ;;  %6050 = vmatmul.mubr.msk.bf16.vlgmr.msra.gmra.mrb[36].mxu0 %vm1781_vm0, %v6336_v49  ;;  %6052 = vmatprep.subr.msk.bf16.mxu0 %vm1785_vm15, %v2375_v5  ;;  %v2469_v14 = vsel %vm1785_vm15, %v2374_v61, 0  ;;  %v2537_v39 = vmul.f32 %v7243_v43, %v2525_v56  ;;  %v6083_v61 = vld [vmem:[%s8394_s24 + $0x7] ss:$8 sm:$0x3] }
 0x4d7   : > { %2475 = vmatpush1.bf16.msra.mxu0 %v2469_v14  ;;  %2506 = vmatprep.mubr.bf16.mxu0 %v6372_v2  ;;  %v7339_v54 = vrot.slane %v6083_v61, %v6601_v30 }
 0x4d8   : > { %v2543_v57 = vpack.c.bf16 %v2538_v46, %v2538_v46  ;;  %v2610_v58 = vpop.permute.xlu0 %2609  ;;  %v2608_v59 = vpop.permute.xlu1 %2607  ;;  %v2542_v38 = vpack.c.bf16 %v2537_v39, %v2537_v39 }
 0x4d9   : > { %v2612_v9 = vsel %vm2611_vm14, %v2608_v59, %v2610_v58  ;;  %v2613_v36 = vsel %vm2611_vm14, %v2610_v58, %v2608_v59 }
 0x4da   : > { %6058 = vmatprep.subr.msk.bf16.mxu0 %vm1785_vm15, %v2543_v57  ;;  %v2626_v63 = vmul.f32 %v7258_v62, %v2612_v9  ;;  %v2553_v28 = vsel %vm1785_vm15, %v2542_v38, 0  ;;  %v2625_v7 = vmul.f32 %v7268_v23, %v2613_v36  ;;  %v7348_v57 = vrot.slane %v6083_v61, %v6579_v13  ;;  %v6089_v9 = vld [vmem:[%s8394_s24 + $0x10] ss:$8 sm:$0x3] }
 0x4dc   : > { %v2631_v1 = vpack.c.bf16 %v2626_v63, %v2626_v63  ;;  %v2630_v11 = vpack.c.bf16 %v2625_v7, %v2625_v7  ;;  %v2764_v21 = vpop.permute.xlu0 %2763  ;;  %v2762_v26 = vpop.permute.xlu1 %2761 }
 0x4dd   : > { %v2767_v27 = vsel %vm2765_vm2, %v2764_v21, %v2762_v26  ;;  %v2766_v53 = vsel %vm2765_vm2, %v2762_v26, %v2764_v21 }
 0x4de   : > { %v2641_v16 = vsel %vm1785_vm15, %v2630_v11, 0  ;;  %v2780_v45 = vmul.f32 %v7291_v52, %v2767_v27  ;;  %v2779_v51 = vmul.f32 %v7302_v3, %v2766_v53  ;;  %v6342_v11 = vld [vmem:[%s8306_s10 + $0x30] sm:$0xff]   ;;  %v6343_v27 = vld [vmem:[%s8306_s10 + $0x38] sm:$0xff]  }
 0x4e0   : > { %v2785_v40 = vpack.c.bf16 %v2780_v45, %v2780_v45  ;;  %v2852_v17 = vpop.permute.xlu0 %2851  ;;  %v2850_v44 = vpop.permute.xlu1 %2849  ;;  %v2784_v10 = vpack.c.bf16 %v2779_v51, %v2779_v51 }
 0x4e1   : > { %v2855_v35 = vsel %vm2853_vm5, %v2852_v17, %v2850_v44  ;;  %v2854_v49 = vsel %vm2853_vm5, %v2850_v44, %v2852_v17 }
 0x4e2   : > { %6053 = vmatmul.mubr.msk.bf16.vlgmr.msra.gmra.mrb[36].mxu0 %vm1781_vm0, %v6337_v6  ;;  %v2868_v24 = vmul.f32 %v7316_v19, %v2855_v35  ;;  %v2795_v47 = vsel %vm1785_vm15, %v2784_v10, 0  ;;  %v2867_v50 = vmul.f32 %v7325_v25, %v2854_v49 }
 0x4e3   : > { %2559 = vmatpush1.bf16.msra.mxu0 %v2553_v28  ;;  %2590 = vmatprep.mubr.bf16.mxu0 %v6372_v2 }
 0x4e4   : > { %6064 = vmatprep.subr.msk.bf16.mxu0 %vm1785_vm15, %v2631_v1  ;;  %v2873_v8 = vpack.c.bf16 %v2868_v24, %v2868_v24  ;;  %v2940_v5 = vpop.permute.xlu0 %2939  ;;  %v2938_v42 = vpop.permute.xlu1 %2937  ;;  %v2872_v14 = vpack.c.bf16 %v2867_v50, %v2867_v50  ;;  %v7362_v1 = vrot.slane %v6089_v9, %v6601_v30 }
 0x4e5   : > { %v2943_v46 = vsel %vm2941_vm12, %v2940_v5, %v2938_v42  ;;  %v2942_v39 = vsel %vm2941_vm12, %v2938_v42, %v2940_v5  ;;  %v3791_v5 = vld [vmem:[%s8309_s13] sm:$0xff]  ;;  %v3792_v42 = vld [vmem:[%s8309_s13 + $0x8] sm:$0xff] }
 0x4e6   : > { %v2956_v56 = vmul.f32 %v7339_v54, %v2943_v46  ;;  %v2883_v59 = vsel %vm1785_vm15, %v2872_v14, 0  ;;  %v2955_v6 = vmul.f32 %v7348_v57, %v2942_v39 }
 0x4e8   : > { %v2961_v58 = vpack.c.bf16 %v2956_v56, %v2956_v56  ;;  %v3028_v38 = vpop.permute.xlu0 %3027  ;;  %v3026_v63 = vpop.permute.xlu1 %3025  ;;  %v2960_v36 = vpack.c.bf16 %v2955_v6, %v2955_v6 }
 0x4e9   : > { %v3031_v28 = vsel %vm3029_vm11, %v3028_v38, %v3026_v63  ;;  %v3030_v20 = vsel %vm3029_vm11, %v3026_v63, %v3028_v38 }
 0x4ea   : > { %v3044_v7 = vmul.f32 %v7362_v1, %v3031_v28 }
 0x4ee   : > { %6059 = vmatmul.mubr.msk.bf16.vlgmr.msra.gmra.mrb[36].mxu0 %vm1781_vm0, %v6338_v12  ;;  %v7371_v12 = vrot.slane %v6089_v9, %v6579_v13 }
 0x4ef   : > { %2647 = vmatpush1.bf16.msra.mxu0 %v2641_v16  ;;  %2678 = vmatprep.mubr.bf16.mxu0 %v6372_v2  ;;  %v3049_v16 = vpack.c.bf16 %v3044_v7, %v3044_v7 }
 0x4f0   : > { %6069 = vmatprep.subr.msk.bf16.mxu0 %vm1785_vm15, %v2697_v18  ;;  %v2971_v18 = vsel %vm1785_vm15, %v2960_v36, 0  ;;  %v3043_v21 = vmul.f32 %v7371_v12, %v3030_v20 }
 0x4f2   : > { %v3048_v26 = vpack.c.bf16 %v3043_v21, %v3043_v21 }
 0x4f4   : > { %v3059_v45 = vsel %vm1785_vm15, %v3048_v26, 0 }
 0x4f9   : > { %v3116_v33 = vpop.permute.xlu1 %3115  ;;  %v3121_v41 = vpop.permute.xlu0 %3120 }
 0x4fa   : > { %6065 = vmatmul.mubr.msk.bf16.vlgmr.msra.gmra.mrb[36].mxu0 %vm1781_vm0, %v6339_v60  ;;  %v6344_v60 = vld [vmem:[%s8306_s10 + $0x40] sm:$0xff]  }
 0x4fb   : > { %2713 = vmatpush1.bf16.msra.mxu0 %v2707_v4  ;;  %2744 = vmatprep.mubr.bf16.mxu0 %v6372_v2 }
 0x4fc   : > { %6075 = vmatprep.subr.msk.bf16.mxu0 %vm1785_vm15, %v2785_v40 }
 0x506   : > { %6070 = vmatmul.mubr.msk.bf16.vlgmr.msra.gmra.mrb[36].mxu0 %vm1781_vm0, %v6340_v22 }
 0x507   : > { %2801 = vmatpush1.bf16.msra.mxu0 %v2795_v47  ;;  %2832 = vmatprep.mubr.bf16.mxu0 %v6372_v2 }
 0x508   : > { %6081 = vmatprep.subr.msk.bf16.mxu0 %vm1785_vm15, %v2873_v8 }
 0x512   : > { %6076 = vmatmul.mubr.msk.bf16.vlgmr.msra.gmra.mrb[36].mxu0 %vm1781_vm0, %v6341_v31 }
 0x513   : > { %2889 = vmatpush1.bf16.msra.mxu0 %v2883_v59  ;;  %2920 = vmatprep.mubr.bf16.mxu0 %v6372_v2 }
 0x514   : > { %6087 = vmatprep.subr.msk.bf16.mxu0 %vm1785_vm15, %v2961_v58 }
 0x51e   : > { %6082 = vmatmul.mubr.msk.bf16.vlgmr.msra.gmra.mrb[36].mxu0 %vm1781_vm0, %v6342_v11 }
 0x51f   : > { %2977 = vmatpush1.bf16.msra.mxu0 %v2971_v18  ;;  %3008 = vmatprep.mubr.bf16.mxu0 %v6372_v2  ;;  %v6345_v18 = vld [vmem:[%s8308_s12 + $0x8] sm:$0xff]  }
 0x520   : > { %6093 = vmatprep.subr.msk.bf16.mxu0 %vm1785_vm15, %v3049_v16 }
 0x52a   : > { %6088 = vmatmul.mubr.msk.bf16.vlgmr.msra.gmra.mrb[36].mxu0 %vm1781_vm0, %v6343_v27 }
 0x52b   : > { %3065 = vmatpush1.bf16.msra.mxu0 %v3059_v45  ;;  %3096 = vmatprep.mubr.bf16.mxu0 %v6372_v2 }
 0x536   : > { %6094 = vmatmul.mubr.msk.bf16.vlgmr.msra.gmra.mrb[36].mxu0 %vm1781_vm0, %v6344_v60 }
 0x537   : > { %3969 = vmatprep.mubr.bf16.mxu0 %v6372_v2 }
 0x609   : > { %v3098_v40 = vpop.f32.mrb[36].mxu0 }
 0x60a   : > { %v3123_v4 = vadd.f32 %v3116_v33, %v3098_v40  ;;  %v3100_v53 = vpop.f32.mrb[37].mxu0 }
 0x60b   : > { %v3124_v17 = vadd.f32 %v3116_v33, %v3100_v53  ;;  %v3102_v44 = vpop.f32.mrb[38].mxu0 }
 0x60c   : > { %v7391_v51 = vmax.f32 %v3123_v4, 0.0  ;;  %v3125_v35 = vadd.f32 %v3121_v41, %v3102_v44  ;;  %v3104_v10 = vpop.f32.mrb[39].mxu0 }
 0x60d   : > { %v3126_v24 = vadd.f32 %v3121_v41, %v3104_v10  ;;  %v7397_v8 = vmax.f32 %v3124_v17, 0.0 }
 0x60e   : > { %v7393_v22 = vmax.f32 %v3125_v35, 0.0  ;;  %3151 = vrot.lane.b32.xlu1 %v7391_v51, %s8395_s23 }
 0x60f   : > { %v7399_v47 = vmax.f32 %v3126_v24, 0.0 }
 0x610   : > { %3153 = vrot.lane.b32.xlu0 %v7393_v22, %s8395_s23  ;;  %v3430_v49 = vpack.c.bf16 %v7393_v22, %v7391_v51 }
 0x611   : > { %v3431_v61 = vpack.c.bf16 %v7399_v47, %v7397_v8 }
 0x612   : > { %3155 = vrot.lane.b32.xlu1 %v7397_v8, %s8395_s23 }
 0x614   : > { %3157 = vrot.lane.b32.xlu0 %v7399_v47, %s8395_s23  ;;  %s8401_s23 = smov 96  }
 0x616   : > { %3131 = vrot.lane.b32.xlu1 %v7391_v51, %s8396_s4 }
 0x618   : > { %3133 = vrot.lane.b32.xlu0 %v7393_v22, %s8396_s4 }
 0x61a   : > { %3135 = vrot.lane.b32.xlu1 %v7397_v8, %s8396_s4 }
 0x61c   : > { %3137 = vrot.lane.b32.xlu0 %v7399_v47, %s8396_s4 }
 0x61e   : > { %3275 = vrot.lane.b32.xlu1 %v7391_v51, %s8397_s29 }
 0x620   : > { %3277 = vrot.lane.b32.xlu0 %v7393_v22, %s8397_s29 }
 0x622   : > { %3279 = vrot.lane.b32.xlu1 %v7397_v8, %s8397_s29 }
 0x624   : > { %3281 = vrot.lane.b32.xlu0 %v7399_v47, %s8397_s29  ;;  %s8419_s29 = sshll.u32 %s8428_s30, 2 }
 0x626   : > { %3351 = vrot.lane.b32.xlu1 %v7391_v51, %s8398_s5 }
 0x628   : > { %3353 = vrot.lane.b32.xlu0 %v7393_v22, %s8398_s5 }
 0x62a   : > { %3355 = vrot.lane.b32.xlu1 %v7397_v8, %s8398_s5 }
 0x62c   : > { %3357 = vrot.lane.b32.xlu0 %v7399_v47, %s8398_s5 }
 0x62e   : > { %3487 = vrot.lane.b32.xlu1 %v7391_v51, %s8399_s8 }
 0x630   : > { %3489 = vrot.lane.b32.xlu0 %v7393_v22, %s8399_s8 }
 0x632   : > { %3491 = vrot.lane.b32.xlu1 %v7397_v8, %s8399_s8 }
 0x634   : > { %3493 = vrot.lane.b32.xlu0 %v7399_v47, %s8399_s8  ;;  %s8402_s8 = sld [smem:[#allocation8_spill]] }
 0x636   : > { %3563 = vrot.lane.b32.xlu1 %v7391_v51, %s8400_s9 }
 0x638   : > { %3565 = vrot.lane.b32.xlu0 %v7393_v22, %s8400_s9 }
 0x63a   : > { %3567 = vrot.lane.b32.xlu1 %v7397_v8, %s8400_s9 }
 0x63c   : > { %3569 = vrot.lane.b32.xlu0 %v7399_v47, %s8400_s9  ;;  %s743_s9 = scalar_lea.vmem %s8317_s21, %s8419_s29 }
 0x63e   : > { %3639 = vrot.lane.b32.xlu1 %v7391_v51, %s8401_s23 }
 0x640   : > { %3641 = vrot.lane.b32.xlu0 %v7393_v22, %s8401_s23 }
 0x642   : > { %3643 = vrot.lane.b32.xlu1 %v7397_v8, %s8401_s23 }
 0x644   : > { %3645 = vrot.lane.b32.xlu0 %v7399_v47, %s8401_s23 }
 0x646   : > { %3715 = vrot.lane.b32.xlu1 %v7391_v51, %s6389_s26 }
 0x648   : > { %3717 = vrot.lane.b32.xlu0 %v7393_v22, %s6389_s26 }
 0x64a   : > { %3719 = vrot.lane.b32.xlu1 %v7397_v8, %s6389_s26 }
 0x64c   : > { %3721 = vrot.lane.b32.xlu0 %v7399_v47, %s6389_s26 }
 0x64e   : > { %3795 = vperm.xlu1 %6313, %v3791_v5  }
 0x650   : > { %3800 = vperm.xlu0 %6334, %v3792_v42  }
 0x680   : > { %v3152_v50 = vpop.permute.xlu1 %3151 }
 0x682   : > { %v3154_v46 = vpop.permute.xlu0 %3153 }
 0x684   : > { %v3156_v14 = vpop.permute.xlu1 %3155 }
 0x685   : > { %v3159_v56 = vsel %vm2382_vm1, %v3152_v50, %v3156_v14  ;;  %v3161_v31 = vsel %vm2382_vm1, %v3156_v14, %v3152_v50  ;;  %v6346_v14 = vld [vmem:[%s8308_s12] sm:$0xff]  }
 0x686   : > { %v3158_v58 = vpop.permute.xlu0 %3157  ;;  %v3163_v9 = vmul.f32 %v3161_v31, %v7201_v55  ;;  %v3164_v38 = vmul.f32 %v3159_v56, %v7204_v32 }
 0x687   : > { %v3160_v59 = vsel %vm2382_vm1, %v3154_v46, %v3158_v58  ;;  %v3162_v39 = vsel %vm2382_vm1, %v3158_v58, %v3154_v46  ;;  %vm3177_vm1 = vcmask 130048  }
 0x688   : > { %v3165_v63 = vmul.f32 %v3162_v39, %v7201_v55  ;;  %v3166_v6 = vmul.f32 %v3160_v59, %v7204_v32  ;;  %v3132_v28 = vpop.permute.xlu1 %3131 }
 0x68a   : > { %v3170_v36 = vpack.c.bf16 %v3165_v63, %v3163_v9  ;;  %v3134_v7 = vpop.permute.xlu0 %3133  ;;  %v3171_v11 = vpack.c.bf16 %v3166_v6, %v3164_v38 }
 0x68c   : > { %v3136_v16 = vpop.permute.xlu1 %3135  ;;  %3181 = vmatprep.subr.bf16.mxu1 %v3171_v11  ;;  %v6347_v11 = vld [vmem:[%s8308_s12 + $0x10] sm:$0xff]  }
 0x68d   : > { %v3139_v20 = vsel %vm2356_vm8, %v3132_v28, %v3136_v16  ;;  %v3141_v21 = vsel %vm2356_vm8, %v3136_v16, %v3132_v28  ;;  %3182 = vmatpush1.bf16.msra.mxu1 %v3170_v36 }
 0x68e   : > { %v3138_v55 = vpop.permute.xlu0 %3137  ;;  %v3143_v27 = vmul.f32 %v3141_v21, %v7217_v0  ;;  %v3144_v45 = vmul.f32 %v3139_v20, %v7220_v34 }
 0x68f   : > { %v3140_v32 = vsel %vm2356_vm8, %v3134_v7, %v3138_v55  ;;  %v3142_v26 = vsel %vm2356_vm8, %v3138_v55, %v3134_v7 }
 0x690   : > { %v3145_v60 = vmul.f32 %v3142_v26, %v7217_v0  ;;  %v3146_v33 = vmul.f32 %v3140_v32, %v7220_v34  ;;  %v3276_v40 = vpop.permute.xlu1 %3275  ;;  %6098 = vmatmul.mubr.msk.bf16.vlgmr.msra.gmra.mrb[36].mxu1 %vm3177_vm1, %v6345_v18 }
 0x691   : > { %3264 = vmatprep.mubr.bf16.mxu1 %v6372_v2 }
 0x692   : > { %v3149_v4 = vpack.c.bf16 %v3145_v60, %v3143_v27  ;;  %v3278_v53 = vpop.permute.xlu0 %3277  ;;  %v3150_v41 = vpack.c.bf16 %v3146_v33, %v3144_v45  ;;  %v6348_v27 = vld [vmem:[%s8308_s12 + $0x18] sm:$0xff]  }
 0x694   : > { %v3280_v17 = vpop.permute.xlu1 %3279  ;;  %3232 = vmatprep.subr.bf16.mxu1 %v3150_v41 }
 0x695   : > { %v3283_v44 = vsel %vm2523_vm13, %v3276_v40, %v3280_v17  ;;  %v3285_v35 = vsel %vm2523_vm13, %v3280_v17, %v3276_v40  ;;  %3233 = vmatpush1.bf16.msra.mxu1 %v3149_v4 }
 0x696   : > { %v3282_v0 = vpop.permute.xlu0 %3281  ;;  %v3287_v24 = vmul.f32 %v3285_v35, %v7243_v43  ;;  %v3288_v5 = vmul.f32 %v3283_v44, %v7235_v48 }
 0x697   : > { %v3284_v34 = vsel %vm2523_vm13, %v3278_v53, %v3282_v0  ;;  %v3286_v10 = vsel %vm2523_vm13, %v3282_v0, %v3278_v53  ;;  %v6349_v53 = vld [vmem:[%s8308_s12 + $0x20] sm:$0xff]  }
 0x698   : > { %v3289_v42 = vmul.f32 %v3286_v10, %v7243_v43  ;;  %v3290_v50 = vmul.f32 %v3284_v34, %v7235_v48  ;;  %v3352_v46 = vpop.permute.xlu1 %3351 }
 0x69a   : > { %v3294_v56 = vpack.c.bf16 %v3289_v42, %v3287_v24  ;;  %v3354_v31 = vpop.permute.xlu0 %3353  ;;  %v3295_v58 = vpack.c.bf16 %v3290_v50, %v3288_v5 }
 0x69c   : > { %v3356_v59 = vpop.permute.xlu1 %3355  ;;  %6100 = vmatmul.mubr.msk.bf16.vlgmr.msra.gmra.mrb[36].mxu1 %vm3177_vm1, %v6346_v14  ;;  %3304 = vmatprep.subr.bf16.mxu1 %v3295_v58  ;;  %v6350_v14 = vld [vmem:[%s8308_s12 + $0x28] sm:$0xff]  }
 0x69d   : > { %v3359_v39 = vsel %vm2611_vm14, %v3352_v46, %v3356_v59  ;;  %3305 = vmatpush1.bf16.msra.mxu1 %v3294_v56  ;;  %3336 = vmatprep.mubr.bf16.mxu1 %v6372_v2  ;;  %v3361_v6 = vsel %vm2611_vm14, %v3356_v59, %v3352_v46 }
 0x69e   : > { %v3358_v43 = vpop.permute.xlu0 %3357  ;;  %v3364_v9 = vmul.f32 %v3359_v39, %v7258_v62  ;;  %v3363_v16 = vmul.f32 %v3361_v6, %v7268_v23 }
 0x69f   : > { %v3360_v48 = vsel %vm2611_vm14, %v3354_v31, %v3358_v43  ;;  %v3362_v38 = vsel %vm2611_vm14, %v3358_v43, %v3354_v31  ;;  %vm8409_vm14 = vcmp.lt.s32.totalorder %v6598_v29, 111 }
 0x6a0   : > { %v3366_v63 = vmul.f32 %v3360_v48, %v7258_v62  ;;  %v3365_v36 = vmul.f32 %v3362_v38, %v7268_v23  ;;  %v3488_v18 = vpop.permute.xlu1 %3487 }
 0x6a2   : > { %v3371_v28 = vpack.c.bf16 %v3366_v63, %v3364_v9  ;;  %v3490_v7 = vpop.permute.xlu0 %3489  ;;  %v3370_v20 = vpack.c.bf16 %v3365_v36, %v3363_v16 }
 0x6a4   : > { %3380 = vmatprep.subr.bf16.mxu1 %v3371_v28  ;;  %v3492_v21 = vpop.permute.xlu1 %3491  ;;  %v6351_v28 = vld [vmem:[%s8308_s12 + $0x30] sm:$0xff]  }
 0x6a5   : > { %v3497_v32 = vsel %vm2765_vm2, %v3492_v21, %v3488_v18 }
 0x6a6   : > { %v3494_v62 = vpop.permute.xlu0 %3493  ;;  %v3500_v45 = vmul.f32 %v3497_v32, %v7291_v52 }
 0x6a7   : > { %v3498_v55 = vsel %vm2765_vm2, %v3494_v62, %v3490_v7 }
 0x6a8   : > { %6104 = vmatmul.mubr.msk.bf16.vlgmr.msra.gmra.mrb[36].mxu1 %vm3177_vm1, %v6347_v11  ;;  %v3502_v23 = vmul.f32 %v3498_v55, %v7291_v52  ;;  %v3564_v60 = vpop.permute.xlu1 %3563  ;;  %v3495_v52 = vsel %vm2765_vm2, %v3488_v18, %v3492_v21  ;;  %v6353_v55 = vld [vmem:[%s8308_s12 + $0x40] sm:$0xff]  }
 0x6a9   : > { %3381 = vmatpush1.bf16.msra.mxu1 %v3370_v20  ;;  %3412 = vmatprep.mubr.bf16.mxu1 %v6372_v2  ;;  %v3499_v41 = vmul.f32 %v3495_v52, %v7302_v3 }
 0x6aa   : > { %3440 = vmatprep.subr.bf16.mxu1 %v3431_v61  ;;  %v3566_v26 = vpop.permute.xlu0 %3565  ;;  %v3507_v8 = vpack.c.bf16 %v3502_v23, %v3500_v45  ;;  %v3496_v61 = vsel %vm2765_vm2, %v3490_v7, %v3494_v62  ;;  %vm8403_vm2 = vcmp.lt.s32.totalorder %v6598_v29, 112 }
 0x6ab   : > { %v3501_v4 = vmul.f32 %v3496_v61, %v7302_v3  ;;  %vm8407_vm8 = vmmov %vm8403_vm2 }
 0x6ac   : > { %v3568_v33 = vpop.permute.xlu1 %3567  ;;  %vm8408_vm13 = vmmov %vm8403_vm2 }
 0x6ad   : > { %v3573_v51 = vsel %vm2853_vm5, %v3568_v33, %v3564_v60  ;;  %v3506_v35 = vpack.c.bf16 %v3501_v4, %v3499_v41  ;;  %v3571_v3 = vsel %vm2853_vm5, %v3564_v60, %v3568_v33 }
 0x6ae   : > { %v3570_v47 = vpop.permute.xlu0 %3569  ;;  %v3576_v17 = vmul.f32 %v3573_v51, %v7316_v19  ;;  %v3575_v56 = vmul.f32 %v3571_v3, %v7325_v25 }
 0x6af   : > { %v3574_v40 = vsel %vm2853_vm5, %v3570_v47, %v3566_v26  ;;  %v3572_v10 = vsel %vm2853_vm5, %v3566_v26, %v3570_v47  ;;  %vm8404_vm5 = vmmov %vm8403_vm2 }
 0x6b0   : > { %v3578_v22 = vmul.f32 %v3574_v40, %v7316_v19  ;;  %v3640_v44 = vpop.permute.xlu1 %3639  ;;  %v3577_v19 = vmul.f32 %v3572_v10, %v7325_v25 }
 0x6b2   : > { %v3583_v0 = vpack.c.bf16 %v3578_v22, %v3576_v17  ;;  %v3582_v59 = vpack.c.bf16 %v3577_v19, %v3575_v56  ;;  %v3811_v22 = vld [vmem:[%s8402_s8] ss:$2 sm:$0x3] }
 0x6b4   : > { %6108 = vmatmul.mubr.msk.bf16.vlgmr.msra.gmra.mrb[36].mxu1 %vm3177_vm1, %v6348_v27  ;;  %v3644_v24 = vpop.permute.xlu1 %3643 }
 0x6b5   : > { %3441 = vmatpush1.bf16.msra.mxu1 %v3430_v49  ;;  %3472 = vmatprep.mubr.bf16.mxu1 %v6372_v2  ;;  %v3642_v49 = vpop.permute.xlu0 %3641  ;;  %v3649_v42 = vsel %vm2941_vm12, %v3644_v24, %v3640_v44  ;;  %v3647_v25 = vsel %vm2941_vm12, %v3640_v44, %v3644_v24 }
 0x6b6   : > { %3516 = vmatprep.subr.bf16.mxu1 %v3507_v8  ;;  %v3652_v31 = vmul.f32 %v3649_v42, %v7339_v54  ;;  %v3651_v36 = vmul.f32 %v3647_v25, %v7348_v57  ;;  %v3886_v25 = vld [vmem:[%s8380_s0] ss:$8 sm:$0x3] }
 0x6b8   : > { %v3716_v58 = vpop.permute.xlu1 %3715 }
 0x6b9   : > { %v3646_v34 = vpop.permute.xlu0 %3645 }
 0x6ba   : > { %v3650_v5 = vsel %vm2941_vm12, %v3646_v34, %v3642_v49  ;;  %v3648_v48 = vsel %vm2941_vm12, %v3642_v49, %v3646_v34  ;;  %vm8406_vm12 = vmmov %vm8403_vm2 }
 0x6bb   : > { %v3654_v50 = vmul.f32 %v3650_v5, %v7339_v54  ;;  %v3653_v54 = vmul.f32 %v3648_v48, %v7348_v57  ;;  %v6352_v57 = vld [vmem:[%s8308_s12 + $0x38] sm:$0xff]  }
 0x6bc   : > { %v3720_v9 = vpop.permute.xlu1 %3719 }
 0x6bd   : > { %v3718_v46 = vpop.permute.xlu0 %3717  ;;  %v3659_v39 = vpack.c.bf16 %v3654_v50, %v3652_v31  ;;  %v3725_v63 = vsel %vm3029_vm11, %v3720_v9, %v3716_v58  ;;  %v3658_v11 = vpack.c.bf16 %v3653_v54, %v3651_v36  ;;  %v3723_v20 = vsel %vm3029_vm11, %v3716_v58, %v3720_v9 }
 0x6be   : > { %v3728_v7 = vmul.f32 %v3725_v63, %v7362_v1 }
 0x6c0   : > { %6112 = vmatmul.mubr.msk.bf16.vlgmr.msra.gmra.mrb[36].mxu1 %vm3177_vm1, %v6349_v53  ;;  %v3834_v53 = vrot.slane %v3811_v22, %v6579_v13 }
 0x6c1   : > { %3517 = vmatpush1.bf16.msra.mxu1 %v3506_v35  ;;  %3548 = vmatprep.mubr.bf16.mxu1 %v6372_v2  ;;  %v3722_v43 = vpop.permute.xlu0 %3721  ;;  %v3838_v35 = vrot.slane %v3811_v22, %v6601_v30  ;;  %v3925_v22 = vld [vmem:[%s8311_s15] sm:$0xf] }
 0x6c2   : > { %3592 = vmatprep.subr.bf16.mxu1 %v3583_v0  ;;  %v3726_v38 = vsel %vm3029_vm11, %v3722_v43, %v3718_v46  ;;  %v3724_v18 = vsel %vm3029_vm11, %v3718_v46, %v3722_v43  ;;  %v6129_v43 = vld [vmem:[%s8402_s8 + $0x1] ss:$2 sm:$0x3]  ;;  %vm8405_vm11 = vmmov %vm8403_vm2 }
 0x6c3   : > { %v3730_v6 = vmul.f32 %v3726_v38, %v7362_v1  ;;  %v3729_v62 = vmul.f32 %v3724_v18, %v7371_v12  ;;  %v3727_v1 = vmul.f32 %v3723_v20, %v7371_v12  ;;  %v3869_v9 = vrot.slane %v6129_v43, %v6579_v13 }
 0x6c4   : > { %v7678_v18 = vrot.slane %v3886_v25, %v6579_v13 }
 0x6c5   : > { %v3735_v16 = vpack.c.bf16 %v3730_v6, %v3728_v7  ;;  %v3734_v21 = vpack.c.bf16 %v3729_v62, %v3727_v1  ;;  %v3873_v6 = vrot.slane %v6129_v43, %v6601_v30  ;;  %v7681_v1 = vrot.slane %v3886_v25, %v6601_v30 }
 0x6cc   : > { %6116 = vmatmul.mubr.msk.bf16.vlgmr.msra.gmra.mrb[36].mxu1 %vm3177_vm1, %v6350_v14 }
 0x6cd   : > { %3593 = vmatpush1.bf16.msra.mxu1 %v3582_v59  ;;  %3624 = vmatprep.mubr.bf16.mxu1 %v6372_v2  ;;  %v3796_v32 = vpop.permute.xlu1 %3795 }
 0x6ce   : > { %3668 = vmatprep.subr.bf16.mxu1 %v3659_v39 }
 0x6cf   : > { %v3801_v45 = vpop.permute.xlu0 %3800 }
 0x6d8   : > { %6120 = vmatmul.mubr.msk.bf16.vlgmr.msra.gmra.mrb[36].mxu1 %vm3177_vm1, %v6351_v28 }
 0x6d9   : > { %3669 = vmatpush1.bf16.msra.mxu1 %v3658_v11  ;;  %3700 = vmatprep.mubr.bf16.mxu1 %v6372_v2 }
 0x6da   : > { %3744 = vmatprep.subr.bf16.mxu1 %v3735_v16 }
 0x6e4   : > { %6124 = vmatmul.mubr.msk.bf16.vlgmr.msra.gmra.mrb[36].mxu1 %vm3177_vm1, %v6352_v57 }
 0x6e5   : > { %3745 = vmatpush1.bf16.msra.mxu1 %v3734_v21  ;;  %3776 = vmatprep.mubr.bf16.mxu1 %v6372_v2 }
 0x6f0   : > { %6128 = vmatmul.mubr.msk.bf16.vlgmr.msra.gmra.mrb[36].mxu1 %vm3177_vm1, %v6353_v55 }
 0x6f1   : > { %4013 = vmatprep.mubr.bf16.mxu1 %v6372_v2 }
 0x7c3   : > { %v3778_v23 = vpop.f32.mrb[36].mxu1 }
 0x7c4   : > { %v3803_v26 = vadd.f32 %v3796_v32, %v3778_v23  ;;  %v3780_v27 = vpop.f32.mrb[37].mxu1 }
 0x7c5   : > { %v3782_v12 = vpop.f32.mrb[38].mxu1  ;;  %v3804_v8 = vadd.f32 %v3796_v32, %v3780_v27 }
 0x7c6   : > { %v3807_v60 = vmax.f32 %v3803_v26, 0.0  ;;  %v3805_v47 = vadd.f32 %v3801_v45, %v3782_v12  ;;  %v3784_v61 = vpop.f32.mrb[39].mxu1 }
 0x7c7   : > { %v3806_v40 = vadd.f32 %v3801_v45, %v3784_v61  ;;  %v3808_v52 = vmax.f32 %v3804_v8, 0.0 }
 0x7c8   : > { %v3809_v33 = vmax.f32 %v3805_v47, 0.0  ;;  %3814 = vrot.lane.b32.xlu1 %v3807_v60, %s8388_s28 }
 0x7c9   : > { %v3810_v4 = vmax.f32 %v3806_v40, 0.0 }
 0x7ca   : > { %3816 = vrot.lane.b32.xlu0 %v3809_v33, %s8388_s28 }
 0x7cc   : > { %3818 = vrot.lane.b32.xlu1 %v3808_v52, %s8388_s28 }
 0x7ce   : > { %3820 = vrot.lane.b32.xlu0 %v3810_v4, %s8388_s28 }
 0x83a   : > { %v3815_v51 = vpop.permute.xlu1 %3814 }
 0x83c   : > { %v3817_v49 = vpop.permute.xlu0 %3816 }
 0x83e   : > { %v3819_v41 = vpop.permute.xlu1 %3818 }
 0x83f   : > { %v3822_v17 = vsel %vm1148_vm7, %v3815_v51, %v3819_v41  ;;  %v3824_v44 = vsel %vm1148_vm7, %v3819_v41, %v3815_v51 }
 0x840   : > { %v3826_v0 = vsub.f32 %v3824_v44, %v3807_v60  ;;  %v3827_v34 = vsub.f32 %v3822_v17, %v3808_v52  ;;  %v3821_v10 = vpop.permute.xlu0 %3820 }
 0x841   : > { %v3823_v24 = vsel %vm1148_vm7, %v3817_v49, %v3821_v10  ;;  %v3825_v5 = vsel %vm1148_vm7, %v3821_v10, %v3817_v49  ;;  %v5122_v49 = vld [vmem:[%s8312_s16] sm:$0xff] }
 0x842   : > { %v3841_v3 = vmul.f32 %v3834_v53, %v3826_v0  ;;  %v3828_v19 = vsub.f32 %v3825_v5, %v3809_v33  ;;  %v3829_v42 = vsub.f32 %v3823_v24, %v3810_v4  ;;  %v3842_v50 = vmul.f32 %v3838_v35, %v3827_v34  ;;  %v6133_v24 = vld [vmem:[%s8380_s0 + $0x1] ss:$8 sm:$0x3] }
 0x844   : > { %v3845_v46 = vadd.f32 %v3841_v3, %v3807_v60  ;;  %v3843_v14 = vmul.f32 %v3834_v53, %v3828_v19  ;;  %v3844_v56 = vmul.f32 %v3838_v35, %v3829_v42  ;;  %v3846_v58 = vadd.f32 %v3842_v50, %v3808_v52 }
 0x845   : > { %v7797_v3 = vrot.slane %v6133_v24, %v6579_v13  ;;  %v7800_v42 = vrot.slane %v6133_v24, %v6601_v30 }
 0x846   : > { %v3847_v31 = vadd.f32 %v3843_v14, %v3809_v33  ;;  %3849 = vrot.lane.b32.xlu1 %v3845_v46, %s8384_s1  ;;  %v3848_v59 = vadd.f32 %v3844_v56, %v3810_v4 }
 0x848   : > { %3851 = vrot.lane.b32.xlu0 %v3847_v31, %s8384_s1 }
 0x84a   : > { %3853 = vrot.lane.b32.xlu1 %v3846_v58, %s8384_s1 }
 0x84c   : > { %3855 = vrot.lane.b32.xlu0 %v3848_v59, %s8384_s1 }
 0x84e   : > { %3917 = vrot.lane.b32.xlu1 %v7134_v15, %s8391_s25 }
 0x850   : > { %3919 = vrot.lane.b32.xlu0 %v7136_v37, %s8391_s25 }
 0x852   : > { %4100 = vrot.lane.b32.xlu1 %v7134_v15, %s8384_s1 }
 0x854   : > { %4102 = vrot.lane.b32.xlu0 %v7136_v37, %s8384_s1 }
 0x856   : > { %4242 = vrot.lane.b32.xlu1 %v7134_v15, %s8387_s6 }
 0x858   : > { %4244 = vrot.lane.b32.xlu0 %v7136_v37, %s8387_s6 }
 0x85a   : > { %4384 = vrot.lane.b32.xlu1 %v7134_v15, %s8388_s28 }
 0x85c   : > { %4386 = vrot.lane.b32.xlu0 %v7136_v37, %s8388_s28 }
 0x85e   : > { %4632 = vrot.lane.b32.xlu1 %v7134_v15, %s8389_s22 }
 0x860   : > { %4634 = vrot.lane.b32.xlu0 %v7136_v37, %s8389_s22 }
 0x8b8   : > { %v3850_v39 = vpop.permute.xlu1 %3849 }
 0x8ba   : > { %v3852_v48 = vpop.permute.xlu0 %3851 }
 0x8bc   : > { %v3854_v38 = vpop.permute.xlu1 %3853 }
 0x8bd   : > { %v3857_v54 = vsel %vm936_vm3, %v3850_v39, %v3854_v38  ;;  %v3859_v63 = vsel %vm936_vm3, %v3854_v38, %v3850_v39 }
 0x8be   : > { %v3861_v28 = vsub.f32 %v3859_v63, %v3845_v46  ;;  %v3862_v36 = vsub.f32 %v3857_v54, %v3846_v58  ;;  %v3856_v7 = vpop.permute.xlu0 %3855 }
 0x8bf   : > { %v3858_v11 = vsel %vm936_vm3, %v3852_v48, %v3856_v7  ;;  %v3860_v16 = vsel %vm936_vm3, %v3856_v7, %v3852_v48 }
 0x8c0   : > { %v3876_v20 = vmul.f32 %v3869_v9, %v3861_v28  ;;  %v3863_v62 = vsub.f32 %v3860_v16, %v3847_v31  ;;  %v3864_v57 = vsub.f32 %v3858_v11, %v3848_v59  ;;  %v3877_v21 = vmul.f32 %v3873_v6, %v3862_v36  ;;  %v3918_v23 = vpop.permute.xlu1 %3917 }
 0x8c2   : > { %v7683_v55 = vadd.f32 %v3876_v20, %v3845_v46  ;;  %v3878_v32 = vmul.f32 %v3869_v9, %v3863_v62  ;;  %v3920_v26 = vpop.permute.xlu0 %3919  ;;  %v3879_v12 = vmul.f32 %v3873_v6, %v3864_v57  ;;  %v7695_v61 = vadd.f32 %v3877_v21, %v3846_v58  ;;  %v6139_v46 = vld [vmem:[%s8380_s0 + $0x2] ss:$8 sm:$0x3] }
 0x8c3   : > { %v3921_v27 = vsel %vm822_vm4, %v3918_v23, %v3920_v26  ;;  %v3922_v45 = vsel %vm822_vm4, %v3920_v26, %v3918_v23  ;;  %v7815_v39 = vrot.slane %v6139_v46, %v6601_v30  ;;  %v7829_v11 = vrot.slane %v6139_v46, %v6579_v13 }
 0x8c4   : > { %v7689_v60 = vadd.f32 %v3878_v32, %v3847_v31  ;;  %v3923_v8 = vmul.f32 %v3922_v45, %v7678_v18  ;;  %v3924_v47 = vmul.f32 %v3921_v27, %v7681_v1  ;;  %3887 = vrot.lane.b32.xlu1 %v7683_v55, %s8391_s25  ;;  %v7701_v4 = vadd.f32 %v3879_v12, %v3848_v59  ;;  %v4101_v53 = vpop.permute.xlu1 %4100  ;;  %v6145_v32 = vld [vmem:[%s8380_s0 + $0x3] ss:$8 sm:$0x3] }
 0x8c5   : > { %v3914_v12 = vld [vmem:[%s8310_s14] sm:$0xf] }
 0x8c6   : > { %v3926_v33 = vpack.c.bf16 %v3923_v8, %v3923_v8  ;;  %v3927_v40 = vpack.c.bf16 %v3924_v47, %v3924_v47  ;;  %3889 = vrot.lane.b32.xlu0 %v7689_v60, %s8391_s25  ;;  %v4450_v52 = vpack.c.bf16 %v7689_v60, %v7683_v55  ;;  %v4103_v41 = vpop.permute.xlu0 %4102  ;;  %v7846_v47 = vrot.slane %v6145_v32, %v6601_v30 }
 0x8c7   : > { %v4105_v50 = vsel %vm936_vm3, %v4103_v41, %v4101_v53  ;;  %v4104_v14 = vsel %vm936_vm3, %v4101_v53, %v4103_v41 }
 0x8c8   : > { %3891 = vrot.lane.b32.xlu1 %v7695_v61, %s8391_s25  ;;  %6130 = vmatprep.subr.msk.bf16.mxu0 %vm1785_vm15, %v3927_v40  ;;  %v3932_v51 = vsel %vm1785_vm15, %v3926_v33, 0  ;;  %v4243_v17 = vpop.permute.xlu1 %4242  ;;  %v4106_v59 = vmul.f32 %v4105_v50, %v7797_v3  ;;  %v4107_v48 = vmul.f32 %v4104_v14, %v7800_v42 }
 0x8c9   : > { %3938 = vmatpush1.bf16.msra.mxu0 %v3932_v51 }
 0x8ca   : > { %3893 = vrot.lane.b32.xlu0 %v7701_v4, %s8391_s25  ;;  %v4245_v44 = vpop.permute.xlu0 %4244  ;;  %v4110_v7 = vpack.c.bf16 %v4106_v59, %v4106_v59  ;;  %v4111_v23 = vpack.c.bf16 %v4107_v48, %v4107_v48 }
 0x8cb   : > { %v4246_v9 = vsel %vm1042_vm6, %v4243_v17, %v4245_v44  ;;  %v4247_v57 = vsel %vm1042_vm6, %v4245_v44, %v4243_v17 }
 0x8cc   : > { %4023 = vrot.lane.b32.xlu1 %v7683_v55, %s8384_s1  ;;  %6131 = vmatmul.mubr.msk.bf16.vlgmr.msra.gmra.mrb[40].mxu0 %vm1781_vm0, %v3925_v22  ;;  %v7785_v35 = vpop.permute.xlu1 %4384  ;;  %v4249_v21 = vmul.f32 %v4246_v9, %v7815_v39  ;;  %v4248_v8 = vmul.f32 %v4247_v57, %v7829_v11  ;;  %v4116_v40 = vsel %vm1785_vm15, %v4110_v7, 0  ;;  %v6134_v9 = vld [vmem:[%s8310_s14 + $0x4] sm:$0xf] }
 0x8cd   : > { %4089 = vmatprep.mubr.bf16.mxu0 %v6372_v2 }
 0x8ce   : > { %4025 = vrot.lane.b32.xlu0 %v7689_v60, %s8384_s1  ;;  %v7787_v0 = vpop.permute.xlu0 %4386  ;;  %v4253_v51 = vpack.c.bf16 %v4249_v21, %v4249_v21 }
 0x8cf   : > { %v4388_v22 = vsel %vm1148_vm7, %v7785_v35, %v7787_v0 }
 0x8d0   : > { %4027 = vrot.lane.b32.xlu1 %v7695_v61, %s8384_s1  ;;  %v7789_v34 = vpop.permute.xlu1 %4632 }
 0x8d2   : > { %4029 = vrot.lane.b32.xlu0 %v7701_v4, %s8384_s1  ;;  %v7791_v10 = vpop.permute.xlu0 %4634 }
 0x8d4   : > { %4165 = vrot.lane.b32.xlu1 %v7683_v55, %s8387_s6 }
 0x8d6   : > { %4167 = vrot.lane.b32.xlu0 %v7689_v60, %s8387_s6 }
 0x8d8   : > { %4169 = vrot.lane.b32.xlu1 %v7695_v61, %s8387_s6 }
 0x8da   : > { %4171 = vrot.lane.b32.xlu0 %v7701_v4, %s8387_s6 }
 0x8dc   : > { %4307 = vrot.lane.b32.xlu1 %v7683_v55, %s8388_s28 }
 0x8de   : > { %4309 = vrot.lane.b32.xlu0 %v7689_v60, %s8388_s28 }
 0x8e0   : > { %4311 = vrot.lane.b32.xlu1 %v7695_v61, %s8388_s28 }
 0x8e2   : > { %4313 = vrot.lane.b32.xlu0 %v7701_v4, %s8388_s28 }
 0x8e4   : > { %4774 = vrot.lane.b32.xlu1 %v7134_v15, %s8390_s2 }
 0x8e6   : > { %4776 = vrot.lane.b32.xlu0 %v7136_v37, %s8390_s2 }
 0x8e8   : > { %4555 = vrot.lane.b32.xlu1 %v7683_v55, %s8389_s22 }
 0x8ea   : > { %4918 = vrot.lane.b32.xlu0 %v7136_v37, %s8383_s7 }
 0x8ec   : > { %4559 = vrot.lane.b32.xlu1 %v7695_v61, %s8389_s22 }
 0x8ee   : > { %4557 = vrot.lane.b32.xlu0 %v7689_v60, %s8389_s22 }
 0x8f0   : > { %4697 = vrot.lane.b32.xlu1 %v7683_v55, %s8390_s2 }
 0x8f2   : > { %4561 = vrot.lane.b32.xlu0 %v7701_v4, %s8389_s22 }
 0x8f4   : > { %4701 = vrot.lane.b32.xlu1 %v7695_v61, %s8390_s2 }
 0x8f6   : > { %4699 = vrot.lane.b32.xlu0 %v7689_v60, %s8390_s2 }
 0x8f8   : > { %4839 = vrot.lane.b32.xlu1 %v7683_v55, %s8383_s7 }
 0x8fa   : > { %4703 = vrot.lane.b32.xlu0 %v7701_v4, %s8390_s2 }
 0x8fc   : > { %4843 = vrot.lane.b32.xlu1 %v7695_v61, %s8383_s7 }
 0x8fe   : > { %4841 = vrot.lane.b32.xlu0 %v7689_v60, %s8383_s7 }
 0x900   : > { %4916 = vrot.lane.b32.xlu1 %v7134_v15, %s8383_s7 }
 0x902   : > { %4845 = vrot.lane.b32.xlu0 %v7701_v4, %s8383_s7 }
 0x904   : > { %4981 = vrot.lane.b32.xlu1 %v7683_v55, %s8385_s27 }
 0x906   : > { %4983 = vrot.lane.b32.xlu0 %v7689_v60, %s8385_s27 }
 0x908   : > { %4985 = vrot.lane.b32.xlu1 %v7695_v61, %s8385_s27 }
 0x90a   : > { %4987 = vrot.lane.b32.xlu0 %v7701_v4, %s8385_s27 }
 0x90c   : > { %5058 = vrot.lane.b32.xlu1 %v7134_v15, %s8385_s27 }
 0x90e   : > { %5060 = vrot.lane.b32.xlu0 %v7136_v37, %s8385_s27 }
 0x910   : > { %5125 = vperm.xlu1 %6313, %v5122_v49  }
 0x936   : > { %v3888_v5 = vpop.permute.xlu1 %3887 }
 0x938   : > { %v3890_v19 = vpop.permute.xlu0 %3889 }
 0x93a   : > { %v3892_v56 = vpop.permute.xlu1 %3891 }
 0x93b   : > { %v3895_v31 = vsel %vm822_vm4, %v3888_v5, %v3892_v56  ;;  %v3897_v58 = vsel %vm822_vm4, %v3892_v56, %v3888_v5  ;;  %v4389_v56 = vsel %vm1148_vm7, %v7787_v0, %v7785_v35  ;;  %v6136_v35 = vld [vmem:[%s8311_s15 + $0x4] sm:$0xf] }
 0x93c   : > { %v3894_v43 = vpop.permute.xlu0 %3893  ;;  %v3910_v54 = vmul.f32 %v7678_v18, %v3897_v58  ;;  %v3911_v63 = vmul.f32 %v7681_v1, %v3895_v31  ;;  %v4391_v31 = vmul.f32 %v4388_v22, %v7846_v47  ;;  %v4252_v58 = vpack.c.bf16 %v4248_v8, %v4248_v8  ;;  %v6142_v8 = vld [vmem:[%s8311_s15 + $0x8] sm:$0xf] }
 0x93d   : > { %v3896_v38 = vsel %vm822_vm4, %v3890_v19, %v3894_v43  ;;  %v3898_v25 = vsel %vm822_vm4, %v3894_v43, %v3890_v19  ;;  %v7865_v19 = vrot.slane %v6145_v32, %v6579_v13 }
 0x93e   : > { %v3912_v6 = vmul.f32 %v7678_v18, %v3898_v25  ;;  %v3913_v28 = vmul.f32 %v7681_v1, %v3896_v38  ;;  %v4024_v36 = vpop.permute.xlu1 %4023  ;;  %v4395_v25 = vpack.c.bf16 %v4391_v31, %v4391_v31 }
 0x93f   : > { %v4390_v0 = vmul.f32 %v4389_v56, %v7865_v19 }
 0x940   : > { %v3915_v16 = vpack.c.bf16 %v3912_v6, %v3910_v54  ;;  %v4026_v20 = vpop.permute.xlu0 %4025  ;;  %v3916_v62 = vpack.c.bf16 %v3913_v28, %v3911_v63 }
 0x941   : > { %v4394_v32 = vpack.c.bf16 %v4390_v0, %v4390_v0  ;;  %v6148_v0 = vld [vmem:[%s8311_s15 + $0xc] sm:$0xf] }
 0x942   : > { %v4028_v26 = vpop.permute.xlu1 %4027  ;;  %3981 = vmatprep.subr.bf16.mxu1 %v3916_v62 }
 0x943   : > { %v4031_v27 = vsel %vm936_vm3, %v4024_v36, %v4028_v26  ;;  %v4033_v45 = vsel %vm936_vm3, %v4028_v26, %v4024_v36  ;;  %3982 = vmatpush1.bf16.msra.mxu1 %v3915_v16 }
 0x944   : > { %6137 = vmatprep.subr.msk.bf16.mxu1 %vm1785_vm15, %v4111_v23  ;;  %v4030_v33 = vpop.permute.xlu0 %4029  ;;  %v4046_v41 = vmul.f32 %v7797_v3, %v4033_v45  ;;  %v4047_v17 = vmul.f32 %v7800_v42, %v4031_v27  ;;  %v6156_v23 = vld [vmem:[%s8380_s0 + $0x5] ss:$8 sm:$0x3] }
 0x945   : > { %v4032_v49 = vsel %vm936_vm3, %v4026_v20, %v4030_v33  ;;  %v4034_v53 = vsel %vm936_vm3, %v4030_v33, %v4026_v20  ;;  %v4258_v20 = vsel %vm1785_vm15, %v4252_v58, 0  ;;  %v7935_v56 = vrot.slane %v6156_v23, %v6579_v13  ;;  %v6162_v58 = vld [vmem:[%s8380_s0 + $0x6] ss:$8 sm:$0x3] }
 0x946   : > { %v4048_v44 = vmul.f32 %v7797_v3, %v4034_v53  ;;  %v4049_v24 = vmul.f32 %v7800_v42, %v4032_v49  ;;  %v4166_v5 = vpop.permute.xlu1 %4165  ;;  %6132 = vmatmul.mubr.msk.bf16.vlgmr.msra.gmra.mrb[40].mxu1 %vm3177_vm1, %v3914_v12  ;;  %v6140_v12 = vld [vmem:[%s8310_s14 + $0x8] sm:$0xf] }
 0x947   : > { %4122 = vmatpush1.bf16.msra.mxu1 %v4116_v40  ;;  %4153 = vmatprep.mubr.bf16.mxu1 %v6372_v2  ;;  %v4501_v40 = vpack.c.bf16 %v7136_v37, %v7136_v37  ;;  %v4400_v37 = vsel %vm1785_vm15, %v4394_v32, 0 }
 0x948   : > { %v4052_v50 = vpack.c.bf16 %v4048_v44, %v4046_v41  ;;  %6143 = vmatprep.subr.msk.bf16.mxu1 %vm1785_vm15, %v4253_v51  ;;  %v4168_v46 = vpop.permute.xlu0 %4167  ;;  %v4053_v14 = vpack.c.bf16 %v4049_v24, %v4047_v17  ;;  %v7914_v51 = vrot.slane %v6156_v23, %v6601_v30 }
 0x94a   : > { %v4170_v59 = vpop.permute.xlu1 %4169  ;;  %4057 = vmatprep.subr.bf16.mxu0 %v4053_v14 }
 0x94b   : > { %v4173_v43 = vsel %vm1042_vm6, %v4166_v5, %v4170_v59  ;;  %v4175_v48 = vsel %vm1042_vm6, %v4170_v59, %v4166_v5  ;;  %4058 = vmatpush1.bf16.msra.mxu0 %v4052_v50  ;;  %v4637_v5 = vsel %vm1330_vm9, %v7791_v10, %v7789_v34 }
 0x94c   : > { %v4172_v38 = vpop.permute.xlu0 %4171  ;;  %v4188_v54 = vmul.f32 %v7829_v11, %v4175_v48  ;;  %v4189_v28 = vmul.f32 %v7815_v39, %v4173_v43  ;;  %v4639_v31 = vmul.f32 %v4637_v5, %v7914_v51  ;;  %v4451_v43 = vpack.c.bf16 %v7701_v4, %v7695_v61 }
 0x94d   : > { %v4174_v63 = vsel %vm1042_vm6, %v4168_v46, %v4172_v38  ;;  %v4176_v6 = vsel %vm1042_vm6, %v4172_v38, %v4168_v46  ;;  %v4500_v48 = vpack.c.bf16 %v7134_v15, %v7134_v15  ;;  %v7958_v61 = vrot.slane %v6162_v58, %v6601_v30 }
 0x94e   : > { %v4190_v36 = vmul.f32 %v7829_v11, %v4176_v6  ;;  %v4191_v7 = vmul.f32 %v7815_v39, %v4174_v63  ;;  %v4308_v16 = vpop.permute.xlu1 %4307  ;;  %6135 = vmatmul.mubr.msk.bf16.vlgmr.msra.gmra.mrb[44].mxu0 %vm3177_vm1, %v6134_v9  ;;  %6138 = vmatmul.mubr.msk.bf16.vlgmr.msra.gmra.mrb[44].mxu1 %vm1781_vm0, %v6136_v35  ;;  %v4636_v9 = vsel %vm1330_vm9, %v7789_v34, %v7791_v10  ;;  %v6146_v35 = vld [vmem:[%s8310_s14 + $0xc] sm:$0xf] }
 0x94f   : > { %4264 = vmatpush1.bf16.msra.mxu1 %v4258_v20  ;;  %4231 = vmatprep.mubr.bf16.mxu0 %v6372_v2  ;;  %v4638_v15 = vmul.f32 %v4636_v9, %v7935_v56  ;;  %v4643_v4 = vpack.c.bf16 %v4639_v31, %v4639_v31 }
 0x950   : > { %v4194_v62 = vpack.c.bf16 %v4190_v36, %v4188_v54  ;;  %6149 = vmatprep.subr.msk.bf16.mxu1 %vm1785_vm15, %v4395_v25  ;;  %v4310_v57 = vpop.permute.xlu0 %4309  ;;  %v4195_v21 = vpack.c.bf16 %v4191_v7, %v4189_v28  ;;  %4295 = vmatprep.mubr.bf16.mxu1 %v6372_v2  ;;  %v4506_v25 = vsel %vm1785_vm15, %v4500_v48, 0  ;;  %v7970_v54 = vrot.slane %v6162_v58, %v6579_v13  ;;  %v6151_v7 = vld [vmem:[%s8310_s14 + $0x10] sm:$0xf] }
 0x951   : > { %v4642_v36 = vpack.c.bf16 %v4638_v15, %v4638_v15 }
 0x952   : > { %v4312_v26 = vpop.permute.xlu1 %4311  ;;  %4199 = vmatprep.subr.bf16.mxu0 %v4195_v21 }
 0x953   : > { %v4315_v27 = vsel %vm1148_vm7, %v4308_v16, %v4312_v26  ;;  %v4317_v45 = vsel %vm1148_vm7, %v4312_v26, %v4308_v16  ;;  %4200 = vmatpush1.bf16.msra.mxu0 %v4194_v62  ;;  %v6153_v16 = vld [vmem:[%s8311_s15 + $0x10] sm:$0xf] }
 0x954   : > { %v4314_v33 = vpop.permute.xlu0 %4313  ;;  %v4330_v22 = vmul.f32 %v7865_v19, %v4317_v45  ;;  %v4331_v41 = vmul.f32 %v7846_v47, %v4315_v27 }
 0x955   : > { %v4316_v49 = vsel %vm1148_vm7, %v4310_v57, %v4314_v33  ;;  %v4318_v53 = vsel %vm1148_vm7, %v4314_v33, %v4310_v57 }
 0x956   : > { %v4332_v17 = vmul.f32 %v7865_v19, %v4318_v53  ;;  %v4333_v44 = vmul.f32 %v7846_v47, %v4316_v49  ;;  %v4775_v24 = vpop.permute.xlu1 %4774  ;;  %6141 = vmatmul.mubr.msk.bf16.vlgmr.msra.gmra.mrb[48].mxu0 %vm3177_vm1, %v6140_v12  ;;  %6144 = vmatmul.mubr.msk.bf16.vlgmr.msra.gmra.mrb[48].mxu1 %vm1781_vm0, %v6142_v8  ;;  %v4648_v8 = vsel %vm1785_vm15, %v4642_v36, 0 }
 0x957   : > { %4406 = vmatpush1.bf16.msra.mxu1 %v4400_v37  ;;  %4373 = vmatprep.mubr.bf16.mxu0 %v6372_v2 }
 0x958   : > { %v4336_v50 = vpack.c.bf16 %v4332_v17, %v4330_v22  ;;  %6154 = vmatprep.subr.msk.bf16.mxu1 %vm1785_vm15, %v4501_v40  ;;  %v4777_v46 = vpop.permute.xlu0 %4776  ;;  %v4337_v14 = vpack.c.bf16 %v4333_v44, %v4331_v41  ;;  %4437 = vmatprep.mubr.bf16.mxu1 %v6372_v2  ;;  %v6157_v44 = vld [vmem:[%s8310_s14 + $0x14] sm:$0xf] }
 0x959   : > { %v4779_v34 = vsel %vm1436_vm10, %v4777_v46, %v4775_v24  ;;  %v4778_v6 = vsel %vm1436_vm10, %v4775_v24, %v4777_v46  ;;  %v6159_v24 = vld [vmem:[%s8311_s15 + $0x14] sm:$0xf] }
 0x95a   : > { %v4556_v59 = vpop.permute.xlu1 %4555  ;;  %4341 = vmatprep.subr.bf16.mxu0 %v4337_v14  ;;  %v4781_v28 = vmul.f32 %v4779_v34, %v7958_v61  ;;  %v4780_v20 = vmul.f32 %v4778_v6, %v7970_v54 }
 0x95b   : > { %4342 = vmatpush1.bf16.msra.mxu0 %v4336_v50 }
 0x95c   : > { %4455 = vmatprep.subr.bf16.mxu0 %v4451_v43  ;;  %v7955_v38 = vpop.permute.xlu0 %4918  ;;  %v4785_v57 = vpack.c.bf16 %v4781_v28, %v4781_v28  ;;  %v4784_v49 = vpack.c.bf16 %v4780_v20, %v4780_v20  ;;  %v6163_v28 = vld [vmem:[%s8310_s14 + $0x18] sm:$0xf] }
 0x95e   : > { %v4560_v10 = vpop.permute.xlu1 %4559  ;;  %6147 = vmatmul.mubr.msk.bf16.vlgmr.msra.gmra.mrb[52].mxu0 %vm3177_vm1, %v6146_v35  ;;  %6150 = vmatmul.mubr.msk.bf16.vlgmr.msra.gmra.mrb[52].mxu1 %vm1781_vm0, %v6148_v0  ;;  %v4790_v48 = vsel %vm1785_vm15, %v4784_v49, 0 }
 0x95f   : > { %4512 = vmatpush1.bf16.msra.mxu1 %v4506_v25  ;;  %4456 = vmatpush1.bf16.msra.mxu0 %v4450_v52  ;;  %v4563_v55 = vsel %vm1330_vm9, %v4556_v59, %v4560_v10  ;;  %v4565_v52 = vsel %vm1330_vm9, %v4560_v10, %v4556_v59  ;;  %v6168_v59 = vld [vmem:[%s8380_s0 + $0x7] ss:$8 sm:$0x3] }
 0x960   : > { %6160 = vmatprep.subr.msk.bf16.mxu1 %vm1785_vm15, %v4643_v4  ;;  %v4558_v63 = vpop.permute.xlu0 %4557  ;;  %4487 = vmatprep.mubr.bf16.mxu0 %v6372_v2  ;;  %v4578_v21 = vmul.f32 %v7935_v56, %v4563_v55  ;;  %v4579_v26 = vmul.f32 %v7914_v51, %v4565_v52  ;;  %v8030_v15 = vrot.slane %v6168_v59, %v6579_v13  ;;  %v6165_v52 = vld [vmem:[%s8311_s15 + $0x18] sm:$0xf] }
 0x961   : > { %4543 = vmatprep.mubr.bf16.mxu1 %v6372_v2  ;;  %v8033_v4 = vrot.slane %v6168_v59, %v6601_v30 }
 0x962   : > { %v4698_v60 = vpop.permute.xlu1 %4697 }
 0x964   : > { %v4562_v62 = vpop.permute.xlu0 %4561 }
 0x965   : > { %v4564_v32 = vsel %vm1330_vm9, %v4558_v63, %v4562_v62  ;;  %v4566_v23 = vsel %vm1330_vm9, %v4562_v62, %v4558_v63 }
 0x966   : > { %v4580_v27 = vmul.f32 %v7935_v56, %v4564_v32  ;;  %v4581_v45 = vmul.f32 %v7914_v51, %v4566_v23  ;;  %v4702_v12 = vpop.permute.xlu1 %4701  ;;  %6152 = vmatmul.mubr.msk.bf16.vlgmr.msra.gmra.mrb[56].mxu0 %vm3177_vm1, %v6151_v7  ;;  %6155 = vmatmul.mubr.msk.bf16.vlgmr.msra.gmra.mrb[56].mxu1 %vm1781_vm0, %v6153_v16 }
 0x967   : > { %4654 = vmatpush1.bf16.msra.mxu1 %v4648_v8  ;;  %4621 = vmatprep.mubr.bf16.mxu0 %v6372_v2  ;;  %v4705_v53 = vsel %vm1436_vm10, %v4698_v60, %v4702_v12  ;;  %v4707_v17 = vsel %vm1436_vm10, %v4702_v12, %v4698_v60 }
 0x968   : > { %v4584_v33 = vpack.c.bf16 %v4580_v27, %v4578_v21  ;;  %6166 = vmatprep.subr.msk.bf16.mxu1 %vm1785_vm15, %v4785_v57  ;;  %v4700_v40 = vpop.permute.xlu0 %4699  ;;  %v4585_v22 = vpack.c.bf16 %v4581_v45, %v4579_v26  ;;  %4685 = vmatprep.mubr.bf16.mxu1 %v6372_v2  ;;  %v4720_v5 = vmul.f32 %v7970_v54, %v4705_v53  ;;  %v6174_v26 = vld [vmem:[%s8380_s0 + $0x10] ss:$8 sm:$0x3] }
 0x969   : > { %v4721_v14 = vmul.f32 %v7958_v61, %v4707_v17 }
 0x96a   : > { %v4840_v41 = vpop.permute.xlu1 %4839  ;;  %4589 = vmatprep.subr.bf16.mxu0 %v4585_v22 }
 0x96b   : > { %4590 = vmatpush1.bf16.msra.mxu0 %v4584_v33  ;;  %v8071_v33 = vrot.slane %v6174_v26, %v6579_v13  ;;  %v6171_v13 = vld [vmem:[%s8311_s15 + $0x1c] sm:$0xf] }
 0x96c   : > { %v4704_v37 = vpop.permute.xlu0 %4703 }
 0x96d   : > { %v4706_v50 = vsel %vm1436_vm10, %v4700_v40, %v4704_v37  ;;  %v4708_v46 = vsel %vm1436_vm10, %v4704_v37, %v4700_v40  ;;  %v8074_v40 = vrot.slane %v6174_v26, %v6601_v30 }
 0x96e   : > { %v4722_v31 = vmul.f32 %v7970_v54, %v4706_v50  ;;  %v4723_v58 = vmul.f32 %v7958_v61, %v4708_v46  ;;  %v4844_v43 = vpop.permute.xlu1 %4843  ;;  %6158 = vmatmul.mubr.msk.bf16.vlgmr.msra.gmra.mrb[60].mxu0 %vm3177_vm1, %v6157_v44  ;;  %6161 = vmatmul.mubr.msk.bf16.vlgmr.msra.gmra.mrb[60].mxu1 %vm1781_vm0, %v6159_v24 }
 0x96f   : > { %4796 = vmatpush1.bf16.msra.mxu1 %v4790_v48  ;;  %4763 = vmatprep.mubr.bf16.mxu0 %v6372_v2  ;;  %v4847_v34 = vsel %vm8403_vm2, %v4840_v41, %v4844_v43  ;;  %v4849_v10 = vsel %vm8404_vm5, %v4844_v43, %v4840_v41  ;;  %vm8410_vm2 = vmmov %vm8409_vm14  ;;  %v6169_v41 = vld [vmem:[%s8310_s14 + $0x1c] sm:$0xf] }
 0x970   : > { %v4726_v9 = vpack.c.bf16 %v4722_v31, %v4720_v5  ;;  %v4842_v35 = vpop.permute.xlu0 %4841  ;;  %v4727_v0 = vpack.c.bf16 %v4723_v58, %v4721_v14  ;;  %4827 = vmatprep.mubr.bf16.mxu1 %v6372_v2  ;;  %v4862_v7 = vmul.f32 %v8030_v15, %v4847_v34  ;;  %v4863_v16 = vmul.f32 %v8033_v4, %v4849_v10  ;;  %vm8411_vm5 = vmmov %vm8410_vm2 }
 0x972   : > { %v4917_v25 = vpop.permute.xlu1 %4916  ;;  %4731 = vmatprep.subr.bf16.mxu0 %v4727_v0 }
 0x973   : > { %v4920_v63 = vsel %vm8405_vm11, %v4917_v25, %v7955_v38  ;;  %v4921_v6 = vsel %vm8406_vm12, %v7955_v38, %v4917_v25  ;;  %4732 = vmatpush1.bf16.msra.mxu0 %v4726_v9  ;;  %vm8412_vm11 = vmmov %vm8410_vm2  ;;  %v6177_v25 = vld [vmem:[%s8311_s15 + $0x20] sm:$0xf] }
 0x974   : > { %v4922_v36 = vmul.f32 %v4920_v63, %v8030_v15  ;;  %v4923_v55 = vmul.f32 %v4921_v6, %v8033_v4  ;;  %v4846_v60 = vpop.permute.xlu0 %4845  ;;  %vm8413_vm12 = vmmov %vm8410_vm2 }
 0x975   : > { %v4848_v38 = vsel %vm8407_vm8, %v4842_v35, %v4846_v60  ;;  %v4850_v20 = vsel %vm8408_vm13, %v4846_v60, %v4842_v35  ;;  %vm8414_vm8 = vmmov %vm8410_vm2  ;;  %v6175_v35 = vld [vmem:[%s8310_s14 + $0x20] sm:$0xf] }
 0x976   : > { %v4926_v62 = vpack.c.bf16 %v4922_v36, %v4922_v36  ;;  %v4927_v57 = vpack.c.bf16 %v4923_v55, %v4923_v55  ;;  %v4864_v21 = vmul.f32 %v8030_v15, %v4848_v38  ;;  %v4865_v32 = vmul.f32 %v8033_v4, %v4850_v20  ;;  %v4982_v23 = vpop.permute.xlu1 %4981  ;;  %6164 = vmatmul.mubr.msk.bf16.vlgmr.msra.gmra.mrb[64].mxu0 %vm3177_vm1, %v6163_v28 }
 0x977   : > { %6167 = vmatmul.mubr.msk.bf16.vlgmr.msra.gmra.mrb[64].mxu1 %vm1781_vm0, %v6165_v52  ;;  %4905 = vmatprep.mubr.bf16.mxu0 %v6372_v2 }
 0x978   : > { %v4868_v27 = vpack.c.bf16 %v4864_v21, %v4862_v7  ;;  %v4984_v45 = vpop.permute.xlu0 %4983  ;;  %6172 = vmatprep.subr.msk.bf16.mxu1 %vm1785_vm15, %v4927_v57  ;;  %v4932_v12 = vsel %vm1785_vm15, %v4926_v62, 0  ;;  %v4869_v8 = vpack.c.bf16 %v4865_v32, %v4863_v16  ;;  %4969 = vmatprep.mubr.bf16.mxu1 %v6372_v2 }
 0x979   : > { %4938 = vmatpush1.bf16.msra.mxu1 %v4932_v12 }
 0x97a   : > { %v4986_v22 = vpop.permute.xlu1 %4985  ;;  %4873 = vmatprep.subr.bf16.mxu0 %v4869_v8 }
 0x97b   : > { %v4989_v49 = vsel %vm8409_vm14, %v4982_v23, %v4986_v22  ;;  %v4991_v53 = vsel %vm8410_vm2, %v4986_v22, %v4982_v23  ;;  %4874 = vmatpush1.bf16.msra.mxu0 %v4868_v27  ;;  %vm8422_vm14 = vcmask 1040384  }
 0x97c   : > { %v4988_v17 = vpop.permute.xlu0 %4987  ;;  %v5004_v24 = vmul.f32 %v8071_v33, %v4989_v49  ;;  %v5005_v37 = vmul.f32 %v8074_v40, %v4991_v53 }
 0x97d   : > { %v4990_v30 = vsel %vm8411_vm5, %v4984_v45, %v4988_v17  ;;  %v4992_v44 = vsel %vm8412_vm11, %v4988_v17, %v4984_v45 }
 0x97e   : > { %v5006_v5 = vmul.f32 %v8071_v33, %v4990_v30  ;;  %v5007_v50 = vmul.f32 %v8074_v40, %v4992_v44  ;;  %6170 = vmatmul.mubr.msk.bf16.vlgmr.msra.gmra.mrb[68].mxu0 %vm3177_vm1, %v6169_v41  ;;  %v5059_v14 = vpop.permute.xlu1 %5058 }
 0x97f   : > { %6173 = vmatmul.mubr.msk.bf16.vlgmr.msra.gmra.mrb[68].mxu1 %vm1781_vm0, %v6171_v13  ;;  %5047 = vmatprep.mubr.bf16.mxu0 %v6372_v2 }
 0x980   : > { %v5010_v46 = vpack.c.bf16 %v5006_v5, %v5004_v24  ;;  %v5061_v31 = vpop.permute.xlu0 %5060  ;;  %v5011_v58 = vpack.c.bf16 %v5007_v50, %v5005_v37  ;;  %5111 = vmatprep.mubr.bf16.mxu1 %v6372_v2 }
 0x981   : > { %v5062_v59 = vsel %vm8413_vm12, %v5059_v14, %v5061_v31  ;;  %v5063_v43 = vsel %vm8414_vm8, %v5061_v31, %v5059_v14 }
 0x982   : > { %v5064_v48 = vmul.f32 %v5062_v59, %v8071_v33  ;;  %v5065_v9 = vmul.f32 %v5063_v43, %v8074_v40  ;;  %5015 = vmatprep.subr.bf16.mxu0 %v5011_v58 }
 0x983   : > { %5016 = vmatpush1.bf16.msra.mxu0 %v5010_v46 }
 0x984   : > { %v5068_v0 = vpack.c.bf16 %v5064_v48, %v5064_v48  ;;  %v5069_v34 = vpack.c.bf16 %v5065_v9, %v5065_v9 }
 0x986   : > { %6176 = vmatmul.mubr.msk.bf16.vlgmr.msra.gmra.mrb[72].mxu0 %vm3177_vm1, %v6175_v35  ;;  %6178 = vmatprep.subr.msk.bf16.mxu1 %vm1785_vm15, %v5069_v34  ;;  %v5074_v10 = vsel %vm1785_vm15, %v5068_v0, 0 }
 0x987   : > { %5080 = vmatpush1.bf16.msra.mxu1 %v5074_v10  ;;  %5196 = vmatprep.mubr.bf16.mxu0 %v6372_v2 }
 0x98a   : > { %6179 = vmatmul.mubr.msk.bf16.vlgmr.msra.gmra.mrb[72].mxu1 %vm1781_vm0, %v6177_v25 }
 0x98b   : > { %5246 = vmatprep.mubr.bf16.mxu1 %v6372_v2 }
 0x99f   : > { %v3971_v63 = vpop.f32.mrb[40].mxu0 }
 0x9a0   : > { %v3973_v6 = vpop.f32.mrb[41].mxu0 }
 0x9a1   : > { %v3975_v28 = vpop.f32.mrb[42].mxu0 }
 0x9a2   : > { %v3976_v36 = vpop.f32.mrb[43].mxu0 }
 0xa19   : > { %v4015_v55 = vpop.f32.mrb[40].mxu1 }
 0xa1a   : > { %v4016_v60 = vadd.f32 %v4015_v55, %v3971_v63  ;;  %v4017_v52 = vpop.f32.mrb[41].mxu1 }
 0xa1b   : > { %v4018_v7 = vadd.f32 %v4017_v52, %v3973_v6  ;;  %v4019_v16 = vpop.f32.mrb[42].mxu1 }
 0xa1c   : > { %v4020_v38 = vpop.f32.mrb[43].mxu1 }
 0xa21   : > { %v4091_v20 = vpop.f32.mrb[44].mxu0  ;;  %v4155_v62 = vpop.f32.mrb[44].mxu1 }
 0xa22   : > { %v4098_v57 = vadd.f32 %v4091_v20, %v4016_v60  ;;  %v4093_v21 = vpop.f32.mrb[45].mxu0  ;;  %v4157_v32 = vpop.f32.mrb[45].mxu1 }
 0xa23   : > { %v4099_v23 = vadd.f32 %v4093_v21, %v4018_v7  ;;  %v4095_v26 = vpop.f32.mrb[46].mxu0  ;;  %v4159_v27 = vpop.f32.mrb[46].mxu1 }
 0xa24   : > { %v4162_v45 = vadd.f32 %v4155_v62, %v4098_v57  ;;  %v4096_v12 = vpop.f32.mrb[47].mxu0  ;;  %v4160_v8 = vpop.f32.mrb[47].mxu1 }
 0xa25   : > { %v4163_v22 = vadd.f32 %v4157_v32, %v4099_v23 }
 0xa29   : > { %v4233_v49 = vpop.f32.mrb[48].mxu0  ;;  %v4297_v53 = vpop.f32.mrb[48].mxu1 }
 0xa2a   : > { %v4240_v41 = vadd.f32 %v4233_v49, %v4162_v45  ;;  %v4235_v17 = vpop.f32.mrb[49].mxu0  ;;  %v4299_v13 = vpop.f32.mrb[49].mxu1 }
 0xa2b   : > { %v4241_v30 = vadd.f32 %v4235_v17, %v4163_v22  ;;  %v4237_v44 = vpop.f32.mrb[50].mxu0  ;;  %v4301_v24 = vpop.f32.mrb[50].mxu1 }
 0xa2c   : > { %v4304_v37 = vadd.f32 %v4297_v53, %v4240_v41  ;;  %v4238_v5 = vpop.f32.mrb[51].mxu0  ;;  %v4302_v50 = vpop.f32.mrb[51].mxu1 }
 0xa2d   : > { %v4305_v46 = vadd.f32 %v4299_v13, %v4241_v30 }
 0xa31   : > { %v4375_v14 = vpop.f32.mrb[52].mxu0  ;;  %v4439_v31 = vpop.f32.mrb[52].mxu1 }
 0xa32   : > { %v4382_v58 = vadd.f32 %v4375_v14, %v4304_v37  ;;  %v4377_v59 = vpop.f32.mrb[53].mxu0  ;;  %v4441_v43 = vpop.f32.mrb[53].mxu1 }
 0xa33   : > { %v4383_v48 = vadd.f32 %v4377_v59, %v4305_v46  ;;  %v4379_v9 = vpop.f32.mrb[54].mxu0  ;;  %v4443_v35 = vpop.f32.mrb[54].mxu1 }
 0xa34   : > { %v4446_v0 = vadd.f32 %v4439_v31, %v4382_v58  ;;  %v4380_v34 = vpop.f32.mrb[55].mxu0  ;;  %v4444_v10 = vpop.f32.mrb[55].mxu1 }
 0xa35   : > { %v4447_v25 = vadd.f32 %v4441_v43, %v4383_v48 }
 0xa39   : > { %v4489_v63 = vpop.f32.mrb[56].mxu0  ;;  %v4545_v6 = vpop.f32.mrb[56].mxu1 }
 0xa3a   : > { %v4496_v28 = vadd.f32 %v4489_v63, %v4446_v0  ;;  %v4491_v36 = vpop.f32.mrb[57].mxu0  ;;  %v4547_v55 = vpop.f32.mrb[57].mxu1 }
 0xa3b   : > { %v4497_v60 = vadd.f32 %v4491_v36, %v4447_v25  ;;  %v4493_v52 = vpop.f32.mrb[58].mxu0  ;;  %v4549_v7 = vpop.f32.mrb[58].mxu1 }
 0xa3c   : > { %v4552_v16 = vadd.f32 %v4545_v6, %v4496_v28  ;;  %v4494_v38 = vpop.f32.mrb[59].mxu0  ;;  %v4550_v20 = vpop.f32.mrb[59].mxu1 }
 0xa3d   : > { %v4553_v62 = vadd.f32 %v4547_v55, %v4497_v60 }
 0xa41   : > { %v4623_v57 = vpop.f32.mrb[60].mxu0  ;;  %v4687_v21 = vpop.f32.mrb[60].mxu1 }
 0xa42   : > { %v4630_v32 = vadd.f32 %v4623_v57, %v4552_v16  ;;  %v4625_v23 = vpop.f32.mrb[61].mxu0  ;;  %v4689_v26 = vpop.f32.mrb[61].mxu1 }
 0xa43   : > { %v4631_v27 = vadd.f32 %v4625_v23, %v4553_v62  ;;  %v4627_v45 = vpop.f32.mrb[62].mxu0  ;;  %v4691_v12 = vpop.f32.mrb[62].mxu1 }
 0xa44   : > { %v4694_v8 = vadd.f32 %v4687_v21, %v4630_v32  ;;  %v4628_v22 = vpop.f32.mrb[63].mxu0  ;;  %v4692_v49 = vpop.f32.mrb[63].mxu1  ;;  %v5695_v12 = vld [vmem:[%s8314_s18] sm:$0xff] }
 0xa45   : > { %v4695_v53 = vadd.f32 %v4689_v26, %v4631_v27  ;;  %v5126_v62 = vpop.permute.xlu1 %5125 }
 0xa49   : > { %v4765_v41 = vpop.f32.mrb[64].mxu0 }
 0xa4a   : > { %v4772_v17 = vadd.f32 %v4765_v41, %v4694_v8  ;;  %v4767_v13 = vpop.f32.mrb[65].mxu0  ;;  %v4829_v30 = vpop.f32.mrb[64].mxu1  ;;  %v5708_v8 = vld [vmem:[%s8316_s20] sm:$0x3] }
 0xa4b   : > { %v4773_v44 = vadd.f32 %v4767_v13, %v4695_v53  ;;  %v4769_v24 = vpop.f32.mrb[66].mxu0  ;;  %v4831_v37 = vpop.f32.mrb[65].mxu1 }
 0xa4c   : > { %v4836_v5 = vadd.f32 %v4829_v30, %v4772_v17  ;;  %v4770_v50 = vpop.f32.mrb[67].mxu0  ;;  %v4833_v46 = vpop.f32.mrb[66].mxu1 }
 0xa4d   : > { %v4837_v14 = vadd.f32 %v4831_v37, %v4773_v44  ;;  %v4834_v31 = vpop.f32.mrb[67].mxu1 }
 0xa51   : > { %v4907_v58 = vpop.f32.mrb[68].mxu0 }
 0xa52   : > { %v4914_v59 = vadd.f32 %v4907_v58, %v4836_v5  ;;  %v4909_v43 = vpop.f32.mrb[69].mxu0  ;;  %v4971_v48 = vpop.f32.mrb[68].mxu1 }
 0xa53   : > { %v4915_v9 = vadd.f32 %v4909_v43, %v4837_v14  ;;  %v4911_v35 = vpop.f32.mrb[70].mxu0  ;;  %v4973_v0 = vpop.f32.mrb[69].mxu1 }
 0xa54   : > { %v4978_v34 = vadd.f32 %v4971_v48, %v4914_v59  ;;  %v4912_v10 = vpop.f32.mrb[71].mxu0  ;;  %v4975_v25 = vpop.f32.mrb[70].mxu1 }
 0xa55   : > { %v4979_v63 = vadd.f32 %v4973_v0, %v4915_v9  ;;  %v4976_v6 = vpop.f32.mrb[71].mxu1 }
 0xa59   : > { %v5049_v28 = vpop.f32.mrb[72].mxu0 }
 0xa5a   : > { %v5056_v36 = vadd.f32 %v5049_v28, %v4978_v34  ;;  %v5051_v55 = vpop.f32.mrb[73].mxu0  ;;  %v5140_v34 = vld [vmem:[%s8313_s17] sm:$0xf] }
 0xa5b   : > { %v5057_v60 = vadd.f32 %v5051_v55, %v4979_v63  ;;  %v5053_v52 = vpop.f32.mrb[74].mxu0 }
 0xa5c   : > { %v5054_v7 = vpop.f32.mrb[75].mxu0 }
 0xa5d   : > { %v5113_v16 = vpop.f32.mrb[72].mxu1  ;;  %v6185_v7 = vld [vmem:[%s8313_s17 + $0x8] sm:$0xf] }
 0xa5e   : > { %v5120_v38 = vadd.f32 %v5113_v16, %v5056_v36  ;;  %v5115_v20 = vpop.f32.mrb[73].mxu1 }
 0xa5f   : > { %v5121_v57 = vadd.f32 %v5115_v20, %v5057_v60  ;;  %v5117_v21 = vpop.f32.mrb[74].mxu1 }
 0xa60   : > { %v5128_v32 = vadd.f32 %v5126_v62, %v5120_v38  ;;  %v5118_v23 = vpop.f32.mrb[75].mxu1 }
 0xa61   : > { %v5129_v26 = vadd.f32 %v5126_v62, %v5121_v57 }
 0xa62   : > { %v8116_v27 = vmax.f32 %v5128_v32, 0.0 }
 0xa63   : > { %v8118_v45 = vmax.f32 %v5129_v26, 0.0  ;;  %v6188_v26 = vld [vmem:[%s8313_s17 + $0xc] sm:$0xf] }
 0xa64   : > { %5143 = vrot.lane.b32.xlu0 %v8116_v27, %s8384_s1  ;;  %v5385_v6 = vpack.c.bf16 %v8116_v27, %v8116_v27 }
 0xa65   : > { %5145 = vrot.lane.b32.xlu1 %v8118_v45, %s8384_s1  ;;  %v5386_v60 = vpack.c.bf16 %v8118_v45, %v8118_v45 }
 0xa66   : > { %v5391_v32 = vsel %vm1785_vm15, %v5385_v6, 0 }
 0xa68   : > { %5132 = vrot.lane.b32.xlu0 %v8116_v27, %s8391_s25 }
 0xa69   : > { %5134 = vrot.lane.b32.xlu1 %v8118_v45, %s8391_s25 }
 0xa6c   : > { %5255 = vrot.lane.b32.xlu0 %v8116_v27, %s8387_s6 }
 0xa6d   : > { %5257 = vrot.lane.b32.xlu1 %v8118_v45, %s8387_s6 }
 0xa70   : > { %5319 = vrot.lane.b32.xlu0 %v8116_v27, %s8388_s28 }
 0xa71   : > { %5321 = vrot.lane.b32.xlu1 %v8118_v45, %s8388_s28  ;;  %s8425_s28 = sld [smem:[#allocation15_spill]] }
 0xa74   : > { %5439 = vrot.lane.b32.xlu0 %v8116_v27, %s8389_s22 }
 0xa75   : > { %5441 = vrot.lane.b32.xlu1 %v8118_v45, %s8389_s22 }
 0xa78   : > { %5503 = vrot.lane.b32.xlu0 %v8116_v27, %s8390_s2 }
 0xa79   : > { %5505 = vrot.lane.b32.xlu1 %v8118_v45, %s8390_s2 }
 0xa7c   : > { %5567 = vrot.lane.b32.xlu0 %v8116_v27, %s8383_s7 }
 0xa7d   : > { %5569 = vrot.lane.b32.xlu1 %v8118_v45, %s8383_s7 }
 0xa80   : > { %5631 = vrot.lane.b32.xlu0 %v8116_v27, %s8385_s27 }
 0xa81   : > { %5633 = vrot.lane.b32.xlu1 %v8118_v45, %s8385_s27 }
 0xa84   : > { %5698 = vperm.xlu0 %6334, %v5695_v12  }
 0xa85   : > { %5711 = vperm.xlu1 %6313, %v5708_v8  }
 0xad6   : > { %v5144_v22 = vpop.permute.xlu0 %5143 }
 0xad7   : > { %v5146_v49 = vpop.permute.xlu1 %5145 }
 0xad8   : > { %v5147_v53 = vsel %vm936_vm3, %v5144_v22, %v5146_v49  ;;  %v5148_v41 = vsel %vm936_vm3, %v5146_v49, %v5144_v22  ;;  %vm8415_vm3 = vmmov %vm8408_vm13 }
 0xad9   : > { %v5149_v17 = vmul.f32 %v5148_v41, %v7797_v3  ;;  %v5150_v13 = vmul.f32 %v5147_v53, %v7800_v42  ;;  %v6180_v42 = vld [vmem:[%s8313_s17 + $0x4] sm:$0xf]  ;;  %v6191_v41 = vld [vmem:[%s8313_s17 + $0x10] sm:$0xf] }
 0xada   : > { %v5133_v30 = vpop.permute.xlu0 %5132 }
 0xadb   : > { %v5153_v44 = vpack.c.bf16 %v5149_v17, %v5149_v17  ;;  %v5154_v24 = vpack.c.bf16 %v5150_v13, %v5150_v13  ;;  %v5135_v37 = vpop.permute.xlu1 %5134 }
 0xadc   : > { %v5136_v5 = vsel %vm822_vm4, %v5133_v30, %v5135_v37  ;;  %v5137_v50 = vsel %vm822_vm4, %v5135_v37, %v5133_v30  ;;  %vm8416_vm4 = vmmov %vm8415_vm3 }
 0xadd   : > { %v5138_v46 = vmul.f32 %v5137_v50, %v7678_v18  ;;  %v5139_v14 = vmul.f32 %v5136_v5, %v7681_v1  ;;  %6181 = vmatprep.subr.msk.bf16.mxu0 %vm1785_vm15, %v5154_v24  ;;  %v5159_v3 = vsel %vm1785_vm15, %v5153_v44, 0  ;;  %v6194_v50 = vld [vmem:[%s8313_s17 + $0x14] sm:$0xf] }
 0xade   : > { %v5256_v31 = vpop.permute.xlu0 %5255  ;;  %5165 = vmatpush1.bf16.msra.mxu0 %v5159_v3 }
 0xadf   : > { %v5141_v58 = vpack.c.bf16 %v5138_v46, %v5138_v46  ;;  %v5142_v59 = vpack.c.bf16 %v5139_v14, %v5139_v14  ;;  %v5258_v43 = vpop.permute.xlu1 %5257 }
 0xae0   : > { %v5259_v48 = vsel %vm1042_vm6, %v5256_v31, %v5258_v43  ;;  %v5260_v18 = vsel %vm1042_vm6, %v5258_v43, %v5256_v31  ;;  %vm8417_vm6 = vmmov %vm8410_vm2 }
 0xae1   : > { %v5261_v1 = vmul.f32 %v5260_v18, %v7829_v11  ;;  %v5262_v9 = vmul.f32 %v5259_v48, %v7815_v39  ;;  %6182 = vmatmul.mubr.msk.bf16.vlgmr.msra.gmra.mrb[76].mxu0 %vm1781_vm0, %v6180_v42  ;;  %6183 = vmatprep.subr.msk.bf16.mxu1 %vm1785_vm15, %v5142_v59  ;;  %v5209_v35 = vsel %vm1785_vm15, %v5141_v58, 0  ;;  %v6197_v59 = vld [vmem:[%s8313_s17 + $0x18] sm:$0xf]  ;;  %v6203_v48 = vld [vmem:[%s8313_s17 + $0x20] sm:$0xf] }
 0xae2   : > { %v5320_v0 = vpop.permute.xlu0 %5319  ;;  %5215 = vmatpush1.bf16.msra.mxu1 %v5209_v35  ;;  %5308 = vmatprep.mubr.bf16.mxu0 %v6372_v2 }
 0xae3   : > { %v5265_v10 = vpack.c.bf16 %v5261_v1, %v5261_v1  ;;  %v5266_v25 = vpack.c.bf16 %v5262_v9, %v5262_v9  ;;  %v5322_v63 = vpop.permute.xlu1 %5321 }
 0xae4   : > { %v5323_v39 = vsel %vm1148_vm7, %v5320_v0, %v5322_v63  ;;  %v5324_v11 = vsel %vm1148_vm7, %v5322_v63, %v5320_v0  ;;  %vm8418_vm7 = vmmov %vm8410_vm2 }
 0xae5   : > { %v5325_v28 = vmul.f32 %v5324_v11, %v7865_v19  ;;  %v5326_v36 = vmul.f32 %v5323_v39, %v7846_v47  ;;  %6184 = vmatmul.mubr.msk.bf16.vlgmr.msra.gmra.mrb[76].mxu1 %vm1781_vm0, %v5140_v34  ;;  %6186 = vmatprep.subr.msk.bf16.mxu0 %vm1785_vm15, %v5266_v25  ;;  %v5271_v55 = vsel %vm1785_vm15, %v5265_v10, 0  ;;  %vm8423_vm2 = vmmov %vm8422_vm14 }
 0xae6   : > { %v5440_v52 = vpop.permute.xlu0 %5439  ;;  %5277 = vmatpush1.bf16.msra.mxu0 %v5271_v55  ;;  %5372 = vmatprep.mubr.bf16.mxu1 %v6372_v2 }
 0xae7   : > { %v5329_v19 = vpack.c.bf16 %v5325_v28, %v5325_v28  ;;  %v5330_v16 = vpack.c.bf16 %v5326_v36, %v5326_v36  ;;  %v5442_v47 = vpop.permute.xlu1 %5441  ;;  %6192 = vmatprep.subr.msk.bf16.mxu0 %vm1785_vm15, %v5386_v60 }
 0xae8   : > { %v5443_v38 = vsel %vm1330_vm9, %v5440_v52, %v5442_v47  ;;  %v5444_v20 = vsel %vm1330_vm9, %v5442_v47, %v5440_v52  ;;  %vm8420_vm9 = vcmask 1041408  }
 0xae9   : > { %v5445_v62 = vmul.f32 %v5443_v38, %v7935_v56  ;;  %v5446_v57 = vmul.f32 %v5444_v20, %v7914_v51  ;;  %6187 = vmatmul.mubr.msk.bf16.vlgmr.msra.gmra.mrb[80].mxu0 %vm1781_vm0, %v6185_v7  ;;  %6189 = vmatprep.subr.msk.bf16.mxu1 %vm1785_vm15, %v5330_v16  ;;  %v5335_v21 = vsel %vm1785_vm15, %v5329_v19, 0 }
 0xaea   : > { %v5504_v23 = vpop.permute.xlu0 %5503  ;;  %5341 = vmatpush1.bf16.msra.mxu1 %v5335_v21  ;;  %5397 = vmatpush1.bf16.msra.mxu0 %v5391_v32 }
 0xaeb   : > { %v5449_v27 = vpack.c.bf16 %v5445_v62, %v5445_v62  ;;  %v5450_v45 = vpack.c.bf16 %v5446_v57, %v5446_v57  ;;  %v5506_v56 = vpop.permute.xlu1 %5505  ;;  %5428 = vmatprep.mubr.bf16.mxu0 %v6372_v2 }
 0xaec   : > { %v5507_v51 = vsel %vm1436_vm10, %v5504_v23, %v5506_v56  ;;  %v5508_v12 = vsel %vm1436_vm10, %v5506_v56, %v5504_v23  ;;  %vm8421_vm10 = vmmov %vm8420_vm9 }
 0xaed   : > { %v5509_v8 = vmul.f32 %v5507_v51, %v7970_v54  ;;  %v5510_v22 = vmul.f32 %v5508_v12, %v7958_v61  ;;  %6190 = vmatmul.mubr.msk.bf16.vlgmr.msra.gmra.mrb[80].mxu1 %vm1781_vm0, %v6188_v26  ;;  %6195 = vmatprep.subr.msk.bf16.mxu1 %vm1785_vm15, %v5450_v45  ;;  %v5455_v49 = vsel %vm1785_vm15, %v5449_v27, 0 }
 0xaee   : > { %v5568_v53 = vpop.permute.xlu0 %5567  ;;  %5461 = vmatpush1.bf16.msra.mxu1 %v5455_v49  ;;  %5492 = vmatprep.mubr.bf16.mxu1 %v6372_v2 }
 0xaef   : > { %v5513_v17 = vpack.c.bf16 %v5509_v8, %v5509_v8  ;;  %v5514_v13 = vpack.c.bf16 %v5510_v22, %v5510_v22  ;;  %v5570_v30 = vpop.permute.xlu1 %5569 }
 0xaf0   : > { %v5571_v61 = vsel %vm8415_vm3, %v5568_v53, %v5570_v30  ;;  %v5572_v54 = vsel %vm8416_vm4, %v5570_v30, %v5568_v53 }
 0xaf1   : > { %v5573_v44 = vmul.f32 %v5571_v61, %v8030_v15  ;;  %v5574_v24 = vmul.f32 %v5572_v54, %v8033_v4  ;;  %6193 = vmatmul.mubr.msk.bf16.vlgmr.msra.gmra.mrb[84].mxu0 %vm1781_vm0, %v6191_v41  ;;  %6198 = vmatprep.subr.msk.bf16.mxu0 %vm1785_vm15, %v5514_v13  ;;  %v5519_v37 = vsel %vm1785_vm15, %v5513_v17, 0 }
 0xaf2   : > { %v5632_v5 = vpop.permute.xlu0 %5631  ;;  %5525 = vmatpush1.bf16.msra.mxu0 %v5519_v37  ;;  %5556 = vmatprep.mubr.bf16.mxu0 %v6372_v2 }
 0xaf3   : > { %v5577_v46 = vpack.c.bf16 %v5573_v44, %v5573_v44  ;;  %v5578_v14 = vpack.c.bf16 %v5574_v24, %v5574_v24  ;;  %v5634_v3 = vpop.permute.xlu1 %5633 }
 0xaf4   : > { %v5635_v15 = vsel %vm8417_vm6, %v5632_v5, %v5634_v3  ;;  %v5636_v4 = vsel %vm8418_vm7, %v5634_v3, %v5632_v5 }
 0xaf5   : > { %v5637_v31 = vmul.f32 %v5635_v15, %v8071_v33  ;;  %v5638_v42 = vmul.f32 %v5636_v4, %v8074_v40  ;;  %6196 = vmatmul.mubr.msk.bf16.vlgmr.msra.gmra.mrb[84].mxu1 %vm1781_vm0, %v6194_v50  ;;  %6201 = vmatprep.subr.msk.bf16.mxu1 %vm1785_vm15, %v5578_v14  ;;  %v5583_v58 = vsel %vm1785_vm15, %v5577_v46, 0  ;;  %v6200_v40 = vld [vmem:[%s8313_s17 + $0x1c] sm:$0xf] }
 0xaf6   : > { %5589 = vmatpush1.bf16.msra.mxu1 %v5583_v58  ;;  %5620 = vmatprep.mubr.bf16.mxu1 %v6372_v2 }
 0xaf7   : > { %v5641_v43 = vpack.c.bf16 %v5637_v31, %v5637_v31  ;;  %v5642_v29 = vpack.c.bf16 %v5638_v42, %v5638_v42 }
 0xaf9   : > { %6199 = vmatmul.mubr.msk.bf16.vlgmr.msra.gmra.mrb[88].mxu0 %vm1781_vm0, %v6197_v59  ;;  %6204 = vmatprep.subr.msk.bf16.mxu0 %vm1785_vm15, %v5642_v29  ;;  %v5647_v33 = vsel %vm1785_vm15, %v5641_v43, 0  ;;  %v5705_v29 = vld [vmem:[%s8315_s19] sm:$0x1] }
 0xafa   : > { %5653 = vmatpush1.bf16.msra.mxu0 %v5647_v33  ;;  %5684 = vmatprep.mubr.bf16.mxu0 %v6372_v2  ;;  %v6361_v33 = vld.sshfl [vmem:[%s6548_s3] sm:$0x33 pattern:$0x76325410]  ;;  %s8424_s3 = sshll.u32 %s8428_s30, 1 }
 0xafb   : > { %s751_s22 = scalar_lea.vmem %s8425_s28, %s8424_s3 }
 0xafd   : > { %6202 = vmatmul.mubr.msk.bf16.vlgmr.msra.gmra.mrb[88].mxu1 %vm1781_vm0, %v6200_v40 }
 0xafe   : > { %5755 = vmatprep.mubr.bf16.mxu1 %v6372_v2 }
 0xb01   : > { %6205 = vmatmul.mubr.msk.bf16.vlgmr.msra.gmra.mrb[92].mxu0 %vm1781_vm0, %v6203_v48 }
 0xb03   : > { %v5699_v50 = vpop.permute.xlu0 %5698 }
 0xb04   : > { %v5712_v40 = vpop.permute.xlu1 %5711 }
 0xbb4   : > { %v5198_v18 = vpop.f32.mrb[76].mxu0 }
 0xbb5   : > { %v5200_v1 = vpop.f32.mrb[77].mxu0 }
 0xbb6   : > { %v5202_v9 = vpop.f32.mrb[78].mxu0 }
 0xbb7   : > { %v5203_v35 = vpop.f32.mrb[79].mxu0 }
 0xbb8   : > { %v5248_v0 = vpop.f32.mrb[76].mxu1  ;;  %v5786_v35 = vcombine.high %v6361_v33, %v6361_v33 }
 0xbb9   : > { %v5249_v34 = vadd.f32 %v5248_v0, %v5198_v18  ;;  %v5250_v10 = vpop.f32.mrb[77].mxu1 }
 0xbba   : > { %v5251_v25 = vadd.f32 %v5250_v10, %v5200_v1  ;;  %v5252_v63 = vpop.f32.mrb[78].mxu1 }
 0xbbb   : > { %v5253_v39 = vpop.f32.mrb[79].mxu1 }
 0xbbc   : > { %v5310_v11 = vpop.f32.mrb[80].mxu0 }
 0xbbd   : > { %v5317_v6 = vadd.f32 %v5310_v11, %v5249_v34  ;;  %v5312_v28 = vpop.f32.mrb[81].mxu0 }
 0xbbe   : > { %v5318_v36 = vadd.f32 %v5312_v28, %v5251_v25  ;;  %v5314_v55 = vpop.f32.mrb[82].mxu0 }
 0xbbf   : > { %v5315_v60 = vpop.f32.mrb[83].mxu0 }
 0xbc0   : > { %v5374_v52 = vpop.f32.mrb[80].mxu1 }
 0xbc1   : > { %v5381_v2 = vadd.f32 %v5374_v52, %v5317_v6  ;;  %v5376_v7 = vpop.f32.mrb[81].mxu1 }
 0xbc2   : > { %v5382_v19 = vadd.f32 %v5376_v7, %v5318_v36  ;;  %v5378_v16 = vpop.f32.mrb[82].mxu1 }
 0xbc3   : > { %v5379_v47 = vpop.f32.mrb[83].mxu1 }
 0xbc4   : > { %v5430_v38 = vpop.f32.mrb[84].mxu0 }
 0xbc5   : > { %v5437_v20 = vadd.f32 %v5430_v38, %v5381_v2  ;;  %v5432_v62 = vpop.f32.mrb[85].mxu0 }
 0xbc6   : > { %v5438_v57 = vadd.f32 %v5432_v62, %v5382_v19  ;;  %v5434_v21 = vpop.f32.mrb[86].mxu0 }
 0xbc7   : > { %v5435_v32 = vpop.f32.mrb[87].mxu0 }
 0xbc8   : > { %v5494_v23 = vpop.f32.mrb[84].mxu1 }
 0xbc9   : > { %v5501_v26 = vadd.f32 %v5494_v23, %v5437_v20  ;;  %v5496_v27 = vpop.f32.mrb[85].mxu1 }
 0xbca   : > { %v5502_v45 = vadd.f32 %v5496_v27, %v5438_v57  ;;  %v5498_v56 = vpop.f32.mrb[86].mxu1 }
 0xbcb   : > { %v5499_v51 = vpop.f32.mrb[87].mxu1 }
 0xbcc   : > { %v5558_v12 = vpop.f32.mrb[88].mxu0 }
 0xbcd   : > { %v5565_v8 = vadd.f32 %v5558_v12, %v5501_v26  ;;  %v5560_v22 = vpop.f32.mrb[89].mxu0 }
 0xbce   : > { %v5566_v49 = vadd.f32 %v5560_v22, %v5502_v45  ;;  %v5562_v53 = vpop.f32.mrb[90].mxu0 }
 0xbcf   : > { %v5563_v41 = vpop.f32.mrb[91].mxu0 }
 0xbd0   : > { %v5622_v17 = vpop.f32.mrb[88].mxu1 }
 0xbd1   : > { %v5629_v13 = vadd.f32 %v5622_v17, %v5565_v8  ;;  %v5624_v30 = vpop.f32.mrb[89].mxu1 }
 0xbd2   : > { %v5630_v61 = vadd.f32 %v5624_v30, %v5566_v49  ;;  %v5626_v54 = vpop.f32.mrb[90].mxu1 }
 0xbd3   : > { %v5627_v44 = vpop.f32.mrb[91].mxu1 }
 0xbd4   : > { %v5686_v24 = vpop.f32.mrb[92].mxu0 }
 0xbd5   : > { %v5693_v37 = vadd.f32 %v5686_v24, %v5629_v13  ;;  %v5688_v5 = vpop.f32.mrb[93].mxu0 }
 0xbd6   : > { %v5694_v46 = vadd.f32 %v5688_v5, %v5630_v61  ;;  %v5690_v14 = vpop.f32.mrb[94].mxu0 }
 0xbd7   : > { %v5701_v3 = vadd.f32 %v5699_v50, %v5693_v37  ;;  %v5691_v15 = vpop.f32.mrb[95].mxu0 }
 0xbd8   : > { %v5702_v4 = vadd.f32 %v5699_v50, %v5694_v46 }
 0xbd9   : > { %v5703_v31 = vmax.f32 %v5701_v3, 0.0 }
 0xbda   : > { %v5704_v42 = vmax.f32 %v5702_v4, 0.0 }
 0xbdb   : > { %v5706_v58 = vpack.c.bf16 %v5703_v31, %v5703_v31 }
 0xbdc   : > { %v5707_v59 = vpack.c.bf16 %v5704_v42, %v5704_v42 }
 0xbdd   : > { %v5718_v43 = vsel %vm1785_vm15, %v5706_v58, 0 }
 0xbde   : > { %6206 = vmatprep.subr.msk.bf16.mxu1 %vm1785_vm15, %v5707_v59 }
 0xbdf   : > { %5724 = vmatpush1.bf16.msra.mxu1 %v5718_v43 }
 0xbe2   : > { %6207 = vmatmul.mubr.msk.bf16.vlgmr.msra.gmra.mrb[92].mxu1 %vm1781_vm0, %v5705_v29 }
 0xcb5   : > { %v5757_v48 = vpop.f32.mrb[92].mxu1 }
 0xcb6   : > { %v5758_v18 = vadd.f32 %v5757_v48, %v5712_v40  ;;  %v5759_v1 = vpop.f32.mrb[93].mxu1 }
 0xcb7   : > { %v5760_v9 = vadd.f32 %v5759_v1, %v5712_v40  ;;  %v5761_v0 = vpop.f32.mrb[94].mxu1 }
 0xcb8   : > { %v5776_v34 = vmul.f32 20.0, %v5758_v18  ;;  %v5762_v10 = vpop.f32.mrb[95].mxu1 }
 0xcb9   : > { %v5766_v25 = vcombine.low %v5758_v18, %v5760_v9  ;;  %v5777_v63 = vmul.f32 20.0, %v5760_v9 }
 0xcba   : > { %v5789_v39 = vsub.f32 %v5776_v34, %v6361_v33 }
 0xcbb   : > { %6208 = vst.sshfl [vmem:[%s743_s9] sm:$0x33 pattern:$0x76325410] %v5766_v25  ;;  %v5790_v11 = vsub.f32 %v5777_v63, %v5786_v35 }
 0xcbc   : > { %v5791_v6 = vmul.f32 %v5789_v39, %v5789_v39 }
 0xcbd   : > { %v5792_v28 = vmul.f32 %v5790_v11, %v5790_v11 }
 0xcbe   : > { %v5807_v36 = vrot.slane %v5791_v6, 1  ;;  %v5793_v55 = vsel %vm8420_vm9, %v5791_v6, 0.0 }
 0xcbf   : > { %v5808_v60 = vrot.slane %v5792_v28, 1  ;;  %v5794_v52 = vsel %vm8421_vm10, %v5792_v28, 0.0 }
 0xcc0   : > { %v5811_v2 = vadd.f32 %v5807_v36, %v5791_v6  ;;  %v5795_v7 = vadd.f32 %v5794_v52, %v5793_v55 }
 0xcc1   : > { %v5812_v19 = vadd.f32 %v5808_v60, %v5792_v28 }
 0xcc2   : > { %5796 = vadd.xlane.f32.xlu0 %v5795_v7  ;;  %6356 = vrsqrt.f32 %v5811_v2  ;;  %vm5815_vm15 = vcmp.eq.f32.partialorder %v5811_v2, inf  ;;  %v5818_v20 = vand.u32 2147483648, %v5811_v2  ;;  %vm5817_vm0 = vcmp.eq.f32.partialorder %v5811_v2, 0.0 }
 0xcc3   : > { %6358 = vrsqrt.f32 %v5812_v19  ;;  %vm5822_vm1 = vcmp.eq.f32.partialorder %v5812_v19, inf  ;;  %v5825_v21 = vand.u32 2147483648, %v5812_v19  ;;  %vm5824_vm13 = vcmp.eq.f32.partialorder %v5812_v19, 0.0 }
 0xccc   : > { %v6357_v16 = vpop.eup %6356 }
 0xccd   : > { %v6359_v47 = vpop.eup %6358  ;;  %v5814_v38 = vmul.f32 %v6357_v16, %v5811_v2 }
 0xcce   : > { %v5821_v62 = vmul.f32 %v6359_v47, %v5812_v19 }
 0xccf   : > { %v5816_v57 = vsel %vm5815_vm15, %v5811_v2, %v5814_v38 }
 0xcd0   : > { %v5819_v32 = vsel %vm5817_vm0, %v5818_v20, %v5816_v57  ;;  %v5823_v23 = vsel %vm5822_vm1, %v5812_v19, %v5821_v62 }
 0xcd1   : > { %v5826_v26 = vsel %vm5824_vm13, %v5825_v21, %v5823_v23  ;;  %v5827_v27 = vsel %vm8422_vm14, %v5819_v32, 0.0 }
 0xcd2   : > { %v5828_v45 = vsel %vm8423_vm2, %v5826_v26, 0.0 }
 0xcd3   : > { %v5829_v56 = vadd.f32 %v5828_v45, %v5827_v27 }
 0xcd5   : > { %5830 = vadd.xlane.f32.xlu1 %v5829_v56 }
 0xd4f   : > { %v5797_v51 = vpop.xlane.xlu0 %5796 }
 0xd50   : > { %v5798_v12 = vrot.slane %v5797_v51, 4 }
 0xd52   : > { %v5799_v8 = vadd.f32 %v5798_v12, %v5797_v51 }
 0xd54   : > { %v5800_v22 = vrot.slane %v5799_v8, 2 }
 0xd56   : > { %v5801_v49 = vadd.f32 %v5800_v22, %v5799_v8 }
 0xd58   : > { %v5802_v53 = vrot.slane %v5801_v49, 1 }
 0xd5a   : > { %v5803_v41 = vadd.f32 %v5802_v53, %v5801_v49 }
 0xd5c   : > { %6280 = vpush %v5803_v41 }
 0xd62   : > { %v5831_v17 = vpop.xlane.xlu1 %5830 }
 0xd63   : > { %v5832_v13 = vrot.slane %v5831_v17, 4 }
 0xd65   : > { %v5833_v30 = vadd.f32 %v5832_v13, %v5831_v17 }
 0xd67   : > { %v5834_v61 = vrot.slane %v5833_v30, 2 }
 0xd69   : > { %v5835_v54 = vadd.f32 %v5834_v61, %v5833_v30 }
 0xd6b   : > { %v5836_v44 = vrot.slane %v5835_v54, 1 }
 0xd6d   : > { %v5837_v24 = vadd.f32 %v5836_v44, %v5835_v54 }
 0xd6f   : > { %6282 = vpush %v5837_v24 }
 0xd8d   : > { %s6281_s7 = spop %6280 }
 0xd8e   : > { %v5839_v37 = vstv %s6281_s7 }
 0xd8f   : > { %5840 = vst [vmem:[%s751_s22] sm:$0x1] %v5839_v37 }
 0xda0   : > { %s6283_s27 = spop %6282 }
 0xda1   : > { %v5841_v5 = vstv %s6283_s27 }
 0xda2   : > { %5842 = vst [vmem:[%s751_s22 + $0x1] sm:$0x1] %v5841_v5 }
 0xda3 PF: > { %s8426_s2 = sld [smem:[#allocation3_spill]] }
 0xda9   : > { %s34_s4 = sadd.s32 1, %s8426_s2  }
 0xdaa   : > { %p31_p4 = scmp.ge.s32.totalorder %s34_s4, 4  }
 0xdac   :  { %33 = sbr.rel (!%p31_p4) target bundleno = 13 (0xd), region = 240 }

</bundles_post_ra>
